<compile_context>
chip_gen: v7x
topology: tpu7x:2x2x1
jax: 0.10.0
libtpu: 0.0.40
codegen_flags: <defaults>
</compile_context>

<pallas_src>
import math

import jax
import jax.numpy as jnp
from jax.experimental import pallas as pl
from jax.experimental.pallas import tpu as pltpu

NHEADS = 11   # pool.nheads()
NTERMS = 7    # len(pool.eqs)


# ----------------------------------------------------------------------------
# Fully fused einnet kernel: one grid step == one batch element z.
#   x_ref : (1, A*B, ninput)     input features on lanes
#   then 4*(nstacks+1) weight refs (w1, b1, w2, b2 per MLP, internal layout)
#   o_ref : (1, A*B, noutput)
# ----------------------------------------------------------------------------
def _make_einnet_kernel(A, B, nh0, nstacks):
    AB = A * B
    C = nh0
    inv_ab = 1.0 / float(A * B)

    def kernel(x_ref, *refs):
        *w_refs, o_ref = refs

        def mlp(h, i):
            w1 = w_refs[4 * i + 0][...]
            b1 = w_refs[4 * i + 1][...]
            w2 = w_refs[4 * i + 2][...]
            b2 = w_refs[4 * i + 3][...]
            z1 = jnp.dot(h, w1, preferred_element_type=jnp.float32) + b1
            z1 = jnp.maximum(z1, 0.0)                               # ReLU
            return jnp.dot(z1, w2, preferred_element_type=jnp.float32) + b2

        h = x_ref[0].astype(jnp.float32)                            # (AB, Fin)

        for i in range(nstacks):
            skip = h
            s = jnp.sin(mlp(h, i)).reshape(A, B, C * NHEADS)        # head-major lanes

            def hs(k):                                              # head slice k
                return s[:, :, k * C:(k + 1) * C]                   # (A, B, C)

            # order-1 terms
            t0 = hs(0)
            t1 = jnp.broadcast_to(jnp.mean(hs(1), axis=0, keepdims=True), (A, B, C))
            t2 = jnp.broadcast_to(jnp.mean(hs(2), axis=1, keepdims=True), (A, B, C))
            t3 = jnp.broadcast_to(jnp.mean(hs(3), axis=(0, 1), keepdims=True), (A, B, C))
            # order-2 terms (second moments)
            t4 = jnp.broadcast_to(jnp.mean(hs(4) * hs(5), axis=1, keepdims=True), (A, B, C))
            t5 = jnp.broadcast_to(jnp.mean(hs(6) * hs(7), axis=0, keepdims=True), (A, B, C))
            # order-3 term on the VPU (channels stay on lanes):
            #   t6[a,b,c] = 1/(A*B) * sum_{a',b'} x8[a,b',c] x9[a',b',c] x10[a',b,c]
            x8, x9, x10 = hs(8), hs(9), hs(10)
            m = jnp.sum(x8[:, None, :, :] * x9[None, :, :, :], axis=2)          # (A, A', C)
            t6 = jnp.sum(m[:, :, None, :] * x10[None, :, :, :], axis=1) * inv_ab  # (A, B, C)

            # term-major feature layout: internal feature index = t * nh0 + c
            pooled = jnp.concatenate([t0, t1, t2, t3, t4, t5, t6], axis=-1)     # (A, B, C*NTERMS)
            h_new = pooled.reshape(AB, C * NTERMS)
            h = h_new + skip if i > 0 else h_new                    # fused skip add

        out = mlp(h, nstacks)                                       # final MLP
        o_ref[0] = out.astype(o_ref.dtype)

    return kernel


# ----------------------------------------------------------------------------
# Weight permutations: canonical (PyTorch) layout -> kernel's internal layout.
#   canonical stack-MLP output feature : f = c * NHEADS + head  (view(..,-1,nheads))
#   canonical pooled feature           : f = c * NTERMS + t     (view(..,-1))
#   internal  stack-MLP output feature : f = head * nh0 + c     (lane-contiguous heads)
#   internal  pooled feature           : f = t    * nh0 + c     (lane-contiguous terms)
# These are exact bijections, so the fused forward equals the canonical one.
# ----------------------------------------------------------------------------
def _internal_layout_params(params, nh0):
    j = jnp.arange(nh0 * NHEADS)
    perm_heads = (j % nh0) * NHEADS + (j // nh0)   # internal col -> canonical col
    r = jnp.arange(nh0 * NTERMS)
    perm_terms = (r % nh0) * NTERMS + (r // nh0)   # internal row -> canonical row

    nstacks = len(params) - 1
    out = []
    for i in range(nstacks):
        w1, b1, w2, b2 = params[i]
        if i > 0:
            w1 = w1[perm_terms, :]
        out.append((w1, b1, w2[:, perm_heads], b2[:, perm_heads]))
    w1, b1, w2, b2 = params[-1]
    out.append((w1[perm_terms, :], b1, w2, b2))
    return out


def einnet_forward(params, X, nh0):
    """Fused einnet forward.  params use the PyTorch Linear convention
    (w: (fan_in, fan_out), b: (1, fan_out)); X is (Z, a, b, ninput)."""
    Z, A, B, F = X.shape
    AB = A * B
    nstacks = len(params) - 1
    noutput = params[-1][2].shape[1]

    flat = [w for p in _internal_layout_params(params, nh0) for w in p]
    kernel = _make_einnet_kernel(A, B, nh0, nstacks)

    in_specs = [pl.BlockSpec((1, AB, F), lambda z: (z, 0, 0))]
    in_specs += [pl.BlockSpec(w.shape, lambda z: (0, 0)) for w in flat]

    out = pl.pallas_call(
        kernel,
        out_shape=jax.ShapeDtypeStruct((Z, AB, noutput), jnp.float32),
        grid=(Z,),
        in_specs=in_specs,
        out_specs=pl.BlockSpec((1, AB, noutput), lambda z: (z, 0, 0)),
        compiler_params=pltpu.CompilerParams(
            dimension_semantics=("parallel",),          # Z>=2 steps -> both v7x TCs busy
            vmem_limit_bytes=32 * 1024 * 1024,          # ample; safe on v7x's 64 MiB VMEM
        ),
    )(X.reshape(Z, AB, F), *flat)
    return out.reshape(Z, A, B, noutput)


# ----------------------------------------------------------------------------
# Pure-JAX reference (canonical PyTorch feature layout) for verification.
# ----------------------------------------------------------------------------
def einnet_reference(params, X, nh0):
    Z, A, B, _ = X.shape
    nstacks = len(params) - 1

    def mlp(h, p):
        w1, b1, w2, b2 = p
        return jnp.maximum(h @ w1 + b1, 0.0) @ w2 + b2

    h = X
    for i in range(nstacks):
        skip = h
        h = jnp.sin(mlp(h, params[i]).reshape(Z, A, B, nh0, NHEADS))
        x = [h[..., k] for k in range(NHEADS)]
        shp = x[0].shape
        t0 = x[0]
        t1 = jnp.broadcast_to(jnp.mean(x[1], axis=1, keepdims=True), shp)
        t2 = jnp.broadcast_to(jnp.mean(x[2], axis=2, keepdims=True), shp)
        t3 = jnp.broadcast_to(jnp.mean(x[3], axis=(1, 2), keepdims=True), shp)
        t4 = jnp.broadcast_to(jnp.mean(x[4] * x[5], axis=2, keepdims=True), shp)
        t5 = jnp.broadcast_to(jnp.mean(x[6] * x[7], axis=1, keepdims=True), shp)
        t6 = jnp.einsum('zaec,zdec,zdbc->zabc', x[8], x[9], x[10]) / (A * B)
        h = jnp.stack([t0, t1, t2, t3, t4, t5, t6], axis=-1).reshape(Z, A, B, nh0 * NTERMS)
        if i > 0:
            h = h + skip
    return mlp(h, params[-1])


def init_mlp(key, nin, nh, nout):
    k1, k2, k3, k4 = jax.random.split(key, 4)
    s1 = 1.0 / math.sqrt(nin)
    s2 = 1.0 / math.sqrt(nh)
    w1 = jax.random.uniform(k1, (nin, nh), jnp.float32, -s1, s1)
    b1 = jax.random.uniform(k2, (1, nh), jnp.float32, -s1, s1)
    w2 = jax.random.uniform(k3, (nh, nout), jnp.float32, -s2, s2)
    b2 = jax.random.uniform(k4, (1, nout), jnp.float32, -s2, s2)
    return (w1, b1, w2, b2)


if __name__ == "__main__":
    # high matmul precision so the Pallas kernel and the reference agree tightly
    jax.config.update("jax_default_matmul_precision", "highest")

    # small shapes consistent with the module (nstacks=2 exercises the skip path)
    Z, A, B = 2, 8, 8
    ninput, nh, noutput, nstacks, nh0 = 16, 32, 16, 2, 8

    key = jax.random.PRNGKey(0)
    kx, kp = jax.random.split(key)
    X = jax.random.normal(kx, (Z, A, B, ninput), dtype=jnp.float32)

    keys = jax.random.split(kp, nstacks + 1)
    params = [init_mlp(keys[0], ninput, nh, nh0 * NHEADS)]
    for i in range(nstacks - 1):
        params.append(init_mlp(keys[i + 1], nh0 * NTERMS, nh, nh0 * NHEADS))
    params.append(init_mlp(keys[nstacks], nh0 * NTERMS, nh, noutput))

    out = einnet_forward(params, X, nh0=nh0)
    jax.block_until_ready(out)
    assert out.shape == (Z, A, B, noutput), out.shape
    assert bool(jnp.all(jnp.isfinite(out)))

    ref = einnet_reference(params, X, nh0=nh0)
    err = float(jnp.max(jnp.abs(out - ref)))
    assert err < 5e-2, f"max |pallas - reference| = {err}"

    print("KERNEL_OK")
</pallas_src>

<mosaic_0001>
module attributes {stable_mosaic.version = 11 : i64} {
  func.func @kernel(%arg0: i32, %arg1: memref<1x64x16xf32, #tpu.memory_space<vmem>>, %arg2: memref<16x32xf32, #tpu.memory_space<vmem>>, %arg3: memref<1x32xf32, #tpu.memory_space<vmem>>, %arg4: memref<32x88xf32, #tpu.memory_space<vmem>>, %arg5: memref<1x88xf32, #tpu.memory_space<vmem>>, %arg6: memref<56x32xf32, #tpu.memory_space<vmem>>, %arg7: memref<1x32xf32, #tpu.memory_space<vmem>>, %arg8: memref<32x88xf32, #tpu.memory_space<vmem>>, %arg9: memref<1x88xf32, #tpu.memory_space<vmem>>, %arg10: memref<56x32xf32, #tpu.memory_space<vmem>>, %arg11: memref<1x32xf32, #tpu.memory_space<vmem>>, %arg12: memref<32x16xf32, #tpu.memory_space<vmem>>, %arg13: memref<1x16xf32, #tpu.memory_space<vmem>>, %arg14: memref<1x64x16xf32, #tpu.memory_space<vmem>>) attributes {dimension_semantics = [#tpu.dimension_semantics<parallel>], iteration_bounds = array<i64: 2>, scalar_prefetch = 0 : i64, scratch_operands = 0 : i64, tpu.core_type = #tpu.core_type<tc>, window_params = [{transform_indices = @transform_0, window_bounds = array<i64: 1, 64, 16>}, {pipeline_mode = #tpu.pipeline_mode<synchronous>, transform_indices = @transform_1, window_bounds = array<i64: 16, 32>}, {pipeline_mode = #tpu.pipeline_mode<synchronous>, transform_indices = @transform_2, window_bounds = array<i64: 1, 32>}, {pipeline_mode = #tpu.pipeline_mode<synchronous>, transform_indices = @transform_3, window_bounds = array<i64: 32, 88>}, {pipeline_mode = #tpu.pipeline_mode<synchronous>, transform_indices = @transform_4, window_bounds = array<i64: 1, 88>}, {pipeline_mode = #tpu.pipeline_mode<synchronous>, transform_indices = @transform_5, window_bounds = array<i64: 56, 32>}, {pipeline_mode = #tpu.pipeline_mode<synchronous>, transform_indices = @transform_6, window_bounds = array<i64: 1, 32>}, {pipeline_mode = #tpu.pipeline_mode<synchronous>, transform_indices = @transform_7, window_bounds = array<i64: 32, 88>}, {pipeline_mode = #tpu.pipeline_mode<synchronous>, transform_indices = @transform_8, window_bounds = array<i64: 1, 88>}, {pipeline_mode = #tpu.pipeline_mode<synchronous>, transform_indices = @transform_9, window_bounds = array<i64: 56, 32>}, {pipeline_mode = #tpu.pipeline_mode<synchronous>, transform_indices = @transform_10, window_bounds = array<i64: 1, 32>}, {pipeline_mode = #tpu.pipeline_mode<synchronous>, transform_indices = @transform_11, window_bounds = array<i64: 32, 16>}, {pipeline_mode = #tpu.pipeline_mode<synchronous>, transform_indices = @transform_12, window_bounds = array<i64: 1, 16>}, {transform_indices = @transform_13, window_bounds = array<i64: 1, 64, 16>}]} {
    %c0 = arith.constant 0 : index
    %c0_0 = arith.constant 0 : index
    %c0_1 = arith.constant 0 : index
    %0 = vector.load %arg1[%c0, %c0_0, %c0_1] : memref<1x64x16xf32, #tpu.memory_space<vmem>>, vector<1x64x16xf32>
    %1 = vector.shape_cast %0 : vector<1x64x16xf32> to vector<64x16xf32>
    %c0_2 = arith.constant 0 : index
    %c0_3 = arith.constant 0 : index
    %2 = vector.load %arg2[%c0_2, %c0_3] : memref<16x32xf32, #tpu.memory_space<vmem>>, vector<16x32xf32>
    %c0_4 = arith.constant 0 : index
    %c0_5 = arith.constant 0 : index
    %3 = vector.load %arg3[%c0_4, %c0_5] : memref<1x32xf32, #tpu.memory_space<vmem>>, vector<1x32xf32>
    %c0_6 = arith.constant 0 : index
    %c0_7 = arith.constant 0 : index
    %4 = vector.load %arg4[%c0_6, %c0_7] : memref<32x88xf32, #tpu.memory_space<vmem>>, vector<32x88xf32>
    %c0_8 = arith.constant 0 : index
    %c0_9 = arith.constant 0 : index
    %5 = vector.load %arg5[%c0_8, %c0_9] : memref<1x88xf32, #tpu.memory_space<vmem>>, vector<1x88xf32>
    %cst = arith.constant dense<0.000000e+00> : vector<64x32xf32>
    %6 = tpu.matmul %1, %2, %cst {dimension_numbers = #tpu.dot_dimension_numbers<[1], [0], [0], [1], [0, 0, 1, 1], [], []>, precision = #tpu.contract_precision<fp32>} : vector<64x16xf32>, vector<16x32xf32>, vector<64x32xf32> -> vector<64x32xf32>
    %7 = vector.broadcast %3 : vector<1x32xf32> to vector<64x32xf32>
    %8 = arith.addf %6, %7 : vector<64x32xf32>
    %cst_10 = arith.constant 0.000000e+00 : f32
    %9 = vector.broadcast %cst_10 : f32 to vector<64x32xf32>
    %10 = arith.maximumf %8, %9 : vector<64x32xf32>
    %cst_11 = arith.constant dense<0.000000e+00> : vector<64x88xf32>
    %11 = tpu.matmul %10, %4, %cst_11 {dimension_numbers = #tpu.dot_dimension_numbers<[1], [0], [0], [1], [0, 0, 1, 1], [], []>, precision = #tpu.contract_precision<fp32>} : vector<64x32xf32>, vector<32x88xf32>, vector<64x88xf32> -> vector<64x88xf32>
    %12 = vector.broadcast %5 : vector<1x88xf32> to vector<64x88xf32>
    %13 = arith.addf %11, %12 : vector<64x88xf32>
    %14 = math.sin %13 : vector<64x88xf32>
    %15 = vector.shape_cast %14 : vector<64x88xf32> to vector<8x8x88xf32>
    %16 = vector.extract_strided_slice %15 {offsets = [0, 0, 0], sizes = [8, 8, 8], strides = [1, 1, 1]} : vector<8x8x88xf32> to vector<8x8x8xf32>
    %17 = vector.extract_strided_slice %15 {offsets = [0, 0, 8], sizes = [8, 8, 8], strides = [1, 1, 1]} : vector<8x8x88xf32> to vector<8x8x8xf32>
    %cst_12 = arith.constant dense<0.000000e+00> : vector<8x8xf32>
    %18 = vector.multi_reduction <add>, %17, %cst_12 [0] : vector<8x8x8xf32> to vector<8x8xf32>
    %19 = vector.shape_cast %18 : vector<8x8xf32> to vector<1x8x8xf32>
    %cst_13 = arith.constant 8.000000e+00 : f32
    %20 = vector.broadcast %cst_13 : f32 to vector<1x8x8xf32>
    %21 = arith.divf %19, %20 : vector<1x8x8xf32>
    %22 = vector.shape_cast %21 : vector<1x8x8xf32> to vector<1x8x8xf32>
    %23 = vector.broadcast %22 : vector<1x8x8xf32> to vector<8x8x8xf32>
    %24 = vector.extract_strided_slice %15 {offsets = [0, 0, 16], sizes = [8, 8, 8], strides = [1, 1, 1]} : vector<8x8x88xf32> to vector<8x8x8xf32>
    %cst_14 = arith.constant dense<0.000000e+00> : vector<8x8xf32>
    %25 = vector.multi_reduction <add>, %24, %cst_14 [1] : vector<8x8x8xf32> to vector<8x8xf32>
    %26 = vector.shape_cast %25 : vector<8x8xf32> to vector<8x1x8xf32>
    %cst_15 = arith.constant 8.000000e+00 : f32
    %27 = vector.broadcast %cst_15 : f32 to vector<8x1x8xf32>
    %28 = arith.divf %26, %27 : vector<8x1x8xf32>
    %29 = vector.shape_cast %28 : vector<8x1x8xf32> to vector<8x1x8xf32>
    %30 = vector.broadcast %29 : vector<8x1x8xf32> to vector<8x8x8xf32>
    %31 = vector.extract_strided_slice %15 {offsets = [0, 0, 24], sizes = [8, 8, 8], strides = [1, 1, 1]} : vector<8x8x88xf32> to vector<8x8x8xf32>
    %cst_16 = arith.constant dense<0.000000e+00> : vector<8xf32>
    %32 = vector.multi_reduction <add>, %31, %cst_16 [0, 1] : vector<8x8x8xf32> to vector<8xf32>
    %33 = vector.shape_cast %32 : vector<8xf32> to vector<1x1x8xf32>
    %cst_17 = arith.constant 6.400000e+01 : f32
    %34 = vector.broadcast %cst_17 : f32 to vector<1x1x8xf32>
    %35 = arith.divf %33, %34 : vector<1x1x8xf32>
    %36 = vector.shape_cast %35 : vector<1x1x8xf32> to vector<1x1x8xf32>
    %37 = vector.broadcast %36 : vector<1x1x8xf32> to vector<8x8x8xf32>
    %38 = vector.extract_strided_slice %15 {offsets = [0, 0, 32], sizes = [8, 8, 8], strides = [1, 1, 1]} : vector<8x8x88xf32> to vector<8x8x8xf32>
    %39 = vector.extract_strided_slice %15 {offsets = [0, 0, 40], sizes = [8, 8, 8], strides = [1, 1, 1]} : vector<8x8x88xf32> to vector<8x8x8xf32>
    %40 = arith.mulf %38, %39 : vector<8x8x8xf32>
    %cst_18 = arith.constant dense<0.000000e+00> : vector<8x8xf32>
    %41 = vector.multi_reduction <add>, %40, %cst_18 [1] : vector<8x8x8xf32> to vector<8x8xf32>
    %42 = vector.shape_cast %41 : vector<8x8xf32> to vector<8x1x8xf32>
    %cst_19 = arith.constant 8.000000e+00 : f32
    %43 = vector.broadcast %cst_19 : f32 to vector<8x1x8xf32>
    %44 = arith.divf %42, %43 : vector<8x1x8xf32>
    %45 = vector.shape_cast %44 : vector<8x1x8xf32> to vector<8x1x8xf32>
    %46 = vector.broadcast %45 : vector<8x1x8xf32> to vector<8x8x8xf32>
    %47 = vector.extract_strided_slice %15 {offsets = [0, 0, 48], sizes = [8, 8, 8], strides = [1, 1, 1]} : vector<8x8x88xf32> to vector<8x8x8xf32>
    %48 = vector.extract_strided_slice %15 {offsets = [0, 0, 56], sizes = [8, 8, 8], strides = [1, 1, 1]} : vector<8x8x88xf32> to vector<8x8x8xf32>
    %49 = arith.mulf %47, %48 : vector<8x8x8xf32>
    %cst_20 = arith.constant dense<0.000000e+00> : vector<8x8xf32>
    %50 = vector.multi_reduction <add>, %49, %cst_20 [0] : vector<8x8x8xf32> to vector<8x8xf32>
    %51 = vector.shape_cast %50 : vector<8x8xf32> to vector<1x8x8xf32>
    %cst_21 = arith.constant 8.000000e+00 : f32
    %52 = vector.broadcast %cst_21 : f32 to vector<1x8x8xf32>
    %53 = arith.divf %51, %52 : vector<1x8x8xf32>
    %54 = vector.shape_cast %53 : vector<1x8x8xf32> to vector<1x8x8xf32>
    %55 = vector.broadcast %54 : vector<1x8x8xf32> to vector<8x8x8xf32>
    %56 = vector.extract_strided_slice %15 {offsets = [0, 0, 64], sizes = [8, 8, 8], strides = [1, 1, 1]} : vector<8x8x88xf32> to vector<8x8x8xf32>
    %57 = vector.extract_strided_slice %15 {offsets = [0, 0, 72], sizes = [8, 8, 8], strides = [1, 1, 1]} : vector<8x8x88xf32> to vector<8x8x8xf32>
    %58 = vector.extract_strided_slice %15 {offsets = [0, 0, 80], sizes = [8, 8, 8], strides = [1, 1, 1]} : vector<8x8x88xf32> to vector<8x8x8xf32>
    %59 = vector.shape_cast %56 : vector<8x8x8xf32> to vector<8x1x8x8xf32>
    %60 = vector.shape_cast %57 : vector<8x8x8xf32> to vector<1x8x8x8xf32>
    %61 = vector.broadcast %59 : vector<8x1x8x8xf32> to vector<8x8x8x8xf32>
    %62 = vector.broadcast %60 : vector<1x8x8x8xf32> to vector<8x8x8x8xf32>
    %63 = arith.mulf %61, %62 : vector<8x8x8x8xf32>
    %cst_22 = arith.constant dense<0.000000e+00> : vector<8x8x8xf32>
    %64 = vector.multi_reduction <add>, %63, %cst_22 [2] : vector<8x8x8x8xf32> to vector<8x8x8xf32>
    %65 = vector.shape_cast %64 : vector<8x8x8xf32> to vector<8x8x1x8xf32>
    %66 = vector.shape_cast %58 : vector<8x8x8xf32> to vector<1x8x8x8xf32>
    %67 = vector.broadcast %65 : vector<8x8x1x8xf32> to vector<8x8x8x8xf32>
    %68 = vector.broadcast %66 : vector<1x8x8x8xf32> to vector<8x8x8x8xf32>
    %69 = arith.mulf %67, %68 : vector<8x8x8x8xf32>
    %cst_23 = arith.constant dense<0.000000e+00> : vector<8x8x8xf32>
    %70 = vector.multi_reduction <add>, %69, %cst_23 [1] : vector<8x8x8x8xf32> to vector<8x8x8xf32>
    %cst_24 = arith.constant 1.562500e-02 : f32
    %71 = vector.broadcast %cst_24 : f32 to vector<8x8x8xf32>
    %72 = arith.mulf %70, %71 : vector<8x8x8xf32>
    %73 = tpu.concatenate %16, %23, %30, %37, %46, %55, %72 in 2 : vector<8x8x8xf32>, vector<8x8x8xf32>, vector<8x8x8xf32>, vector<8x8x8xf32>, vector<8x8x8xf32>, vector<8x8x8xf32>, vector<8x8x8xf32> -> vector<8x8x56xf32>
    %74 = vector.shape_cast %73 : vector<8x8x56xf32> to vector<64x56xf32>
    %c0_25 = arith.constant 0 : index
    %c0_26 = arith.constant 0 : index
    %75 = vector.load %arg6[%c0_25, %c0_26] : memref<56x32xf32, #tpu.memory_space<vmem>>, vector<56x32xf32>
    %c0_27 = arith.constant 0 : index
    %c0_28 = arith.constant 0 : index
    %76 = vector.load %arg7[%c0_27, %c0_28] : memref<1x32xf32, #tpu.memory_space<vmem>>, vector<1x32xf32>
    %c0_29 = arith.constant 0 : index
    %c0_30 = arith.constant 0 : index
    %77 = vector.load %arg8[%c0_29, %c0_30] : memref<32x88xf32, #tpu.memory_space<vmem>>, vector<32x88xf32>
    %c0_31 = arith.constant 0 : index
    %c0_32 = arith.constant 0 : index
    %78 = vector.load %arg9[%c0_31, %c0_32] : memref<1x88xf32, #tpu.memory_space<vmem>>, vector<1x88xf32>
    %cst_33 = arith.constant dense<0.000000e+00> : vector<64x32xf32>
    %79 = tpu.matmul %74, %75, %cst_33 {dimension_numbers = #tpu.dot_dimension_numbers<[1], [0], [0], [1], [0, 0, 1, 1], [], []>, precision = #tpu.contract_precision<fp32>} : vector<64x56xf32>, vector<56x32xf32>, vector<64x32xf32> -> vector<64x32xf32>
    %80 = vector.broadcast %76 : vector<1x32xf32> to vector<64x32xf32>
    %81 = arith.addf %79, %80 : vector<64x32xf32>
    %cst_34 = arith.constant 0.000000e+00 : f32
    %82 = vector.broadcast %cst_34 : f32 to vector<64x32xf32>
    %83 = arith.maximumf %81, %82 : vector<64x32xf32>
    %cst_35 = arith.constant dense<0.000000e+00> : vector<64x88xf32>
    %84 = tpu.matmul %83, %77, %cst_35 {dimension_numbers = #tpu.dot_dimension_numbers<[1], [0], [0], [1], [0, 0, 1, 1], [], []>, precision = #tpu.contract_precision<fp32>} : vector<64x32xf32>, vector<32x88xf32>, vector<64x88xf32> -> vector<64x88xf32>
    %85 = vector.broadcast %78 : vector<1x88xf32> to vector<64x88xf32>
    %86 = arith.addf %84, %85 : vector<64x88xf32>
    %87 = math.sin %86 : vector<64x88xf32>
    %88 = vector.shape_cast %87 : vector<64x88xf32> to vector<8x8x88xf32>
    %89 = vector.extract_strided_slice %88 {offsets = [0, 0, 0], sizes = [8, 8, 8], strides = [1, 1, 1]} : vector<8x8x88xf32> to vector<8x8x8xf32>
    %90 = vector.extract_strided_slice %88 {offsets = [0, 0, 8], sizes = [8, 8, 8], strides = [1, 1, 1]} : vector<8x8x88xf32> to vector<8x8x8xf32>
    %cst_36 = arith.constant dense<0.000000e+00> : vector<8x8xf32>
    %91 = vector.multi_reduction <add>, %90, %cst_36 [0] : vector<8x8x8xf32> to vector<8x8xf32>
    %92 = vector.shape_cast %91 : vector<8x8xf32> to vector<1x8x8xf32>
    %cst_37 = arith.constant 8.000000e+00 : f32
    %93 = vector.broadcast %cst_37 : f32 to vector<1x8x8xf32>
    %94 = arith.divf %92, %93 : vector<1x8x8xf32>
    %95 = vector.shape_cast %94 : vector<1x8x8xf32> to vector<1x8x8xf32>
    %96 = vector.broadcast %95 : vector<1x8x8xf32> to vector<8x8x8xf32>
    %97 = vector.extract_strided_slice %88 {offsets = [0, 0, 16], sizes = [8, 8, 8], strides = [1, 1, 1]} : vector<8x8x88xf32> to vector<8x8x8xf32>
    %cst_38 = arith.constant dense<0.000000e+00> : vector<8x8xf32>
    %98 = vector.multi_reduction <add>, %97, %cst_38 [1] : vector<8x8x8xf32> to vector<8x8xf32>
    %99 = vector.shape_cast %98 : vector<8x8xf32> to vector<8x1x8xf32>
    %cst_39 = arith.constant 8.000000e+00 : f32
    %100 = vector.broadcast %cst_39 : f32 to vector<8x1x8xf32>
    %101 = arith.divf %99, %100 : vector<8x1x8xf32>
    %102 = vector.shape_cast %101 : vector<8x1x8xf32> to vector<8x1x8xf32>
    %103 = vector.broadcast %102 : vector<8x1x8xf32> to vector<8x8x8xf32>
    %104 = vector.extract_strided_slice %88 {offsets = [0, 0, 24], sizes = [8, 8, 8], strides = [1, 1, 1]} : vector<8x8x88xf32> to vector<8x8x8xf32>
    %cst_40 = arith.constant dense<0.000000e+00> : vector<8xf32>
    %105 = vector.multi_reduction <add>, %104, %cst_40 [0, 1] : vector<8x8x8xf32> to vector<8xf32>
    %106 = vector.shape_cast %105 : vector<8xf32> to vector<1x1x8xf32>
    %cst_41 = arith.constant 6.400000e+01 : f32
    %107 = vector.broadcast %cst_41 : f32 to vector<1x1x8xf32>
    %108 = arith.divf %106, %107 : vector<1x1x8xf32>
    %109 = vector.shape_cast %108 : vector<1x1x8xf32> to vector<1x1x8xf32>
    %110 = vector.broadcast %109 : vector<1x1x8xf32> to vector<8x8x8xf32>
    %111 = vector.extract_strided_slice %88 {offsets = [0, 0, 32], sizes = [8, 8, 8], strides = [1, 1, 1]} : vector<8x8x88xf32> to vector<8x8x8xf32>
    %112 = vector.extract_strided_slice %88 {offsets = [0, 0, 40], sizes = [8, 8, 8], strides = [1, 1, 1]} : vector<8x8x88xf32> to vector<8x8x8xf32>
    %113 = arith.mulf %111, %112 : vector<8x8x8xf32>
    %cst_42 = arith.constant dense<0.000000e+00> : vector<8x8xf32>
    %114 = vector.multi_reduction <add>, %113, %cst_42 [1] : vector<8x8x8xf32> to vector<8x8xf32>
    %115 = vector.shape_cast %114 : vector<8x8xf32> to vector<8x1x8xf32>
    %cst_43 = arith.constant 8.000000e+00 : f32
    %116 = vector.broadcast %cst_43 : f32 to vector<8x1x8xf32>
    %117 = arith.divf %115, %116 : vector<8x1x8xf32>
    %118 = vector.shape_cast %117 : vector<8x1x8xf32> to vector<8x1x8xf32>
    %119 = vector.broadcast %118 : vector<8x1x8xf32> to vector<8x8x8xf32>
    %120 = vector.extract_strided_slice %88 {offsets = [0, 0, 48], sizes = [8, 8, 8], strides = [1, 1, 1]} : vector<8x8x88xf32> to vector<8x8x8xf32>
    %121 = vector.extract_strided_slice %88 {offsets = [0, 0, 56], sizes = [8, 8, 8], strides = [1, 1, 1]} : vector<8x8x88xf32> to vector<8x8x8xf32>
    %122 = arith.mulf %120, %121 : vector<8x8x8xf32>
    %cst_44 = arith.constant dense<0.000000e+00> : vector<8x8xf32>
    %123 = vector.multi_reduction <add>, %122, %cst_44 [0] : vector<8x8x8xf32> to vector<8x8xf32>
    %124 = vector.shape_cast %123 : vector<8x8xf32> to vector<1x8x8xf32>
    %cst_45 = arith.constant 8.000000e+00 : f32
    %125 = vector.broadcast %cst_45 : f32 to vector<1x8x8xf32>
    %126 = arith.divf %124, %125 : vector<1x8x8xf32>
    %127 = vector.shape_cast %126 : vector<1x8x8xf32> to vector<1x8x8xf32>
    %128 = vector.broadcast %127 : vector<1x8x8xf32> to vector<8x8x8xf32>
    %129 = vector.extract_strided_slice %88 {offsets = [0, 0, 64], sizes = [8, 8, 8], strides = [1, 1, 1]} : vector<8x8x88xf32> to vector<8x8x8xf32>
    %130 = vector.extract_strided_slice %88 {offsets = [0, 0, 72], sizes = [8, 8, 8], strides = [1, 1, 1]} : vector<8x8x88xf32> to vector<8x8x8xf32>
    %131 = vector.extract_strided_slice %88 {offsets = [0, 0, 80], sizes = [8, 8, 8], strides = [1, 1, 1]} : vector<8x8x88xf32> to vector<8x8x8xf32>
    %132 = vector.shape_cast %129 : vector<8x8x8xf32> to vector<8x1x8x8xf32>
    %133 = vector.shape_cast %130 : vector<8x8x8xf32> to vector<1x8x8x8xf32>
    %134 = vector.broadcast %132 : vector<8x1x8x8xf32> to vector<8x8x8x8xf32>
    %135 = vector.broadcast %133 : vector<1x8x8x8xf32> to vector<8x8x8x8xf32>
    %136 = arith.mulf %134, %135 : vector<8x8x8x8xf32>
    %cst_46 = arith.constant dense<0.000000e+00> : vector<8x8x8xf32>
    %137 = vector.multi_reduction <add>, %136, %cst_46 [2] : vector<8x8x8x8xf32> to vector<8x8x8xf32>
    %138 = vector.shape_cast %137 : vector<8x8x8xf32> to vector<8x8x1x8xf32>
    %139 = vector.shape_cast %131 : vector<8x8x8xf32> to vector<1x8x8x8xf32>
    %140 = vector.broadcast %138 : vector<8x8x1x8xf32> to vector<8x8x8x8xf32>
    %141 = vector.broadcast %139 : vector<1x8x8x8xf32> to vector<8x8x8x8xf32>
    %142 = arith.mulf %140, %141 : vector<8x8x8x8xf32>
    %cst_47 = arith.constant dense<0.000000e+00> : vector<8x8x8xf32>
    %143 = vector.multi_reduction <add>, %142, %cst_47 [1] : vector<8x8x8x8xf32> to vector<8x8x8xf32>
    %cst_48 = arith.constant 1.562500e-02 : f32
    %144 = vector.broadcast %cst_48 : f32 to vector<8x8x8xf32>
    %145 = arith.mulf %143, %144 : vector<8x8x8xf32>
    %146 = tpu.concatenate %89, %96, %103, %110, %119, %128, %145 in 2 : vector<8x8x8xf32>, vector<8x8x8xf32>, vector<8x8x8xf32>, vector<8x8x8xf32>, vector<8x8x8xf32>, vector<8x8x8xf32>, vector<8x8x8xf32> -> vector<8x8x56xf32>
    %147 = vector.shape_cast %146 : vector<8x8x56xf32> to vector<64x56xf32>
    %148 = arith.addf %147, %74 : vector<64x56xf32>
    %c0_49 = arith.constant 0 : index
    %c0_50 = arith.constant 0 : index
    %149 = vector.load %arg10[%c0_49, %c0_50] : memref<56x32xf32, #tpu.memory_space<vmem>>, vector<56x32xf32>
    %c0_51 = arith.constant 0 : index
    %c0_52 = arith.constant 0 : index
    %150 = vector.load %arg11[%c0_51, %c0_52] : memref<1x32xf32, #tpu.memory_space<vmem>>, vector<1x32xf32>
    %c0_53 = arith.constant 0 : index
    %c0_54 = arith.constant 0 : index
    %151 = vector.load %arg12[%c0_53, %c0_54] : memref<32x16xf32, #tpu.memory_space<vmem>>, vector<32x16xf32>
    %c0_55 = arith.constant 0 : index
    %c0_56 = arith.constant 0 : index
    %152 = vector.load %arg13[%c0_55, %c0_56] : memref<1x16xf32, #tpu.memory_space<vmem>>, vector<1x16xf32>
    %cst_57 = arith.constant dense<0.000000e+00> : vector<64x32xf32>
    %153 = tpu.matmul %148, %149, %cst_57 {dimension_numbers = #tpu.dot_dimension_numbers<[1], [0], [0], [1], [0, 0, 1, 1], [], []>, precision = #tpu.contract_precision<fp32>} : vector<64x56xf32>, vector<56x32xf32>, vector<64x32xf32> -> vector<64x32xf32>
    %154 = vector.broadcast %150 : vector<1x32xf32> to vector<64x32xf32>
    %155 = arith.addf %153, %154 : vector<64x32xf32>
    %cst_58 = arith.constant 0.000000e+00 : f32
    %156 = vector.broadcast %cst_58 : f32 to vector<64x32xf32>
    %157 = arith.maximumf %155, %156 : vector<64x32xf32>
    %cst_59 = arith.constant dense<0.000000e+00> : vector<64x16xf32>
    %158 = tpu.matmul %157, %151, %cst_59 {dimension_numbers = #tpu.dot_dimension_numbers<[1], [0], [0], [1], [0, 0, 1, 1], [], []>, precision = #tpu.contract_precision<fp32>} : vector<64x32xf32>, vector<32x16xf32>, vector<64x16xf32> -> vector<64x16xf32>
    %159 = vector.broadcast %152 : vector<1x16xf32> to vector<64x16xf32>
    %160 = arith.addf %158, %159 : vector<64x16xf32>
    %c0_60 = arith.constant 0 : index
    %c0_61 = arith.constant 0 : index
    %c0_62 = arith.constant 0 : index
    %161 = vector.load %arg14[%c0_60, %c0_61, %c0_62] : memref<1x64x16xf32, #tpu.memory_space<vmem>>, vector<1x64x16xf32>
    %162 = vector.shape_cast %161 : vector<1x64x16xf32> to vector<64x16xf32>
    %163 = vector.shape_cast %160 : vector<64x16xf32> to vector<1x64x16xf32>
    tpu.vector_store %arg14[%c0_60, %c0_61, %c0_62], %163 {strides = array<i32>} : memref<1x64x16xf32, #tpu.memory_space<vmem>>, vector<1x64x16xf32>,
    return
  }
  func.func @transform_0(%arg0: i32) -> (i32, i32, i32) {
    %c0_i32 = arith.constant 0 : i32
    %c0_i32_0 = arith.constant 0 : i32
    %c0_i32_1 = arith.constant 0 : i32
    return %arg0, %c0_i32, %c0_i32_0 : i32, i32, i32
  }
  func.func @transform_1(%arg0: i32) -> (i32, i32) {
    %c0_i32 = arith.constant 0 : i32
    %c0_i32_0 = arith.constant 0 : i32
    %c0_i32_1 = arith.constant 0 : i32
    return %c0_i32, %c0_i32_0 : i32, i32
  }
  func.func @transform_2(%arg0: i32) -> (i32, i32) {
    %c0_i32 = arith.constant 0 : i32
    %c0_i32_0 = arith.constant 0 : i32
    %c0_i32_1 = arith.constant 0 : i32
    return %c0_i32, %c0_i32_0 : i32, i32
  }
  func.func @transform_3(%arg0: i32) -> (i32, i32) {
    %c0_i32 = arith.constant 0 : i32
    %c0_i32_0 = arith.constant 0 : i32
    %c0_i32_1 = arith.constant 0 : i32
    return %c0_i32, %c0_i32_0 : i32, i32
  }
  func.func @transform_4(%arg0: i32) -> (i32, i32) {
    %c0_i32 = arith.constant 0 : i32
    %c0_i32_0 = arith.constant 0 : i32
    %c0_i32_1 = arith.constant 0 : i32
    return %c0_i32, %c0_i32_0 : i32, i32
  }
  func.func @transform_5(%arg0: i32) -> (i32, i32) {
    %c0_i32 = arith.constant 0 : i32
    %c0_i32_0 = arith.constant 0 : i32
    %c0_i32_1 = arith.constant 0 : i32
    return %c0_i32, %c0_i32_0 : i32, i32
  }
  func.func @transform_6(%arg0: i32) -> (i32, i32) {
    %c0_i32 = arith.constant 0 : i32
    %c0_i32_0 = arith.constant 0 : i32
    %c0_i32_1 = arith.constant 0 : i32
    return %c0_i32, %c0_i32_0 : i32, i32
  }
  func.func @transform_7(%arg0: i32) -> (i32, i32) {
    %c0_i32 = arith.constant 0 : i32
    %c0_i32_0 = arith.constant 0 : i32
    %c0_i32_1 = arith.constant 0 : i32
    return %c0_i32, %c0_i32_0 : i32, i32
  }
  func.func @transform_8(%arg0: i32) -> (i32, i32) {
    %c0_i32 = arith.constant 0 : i32
    %c0_i32_0 = arith.constant 0 : i32
    %c0_i32_1 = arith.constant 0 : i32
    return %c0_i32, %c0_i32_0 : i32, i32
  }
  func.func @transform_9(%arg0: i32) -> (i32, i32) {
    %c0_i32 = arith.constant 0 : i32
    %c0_i32_0 = arith.constant 0 : i32
    %c0_i32_1 = arith.constant 0 : i32
    return %c0_i32, %c0_i32_0 : i32, i32
  }
  func.func @transform_10(%arg0: i32) -> (i32, i32) {
    %c0_i32 = arith.constant 0 : i32
    %c0_i32_0 = arith.constant 0 : i32
    %c0_i32_1 = arith.constant 0 : i32
    return %c0_i32, %c0_i32_0 : i32, i32
  }
  func.func @transform_11(%arg0: i32) -> (i32, i32) {
    %c0_i32 = arith.constant 0 : i32
    %c0_i32_0 = arith.constant 0 : i32
    %c0_i32_1 = arith.constant 0 : i32
    return %c0_i32, %c0_i32_0 : i32, i32
  }
  func.func @transform_12(%arg0: i32) -> (i32, i32) {
    %c0_i32 = arith.constant 0 : i32
    %c0_i32_0 = arith.constant 0 : i32
    %c0_i32_1 = arith.constant 0 : i32
    return %c0_i32, %c0_i32_0 : i32, i32
  }
  func.func @transform_13(%arg0: i32) -> (i32, i32, i32) {
    %c0_i32 = arith.constant 0 : i32
    %c0_i32_0 = arith.constant 0 : i32
    %c0_i32_1 = arith.constant 0 : i32
    return %arg0, %c0_i32, %c0_i32_0 : i32, i32, i32
  }
}

</mosaic_0001>

<bundles_post_ra>
// kernel: tpu_custom_call.1
= control target key start
LH: loop header
LB: loop body
LE: loop exit
PB: predicated region body
PF: predicated region fallthrough
CT: control target
= control target key end

     0   :  { %s11394_s25 = smov 0   ;;  %s15574_s0 = inlined_call_operand.vmem [shape: f32[2,64,16], index: 0, kind: input, shape index: {}]   ;;  %s15575_s1 = inlined_call_operand.vmem [shape: f32[16,32], index: 1, kind: input, shape index: {}]   ;;  %s15576_s2 = inlined_call_operand.vmem [shape: f32[1,32], index: 2, kind: input, shape index: {}]   ;;  %s15577_s3 = inlined_call_operand.vmem [shape: f32[32,88], index: 3, kind: input, shape index: {}]   ;;  %s15578_s4 = inlined_call_operand.vmem [shape: f32[1,88], index: 4, kind: input, shape index: {}]   ;;  %s15579_s5 = inlined_call_operand.vmem [shape: f32[56,32], index: 5, kind: input, shape index: {}]   ;;  %s15580_s6 = inlined_call_operand.vmem [shape: f32[1,32], index: 6, kind: input, shape index: {}]   ;;  %s15581_s7 = inlined_call_operand.vmem [shape: f32[32,88], index: 7, kind: input, shape index: {}]   ;;  %s15582_s8 = inlined_call_operand.vmem [shape: f32[1,88], index: 8, kind: input, shape index: {}]   ;;  %s15583_s9 = inlined_call_operand.vmem [shape: f32[56,32], index: 9, kind: input, shape index: {}]   ;;  %s15584_s10 = inlined_call_operand.vmem [shape: f32[1,32], index: 10, kind: input, shape index: {}]   ;;  %s15585_s11 = inlined_call_operand.vmem [shape: f32[32,16], index: 11, kind: input, shape index: {}]   ;;  %s15586_s12 = inlined_call_operand.vmem [shape: f32[1,16], index: 12, kind: input, shape index: {}]   ;;  %s15587_s13 = inlined_call_operand.vmem [shape: f32[2,64,16], index: 13, kind: output, shape index: {}]  }
   0x1 LB: > { %s9257_s26 = sadd.s32 4294967295, %s11314_s25   ;;  %p9261_p0 = scmp.ge.s32.totalorder %s11314_s25, 1  ;;  %s11314_s25 = sphi %s11394_s25, %s23_s25  }
   0x2   : > { %p387_p1 = scmp.lt.s32.totalorder %s11314_s25, 3 }
   0x4   : > { %p388_p2 = pnand %p9261_p0, %p387_p1 }
   0x6   : > { %391 = sbr.rel (%p388_p2) target bundleno = 2930 (0xb72), region = 72 }
   0xd   : > { %v449_v0 = vld [vmem:[%s15575_s1] sm:$0xff]  ;;  %v450_v1 = vld [vmem:[%s15575_s1 + $0x8] sm:$0xff]  ;;  %p431_p3 = scmp.lt.s32.totalorder %s9257_s26, 1  ;;  %vm15635_vm0 = vcmask 130048   ;;  %vm15633_vm1 = vcmask 261120   ;;  %s11322_s16 = smov 120  }
   0xe   : > { %v489_v2 = vand.u32 4294901760, %v449_v0  ;;  %v492_v3 = vand.u32 4294901760, %v450_v1 }
   0xf   : > { %s16028_s26 = smov (!%p431_p3, %s9257_s26), 1 }
  0x10   : > { %v11410_v4 = vpack.c.bf16 %v492_v3, %v489_v2  ;;  %v11412_v5 = vsub.f32 %v449_v0, %v489_v2  ;;  %v11414_v6 = vsub.f32 %v450_v1, %v492_v3  ;;  %s9338_s14 = sshll.u32 %s16028_s26, 6 }
  0x11   : > { %s11423_s17 = scalar_lea.vmem %s15574_s0, %s9338_s14 }
  0x12   : > { %10565 = vmatprep.subr.bf16.mxu0 %v11410_v4  ;;  %v638_v7 = vand.u32 4294901760, %v11412_v5  ;;  %v645_v8 = vand.u32 4294901760, %v11414_v6  ;;  %v441_v9 = vld [vmem:[%s11423_s17] sm:$0xff]  ;;  %v442_v10 = vld [vmem:[%s11423_s17 + $0x8] sm:$0xff]  ;;  %v443_v11 = vld [vmem:[%s11423_s17 + $0x10] sm:$0xff]  ;;  %v10572_v60 = vpack.c.bf16 %v11414_v6, %v11412_v5 }
  0x13   : > { %10567 = vmatpush3.bf16.msra.mxu0 %v11410_v4  ;;  %v465_v12 = vsel %vm15635_vm0, %v441_v9, 0  ;;  %v468_v15 = vsel %vm15635_vm0, %v442_v10, 0  ;;  %v444_v16 = vld [vmem:[%s11423_s17 + $0x18] sm:$0xff]  ;;  %v445_v17 = vld [vmem:[%s11423_s17 + $0x20] sm:$0xff]  ;;  %v446_v18 = vld [vmem:[%s11423_s17 + $0x28] sm:$0xff]  ;;  %v471_v21 = vsel %vm15635_vm0, %v443_v11, 0 }
  0x14   : > { %v639_v13 = vsub.f32 %v11412_v5, %v638_v7  ;;  %v646_v14 = vsub.f32 %v11414_v6, %v645_v8  ;;  %v11442_v19 = vand.u32 4294901760, %v465_v12  ;;  %v11444_v20 = vand.u32 4294901760, %v468_v15  ;;  %v447_v27 = vld [vmem:[%s11423_s17 + $0x30] sm:$0xff]  ;;  %v448_v36 = vld [vmem:[%s11423_s17 + $0x38] sm:$0xff]  ;;  %v453_v5 = vld [vmem:[%s15577_s3 + $0x8] sm:$0xff]  ;;  %s11323_s17 = smov 112  }
  0x15   : > { %v474_v22 = vsel %vm15635_vm0, %v444_v16, 0  ;;  %v11448_v25 = vand.u32 4294901760, %v471_v21  ;;  %v477_v30 = vsel %vm15635_vm0, %v445_v17, 0  ;;  %v480_v31 = vsel %vm15635_vm0, %v446_v18, 0 }
  0x16   : > { %v640_v23 = vand.u32 4294901760, %v639_v13  ;;  %v647_v24 = vand.u32 4294901760, %v646_v14  ;;  %v11450_v26 = vand.u32 4294901760, %v474_v22  ;;  %v11454_v28 = vsub.f32 %v465_v12, %v11442_v19  ;;  %v454_v13 = vld [vmem:[%s15577_s3 + $0x10] sm:$0xff]  ;;  %v455_v14 = vld [vmem:[%s15577_s3 + $0x18] sm:$0xff] }
  0x17   : > { %v11457_v29 = vsub.f32 %v468_v15, %v11444_v20  ;;  %v11462_v33 = vsub.f32 %v471_v21, %v11448_v25  ;;  %v11467_v35 = vand.u32 4294901760, %v477_v30  ;;  %v11472_v39 = vand.u32 4294901760, %v480_v31 }
  0x18   : > { %v10568_v32 = vpack.c.bf16 %v647_v24, %v640_v23  ;;  %v11465_v34 = vsub.f32 %v474_v22, %v11450_v26  ;;  %v557_v37 = vand.u32 4294901760, %v11454_v28  ;;  %v483_v40 = vsel %vm15635_vm0, %v447_v27, 0 }
  0x19   : > { %v567_v38 = vand.u32 4294901760, %v11457_v29  ;;  %v577_v41 = vand.u32 4294901760, %v11462_v33  ;;  %v11478_v43 = vsub.f32 %v477_v30, %v11467_v35  ;;  %v11480_v44 = vand.u32 4294901760, %v483_v40 }
  0x1a   : > { %10569 = vmatprep.subr.bf16.mxu0 %v10568_v32  ;;  %v587_v42 = vand.u32 4294901760, %v11465_v34  ;;  %v558_v45 = vsub.f32 %v11454_v28, %v557_v37  ;;  %v606_v47 = vsub.f32 %v480_v31, %v11472_v39  ;;  %v486_v48 = vsel %vm15635_vm0, %v448_v36, 0 }
  0x1b   : > { %v568_v46 = vsub.f32 %v11457_v29, %v567_v38  ;;  %v578_v49 = vsub.f32 %v11462_v33, %v577_v41  ;;  %v597_v51 = vand.u32 4294901760, %v11478_v43  ;;  %v616_v52 = vsub.f32 %v483_v40, %v11480_v44  ;;  %v9266_v40 = vld [vmem:[%s15576_s2] ss:$0 sm:$0xff] }
  0x1c   : > { %v588_v50 = vsub.f32 %v11465_v34, %v587_v42  ;;  %v559_v53 = vand.u32 4294901760, %v558_v45  ;;  %v607_v55 = vand.u32 4294901760, %v606_v47  ;;  %v11498_v56 = vand.u32 4294901760, %v486_v48 }
  0x1d   : > { %v569_v54 = vand.u32 4294901760, %v568_v46  ;;  %v579_v57 = vand.u32 4294901760, %v578_v49  ;;  %v598_v58 = vsub.f32 %v11478_v43, %v597_v51  ;;  %v617_v59 = vand.u32 4294901760, %v616_v52 }
  0x1e   : > { %9800 = vmatprep.mubr.f32.mxu0 %v559_v53  ;;  %v626_v61 = vsub.f32 %v486_v48, %v11498_v56  ;;  %v589_v62 = vand.u32 4294901760, %v588_v50  ;;  %v608_v63 = vsub.f32 %v606_v47, %v607_v55  ;;  %v10580_v12 = vpack.c.bf16 %v645_v8, %v638_v7 }
  0x1f   : > { %9801 = vmatmul.mubr.f32.vlgmr.msra.gmra.mrb[0].mxu0 %v569_v54  ;;  %v599_v0 = vand.u32 4294901760, %v598_v58  ;;  %v618_v1 = vsub.f32 %v616_v52, %v617_v59  ;;  %v1291_v7 = vand.u32 4294901760, %v453_v5  ;;  %v1294_v15 = vand.u32 4294901760, %v454_v13 }
  0x20   : > { %10571 = vmatpush3.bf16.msra.mxu0 %v10568_v32  ;;  %9803 = vmatprep.mubr.f32.mxu0 %v579_v57  ;;  %v627_v2 = vand.u32 4294901760, %v626_v61  ;;  %v609_v3 = vand.u32 4294901760, %v608_v63  ;;  %v1297_v16 = vand.u32 4294901760, %v455_v14 }
  0x21   : > { %10573 = vmatprep.subr.bf16.mxu0 %v10572_v60  ;;  %v619_v10 = vand.u32 4294901760, %v618_v1 }
  0x22   : > { %v628_v9 = vsub.f32 %v626_v61, %v627_v2  ;;  %v11565_v17 = vpack.c.bf16 %v1297_v16, %v1294_v15  ;;  %v1459_v27 = vsub.f32 %v455_v14, %v1297_v16 }
  0x23   : > { %9804 = vmatmul.mubr.f32.gmra.mrb[2].mxu0 %v589_v62 }
  0x24   : > { %9806 = vmatprep.mubr.f32.mxu0 %v599_v0  ;;  %v629_v11 = vand.u32 4294901760, %v628_v9  ;;  %v1460_v30 = vand.u32 4294901760, %v1459_v27 }
  0x26   : > { %v1461_v32 = vsub.f32 %v1459_v27, %v1460_v30 }
  0x27   : > { %9807 = vmatmul.mubr.f32.gmra.mrb[4].mxu0 %v609_v3 }
  0x28   : > { %9809 = vmatprep.mubr.f32.mxu0 %v619_v10 }
  0x2b   : > { %9810 = vmatmul.mubr.f32.gmra.mrb[6].mxu0 %v629_v11 }
  0x2c   : > { %9816 = vmatprep.mubr.f32.mxu0 %v11442_v19 }
  0x2f   : > { %9817 = vmatmul.mubr.f32.vlgmr.msra.gmra.mrb[0].mxu0 %v11444_v20 }
  0x30   : > { %10575 = vmatpush3.bf16.msra.mxu0 %v10572_v60  ;;  %9819 = vmatprep.mubr.f32.mxu0 %v11448_v25 }
  0x31   : > { %10577 = vmatprep.subr.bf16.mxu0 %v11410_v4 }
  0x33   : > { %9820 = vmatmul.mubr.f32.gmra.mrb[2].mxu0 %v11450_v26 }
  0x34   : > { %9822 = vmatprep.mubr.f32.mxu0 %v11467_v35 }
  0x37   : > { %9823 = vmatmul.mubr.f32.gmra.mrb[4].mxu0 %v11472_v39 }
  0x38   : > { %9825 = vmatprep.mubr.f32.mxu0 %v11480_v44 }
  0x3b   : > { %9826 = vmatmul.mubr.f32.gmra.mrb[6].mxu0 %v11498_v56 }
  0x3c   : > { %9832 = vmatprep.mubr.f32.mxu0 %v11454_v28 }
  0x3f   : > { %9833 = vmatmul.mubr.f32.vlgmr.msra.gmra.mrb[0].mxu0 %v11457_v29 }
  0x40   : > { %10579 = vmatpush3.bf16.msra.mxu0 %v11410_v4  ;;  %9835 = vmatprep.mubr.f32.mxu0 %v11462_v33 }
  0x41   : > { %10581 = vmatprep.subr.bf16.mxu0 %v10580_v12 }
  0x43   : > { %9836 = vmatmul.mubr.f32.gmra.mrb[2].mxu0 %v11465_v34  ;;  %v1462_v34 = vand.u32 4294901760, %v1461_v32 }
  0x44   : > { %9838 = vmatprep.mubr.f32.mxu0 %v11478_v43 }
  0x47   : > { %9839 = vmatmul.mubr.f32.gmra.mrb[4].mxu0 %v606_v47 }
  0x48   : > { %9841 = vmatprep.mubr.f32.mxu0 %v616_v52 }
  0x4b   : > { %9842 = vmatmul.mubr.f32.gmra.mrb[6].mxu0 %v626_v61 }
  0x4c   : > { %9848 = vmatprep.mubr.f32.mxu0 %v557_v37 }
  0x4f   : > { %9849 = vmatmul.mubr.f32.vlgmr.msra.gmra.mrb[0].mxu0 %v567_v38 }
  0x50   : > { %10583 = vmatpush3.bf16.msra.mxu0 %v10580_v12  ;;  %9851 = vmatprep.mubr.f32.mxu0 %v577_v41 }
  0x51   : > { %10585 = vmatprep.subr.bf16.mxu0 %v11410_v4 }
  0x53   : > { %9852 = vmatmul.mubr.f32.gmra.mrb[2].mxu0 %v587_v42 }
  0x54   : > { %9854 = vmatprep.mubr.f32.mxu0 %v597_v51 }
  0x57   : > { %9855 = vmatmul.mubr.f32.gmra.mrb[4].mxu0 %v607_v55 }
  0x58   : > { %9857 = vmatprep.mubr.f32.mxu0 %v617_v59 }
  0x5b   : > { %9858 = vmatmul.mubr.f32.gmra.mrb[6].mxu0 %v627_v2 }
  0x5c   : > { %9864 = vmatprep.mubr.f32.mxu0 %v11442_v19 }
  0x5f   : > { %9865 = vmatmul.mubr.f32.vlgmr.msra.gmra.mrb[0].mxu0 %v11444_v20 }
  0x60   : > { %10587 = vmatpush3.bf16.msra.mxu0 %v11410_v4  ;;  %9867 = vmatprep.mubr.f32.mxu0 %v11448_v25  ;;  %v452_v4 = vld [vmem:[%s15577_s3] sm:$0xff] }
  0x61   : > { %v1288_v6 = vand.u32 4294901760, %v452_v4 }
  0x63   : > { %9868 = vmatmul.mubr.f32.gmra.mrb[2].mxu0 %v11450_v26  ;;  %v11555_v8 = vpack.c.bf16 %v1291_v7, %v1288_v6  ;;  %v1438_v18 = vsub.f32 %v452_v4, %v1288_v6 }
  0x64   : > { %9870 = vmatprep.mubr.f32.mxu0 %v11467_v35 }
  0x65   : > { %10589 = vmatprep.subr.bf16.mxu1 %v11555_v8 }
  0x66   : > { %10591 = vmatpush3.bf16.msra.mxu1 %v11555_v8 }
  0x67   : > { %9871 = vmatmul.mubr.f32.gmra.mrb[4].mxu0 %v11472_v39  ;;  %10593 = vmatprep.subr.bf16.mxu1 %v11565_v17 }
  0x68   : > { %9873 = vmatprep.mubr.f32.mxu0 %v11480_v44 }
  0x6a   : > { %10595 = vmatpush3.bf16.msra.mxu1 %v11565_v17 }
  0x6b   : > { %9874 = vmatmul.mubr.f32.gmra.mrb[6].mxu0 %v11498_v56 }
  0x6c   : > { %9880 = vmatprep.mubr.f32.mxu0 %v11442_v19  ;;  %v1445_v19 = vsub.f32 %v453_v5, %v1291_v7 }
  0x6e   : > { %v1446_v21 = vand.u32 4294901760, %v1445_v19  ;;  %v11574_v36 = vpack.c.bf16 %v1445_v19, %v1438_v18 }
  0x6f   : > { %9881 = vmatmul.mubr.f32.vlgmr.msra.gmra.mrb[0].mxu0 %v11444_v20  ;;  %v1439_v20 = vand.u32 4294901760, %v1438_v18 }
  0x70   : > { %9883 = vmatprep.mubr.f32.mxu0 %v11448_v25  ;;  %v1447_v23 = vsub.f32 %v1445_v19, %v1446_v21 }
  0x71   : > { %v1440_v22 = vsub.f32 %v1438_v18, %v1439_v20  ;;  %v11578_v38 = vpack.c.bf16 %v1446_v21, %v1439_v20 }
  0x72   : > { %v1448_v25 = vand.u32 4294901760, %v1447_v23 }
  0x73   : > { %9884 = vmatmul.mubr.f32.gmra.mrb[2].mxu0 %v11450_v26  ;;  %v1441_v24 = vand.u32 4294901760, %v1440_v22  ;;  %v1452_v26 = vsub.f32 %v454_v13, %v1294_v15 }
  0x74   : > { %9886 = vmatprep.mubr.f32.mxu0 %v11467_v35 }
  0x75   : > { %v11569_v28 = vpack.c.bf16 %v1448_v25, %v1441_v24  ;;  %v1453_v29 = vand.u32 4294901760, %v1452_v26  ;;  %v11576_v37 = vpack.c.bf16 %v1459_v27, %v1452_v26 }
  0x77   : > { %9887 = vmatmul.mubr.f32.gmra.mrb[4].mxu0 %v11472_v39  ;;  %10597 = vmatprep.subr.bf16.mxu1 %v11569_v28  ;;  %v1454_v31 = vsub.f32 %v1452_v26, %v1453_v29  ;;  %v11580_v39 = vpack.c.bf16 %v1460_v30, %v1453_v29 }
  0x78   : > { %9889 = vmatprep.mubr.f32.mxu0 %v11480_v44 }
  0x79   : > { %v1455_v33 = vand.u32 4294901760, %v1454_v31 }
  0x7b   : > { %9890 = vmatmul.mubr.f32.gmra.mrb[6].mxu0 %v11498_v56  ;;  %v11572_v35 = vpack.c.bf16 %v1462_v34, %v1455_v33 }
 0x142   : > { %v9882_v41 = vpop.f32.mrb[0].mxu0 }
 0x143   : > { %v10876_v42 = vadd.f32 %v9882_v41, %v9266_v40  ;;  %v1202_v43 = vpop.f32.mrb[1].mxu0 }
 0x144   : > { %v10877_v44 = vadd.f32 %v9266_v40, %v1202_v43 }
 0x145   : > { %v1249_v45 = vmax.f32 %v10876_v42, 0.0 }
 0x146   : > { %v1248_v46 = vmax.f32 %v10877_v44, 0.0  ;;  %v9885_v47 = vpop.f32.mrb[2].mxu0 }
 0x147   : > { %v1267_v48 = vsel %vm15633_vm1, %v1249_v45, 0  ;;  %v10878_v49 = vadd.f32 %v9885_v47, %v9266_v40  ;;  %v1214_v50 = vpop.f32.mrb[3].mxu0 }
 0x148   : > { %v11586_v51 = vand.u32 4294901760, %v1267_v48  ;;  %v1264_v52 = vsel %vm15633_vm1, %v1248_v46, 0  ;;  %v10879_v53 = vadd.f32 %v9266_v40, %v1214_v50 }
 0x149   : > { %v11589_v54 = vand.u32 4294901760, %v1264_v52  ;;  %v1251_v55 = vmax.f32 %v10878_v49, 0.0 }
 0x14a   : > { %v11592_v56 = vsub.f32 %v1267_v48, %v11586_v51  ;;  %v1250_v57 = vmax.f32 %v10879_v53, 0.0  ;;  %v9888_v58 = vpop.f32.mrb[4].mxu0 }
 0x14b   : > { %v11595_v59 = vsub.f32 %v1264_v52, %v11589_v54  ;;  %v1273_v60 = vsel %vm15633_vm1, %v1251_v55, 0  ;;  %v10880_v61 = vadd.f32 %v9888_v58, %v9266_v40  ;;  %v1226_v62 = vpop.f32.mrb[5].mxu0 }
 0x14c   : > { %v11598_v63 = vand.u32 4294901760, %v1273_v60  ;;  %v1270_v0 = vsel %vm15633_vm1, %v1250_v57, 0  ;;  %v10881_v1 = vadd.f32 %v9266_v40, %v1226_v62  ;;  %v1368_v2 = vand.u32 4294901760, %v11592_v56 }
 0x14d   : > { %v11602_v3 = vand.u32 4294901760, %v1270_v0  ;;  %v1253_v9 = vmax.f32 %v10880_v61, 0.0  ;;  %v1358_v10 = vand.u32 4294901760, %v11595_v59 }
 0x14e   : > { %v11606_v11 = vsub.f32 %v1273_v60, %v11598_v63  ;;  %v1252_v12 = vmax.f32 %v10881_v1, 0.0  ;;  %v9891_v4 = vpop.f32.mrb[6].mxu0  ;;  %v1369_v5 = vsub.f32 %v11592_v56, %v1368_v2 }
 0x14f   : > { %v11612_v6 = vsub.f32 %v1270_v0, %v11602_v3  ;;  %v1279_v7 = vsel %vm15633_vm1, %v1253_v9, 0  ;;  %v10882_v13 = vadd.f32 %v9891_v4, %v9266_v40  ;;  %v1238_v14 = vpop.f32.mrb[7].mxu0  ;;  %v1359_v15 = vsub.f32 %v11595_v59, %v1358_v10 }
 0x150   : > { %v11618_v16 = vand.u32 4294901760, %v1279_v7  ;;  %v1276_v18 = vsel %vm15633_vm1, %v1252_v12, 0  ;;  %v10883_v19 = vadd.f32 %v9266_v40, %v1238_v14  ;;  %v1370_v26 = vand.u32 4294901760, %v1369_v5 }
 0x151   : > { %v11621_v20 = vand.u32 4294901760, %v1276_v18  ;;  %v1255_v21 = vmax.f32 %v10882_v13, 0.0  ;;  %v1360_v22 = vand.u32 4294901760, %v1359_v15  ;;  %v1378_v23 = vand.u32 4294901760, %v11612_v6 }
 0x152   : > { %v11625_v24 = vsub.f32 %v1279_v7, %v11618_v16  ;;  %v1254_v25 = vmax.f32 %v10883_v19, 0.0  ;;  %v1388_v27 = vand.u32 4294901760, %v11606_v11 }
 0x153   : > { %v11629_v29 = vsub.f32 %v1276_v18, %v11621_v20  ;;  %v1285_v30 = vsel %vm15633_vm1, %v1255_v21, 0  ;;  %9900 = vmatprep.mubr.f32.mxu1 %v1360_v22  ;;  %v1379_v31 = vsub.f32 %v11612_v6, %v1378_v23 }
 0x154   : > { %v11635_v32 = vand.u32 4294901760, %v1285_v30  ;;  %v1282_v33 = vsel %vm15633_vm1, %v1254_v25, 0  ;;  %9901 = vmatmul.mubr.f32.vlgmr.msra.gmra.mrb[0].mxu1 %v1370_v26  ;;  %v1389_v34 = vsub.f32 %v11606_v11, %v1388_v27  ;;  %v1408_v40 = vand.u32 4294901760, %v11625_v24 }
 0x155   : > { %v11642_v41 = vand.u32 4294901760, %v1282_v33  ;;  %10599 = vmatpush3.bf16.msra.mxu1 %v11569_v28  ;;  %v1380_v42 = vand.u32 4294901760, %v1379_v31  ;;  %v1398_v43 = vand.u32 4294901760, %v11629_v29 }
 0x156   : > { %v1427_v44 = vsub.f32 %v1285_v30, %v11635_v32  ;;  %v1390_v45 = vand.u32 4294901760, %v1389_v34  ;;  %10601 = vmatprep.subr.bf16.mxu1 %v11572_v35  ;;  %v1409_v46 = vsub.f32 %v11625_v24, %v1408_v40  ;;  %v15594_v34 = vmov 2131351028  }
 0x157   : > { %v1417_v47 = vsub.f32 %v1282_v33, %v11642_v41  ;;  %9903 = vmatprep.mubr.f32.mxu1 %v1380_v42  ;;  %v1399_v48 = vsub.f32 %v11629_v29, %v1398_v43 }
 0x158   : > { %9904 = vmatmul.mubr.f32.gmra.mrb[2].mxu1 %v1390_v45  ;;  %v1428_v49 = vand.u32 4294901760, %v1427_v44  ;;  %v1410_v52 = vand.u32 4294901760, %v1409_v46 }
 0x159   : > { %v1400_v50 = vand.u32 4294901760, %v1399_v48  ;;  %10603 = vmatpush3.bf16.msra.mxu1 %v11572_v35  ;;  %v1418_v28 = vand.u32 4294901760, %v1417_v47 }
 0x15a   : > { %v1429_v53 = vsub.f32 %v1427_v44, %v1428_v49  ;;  %10605 = vmatprep.subr.bf16.mxu1 %v11574_v36 }
 0x15b   : > { %9906 = vmatprep.mubr.f32.mxu1 %v1400_v50  ;;  %v1419_v55 = vsub.f32 %v1417_v47, %v1418_v28  ;;  %v15588_v50 = vmov 1326507024  }
 0x15c   : > { %9907 = vmatmul.mubr.f32.gmra.mrb[4].mxu1 %v1410_v52  ;;  %v1430_v58 = vand.u32 4294901760, %v1429_v53 }
 0x15d   : > { %v1420_v57 = vand.u32 4294901760, %v1419_v55 }
 0x15f   : > { %9909 = vmatprep.mubr.f32.mxu1 %v1420_v57 }
 0x160   : > { %9910 = vmatmul.mubr.f32.gmra.mrb[6].mxu1 %v1430_v58 }
 0x161   : > { %9920 = vmatprep.mubr.f32.mxu1 %v11589_v54 }
 0x164   : > { %9921 = vmatmul.mubr.f32.vlgmr.msra.gmra.mrb[0].mxu1 %v11586_v51 }
 0x165   : > { %10607 = vmatpush3.bf16.msra.mxu1 %v11574_v36  ;;  %9923 = vmatprep.mubr.f32.mxu1 %v11602_v3 }
 0x166   : > { %10609 = vmatprep.subr.bf16.mxu1 %v11576_v37 }
 0x168   : > { %9924 = vmatmul.mubr.f32.gmra.mrb[2].mxu1 %v11598_v63 }
 0x169   : > { %9926 = vmatprep.mubr.f32.mxu1 %v11621_v20  ;;  %10611 = vmatpush3.bf16.msra.mxu1 %v11576_v37 }
 0x16a   : > { %10613 = vmatprep.subr.bf16.mxu1 %v11555_v8 }
 0x16c   : > { %9927 = vmatmul.mubr.f32.gmra.mrb[4].mxu1 %v11618_v16 }
 0x16d   : > { %9929 = vmatprep.mubr.f32.mxu1 %v11642_v41 }
 0x170   : > { %9930 = vmatmul.mubr.f32.gmra.mrb[6].mxu1 %v11635_v32 }
 0x171   : > { %9940 = vmatprep.mubr.f32.mxu1 %v11595_v59 }
 0x174   : > { %9941 = vmatmul.mubr.f32.vlgmr.msra.gmra.mrb[0].mxu1 %v11592_v56 }
 0x175   : > { %10615 = vmatpush3.bf16.msra.mxu1 %v11555_v8  ;;  %9943 = vmatprep.mubr.f32.mxu1 %v11612_v6 }
 0x176   : > { %10617 = vmatprep.subr.bf16.mxu1 %v11565_v17 }
 0x178   : > { %9944 = vmatmul.mubr.f32.gmra.mrb[2].mxu1 %v11606_v11 }
 0x179   : > { %9946 = vmatprep.mubr.f32.mxu1 %v11629_v29  ;;  %10619 = vmatpush3.bf16.msra.mxu1 %v11565_v17 }
 0x17a   : > { %10621 = vmatprep.subr.bf16.mxu1 %v11578_v38 }
 0x17c   : > { %9947 = vmatmul.mubr.f32.gmra.mrb[4].mxu1 %v11625_v24 }
 0x17d   : > { %9949 = vmatprep.mubr.f32.mxu1 %v1417_v47 }
 0x180   : > { %9950 = vmatmul.mubr.f32.gmra.mrb[6].mxu1 %v1427_v44 }
 0x181   : > { %9960 = vmatprep.mubr.f32.mxu1 %v1358_v10 }
 0x184   : > { %9961 = vmatmul.mubr.f32.vlgmr.msra.gmra.mrb[0].mxu1 %v1368_v2 }
 0x185   : > { %10623 = vmatpush3.bf16.msra.mxu1 %v11578_v38  ;;  %9963 = vmatprep.mubr.f32.mxu1 %v1378_v23 }
 0x186   : > { %10625 = vmatprep.subr.bf16.mxu1 %v11580_v39 }
 0x188   : > { %9964 = vmatmul.mubr.f32.gmra.mrb[2].mxu1 %v1388_v27  ;;  %v15598_v27 = vmov 683565275  }
 0x189   : > { %9966 = vmatprep.mubr.f32.mxu1 %v1398_v43  ;;  %10627 = vmatpush3.bf16.msra.mxu1 %v11580_v39  ;;  %v15590_v43 = vmov 920167782  }
 0x18a   : > { %10629 = vmatprep.subr.bf16.mxu1 %v11555_v8 }
 0x18c   : > { %9967 = vmatmul.mubr.f32.gmra.mrb[4].mxu1 %v1408_v40 }
 0x18d   : > { %9969 = vmatprep.mubr.f32.mxu1 %v1418_v28 }
 0x190   : > { %9970 = vmatmul.mubr.f32.gmra.mrb[6].mxu1 %v1428_v49 }
 0x191   : > { %9980 = vmatprep.mubr.f32.mxu1 %v11589_v54 }
 0x194   : > { %9981 = vmatmul.mubr.f32.vlgmr.msra.gmra.mrb[0].mxu1 %v11586_v51 }
 0x195   : > { %10631 = vmatpush3.bf16.msra.mxu1 %v11555_v8  ;;  %9983 = vmatprep.mubr.f32.mxu1 %v11602_v3  ;;  %v11709_v8 = vld [vmem:[%s15578_s4] ss:$0 sm:$0xff] }
 0x196   : > { %10633 = vmatprep.subr.bf16.mxu1 %v11565_v17 }
 0x198   : > { %9984 = vmatmul.mubr.f32.gmra.mrb[2].mxu1 %v11598_v63 }
 0x199   : > { %9986 = vmatprep.mubr.f32.mxu1 %v11621_v20  ;;  %10635 = vmatpush3.bf16.msra.mxu1 %v11565_v17 }
 0x19c   : > { %9987 = vmatmul.mubr.f32.gmra.mrb[4].mxu1 %v11618_v16 }
 0x19d   : > { %9989 = vmatprep.mubr.f32.mxu1 %v11642_v41 }
 0x1a0   : > { %9990 = vmatmul.mubr.f32.gmra.mrb[6].mxu1 %v11635_v32 }
 0x1a1   : > { %10000 = vmatprep.mubr.f32.mxu1 %v11589_v54 }
 0x1a4   : > { %10001 = vmatmul.mubr.f32.vlgmr.msra.gmra.mrb[0].mxu1 %v11586_v51 }
 0x1a5   : > { %10003 = vmatprep.mubr.f32.mxu1 %v11602_v3 }
 0x1a8   : > { %10004 = vmatmul.mubr.f32.gmra.mrb[2].mxu1 %v11598_v63 }
 0x1a9   : > { %10006 = vmatprep.mubr.f32.mxu1 %v11621_v20 }
 0x1ac   : > { %10007 = vmatmul.mubr.f32.gmra.mrb[4].mxu1 %v11618_v16 }
 0x1ad   : > { %10009 = vmatprep.mubr.f32.mxu1 %v11642_v41  ;;  %v15592_v41 = vmov 2102212464  }
 0x1b0   : > { %10010 = vmatmul.mubr.f32.gmra.mrb[6].mxu1 %v11635_v32  ;;  %v15596_v32 = vmov 2475754826  }
 0x277   : > { %v10002_v17 = vpop.f32.mrb[0].mxu1 }
 0x278   : > { %v11712_v35 = vadd.f32 %v10002_v17, %v11709_v8  ;;  %v2027_v36 = vpop.f32.mrb[1].mxu1 }
 0x279   : > { %v11715_v37 = vadd.f32 %v11709_v8, %v2027_v36 }
 0x27a   : > { %v2177_v38 = vand.u32 2147483647, %v11712_v35  ;;  %v2180_v39 = vand.u32 2139095040, %v11712_v35  ;;  %vm2179_vm15 = vcmp.lt.s32.totalorder %v11712_v35, 0 }
 0x27b   : > { %v2073_v51 = vand.u32 2147483647, %v11715_v37  ;;  %v2076_v54 = vand.u32 2139095040, %v11715_v37  ;;  %v10005_v56 = vpop.f32.mrb[2].mxu1 }
 0x27c   : > { %v2181_v59 = vshrl.u32 %v2180_v39, 23  ;;  %v2184_v60 = vand.u32 8388607, %v2177_v38  ;;  %v11724_v61 = vadd.f32 %v10005_v56, %v11709_v8  ;;  %v2039_v62 = vpop.f32.mrb[3].mxu1 }
 0x27d   : > { %v2077_v63 = vshrl.u32 %v2076_v54, 23  ;;  %v2080_v0 = vand.u32 8388607, %v2073_v51  ;;  %v11737_v20 = vadd.f32 %v11709_v8, %v2039_v62 }
 0x27e   : > { %v9272_v1 = vadd.s32 4294967169, %v2181_v59  ;;  %v2388_v3 = vand.u32 2139095040, %v11724_v61  ;;  %v2185_v10 = vor.u32 8388608, %v2184_v60  ;;  %v2385_v5 = vand.u32 2147483647, %v11724_v61 }
 0x27f   : > { %v9268_v2 = vadd.s32 4294967169, %v2077_v63  ;;  %v11729_v9 = vpop.f32.mrb[4].mxu1  ;;  %v2081_v12 = vor.u32 8388608, %v2080_v0 }
 0x280   : > { %v2187_v11 = vadd.s32 1, %v9272_v1  ;;  %v2389_v6 = vshrl.u32 %v2388_v3, 23  ;;  %v11732_v7 = vpop.f32.mrb[5].mxu1  ;;  %v11741_v22 = vshll.u32 %v2185_v10, 8  ;;  %v11749_v25 = vand.u32 8388607, %v2385_v5 }
 0x281   : > { %v2083_v4 = vadd.s32 1, %v9268_v2  ;;  %v11745_v24 = vshll.u32 %v2081_v12, 8 }
 0x282   : > { %vm2188_vm2 = vcmp.gt.s32.totalorder %v2187_v11, 0  ;;  %v9280_v14 = vadd.s32 4294967169, %v2389_v6 }
 0x283   : > { %v2189_v13 = vsel %vm2188_vm2, %v2187_v11, 0  ;;  %vm2084_vm3 = vcmp.gt.s32.totalorder %v2083_v4, 0  ;;  %v11734_v15 = vpop.f32.mrb[6].mxu1  ;;  %vm2075_vm2 = vcmp.lt.s32.totalorder %v11715_v37, 0 }
 0x284   : > { %v2190_v16 = vshrl.u32 %v2189_v13, 5  ;;  %v2191_v18 = vand.u32 31, %v2189_v13  ;;  %v2085_v19 = vsel %vm2084_vm3, %v2083_v4, 0  ;;  %v11739_v21 = vpop.f32.mrb[7].mxu1  ;;  %v11752_v31 = vadd.s32 1, %v9280_v14 }
 0x285   : > { %v11743_v23 = vshrl.u32 %v2085_v19, 5  ;;  %v2087_v30 = vand.u32 31, %v2085_v19 }
 0x286   : > { %v2192_v26 = vsub.s32 32, %v2191_v18  ;;  %v2194_v29 = vshll.u32 %v15598_v27, %v2191_v18  ;;  %v2197_v33 = vshll.u32 %v15596_v32, %v2191_v18  ;;  %v2200_v40 = vshll.u32 %v15594_v34, %v2191_v18 }
 0x287   : > { %v2203_v42 = vshll.u32 %v15592_v41, %v2191_v18  ;;  %v2206_v44 = vshll.u32 %v15590_v43, %v2191_v18  ;;  %vm2209_vm4 = vcmp.lt.s32.totalorder %v2190_v16, 1  ;;  %vm2210_vm5 = vcmp.lt.s32.totalorder %v2190_v16, 2 }
 0x288   : > { %v2195_v45 = vshrl.u32 %v15596_v32, %v2192_v26  ;;  %v2198_v46 = vshrl.u32 %v15594_v34, %v2192_v26  ;;  %v2201_v47 = vshrl.u32 %v15592_v41, %v2192_v26  ;;  %v2193_v48 = vshrl.u32 %v15598_v27, %v2192_v26 }
 0x289   : > { %v2204_v49 = vshrl.u32 %v15590_v43, %v2192_v26  ;;  %v2207_v28 = vshrl.u32 %v15588_v50, %v2192_v26  ;;  %v2088_v57 = vsub.s32 32, %v2087_v30  ;;  %vm2211_vm6 = vcmp.lt.s32.totalorder %v2190_v16, 3 }
 0x28a   : > { %v2196_v52 = vor.u32 %v2195_v45, %v2194_v29  ;;  %v2199_v53 = vor.u32 %v2198_v46, %v2197_v33  ;;  %v2202_v55 = vor.u32 %v2201_v47, %v2200_v40  ;;  %vm2212_vm7 = vcmp.lt.s32.totalorder %v2190_v16, 4 }
 0x28b   : > { %v2205_v58 = vor.u32 %v2204_v49, %v2203_v42  ;;  %v2208_v17 = vor.u32 %v2207_v28, %v2206_v44  ;;  %v2090_v63 = vshll.u32 %v15598_v27, %v2087_v30  ;;  %v2091_v2 = vshrl.u32 %v15596_v32, %v2088_v57 }
 0x28c   : > { %v2213_v36 = vsel %vm2209_vm4, %v2193_v48, %v2196_v52  ;;  %v2214_v39 = vsel %vm2212_vm7, %v2202_v55, 2102212464  ;;  %v2217_v54 = vsel %vm2209_vm4, %v2196_v52, %v2199_v53  ;;  %v2221_v56 = vsel %vm2209_vm4, %v2199_v53, %v2202_v55 }
 0x28d   : > { %v2215_v59 = vsel %vm2211_vm6, %v2199_v53, %v2214_v39  ;;  %v2218_v60 = vsel %vm2212_vm7, %v2205_v58, 920167782  ;;  %v2222_v62 = vsel %vm2212_vm7, %v2208_v17, 1326507024  ;;  %v2093_v3 = vshll.u32 %v15596_v32, %v2087_v30 }
 0x28e   : > { %v2219_v0 = vsel %vm2211_vm6, %v2202_v55, %v2218_v60  ;;  %v2223_v1 = vsel %vm2211_vm6, %v2205_v58, %v2222_v62  ;;  %v2216_v10 = vsel %vm2210_vm5, %v2213_v36, %v2215_v59  ;;  %v2094_v4 = vshrl.u32 %v15594_v34, %v2088_v57 }
 0x28f   : > { %v2220_v11 = vsel %vm2210_vm5, %v2217_v54, %v2219_v0  ;;  %v2224_v12 = vsel %vm2210_vm5, %v2221_v56, %v2223_v1  ;;  %v2092_v19 = vor.u32 %v2091_v2, %v2090_v63  ;;  %v2096_v29 = vshll.u32 %v15594_v34, %v2087_v30 }
 0x290   : > { %v11775_v6 = vmul.u32.u64.low %v11741_v22, %v2224_v12  ;;  %v11776_v13 = vmul.u32.u64.high %v11741_v22, %v2224_v12, %v11775_v6  ;;  %v11779_v14 = vmul.u32.u64.low %v11741_v22, %v2220_v11  ;;  %v11780_v18 = vmul.u32.u64.high %v11741_v22, %v2220_v11, %v11779_v14 }
 0x291   : > { %v2095_v26 = vor.u32 %v2094_v4, %v2093_v3  ;;  %v2097_v33 = vshrl.u32 %v15592_v41, %v2088_v57  ;;  %v2089_v40 = vshrl.u32 %v15598_v27, %v2088_v57  ;;  %v2099_v16 = vshll.u32 %v15592_v41, %v2087_v30 }
 0x292   : > { %v2100_v42 = vshrl.u32 %v15590_v43, %v2088_v57  ;;  %v2103_v44 = vshrl.u32 %v15588_v50, %v2088_v57  ;;  %v2232_v45 = vmul.u32 %v11741_v22, %v2216_v10  ;;  %v2102_v47 = vshll.u32 %v15590_v43, %v2087_v30 }
 0x293   : > { %v2098_v46 = vor.u32 %v2097_v33, %v2096_v29  ;;  %vm2105_vm8 = vcmp.lt.s32.totalorder %v11743_v23, 1  ;;  %vm2234_vm9 = vc.u32 %v11776_v13, %v11779_v14  ;;  %v2235_v48 = vadd.s32 1, %v11780_v18 }
 0x294   : > { %v2101_v49 = vor.u32 %v2100_v42, %v2099_v16  ;;  %vm2106_vm10 = vcmp.lt.s32.totalorder %v11743_v23, 2  ;;  %v2104_v28 = vor.u32 %v2103_v44, %v2102_v47  ;;  %vm2107_vm11 = vcmp.lt.s32.totalorder %v11743_v23, 3 }
 0x295   : > { %vm2108_vm12 = vcmp.lt.s32.totalorder %v11743_v23, 4  ;;  %v2113_v52 = vsel %vm2105_vm8, %v2092_v19, %v2095_v26  ;;  %v2236_v22 = vsel %vm2234_vm9, %v2235_v48, %v11780_v18  ;;  %v2117_v30 = vsel %vm2105_vm8, %v2095_v26, %v2098_v46 }
 0x296   : > { %v2110_v53 = vsel %vm2108_vm12, %v2098_v46, 2102212464  ;;  %v2114_v55 = vsel %vm2108_vm12, %v2101_v49, 920167782  ;;  %v2237_v57 = vadd.s32 %v2236_v22, %v2232_v45  ;;  %v2109_v58 = vsel %vm2105_vm8, %v2089_v40, %v2092_v19 }
 0x297   : > { %v2115_v17 = vsel %vm2107_vm11, %v2098_v46, %v2114_v55  ;;  %v2118_v36 = vsel %vm2108_vm12, %v2104_v28, 1326507024  ;;  %v2111_v39 = vsel %vm2107_vm11, %v2095_v26, %v2110_v53  ;;  %vm2396_vm13 = vcmp.gt.s32.totalorder %v11752_v31, 0 }
 0x298   : > { %v2116_v54 = vsel %vm2106_vm10, %v2113_v52, %v2115_v17  ;;  %v2119_v56 = vsel %vm2107_vm11, %v2101_v49, %v2118_v36  ;;  %v2238_v59 = vadd.s32 536870912, %v2237_v57  ;;  %v2397_v2 = vsel %vm2396_vm13, %v11752_v31, 0 }
 0x299   : > { %v2120_v60 = vsel %vm2106_vm10, %v2117_v30, %v2119_v56  ;;  %v11803_v62 = vmul.u32.u64.low %v11745_v24, %v2116_v54  ;;  %v11804_v63 = vmul.u32.u64.high %v11745_v24, %v2116_v54, %v11803_v62  ;;  %v2112_v10 = vsel %vm2106_vm10, %v2109_v58, %v2111_v39 }
 0x29a   : > { %v11808_v0 = vmul.u32.u64.low %v11745_v24, %v2120_v60  ;;  %v11809_v1 = vmul.u32.u64.high %v11745_v24, %v2120_v60, %v11808_v0  ;;  %v11812_v3 = vshrl.u32 %v2238_v59, 30  ;;  %v2399_v11 = vand.u32 31, %v2397_v2 }
 0x29b   : > { %v2284_v12 = vand.u32 2139095040, %v11737_v20  ;;  %v2131_v6 = vadd.s32 1, %v11804_v63  ;;  %v2393_v18 = vor.u32 8388608, %v11749_v25  ;;  %v2128_v19 = vmul.u32 %v11745_v24, %v2112_v10 }
 0x29c   : > { %v2240_v4 = vshll.u32 %v11812_v3, 30  ;;  %vm2130_vm14 = vc.u32 %v11809_v1, %v11803_v62  ;;  %v2400_v31 = vsub.s32 32, %v2399_v11  ;;  %v2281_v42 = vand.u32 2147483647, %v11737_v20 }
 0x29d   : > { %v2132_v23 = vsel %vm2130_vm14, %v2131_v6, %v11804_v63  ;;  %v2285_v33 = vshrl.u32 %v2284_v12, 23  ;;  %v11827_v16 = vshll.u32 %v2393_v18, 8  ;;  %v2233_v25 = vadd.s32 %v11779_v14, %v11776_v13 }
 0x29e   : > { %v11823_v26 = vsub.s32 %v2237_v57, %v2240_v4  ;;  %v2133_v29 = vadd.s32 %v2132_v23, %v2128_v19  ;;  %v2403_v24 = vshrl.u32 %v15596_v32, %v2400_v31  ;;  %v2406_v45 = vshrl.u32 %v15594_v34, %v2400_v31 }
 0x29f   : > { %v2398_v47 = vshrl.u32 %v2397_v2, 5  ;;  %v2409_v48 = vshrl.u32 %v15592_v41, %v2400_v31  ;;  %v2412_v49 = vshrl.u32 %v15590_v43, %v2400_v31  ;;  %v2402_v52 = vshll.u32 %v15598_v27, %v2399_v11 }
 0x2a0   : > { %v2243_v40 = vsub.s32 0, %v11823_v26  ;;  %v2134_v44 = vadd.s32 536870912, %v2133_v29  ;;  %v2405_v22 = vshll.u32 %v15596_v32, %v2399_v11  ;;  %v9276_v53 = vadd.s32 4294967169, %v2285_v33 }
 0x2a1   : > { %v2408_v14 = vshll.u32 %v15594_v34, %v2399_v11  ;;  %v2411_v55 = vshll.u32 %v15592_v41, %v2399_v11  ;;  %v2415_v30 = vshrl.u32 %v15588_v50, %v2400_v31  ;;  %v2263_v57 = vsub.s32 4, %v11812_v3 }
 0x2a2   : > { %v9273_v46 = vmin.u32 %v2243_v40, %v11823_v26  ;;  %v2135_v28 = vshrl.u32 %v2134_v44, 30  ;;  %v2404_v17 = vor.u32 %v2403_v24, %v2402_v52  ;;  %v2407_v36 = vor.u32 %v2406_v45, %v2405_v22 }
 0x2a3   : > { %v2410_v54 = vor.u32 %v2409_v48, %v2408_v14  ;;  %v2413_v56 = vor.u32 %v2412_v49, %v2411_v55  ;;  %v2414_v59 = vshll.u32 %v15590_v43, %v2399_v11  ;;  %v2401_v0 = vshrl.u32 %v15598_v27, %v2400_v31 }
 0x2a4   : > { %v2245_v13 = vclz %v9273_v46  ;;  %v2136_v58 = vshll.u32 %v2135_v28, 30  ;;  %v2159_v63 = vsub.s32 4, %v2135_v28  ;;  %vm2417_vm3 = vcmp.lt.s32.totalorder %v2398_v47, 1 }
 0x2a5   : > { %vm11850_vm4 = vcmp.le.f32.partialorder %v2177_v38, 0.7853982  ;;  %v2416_v10 = vor.u32 %v2415_v30, %v2414_v59  ;;  %vm2418_vm6 = vcmp.lt.s32.totalorder %v2398_v47, 2  ;;  %vm2419_vm7 = vcmp.lt.s32.totalorder %v2398_v47, 3 }
 0x2a6   : > { %v9274_v39 = vadd.s32 4294967294, %v2245_v13  ;;  %v11845_v60 = vsub.s32 %v2133_v29, %v2136_v58  ;;  %vm11856_vm8 = vcmp.le.f32.partialorder %v2073_v51, 0.7853982  ;;  %vm2420_vm9 = vcmp.lt.s32.totalorder %v2398_v47, 4 }
 0x2a7   : > { %v2425_v6 = vsel %vm2417_vm3, %v2404_v17, %v2407_v36  ;;  %v2422_v19 = vsel %vm2420_vm9, %v2410_v54, 2102212464  ;;  %v2426_v31 = vsel %vm2420_vm9, %v2413_v56, 920167782  ;;  %v2429_v51 = vsel %vm2417_vm3, %v2407_v36, %v2410_v54 }
 0x2a8   : > { %vm9275_vm5 = vcmp.lt.s32.totalorder %v9274_v39, 0  ;;  %v2139_v4 = vsub.s32 0, %v11845_v60  ;;  %v2427_v33 = vsel %vm2419_vm7, %v2410_v54, %v2426_v31  ;;  %v2430_v45 = vsel %vm2420_vm9, %v2416_v10, 1326507024 }
 0x2a9   : > { %v2248_v12 = vsel %vm9275_vm5, 0, %v9274_v39  ;;  %v2428_v24 = vsel %vm2418_vm6, %v2425_v6, %v2427_v33  ;;  %v2264_v46 = vsel %vm2179_vm15, %v2263_v57, %v11812_v3  ;;  %v2421_v49 = vsel %vm2417_vm3, %v2401_v0, %v2404_v17 }
 0x2aa   : > { %v2249_v38 = vsub.s32 32, %v2248_v12  ;;  %v2253_v18 = vsub.s32 4294967266, %v2248_v12  ;;  %v2250_v23 = vshll.u32 %v11823_v26, %v2248_v12  ;;  %v9269_v29 = vmin.u32 %v2139_v4, %v11845_v60 }
 0x2ab   : > { %v2423_v26 = vsel %vm2419_vm7, %v2407_v36, %v2422_v19  ;;  %v2160_v13 = vsel %vm2075_vm2, %v2159_v63, %v2135_v28  ;;  %v11877_v30 = vmul.u32.u64.low %v11827_v16, %v2428_v24  ;;  %v11878_v58 = vmul.u32.u64.high %v11827_v16, %v2428_v24, %v11877_v30 }
 0x2ac   : > { %v2251_v40 = vshrl.u32 %v2233_v25, %v2249_v38  ;;  %v2254_v44 = vadd.s32 127, %v2253_v18  ;;  %v2141_v48 = vclz %v9269_v29  ;;  %v2431_v25 = vsel %vm2419_vm7, %v2413_v56, %v2430_v45 }
 0x2ad   : > { %v2432_v55 = vsel %vm2418_vm6, %v2429_v51, %v2431_v25  ;;  %v2424_v57 = vsel %vm2418_vm6, %v2421_v49, %v2423_v26  ;;  %v2266_v28 = vsel %vm11850_vm4, 0, %v2264_v46  ;;  %v2129_v39 = vadd.s32 %v11803_v62, %v11809_v1 }
 0x2ae   : > { %v2252_v52 = vor.u32 %v2251_v40, %v2250_v23  ;;  %v2255_v22 = vshll.u32 %v2254_v44, 23  ;;  %v9270_v14 = vadd.s32 4294967294, %v2141_v48  ;;  %v2291_v54 = vadd.s32 1, %v9276_v53 }
 0x2af   : > { %v11883_v17 = vmul.u32.u64.low %v11827_v16, %v2432_v55  ;;  %v11884_v36 = vmul.u32.u64.high %v11827_v16, %v2432_v55, %v11883_v17  ;;  %v2162_v0 = vsel %vm11856_vm8, 0, %v2160_v13  ;;  %v2440_v12 = vmul.u32 %v11827_v16, %v2424_v57 }
 0x2b0   : > { %v2256_v3 = vor.u32 4788187, %v2255_v22  ;;  %vm9271_vm10 = vcmp.lt.s32.totalorder %v9270_v14, 0  ;;  %v2259_v59 = vcvt.s32.f32 %v2252_v52  ;;  %v2443_v4 = vadd.s32 1, %v11878_v58 }
 0x2b1   : > { %v2144_v63 = vsel %vm9271_vm10, 0, %v9270_v14  ;;  %vm2442_vm11 = vc.u32 %v11884_v36, %v11877_v30  ;;  %vm2292_vm12 = vcmp.gt.s32.totalorder %v2291_v54, 0  ;;  %v2270_v31 = vadd.s32 3, %v2266_v28 }
 0x2b2   : > { %v2257_v56 = vand.u32 2147483647, %v2256_v3  ;;  %v2145_v47 = vsub.s32 32, %v2144_v63  ;;  %v2149_v10 = vsub.s32 4294967266, %v2144_v63  ;;  %v2146_v38 = vshll.u32 %v11845_v60, %v2144_v63 }
 0x2b3   : > { %v2444_v53 = vsel %vm2442_vm11, %v2443_v4, %v11878_v58  ;;  %v2293_v18 = vsel %vm2292_vm12, %v2291_v54, 0  ;;  %v2166_v40 = vadd.s32 3, %v2162_v0  ;;  %v11903_v46 = vand.u32 3, %v2270_v31 }
 0x2b4   : > { %v2260_v6 = vmul.f32 %v2259_v59, %v2257_v56  ;;  %v2147_v62 = vshrl.u32 %v2129_v39, %v2145_v47  ;;  %v2150_v1 = vadd.s32 127, %v2149_v10  ;;  %v2445_v23 = vadd.s32 %v2444_v53, %v2440_v12 }
 0x2b5   : > { %v2295_v29 = vand.u32 31, %v2293_v18  ;;  %v2288_v49 = vand.u32 8388607, %v2281_v42  ;;  %v11911_v22 = vadd.f32 %v11729_v9, %v11709_v8  ;;  %v11913_v13 = vand.u32 3, %v2166_v40 }
 0x2b6   : > { %v2261_v19 = vxor.u32 2147483648, %v2260_v6  ;;  %v2148_v33 = vor.u32 %v2147_v62, %v2146_v38  ;;  %v2151_v16 = vshll.u32 %v2150_v1, 23  ;;  %v2446_v60 = vadd.s32 536870912, %v2445_v23 }
 0x2b7   : > { %v2296_v44 = vsub.s32 32, %v2295_v29  ;;  %v2307_v3 = vshll.u32 %v15592_v41, %v2295_v29  ;;  %vm2276_vm13 = vcmp.eq.s32.totalorder %v11903_v46, 2  ;;  %v11924_v9 = vshrl.u32 %v2293_v18, 5 }
 0x2b8   : > { %v2262_v51 = vsel %vm2179_vm15, %v2261_v19, %v2260_v6  ;;  %v2152_v45 = vor.u32 4788187, %v2151_v16  ;;  %v11905_v48 = vshrl.u32 %v2446_v60, 30  ;;  %v2155_v52 = vcvt.s32.f32 %v2148_v33 }
 0x2b9   : > { %v2265_v24 = vsel %vm11850_vm4, %v11712_v35, %v2262_v51  ;;  %v2299_v25 = vshrl.u32 %v15596_v32, %v2296_v44  ;;  %v2302_v14 = vshrl.u32 %v15594_v34, %v2296_v44  ;;  %v2305_v58 = vshrl.u32 %v15592_v41, %v2296_v44 }
 0x2ba   : > { %11244 = vcosq.f32 %v2265_v24  ;;  %v2153_v26 = vand.u32 2147483647, %v2152_v45  ;;  %v2448_v2 = vshll.u32 %v11905_v48, 30  ;;  %v2308_v57 = vshrl.u32 %v15590_v43, %v2296_v44 }
 0x2bb   : > { %11246 = vsinq.f32 %v2265_v24  ;;  %v2298_v28 = vshll.u32 %v15598_v27, %v2295_v29  ;;  %v2301_v39 = vshll.u32 %v15596_v32, %v2295_v29  ;;  %vm2273_vm14 = vcmp.eq.s32.totalorder %v11903_v46, 0 }
 0x2bc   : > { %v2156_v55 = vmul.f32 %v2155_v52, %v2153_v26  ;;  %v11922_v17 = vsub.s32 %v2445_v23, %v2448_v2  ;;  %v2304_v56 = vshll.u32 %v15594_v34, %v2295_v29  ;;  %v2309_v59 = vor.u32 %v2308_v57, %v2307_v3 }
 0x2bd   : > { %v2311_v63 = vshrl.u32 %v15588_v50, %v2296_v44  ;;  %vm2272_vm15 = vcmp.lt.s32.totalorder %v11903_v46, 2  ;;  %v2289_v47 = vor.u32 8388608, %v2288_v49  ;;  %v2300_v10 = vor.u32 %v2299_v25, %v2298_v28 }
 0x2be   : > { %v2157_v54 = vxor.u32 2147483648, %v2156_v55  ;;  %v2451_v0 = vsub.s32 0, %v11922_v17  ;;  %v2303_v12 = vor.u32 %v2302_v14, %v2301_v39  ;;  %vm2269_vm3 = vweird.f32 %v11712_v35 }
 0x2bf   : > { %v2306_v6 = vor.u32 %v2305_v58, %v2304_v56  ;;  %v2310_v38 = vshll.u32 %v15590_v43, %v2295_v29  ;;  %v2596_v62 = vand.u32 2139095040, %v11911_v22  ;;  %v2441_v53 = vadd.s32 %v11877_v30, %v11884_v36 }
 0x2c0   : > { %v2158_v4 = vsel %vm2075_vm2, %v2157_v54, %v2156_v55  ;;  %v9281_v18 = vmin.u32 %v2451_v0, %v11922_v17  ;;  %vm2316_vm4 = vcmp.lt.s32.totalorder %v11924_v9, 4  ;;  %vm2313_vm2 = vcmp.lt.s32.totalorder %v11924_v9, 1 }
 0x2c1   : > { %v2161_v1 = vsel %vm11856_vm8, %v11715_v37, %v2158_v4  ;;  %v2312_v19 = vor.u32 %v2311_v63, %v2310_v38  ;;  %v2322_v31 = vsel %vm2316_vm4, %v2309_v59, 920167782  ;;  %vm2315_vm5 = vcmp.lt.s32.totalorder %v11924_v9, 3 }
 0x2c2   : > { %11248 = vcosq.f32 %v2161_v1  ;;  %v2453_v29 = vclz %v9281_v18  ;;  %v2321_v11 = vsel %vm2313_vm2, %v2300_v10, %v2303_v12  ;;  %v2297_v33 = vshrl.u32 %v15598_v27, %v2296_v44 }
 0x2c3   : > { %11250 = vsinq.f32 %v2161_v1  ;;  %v2323_v16 = vsel %vm2315_vm5, %v2306_v6, %v2322_v31  ;;  %v2329_v51 = vshll.u32 %v2289_v47, 8  ;;  %vm2314_vm6 = vcmp.lt.s32.totalorder %v11924_v9, 2 }
 0x2c4   : > { %v11245_v23 = vpop.eup %11244  ;;  %v9282_v60 = vadd.s32 4294967294, %v2453_v29  ;;  %v2318_v24 = vsel %vm2316_vm4, %v2306_v6, 2102212464  ;;  %v2324_v49 = vsel %vm2314_vm6, %v2321_v11, %v2323_v16  ;;  %v2325_v44 = vsel %vm2313_vm2, %v2303_v12, %v2306_v6 }
 0x2c5   : > { %v11247_v30 = vpop.eup %11246  ;;  %v2277_v36 = vxor.u32 2147483648, %v11245_v23  ;;  %v2326_v26 = vsel %vm2316_vm4, %v2312_v19, 1326507024  ;;  %v2597_v25 = vshrl.u32 %v2596_v62, 23  ;;  %v2317_v58 = vsel %vm2313_vm2, %v2297_v33, %v2300_v10 }
 0x2c6   : > { %v2274_v40 = vxor.u32 2147483648, %v11247_v30  ;;  %vm9283_vm7 = vcmp.lt.s32.totalorder %v9282_v60, 0  ;;  %v2327_v2 = vsel %vm2315_vm5, %v2309_v59, %v2326_v26  ;;  %v2319_v54 = vsel %vm2315_vm5, %v2303_v12, %v2318_v24 }
 0x2c7   : > { %v2278_v45 = vsel %vm2276_vm13, %v2277_v36, %v11247_v30  ;;  %v2456_v55 = vsel %vm9283_vm7, 0, %v9282_v60  ;;  %v2328_v3 = vsel %vm2314_vm6, %v2325_v44, %v2327_v2  ;;  %v9288_v10 = vadd.s32 4294967169, %v2597_v25 }
 0x2c8   : > { %v2275_v52 = vsel %vm2273_vm14, %v11245_v23, %v2274_v40  ;;  %v2457_v28 = vsub.s32 32, %v2456_v55  ;;  %v2461_v39 = vsub.s32 4294967266, %v2456_v55  ;;  %vm2169_vm8 = vcmp.eq.s32.totalorder %v11913_v13, 0 }
 0x2c9   : > { %v2279_v14 = vsel %vm2272_vm15, %v2275_v52, %v2278_v45  ;;  %v11981_v56 = vmul.u32.u64.low %v2329_v51, %v2328_v3  ;;  %v11982_v59 = vmul.u32.u64.high %v2329_v51, %v2328_v3, %v11981_v56  ;;  %v2320_v35 = vsel %vm2314_vm6, %v2317_v58, %v2319_v54 }
 0x2ca   : > { %v11977_v57 = vsel %vm2269_vm3, nan, %v2279_v14  ;;  %v11984_v46 = vmul.u32.u64.low %v2329_v51, %v2324_v49  ;;  %v11985_v63 = vmul.u32.u64.high %v2329_v51, %v2324_v49, %v11984_v46  ;;  %v2459_v0 = vshrl.u32 %v2441_v53, %v2457_v28 }
 0x2cb   : > { %15680 = vst [vmem:[#allocation2_spill] sm:$0xff] %v11977_v57  ;;  %v2462_v47 = vadd.s32 127, %v2461_v39  ;;  %v11993_v6 = vadd.f32 %v11709_v8, %v11732_v7  ;;  %v2458_v62 = vshll.u32 %v11922_v17, %v2456_v55  ;;  %v2603_v18 = vadd.s32 1, %v9288_v10 }
 0x2cc   : > { %v11249_v4 = vpop.eup %11248  ;;  %v2471_v53 = vsub.s32 4, %v11905_v48  ;;  %vm2338_vm9 = vc.u32 %v11982_v59, %v11984_v46  ;;  %v2339_v31 = vadd.s32 1, %v11985_v63  ;;  %v2336_v29 = vmul.u32 %v2329_v51, %v2320_v35 }
 0x2cd   : > { %v11251_v12 = vpop.eup %11250  ;;  %v2173_v38 = vxor.u32 2147483648, %v11249_v4  ;;  %v2463_v1 = vshll.u32 %v2462_v47, 23  ;;  %v2460_v9 = vor.u32 %v2459_v0, %v2458_v62  ;;  %vm2604_vm10 = vcmp.gt.s32.totalorder %v2603_v18, 0 }
 0x2ce   : > { %v2170_v19 = vxor.u32 2147483648, %v11251_v12  ;;  %vm2172_vm11 = vcmp.eq.s32.totalorder %v11913_v13, 2  ;;  %v2340_v7 = vsel %vm2338_vm9, %v2339_v31, %v11985_v63  ;;  %v2593_v17 = vand.u32 2147483647, %v11911_v22 }
 0x2cf   : > { %v2464_v23 = vor.u32 4788187, %v2463_v1  ;;  %v2605_v11 = vsel %vm2604_vm10, %v2603_v18, 0  ;;  %v2174_v36 = vsel %vm2172_vm11, %v2173_v38, %v11251_v12  ;;  %v2341_v16 = vadd.s32 %v2340_v7, %v2336_v29 }
 0x2d0   : > { %v2171_v30 = vsel %vm2169_vm8, %v11249_v4, %v2170_v19  ;;  %vm2165_vm12 = vweird.f32 %v11715_v37  ;;  %vm2387_vm13 = vcmp.lt.s32.totalorder %v11724_v61, 0  ;;  %v2607_v40 = vand.u32 31, %v2605_v11 }
 0x2d1   : > { %v2465_v33 = vand.u32 2147483647, %v2464_v23  ;;  %vm2168_vm14 = vcmp.lt.s32.totalorder %v11913_v13, 2  ;;  %v2467_v51 = vcvt.s32.f32 %v2460_v9  ;;  %v12011_v60 = vsel %vm2387_vm13, %v2471_v53, %v11905_v48 }
 0x2d2   : > { %v2342_v24 = vadd.s32 536870912, %v2341_v16  ;;  %v2175_v45 = vsel %vm2168_vm14, %v2171_v30, %v2174_v36  ;;  %v2600_v49 = vand.u32 8388607, %v2593_v17  ;;  %v2608_v44 = vsub.s32 32, %v2607_v40 }
 0x2d3   : > { %v2492_v26 = vand.u32 2139095040, %v11993_v6  ;;  %v2468_v52 = vmul.f32 %v2467_v51, %v2465_v33  ;;  %v2606_v25 = vshrl.u32 %v2605_v11, 5  ;;  %v2610_v14 = vshll.u32 %v15598_v27, %v2607_v40 }
 0x2d4   : > { %v2343_v2 = vshrl.u32 %v2342_v24, 30  ;;  %vm2283_vm15 = vcmp.lt.s32.totalorder %v11737_v20, 0  ;;  %v2611_v13 = vshrl.u32 %v15596_v32, %v2608_v44  ;;  %v2613_v48 = vshll.u32 %v15596_v32, %v2607_v40 }
 0x2d5   : > { %v2614_v55 = vshrl.u32 %v15594_v34, %v2608_v44  ;;  %v2617_v58 = vshrl.u32 %v15592_v41, %v2608_v44  ;;  %v2616_v28 = vshll.u32 %v15594_v34, %v2607_v40  ;;  %v2619_v39 = vshll.u32 %v15592_v41, %v2607_v40 }
 0x2d6   : > { %v2344_v3 = vshll.u32 %v2343_v2, 30  ;;  %v2620_v54 = vshrl.u32 %v15590_v43, %v2608_v44  ;;  %v12027_v56 = vsel %vm2165_vm12, nan, %v2175_v45  ;;  %vm12031_vm3 = vcmp.le.f32.partialorder %v2385_v5, 0.7853982 }
 0x2d7   : > { %15681 = vst [vmem:[#allocation3_spill] sm:$0xff] %v12027_v56  ;;  %v2601_v0 = vor.u32 8388608, %v2600_v49  ;;  %v2612_v47 = vor.u32 %v2611_v13, %v2610_v14  ;;  %v2615_v10 = vor.u32 %v2614_v55, %v2613_v48  ;;  %v2618_v35 = vor.u32 %v2617_v58, %v2616_v28  ;;  %3020 = vrot.lane.b32.xlu0 %v12027_v56, %s11322_s16 }
 0x2d8   : > { %v12035_v4 = vsub.s32 %v2341_v16, %v2344_v3  ;;  %v2621_v12 = vor.u32 %v2620_v54, %v2619_v39  ;;  %v2493_v38 = vshrl.u32 %v2492_v26, 23  ;;  %v2622_v62 = vshll.u32 %v15590_v43, %v2607_v40 }
 0x2d9   : > { %v2623_v37 = vshrl.u32 %v15588_v50, %v2608_v44  ;;  %vm2625_vm4 = vcmp.lt.s32.totalorder %v2606_v25, 1  ;;  %vm2626_vm2 = vcmp.lt.s32.totalorder %v2606_v25, 2  ;;  %v2469_v1 = vxor.u32 2147483648, %v2468_v52 }
 0x2da   : > { %v2347_v5 = vsub.s32 0, %v12035_v4  ;;  %v2367_v18 = vsub.s32 4, %v2343_v2  ;;  %vm2628_vm5 = vcmp.lt.s32.totalorder %v2606_v25, 4  ;;  %vm2627_vm6 = vcmp.lt.s32.totalorder %v2606_v25, 3 }
 0x2db   : > { %v2624_v19 = vor.u32 %v2623_v37, %v2622_v62  ;;  %v2633_v53 = vsel %vm2625_vm4, %v2612_v47, %v2615_v10  ;;  %v2634_v31 = vsel %vm2628_vm5, %v2621_v12, 920167782  ;;  %v2609_v23 = vshrl.u32 %v15598_v27, %v2608_v44  ;;  %3022 = vrot.lane.b32.xlu0 %v11977_v57, %s11322_s16 }
 0x2dc   : > { %v9277_v9 = vmin.u32 %v2347_v5, %v12035_v4  ;;  %v2630_v29 = vsel %vm2628_vm5, %v2618_v35, 2102212464  ;;  %v2635_v7 = vsel %vm2627_vm6, %v2618_v35, %v2634_v31  ;;  %v2637_v30 = vsel %vm2625_vm4, %v2615_v10, %v2618_v35 }
 0x2dd   : > { %v2636_v11 = vsel %vm2626_vm2, %v2633_v53, %v2635_v7  ;;  %v2638_v36 = vsel %vm2628_vm5, %v2624_v19, 1326507024  ;;  %v2641_v33 = vshll.u32 %v2601_v0, 8  ;;  %v2470_v16 = vsel %vm2387_vm13, %v2469_v1, %v2468_v52 }
 0x2de   : > { %v2349_v40 = vclz %v9277_v9  ;;  %v2368_v51 = vsel %vm2283_vm15, %v2367_v18, %v2343_v2  ;;  %v2629_v24 = vsel %vm2625_vm4, %v2609_v23, %v2612_v47  ;;  %v2631_v45 = vsel %vm2627_vm6, %v2615_v10, %v2630_v29 }
 0x2df   : > { %v2639_v49 = vsel %vm2627_vm6, %v2621_v12, %v2638_v36  ;;  %v12057_v44 = vmul.u32.u64.low %v2641_v33, %v2636_v11  ;;  %v12058_v26 = vmul.u32.u64.high %v2641_v33, %v2636_v11, %v12057_v44  ;;  %v2474_v52 = vsel %vm12031_vm3, 0, %v12011_v60 }
 0x2e0   : > { %v9278_v14 = vadd.s32 4294967294, %v2349_v40  ;;  %v2640_v2 = vsel %vm2626_vm2, %v2637_v30, %v2639_v49  ;;  %v9284_v13 = vadd.s32 4294967169, %v2493_v38  ;;  %v2473_v48 = vsel %vm12031_vm3, %v11724_v61, %v2470_v16 }
 0x2e1   : > { %vm12070_vm7 = vcmp.le.f32.partialorder %v2281_v42, 0.7853982  ;;  %v12074_v58 = vmul.u32.u64.low %v2641_v33, %v2640_v2  ;;  %v12075_v3 = vmul.u32.u64.high %v2641_v33, %v2640_v2, %v12074_v58  ;;  %v2632_v28 = vsel %vm2626_vm2, %v2629_v24, %v2631_v45 }
 0x2e2   : > { %vm9279_vm8 = vcmp.lt.s32.totalorder %v9278_v14, 0  ;;  %v2370_v60 = vsel %vm12070_vm7, 0, %v2368_v51  ;;  %v2499_v39 = vadd.s32 1, %v9284_v13  ;;  %v2478_v54 = vadd.s32 3, %v2474_v52 }
 0x2e3   : > { %v2352_v0 = vsel %vm9279_vm8, 0, %v9278_v14  ;;  %v2651_v63 = vadd.s32 1, %v12058_v26  ;;  %11252 = vcosq.f32 %v2473_v48  ;;  %v2337_v42 = vadd.s32 %v11984_v46, %v11982_v59 }
 0x2e4   : > { %v2353_v47 = vsub.s32 32, %v2352_v0  ;;  %v2357_v10 = vsub.s32 4294967266, %v2352_v0  ;;  %v2374_v35 = vadd.s32 3, %v2370_v60  ;;  %v2648_v12 = vmul.u32 %v2641_v33, %v2632_v28 }
 0x2e5   : > { %vm2650_vm9 = vc.u32 %v12075_v3, %v12057_v44  ;;  %vm2500_vm10 = vcmp.gt.s32.totalorder %v2499_v39, 0  ;;  %v2354_v25 = vshll.u32 %v12035_v4, %v2352_v0  ;;  %v2489_v5 = vand.u32 2147483647, %v11993_v6 }
 0x2e6   : > { %v2355_v38 = vshrl.u32 %v2337_v42, %v2353_v47  ;;  %v2358_v62 = vadd.s32 127, %v2357_v10  ;;  %v2652_v37 = vsel %vm2650_vm9, %v2651_v63, %v12058_v26  ;;  %v2501_v18 = vsel %vm2500_vm10, %v2499_v39, 0 }
 0x2e7   : > { %v2653_v1 = vadd.s32 %v2652_v37, %v2648_v12  ;;  %v2503_v53 = vand.u32 31, %v2501_v18  ;;  %11254 = vsinq.f32 %v2473_v48  ;;  %v12088_v31 = vand.u32 3, %v2478_v54 }
 0x2e8   : > { %v2356_v19 = vor.u32 %v2355_v38, %v2354_v25  ;;  %v2359_v59 = vshll.u32 %v2358_v62, 23  ;;  %v12090_v23 = vand.u32 3, %v2374_v35  ;;  %v2496_v4 = vand.u32 8388607, %v2489_v5 }
 0x2e9   : > { %v2654_v46 = vadd.s32 536870912, %v2653_v1  ;;  %v2504_v7 = vsub.s32 32, %v2503_v53  ;;  %v12098_v11 = vadd.f32 %v11734_v15, %v11709_v8  ;;  %v12100_v33 = vshrl.u32 %v2501_v18, 5 }
 0x2ea   : > { %v2360_v9 = vor.u32 4788187, %v2359_v59  ;;  %v2363_v36 = vcvt.s32.f32 %v2356_v19  ;;  %v2506_v16 = vshll.u32 %v15598_v27, %v2503_v53  ;;  %v2509_v24 = vshll.u32 %v15596_v32, %v2503_v53 }
 0x2eb   : > { %v12092_v29 = vshrl.u32 %v2654_v46, 30  ;;  %v2507_v51 = vshrl.u32 %v15596_v32, %v2504_v7  ;;  %v2512_v45 = vshll.u32 %v15594_v34, %v2503_v53  ;;  %v2510_v15 = vshrl.u32 %v15594_v34, %v2504_v7 }
 0x2ec   : > { %v2361_v30 = vand.u32 2147483647, %v2360_v9  ;;  %v2513_v52 = vshrl.u32 %v15592_v41, %v2504_v7  ;;  %v2516_v14 = vshrl.u32 %v15590_v43, %v2504_v7  ;;  %v2497_v13 = vor.u32 8388608, %v2496_v4 }
 0x2ed   : > { %v2656_v40 = vshll.u32 %v12092_v29, 30  ;;  %v12107_v49 = vpop.eup %11252  ;;  %v2515_v48 = vshll.u32 %v15592_v41, %v2503_v53  ;;  %v2519_v58 = vshrl.u32 %v15588_v50, %v2504_v7  ;;  %v2508_v28 = vor.u32 %v2507_v51, %v2506_v16 }
 0x2ee   : > { %v2364_v26 = vmul.f32 %v2363_v36, %v2361_v30  ;;  %v2511_v39 = vor.u32 %v2510_v15, %v2509_v24  ;;  %v2514_v54 = vor.u32 %v2513_v52, %v2512_v45  ;;  %v2518_v42 = vshll.u32 %v15590_v43, %v2503_v53 }
 0x2ef   : > { %v12112_v2 = vsub.s32 %v2653_v1, %v2656_v40  ;;  %v2517_v63 = vor.u32 %v2516_v14, %v2515_v48  ;;  %v12120_v47 = vadd.f32 %v11709_v8, %v11739_v21  ;;  %v2485_v10 = vxor.u32 2147483648, %v12107_v49 }
 0x2f0   : > { %v2365_v60 = vxor.u32 2147483648, %v2364_v26  ;;  %v2505_v12 = vshrl.u32 %v15598_v27, %v2504_v7  ;;  %vm2521_vm11 = vcmp.lt.s32.totalorder %v12100_v33, 1  ;;  %vm2484_vm12 = vcmp.eq.s32.totalorder %v12088_v31, 2 }
 0x2f1   : > { %v2659_v0 = vsub.s32 0, %v12112_v2  ;;  %v2520_v62 = vor.u32 %v2519_v58, %v2518_v42  ;;  %vm2524_vm13 = vcmp.lt.s32.totalorder %v12100_v33, 4  ;;  %v11255_v8 = vpop.eup %11254  ;;  %vm2481_vm14 = vcmp.eq.s32.totalorder %v12088_v31, 0 }
 0x2f2   : > { %v2366_v35 = vsel %vm2283_vm15, %v2365_v60, %v2364_v26  ;;  %v2526_v21 = vsel %vm2524_vm13, %v2514_v54, 2102212464  ;;  %v2529_v37 = vsel %vm2521_vm11, %v2508_v28, %v2511_v39  ;;  %v2530_v1 = vsel %vm2524_vm13, %v2517_v63, 920167782 }
 0x2f3   : > { %v2369_v25 = vsel %vm12070_vm7, %v11737_v20, %v2366_v35  ;;  %v9289_v38 = vmin.u32 %v2659_v0, %v12112_v2  ;;  %vm2595_vm15 = vcmp.lt.s32.totalorder %v11911_v22, 0  ;;  %vm2523_vm3 = vcmp.lt.s32.totalorder %v12100_v33, 3 }
 0x2f4   : > { %11256 = vcosq.f32 %v2369_v25  ;;  %v2537_v18 = vshll.u32 %v2497_v13, 8  ;;  %vm2522_vm4 = vcmp.lt.s32.totalorder %v12100_v33, 2  ;;  %v2525_v19 = vsel %vm2521_vm11, %v2505_v12, %v2508_v28 }
 0x2f5   : > { %11258 = vsinq.f32 %v2369_v25  ;;  %v2661_v55 = vclz %v9289_v38  ;;  %v2531_v59 = vsel %vm2523_vm3, %v2514_v54, %v2530_v1  ;;  %v2533_v46 = vsel %vm2521_vm11, %v2511_v39, %v2514_v54 }
 0x2f6   : > { %vm2480_vm2 = vcmp.lt.s32.totalorder %v12088_v31, 2  ;;  %v2527_v9 = vsel %vm2523_vm3, %v2511_v39, %v2526_v21  ;;  %v2532_v4 = vsel %vm2522_vm4, %v2529_v37, %v2531_v59  ;;  %v2534_v7 = vsel %vm2524_vm13, %v2520_v62, 1326507024 }
 0x2f7   : > { %v9290_v53 = vadd.s32 4294967294, %v2661_v55  ;;  %vm2380_vm5 = vcmp.eq.s32.totalorder %v12090_v23, 2  ;;  %vm12155_vm6 = vcmp.le.f32.partialorder %v2593_v17, 0.7853982  ;;  %v2535_v36 = vsel %vm2523_vm3, %v2517_v63, %v2534_v7 }
 0x2f8   : > { %v12159_v16 = vmul.u32.u64.low %v2537_v18, %v2532_v4  ;;  %v12160_v40 = vmul.u32.u64.high %v2537_v18, %v2532_v4, %v12159_v16  ;;  %v2804_v51 = vand.u32 2139095040, %v12098_v11  ;;  %v2482_v24 = vxor.u32 2147483648, %v11255_v8 }
 0x2f9   : > { %vm2377_vm7 = vcmp.eq.s32.totalorder %v12090_v23, 0  ;;  %vm9291_vm8 = vcmp.lt.s32.totalorder %v9290_v53, 0  ;;  %v2679_v45 = vsub.s32 4, %v12092_v29  ;;  %v2536_v26 = vsel %vm2522_vm4, %v2533_v46, %v2535_v36 }
 0x2fa   : > { %vm2376_vm9 = vcmp.lt.s32.totalorder %v12090_v23, 2  ;;  %v2664_v17 = vsel %vm9291_vm8, 0, %v9290_v53  ;;  %v12169_v15 = vmul.u32.u64.low %v2537_v18, %v2536_v26  ;;  %v12170_v52 = vmul.u32.u64.high %v2537_v18, %v2536_v26, %v12169_v15 }
 0x2fb   : > { %v2805_v14 = vshrl.u32 %v2804_v51, 23  ;;  %v2649_v13 = vadd.s32 %v12057_v44, %v12075_v3  ;;  %v2665_v48 = vsub.s32 32, %v2664_v17  ;;  %v2669_v58 = vsub.s32 4294967266, %v2664_v17 }
 0x2fc   : > { %v2528_v60 = vsel %vm2522_vm4, %v2525_v19, %v2527_v9  ;;  %vm2477_vm10 = vweird.f32 %v11724_v61  ;;  %v2486_v28 = vsel %vm2484_vm12, %v2485_v10, %v11255_v8  ;;  %v2547_v39 = vadd.s32 1, %v12160_v40 }
 0x2fd   : > { %v2801_v54 = vand.u32 2147483647, %v12098_v11  ;;  %v9296_v0 = vadd.s32 4294967169, %v2805_v14  ;;  %v2483_v63 = vsel %vm2481_vm14, %v12107_v49, %v2482_v24  ;;  %v2666_v44 = vshll.u32 %v12112_v2, %v2664_v17 }
 0x2fe   : > { %v2667_v3 = vshrl.u32 %v2649_v13, %v2665_v48  ;;  %v2670_v42 = vadd.s32 127, %v2669_v58  ;;  %v11257_v33 = vpop.eup %11256  ;;  %v2680_v35 = vsel %vm2595_vm15, %v2679_v45, %v12092_v29  ;;  %v2544_v12 = vmul.u32 %v2537_v18, %v2528_v60 }
 0x2ff   : > { %vm2546_vm11 = vc.u32 %v12170_v52, %v12159_v16  ;;  %v2811_v10 = vadd.s32 1, %v9296_v0  ;;  %v11259_v25 = vpop.eup %11258  ;;  %v2381_v38 = vxor.u32 2147483648, %v11257_v33  ;;  %v2487_v2 = vsel %vm2480_vm2, %v2483_v63, %v2486_v28 }
 0x300   : > { %v2668_v62 = vor.u32 %v2667_v3, %v2666_v44  ;;  %v2671_v8 = vshll.u32 %v2670_v42, 23  ;;  %v2548_v49 = vsel %vm2546_vm11, %v2547_v39, %v12160_v40  ;;  %v2378_v21 = vxor.u32 2147483648, %v11259_v25 }
 0x301   : > { %v2549_v37 = vadd.s32 %v2548_v49, %v2544_v12  ;;  %vm2812_vm12 = vcmp.gt.s32.totalorder %v2811_v10, 0  ;;  %v2382_v29 = vsel %vm2380_vm5, %v2381_v38, %v11259_v25  ;;  %v2682_v55 = vsel %vm12155_vm6, 0, %v2680_v35 }
 0x302   : > { %v2672_v1 = vor.u32 4788187, %v2671_v8  ;;  %v2813_v18 = vsel %vm2812_vm12, %v2811_v10, 0  ;;  %v2379_v19 = vsel %vm2377_vm7, %v11257_v33, %v2378_v21  ;;  %v2808_v46 = vand.u32 8388607, %v2801_v54 }
 0x303   : > { %v2550_v59 = vadd.s32 536870912, %v2549_v37  ;;  %v2815_v31 = vand.u32 31, %v2813_v18  ;;  %vm2373_vm13 = vweird.f32 %v11737_v20  ;;  %v2383_v53 = vsel %vm2376_vm9, %v2379_v19, %v2382_v29 }
 0x304   : > { %v2673_v9 = vand.u32 2147483647, %v2672_v1  ;;  %v2675_v4 = vcvt.s32.f32 %v2668_v62  ;;  %v12204_v7 = vsel %vm2373_vm13, nan, %v2383_v53  ;;  %v2700_v51 = vand.u32 2139095040, %v12120_v47 }
 0x305   : > { %15688 = vst [vmem:[#allocation4_spill] sm:$0xff] %v12204_v7  ;;  %v12206_v36 = vshrl.u32 %v2550_v59, 30  ;;  %v2816_v40 = vsub.s32 32, %v2815_v31  ;;  %v12211_v24 = vsel %vm2477_vm10, nan, %v2487_v2  ;;  %v2686_v26 = vadd.s32 3, %v2682_v55  ;;  %3024 = vrot.lane.b32.xlu1 %v12204_v7, %s11322_s16 }
 0x306   : > { %15689 = vst [vmem:[#allocation5_spill] sm:$0xff] %v12211_v24  ;;  %v2676_v45 = vmul.f32 %v2675_v4, %v2673_v9  ;;  %v2809_v23 = vor.u32 8388608, %v2808_v46  ;;  %v2818_v17 = vshll.u32 %v15598_v27, %v2815_v31  ;;  %v2814_v60 = vshrl.u32 %v2813_v18, 5 }
 0x307   : > { %v2552_v20 = vshll.u32 %v12206_v36, 30  ;;  %v2819_v15 = vshrl.u32 %v15596_v32, %v2816_v40  ;;  %v2822_v13 = vshrl.u32 %v15594_v34, %v2816_v40  ;;  %v2825_v48 = vshrl.u32 %v15592_v41, %v2816_v40 }
 0x308   : > { %v2677_v14 = vxor.u32 2147483648, %v2676_v45  ;;  %v2828_v61 = vshrl.u32 %v15590_v43, %v2816_v40  ;;  %v2821_v28 = vshll.u32 %v15596_v32, %v2815_v31  ;;  %v2701_v39 = vshrl.u32 %v2700_v51, 23 }
 0x309   : > { %v12221_v58 = vsub.s32 %v2549_v37, %v2552_v20  ;;  %v2820_v63 = vor.u32 %v2819_v15, %v2818_v17  ;;  %v2824_v44 = vshll.u32 %v15594_v34, %v2815_v31  ;;  %v2827_v3 = vshll.u32 %v15592_v41, %v2815_v31  ;;  %3026 = vrot.lane.b32.xlu1 %v12211_v24, %s11322_s16 }
 0x30a   : > { %v2678_v0 = vsel %vm2595_vm15, %v2677_v14, %v2676_v45  ;;  %v2823_v35 = vor.u32 %v2822_v13, %v2821_v28  ;;  %v2830_v12 = vshll.u32 %v15590_v43, %v2815_v31  ;;  %v2831_v38 = vshrl.u32 %v15588_v50, %v2816_v40 }
 0x30b   : > { %v2681_v42 = vsel %vm12155_vm6, %v11911_v22, %v2678_v0  ;;  %v2555_v33 = vsub.s32 0, %v12221_v58  ;;  %v2826_v10 = vor.u32 %v2825_v48, %v2824_v44  ;;  %v2829_v25 = vor.u32 %v2828_v61, %v2827_v3 }
 0x30c   : > { %11260 = vcosq.f32 %v2681_v42  ;;  %v2687_v62 = vand.u32 3, %v2686_v26  ;;  %v2849_v49 = vshll.u32 %v2809_v23, 8  ;;  %v2817_v2 = vshrl.u32 %v15598_v27, %v2816_v40 }
 0x30d   : > { %11262 = vsinq.f32 %v2681_v42  ;;  %v9285_v8 = vmin.u32 %v2555_v33, %v12221_v58  ;;  %v2832_v21 = vor.u32 %v2831_v38, %v2830_v12  ;;  %vm2833_vm14 = vcmp.lt.s32.totalorder %v2814_v60, 1 }
 0x30e   : > { %v9292_v30 = vadd.s32 4294967169, %v2701_v39  ;;  %vm2835_vm15 = vcmp.lt.s32.totalorder %v2814_v60, 3  ;;  %vm2836_vm3 = vcmp.lt.s32.totalorder %v2814_v60, 4  ;;  %v2841_v29 = vsel %vm2833_vm14, %v2820_v63, %v2823_v35 }
 0x30f   : > { %v2557_v37 = vclz %v9285_v8  ;;  %v2838_v1 = vsel %vm2836_vm3, %v2826_v10, 2102212464  ;;  %v2842_v55 = vsel %vm2836_vm3, %v2829_v25, 920167782  ;;  %v2845_v18 = vsel %vm2833_vm14, %v2823_v35, %v2826_v10 }
 0x310   : > { %v2846_v19 = vsel %vm2836_vm3, %v2832_v21, 1326507024  ;;  %vm2834_vm4 = vcmp.lt.s32.totalorder %v2814_v60, 2  ;;  %v2843_v46 = vsel %vm2835_vm15, %v2826_v10, %v2842_v55  ;;  %vm2688_vm2 = vcmp.lt.s32.totalorder %v2687_v62, 2 }
 0x311   : > { %v9286_v59 = vadd.s32 4294967294, %v2557_v37  ;;  %v2847_v31 = vsel %vm2835_vm15, %v2829_v25, %v2846_v19  ;;  %vm2491_vm5 = vcmp.lt.s32.totalorder %v11993_v6, 0  ;;  %v2837_v53 = vsel %vm2833_vm14, %v2817_v2, %v2820_v63 }
 0x312   : > { %v2844_v9 = vsel %vm2834_vm4, %v2841_v29, %v2843_v46  ;;  %v2848_v4 = vsel %vm2834_vm4, %v2845_v18, %v2847_v31  ;;  %vm2685_vm6 = vweird.f32 %v11911_v22  ;;  %v2839_v40 = vsel %vm2835_vm15, %v2823_v35, %v2838_v1 }
 0x313   : > { %vm9287_vm7 = vcmp.lt.s32.totalorder %v9286_v59, 0  ;;  %v12248_v51 = vmul.u32.u64.low %v2849_v49, %v2848_v4  ;;  %v12249_v45 = vmul.u32.u64.high %v2849_v49, %v2848_v4, %v12248_v51  ;;  %v2707_v17 = vadd.s32 1, %v9292_v30 }
 0x314   : > { %v2560_v26 = vsel %vm9287_vm7, 0, %v9286_v59  ;;  %v12251_v20 = vmul.u32.u64.low %v2849_v49, %v2844_v9  ;;  %v12252_v23 = vmul.u32.u64.high %v2849_v49, %v2844_v9, %v12251_v20  ;;  %vm2689_vm8 = vcmp.eq.s32.totalorder %v2687_v62, 0 }
 0x315   : > { %v2545_v15 = vadd.s32 %v12159_v16, %v12170_v52  ;;  %v2561_v14 = vsub.s32 32, %v2560_v26  ;;  %v2565_v13 = vsub.s32 4294967266, %v2560_v26  ;;  %vm2692_vm9 = vcmp.eq.s32.totalorder %v2687_v62, 2 }
 0x316   : > { %v11261_v48 = vpop.eup %11260  ;;  %v2575_v61 = vsub.s32 4, %v12206_v36  ;;  %v2840_v28 = vsel %vm2834_vm4, %v2837_v53, %v2839_v40  ;;  %vm2708_vm10 = vcmp.gt.s32.totalorder %v2707_v17, 0  ;;  %v2562_v63 = vshll.u32 %v12221_v58, %v2560_v26 }
 0x317   : > { %v11263_v39 = vpop.eup %11262  ;;  %v2693_v0 = vxor.u32 2147483648, %v11261_v48  ;;  %v2563_v44 = vshrl.u32 %v2545_v15, %v2561_v14  ;;  %v2566_v3 = vadd.s32 127, %v2565_v13  ;;  %vm2858_vm11 = vc.u32 %v12249_v45, %v12251_v20 }
 0x318   : > { %v2690_v42 = vxor.u32 2147483648, %v11263_v39  ;;  %v2859_v16 = vadd.s32 1, %v12252_v23  ;;  %v2709_v52 = vsel %vm2708_vm10, %v2707_v17, 0  ;;  %v2856_v10 = vmul.u32 %v2849_v49, %v2840_v28 }
 0x319   : > { %v2694_v33 = vsel %vm2692_vm9, %v2693_v0, %v11263_v39  ;;  %v2564_v35 = vor.u32 %v2563_v44, %v2562_v63  ;;  %v2567_v12 = vshll.u32 %v2566_v3, 23  ;;  %v2697_v38 = vand.u32 2147483647, %v12120_v47 }
 0x31a   : > { %v2691_v60 = vsel %vm2689_vm8, %v11261_v48, %v2690_v42  ;;  %v2860_v25 = vsel %vm2858_vm11, %v2859_v16, %v12252_v23  ;;  %v2711_v58 = vand.u32 31, %v2709_v52  ;;  %v2576_v21 = vsel %vm2491_vm5, %v2575_v61, %v12206_v36 }
 0x31b   : > { %v2695_v8 = vsel %vm2688_vm2, %v2691_v60, %v2694_v33  ;;  %v2568_v2 = vor.u32 4788187, %v2567_v12  ;;  %v2861_v30 = vadd.s32 %v2860_v25, %v2856_v10  ;;  %vm12276_vm12 = vcmp.le.f32.partialorder %v2489_v5, 0.7853982 }
 0x31c   : > { %v12272_v37 = vsel %vm2685_vm6, nan, %v2695_v8  ;;  %v2712_v49 = vsub.s32 32, %v2711_v58  ;;  %v2571_v62 = vcvt.s32.f32 %v2564_v35  ;;  %v2578_v36 = vsel %vm12276_vm12, 0, %v2576_v21 }
 0x31d   : > { %15690 = vst [vmem:[#allocation6_spill] sm:$0xff] %v12272_v37  ;;  %v2569_v1 = vand.u32 2147483647, %v2568_v2  ;;  %v2862_v55 = vadd.s32 536870912, %v2861_v30  ;;  %3030 = vrot.lane.b32.xlu1 %v12272_v37, %s11322_s16  ;;  %v2704_v22 = vand.u32 8388607, %v2697_v38  ;;  %v2714_v53 = vshll.u32 %v15598_v27, %v2711_v58 }
 0x31e   : > { %v2715_v18 = vshrl.u32 %v15596_v32, %v2712_v49  ;;  %v2718_v19 = vshrl.u32 %v15594_v34, %v2712_v49  ;;  %v2721_v46 = vshrl.u32 %v15592_v41, %v2712_v49  ;;  %v2724_v31 = vshrl.u32 %v15590_v43, %v2712_v49 }
 0x31f   : > { %v2572_v5 = vmul.f32 %v2571_v62, %v2569_v1  ;;  %v12288_v59 = vshrl.u32 %v2862_v55, 30  ;;  %v2717_v9 = vshll.u32 %v15596_v32, %v2711_v58  ;;  %v2723_v4 = vshll.u32 %v15592_v41, %v2711_v58 }
 0x320   : > { %v2727_v40 = vshrl.u32 %v15588_v50, %v2712_v49  ;;  %v2710_v23 = vshrl.u32 %v2709_v52, 5  ;;  %v2720_v17 = vshll.u32 %v15594_v34, %v2711_v58  ;;  %v2716_v15 = vor.u32 %v2715_v18, %v2714_v53 }
 0x321   : > { %v2573_v51 = vxor.u32 2147483648, %v2572_v5  ;;  %v2864_v26 = vshll.u32 %v12288_v59, 30  ;;  %v2719_v14 = vor.u32 %v2718_v19, %v2717_v9  ;;  %v2725_v13 = vor.u32 %v2724_v31, %v2723_v4 }
 0x322   : > { %v2726_v48 = vshll.u32 %v15590_v43, %v2711_v58  ;;  %v2582_v28 = vadd.s32 3, %v2578_v36  ;;  %v2722_v0 = vor.u32 %v2721_v46, %v2720_v17  ;;  %v2705_v44 = vor.u32 8388608, %v2704_v22 }
 0x323   : > { %v2574_v61 = vsel %vm2491_vm5, %v2573_v51, %v2572_v5  ;;  %v2865_v39 = vsub.s32 %v2861_v30, %v2864_v26  ;;  %v2713_v3 = vshrl.u32 %v15598_v27, %v2712_v49  ;;  %vm2729_vm13 = vcmp.lt.s32.totalorder %v2710_v23, 1 }
 0x324   : > { %v2577_v63 = vsel %vm12276_vm12, %v11993_v6, %v2574_v61  ;;  %v2728_v42 = vor.u32 %v2727_v40, %v2726_v48  ;;  %vm2732_vm14 = vcmp.lt.s32.totalorder %v2710_v23, 4  ;;  %vm2731_vm15 = vcmp.lt.s32.totalorder %v2710_v23, 3 }
 0x325   : > { %11264 = vcosq.f32 %v2577_v63  ;;  %v2867_v16 = vsub.s32 0, %v2865_v39  ;;  %v2737_v52 = vsel %vm2729_vm13, %v2716_v15, %v2719_v14  ;;  %v2738_v33 = vsel %vm2732_vm14, %v2725_v13, 920167782 }
 0x326   : > { %11266 = vsinq.f32 %v2577_v63  ;;  %vm2730_vm3 = vcmp.lt.s32.totalorder %v2710_v23, 2  ;;  %v2734_v12 = vsel %vm2732_vm14, %v2722_v0, 2102212464  ;;  %v2739_v10 = vsel %vm2731_vm15, %v2722_v0, %v2738_v33 }
 0x327   : > { %v9297_v35 = vmin.u32 %v2867_v16, %v2865_v39  ;;  %v2740_v60 = vsel %vm2730_vm3, %v2737_v52, %v2739_v10  ;;  %v2741_v25 = vsel %vm2729_vm13, %v2719_v14, %v2722_v0  ;;  %v2742_v58 = vsel %vm2732_vm14, %v2728_v42, 1326507024 }
 0x328   : > { %v2745_v8 = vshll.u32 %v2705_v44, 8  ;;  %v2733_v21 = vsel %vm2729_vm13, %v2713_v3, %v2716_v15  ;;  %v2735_v30 = vsel %vm2731_vm15, %v2719_v14, %v2734_v12  ;;  %v2743_v49 = vsel %vm2731_vm15, %v2725_v13, %v2742_v58 }
 0x329   : > { %v2869_v2 = vclz %v9297_v35  ;;  %v2583_v62 = vand.u32 3, %v2582_v28  ;;  %v2744_v36 = vsel %vm2730_vm3, %v2741_v25, %v2743_v49  ;;  %v2736_v19 = vsel %vm2730_vm3, %v2733_v21, %v2735_v30 }
 0x32a   : > { %v12306_v29 = vmul.u32.u64.low %v2745_v8, %v2740_v60  ;;  %v12307_v1 = vmul.u32.u64.high %v2745_v8, %v2740_v60, %v12306_v29  ;;  %v12310_v22 = vmul.u32.u64.low %v2745_v8, %v2744_v36  ;;  %v12311_v18 = vmul.u32.u64.high %v2745_v8, %v2744_v36, %v12310_v22 }
 0x32b   : > { %v9298_v55 = vadd.s32 4294967294, %v2869_v2  ;;  %vm2588_vm2 = vcmp.eq.s32.totalorder %v2583_v62, 2  ;;  %v2857_v53 = vadd.s32 %v12251_v20, %v12249_v45  ;;  %v2752_v17 = vmul.u32 %v2745_v8, %v2736_v19 }
 0x32c   : > { %v2755_v46 = vadd.s32 1, %v12307_v1  ;;  %vm2754_vm5 = vc.u32 %v12311_v18, %v12306_v29  ;;  %vm2585_vm6 = vcmp.eq.s32.totalorder %v2583_v62, 0  ;;  %vm2584_vm7 = vcmp.lt.s32.totalorder %v2583_v62, 2 }
 0x32d   : > { %vm9299_vm4 = vcmp.lt.s32.totalorder %v9298_v55, 0  ;;  %vm2581_vm8 = vweird.f32 %v11993_v6  ;;  %v2887_v35 = vsub.s32 4, %v12288_v59  ;;  %vm2803_vm9 = vcmp.lt.s32.totalorder %v12098_v11, 0 }
 0x32e   : > { %v2872_v5 = vsel %vm9299_vm4, 0, %v9298_v55  ;;  %v2756_v13 = vsel %vm2754_vm5, %v2755_v46, %v12307_v1  ;;  %vm2802_vm10 = vcmp.le.f32.partialorder %v2801_v54, 0.7853982  ;;  %v2753_v62 = vadd.s32 %v12306_v29, %v12311_v18 }
 0x32f   : > { %v11265_v31 = vpop.eup %11264  ;;  %v2873_v9 = vsub.s32 32, %v2872_v5  ;;  %v2877_v4 = vsub.s32 4294967266, %v2872_v5  ;;  %v2874_v26 = vshll.u32 %v2865_v39, %v2872_v5  ;;  %v2757_v61 = vadd.s32 %v2756_v13, %v2752_v17 }
 0x330   : > { %v11267_v40 = vpop.eup %11266  ;;  %v2589_v51 = vxor.u32 2147483648, %v11265_v31  ;;  %v2888_v25 = vsel %vm2803_vm9, %v2887_v35, %v12288_v59  ;;  %vm2893_vm15 = vweird.f32 %v12098_v11  ;;  %vm2699_vm3 = vcmp.lt.s32.totalorder %v12120_v47, 0 }
 0x331   : > { %v2586_v15 = vxor.u32 2147483648, %v11267_v40  ;;  %v2875_v14 = vshrl.u32 %v2857_v53, %v2873_v9  ;;  %v2878_v23 = vadd.s32 127, %v2877_v4  ;;  %v2758_v63 = vadd.s32 536870912, %v2757_v61 }
 0x332   : > { %v2590_v48 = vsel %vm2588_vm2, %v2589_v51, %v11267_v40  ;;  %v2890_v2 = vsel %vm2802_vm10, 0, %v2888_v25  ;;  %vm2698_vm4 = vcmp.le.f32.partialorder %v2697_v38, 0.7853982  ;;  %vm3190_vm2 = vcmask 589312  }
 0x333   : > { %v2587_v28 = vsel %vm2585_vm6, %v11265_v31, %v2586_v15  ;;  %v2876_v0 = vor.u32 %v2875_v14, %v2874_v26  ;;  %v2879_v45 = vshll.u32 %v2878_v23, 23  ;;  %v2759_v3 = vshrl.u32 %v2758_v63, 30 }
 0x334   : > { %v2591_v20 = vsel %vm2584_vm7, %v2587_v28, %v2590_v48  ;;  %v2894_v49 = vadd.s32 3, %v2890_v2  ;;  %vm2789_vm5 = vweird.f32 %v12120_v47 }
 0x335   : > { %v12320_v39 = vsel %vm2581_vm8, nan, %v2591_v20  ;;  %v2880_v44 = vor.u32 4788187, %v2879_v45  ;;  %v2883_v16 = vcvt.s32.f32 %v2876_v0  ;;  %v2760_v52 = vshll.u32 %v2759_v3, 30 }
 0x336   : > { %3028 = vrot.lane.b32.xlu0 %v12320_v39, %s11322_s16  ;;  %v2895_v22 = vand.u32 3, %v2894_v49  ;;  %v2783_v17 = vsub.s32 4, %v2759_v3 }
 0x337   : > { %v2881_v42 = vand.u32 2147483647, %v2880_v44  ;;  %v2761_v12 = vsub.s32 %v2757_v61, %v2760_v52 }
 0x338   : > { %vm2900_vm12 = vcmp.eq.s32.totalorder %v2895_v22, 2  ;;  %vm2897_vm13 = vcmp.eq.s32.totalorder %v2895_v22, 0  ;;  %vm2896_vm14 = vcmp.lt.s32.totalorder %v2895_v22, 2  ;;  %v2784_v13 = vsel %vm2699_vm3, %v2783_v17, %v2759_v3 }
 0x339   : > { %v2884_v33 = vmul.f32 %v2883_v16, %v2881_v42  ;;  %v2763_v6 = vsub.s32 0, %v2761_v12  ;;  %v2786_v28 = vsel %vm2698_vm4, 0, %v2784_v13 }
 0x33a   : > { %v2790_v45 = vadd.s32 3, %v2786_v28 }
 0x33b   : > { %v2885_v10 = vxor.u32 2147483648, %v2884_v33  ;;  %v9293_v8 = vmin.u32 %v2763_v6, %v2761_v12 }
 0x33c   : > { %v2791_v20 = vand.u32 3, %v2790_v45 }
 0x33d   : > { %v2886_v60 = vsel %vm2803_vm9, %v2885_v10, %v2884_v33  ;;  %v2765_v21 = vclz %v9293_v8  ;;  %vm3117_vm9 = vcmask 458112  }
 0x33e   : > { %v2889_v58 = vsel %vm2802_vm10, %v12098_v11, %v2886_v60  ;;  %vm2792_vm6 = vcmp.lt.s32.totalorder %v2791_v20, 2  ;;  %vm2793_vm7 = vcmp.eq.s32.totalorder %v2791_v20, 0  ;;  %vm2796_vm8 = vcmp.eq.s32.totalorder %v2791_v20, 2 }
 0x33f   : > { %11268 = vcosq.f32 %v2889_v58  ;;  %v9294_v30 = vadd.s32 4294967294, %v2765_v21  ;;  %vm2988_vm10 = vcmask 261312  }
 0x340   : > { %11270 = vsinq.f32 %v2889_v58 }
 0x341   : > { %vm9295_vm11 = vcmp.lt.s32.totalorder %v9294_v30, 0 }
 0x342   : > { %v2768_v1 = vsel %vm9295_vm11, 0, %v9294_v30  ;;  %vm2905_vm11 = vcmask 130112  }
 0x343   : > { %v2769_v55 = vsub.s32 32, %v2768_v1  ;;  %v2773_v36 = vsub.s32 4294967266, %v2768_v1  ;;  %v2770_v54 = vshll.u32 %v2761_v12, %v2768_v1 }
 0x345   : > { %v2771_v19 = vshrl.u32 %v2753_v62, %v2769_v55  ;;  %v2774_v5 = vadd.s32 127, %v2773_v36 }
 0x347   : > { %v2772_v53 = vor.u32 %v2771_v19, %v2770_v54  ;;  %v2775_v9 = vshll.u32 %v2774_v5, 23 }
 0x349   : > { %v11269_v59 = vpop.eup %11268  ;;  %v2776_v51 = vor.u32 4788187, %v2775_v9  ;;  %v2779_v15 = vcvt.s32.f32 %v2772_v53  ;;  %v12342_v0 = vpop.permute.xlu0 %3020 }
 0x34a   : > { %v11271_v46 = vpop.eup %11270  ;;  %v2901_v31 = vxor.u32 2147483648, %v11269_v59  ;;  %v3141_v38 = vmul.f32 %v12342_v0, %v11977_v57  ;;  %v3148_v44 = vmul.f32 %v12342_v0, %v12204_v7  ;;  %v12356_v3 = vmul.f32 %v12342_v0, %v12027_v56 }
 0x34b   : > { %v2898_v4 = vxor.u32 2147483648, %v11271_v46  ;;  %v2777_v18 = vand.u32 2147483647, %v2776_v51  ;;  %v3155_v42 = vmul.f32 %v12342_v0, %v12211_v24  ;;  %v3162_v33 = vmul.f32 %v12342_v0, %v12320_v39 }
 0x34c   : > { %v2902_v40 = vsel %vm2900_vm12, %v2901_v31, %v11271_v46  ;;  %15693 = vst [vmem:[#allocation7_spill] sm:$0xff] %v12356_v3  ;;  %v3247_v35 = vsel %vm3190_vm2, %v3141_v38, 0.0  ;;  %v3169_v60 = vmul.f32 %v12342_v0, %v12272_v37  ;;  %v3303_v25 = vsel %vm3190_vm2, %v3148_v44, 0.0 }
 0x34d   : > { %v2899_v26 = vsel %vm2897_vm13, %v11269_v59, %v2898_v4  ;;  %v2780_v23 = vmul.f32 %v2779_v15, %v2777_v18  ;;  %v12350_v63 = vpop.permute.xlu0 %3022  ;;  %v3191_v21 = vsel %vm3190_vm2, %v12356_v3, 0.0  ;;  %v3248_v49 = vrot.slane %v3247_v35, 4 }
 0x34e   : > { %v2903_v29 = vsel %vm2896_vm14, %v2899_v26, %v2902_v40  ;;  %v3134_v16 = vmul.f32 %v12350_v63, %v12027_v56  ;;  %v12370_v12 = vmul.f32 %v12350_v63, %v11977_v57  ;;  %v3156_v58 = vmul.f32 %v12350_v63, %v12211_v24 }
 0x34f   : > { %v12332_v14 = vsel %vm2893_vm15, nan, %v2903_v29  ;;  %v2781_v48 = vxor.u32 2147483648, %v2780_v23  ;;  %v3359_v1 = vsel %vm3190_vm2, %v3155_v42, 0.0  ;;  %v3304_v36 = vrot.slane %v3303_v25, 4 }
 0x350   : > { %3034 = vrot.lane.b32.xlu1 %v12332_v14, %s11322_s16  ;;  %15694 = vst [vmem:[#allocation8_spill] sm:$0xff] %v12370_v12  ;;  %v3183_v2 = vmul.f32 %v12342_v0, %v12332_v14  ;;  %v3198_v62 = vsel %vm3190_vm2, %v3134_v16, 0.0  ;;  %v3415_v22 = vsel %vm3190_vm2, %v3162_v33, 0.0  ;;  %v3254_v54 = vsel %vm3190_vm2, %v12370_v12, 0.0 }
 0x351   : > { %v2782_v61 = vsel %vm2699_vm3, %v2781_v48, %v2780_v23  ;;  %v3471_v5 = vsel %vm3190_vm2, %v3169_v60, 0.0  ;;  %v3149_v59 = vmul.f32 %v12350_v63, %v12204_v7  ;;  %v3366_v46 = vsel %vm3190_vm2, %v3156_v58, 0.0 }
 0x352   : > { %v2785_v11 = vsel %vm2698_vm4, %v12120_v47, %v2782_v61  ;;  %v3163_v53 = vmul.f32 %v12350_v63, %v12320_v39  ;;  %v3170_v9 = vmul.f32 %v12350_v63, %v12272_v37  ;;  %v3199_v4 = vrot.slane %v3198_v62, 4 }
 0x353   : > { %11272 = vcosq.f32 %v2785_v11  ;;  %v3192_v40 = vrot.slane %v3191_v21, 4  ;;  %v3360_v51 = vrot.slane %v3359_v1, 4  ;;  %v3184_v26 = vmul.f32 %v12350_v63, %v12332_v14 }
 0x354   : > { %3641 = vrot.lane.b32.xlu1 %v11977_v57, %s11323_s17  ;;  %11274 = vsinq.f32 %v2785_v11  ;;  %v3255_v17 = vrot.slane %v3254_v54, 4  ;;  %v3416_v29 = vrot.slane %v3415_v22, 4  ;;  %v3367_v47 = vrot.slane %v3366_v46, 4 }
 0x355   : > { %v3249_v18 = vadd.f32 %v3248_v49, %v3247_v35  ;;  %v3472_v15 = vrot.slane %v3471_v5, 4  ;;  %v3583_v23 = vsel %vm3190_vm2, %v3183_v2, 0.0  ;;  %v3310_v13 = vsel %vm3190_vm2, %v3149_v59, 0.0 }
 0x356   : > { %v3305_v48 = vadd.f32 %v3304_v36, %v3303_v25  ;;  %v3200_v61 = vadd.f32 %v3199_v4, %v3198_v62  ;;  %v3422_v28 = vsel %vm3190_vm2, %v3163_v53, 0.0  ;;  %v3478_v11 = vsel %vm3190_vm2, %v3170_v9, 0.0 }
 0x357   : > { %v3193_v45 = vadd.f32 %v3192_v40, %v3191_v21  ;;  %v3361_v20 = vadd.f32 %v3360_v51, %v3359_v1  ;;  %v3256_v38 = vadd.f32 %v3255_v17, %v3254_v54  ;;  %v3590_v44 = vsel %vm3190_vm2, %v3184_v26, 0.0 }
 0x358   : > { %3645 = vrot.lane.b32.xlu1 %v12211_v24, %s11323_s17  ;;  %v3417_v42 = vadd.f32 %v3416_v29, %v3415_v22  ;;  %v3584_v16 = vrot.slane %v3583_v23, 4  ;;  %v3368_v33 = vadd.f32 %v3367_v47, %v3366_v46  ;;  %v3250_v35 = vrot.slane %v3249_v18, 2 }
 0x359   : > { %v3479_v60 = vrot.slane %v3478_v11, 4  ;;  %v3306_v58 = vrot.slane %v3305_v48, 2  ;;  %v3591_v2 = vrot.slane %v3590_v44, 4  ;;  %v3362_v21 = vrot.slane %v3361_v20, 2 }
 0x35a   : > { %v3257_v49 = vrot.slane %v3256_v38, 2  ;;  %v3194_v1 = vrot.slane %v3193_v45, 2  ;;  %v3418_v62 = vrot.slane %v3417_v42, 2  ;;  %v3369_v22 = vrot.slane %v3368_v33, 2 }
 0x35b   : > { %v12420_v46 = vadd.f32 %v3591_v2, %v3590_v44  ;;  %v3363_v40 = vadd.f32 %v3362_v21, %v3361_v20  ;;  %v3307_v29 = vadd.f32 %v3306_v58, %v3305_v48  ;;  %vm2923_vm12 = vcmask 195712  }
 0x35c   : > { %3649 = vrot.lane.b32.xlu1 %v12272_v37, %s11323_s17  ;;  %v3258_v9 = vadd.f32 %v3257_v49, %v3256_v38  ;;  %v3195_v4 = vadd.f32 %v3194_v1, %v3193_v45  ;;  %v3370_v17 = vadd.f32 %v3369_v22, %v3368_v33  ;;  %v3419_v21 = vadd.f32 %v3418_v62, %v3417_v42 }
 0x35d   : > { %v11273_v52 = vpop.eup %11272  ;;  %v3364_v48 = vrot.slane %v3363_v40, 1  ;;  %v3308_v33 = vrot.slane %v3307_v29, 1  ;;  %vm15637_vm13 = vcmask 326912   ;;  %vm15636_vm14 = vcmask 64512  }
 0x35e   : > { %v11275_v10 = vpop.eup %11274  ;;  %v2797_v6 = vxor.u32 2147483648, %v11273_v52  ;;  %v3259_v45 = vrot.slane %v3258_v9, 1  ;;  %v3196_v20 = vrot.slane %v3195_v4, 1  ;;  %vm15634_vm15 = vcmask 195584  }
 0x35f   : > { %v2794_v8 = vxor.u32 2147483648, %v11275_v10  ;;  %vm15632_vm3 = vcmask 326656   ;;  %vm15631_vm4 = vcmask 392192  }
 0x360   : > { %3653 = vrot.lane.b32.xlu1 %v12332_v14, %s11323_s17  ;;  %v2798_v30 = vsel %vm2796_vm8, %v2797_v6, %v11275_v10  ;;  %v3473_v10 = vadd.f32 %v3472_v15, %v3471_v5  ;;  %v3423_v6 = vrot.slane %v3422_v28, 4  ;;  %v3251_v5 = vadd.f32 %v3250_v35, %v3249_v18 }
 0x361   : > { %v2795_v55 = vsel %vm2793_vm7, %v11273_v52, %v2794_v8  ;;  %v3311_v52 = vrot.slane %v3310_v13, 4  ;;  %v3201_v8 = vrot.slane %v3200_v61, 2  ;;  %v3119_v15 = vsel %vm3117_vm9, %v12370_v12, 0.0 }
 0x362   : > { %v2799_v19 = vsel %vm2792_vm6, %v2795_v55, %v2798_v30  ;;  %v12417_v55 = vadd.f32 %v3584_v16, %v3583_v23  ;;  %v3474_v54 = vrot.slane %v3473_v10, 2  ;;  %v3252_v23 = vrot.slane %v3251_v5, 1 }
 0x363   : > { %v12394_v31 = vsel %vm2789_vm5, nan, %v2799_v19  ;;  %v3312_v36 = vadd.f32 %v3311_v52, %v3310_v13  ;;  %v3424_v19 = vadd.f32 %v3423_v6, %v3422_v28  ;;  %v3202_v53 = vadd.f32 %v3201_v8, %v3200_v61 }
 0x364   : > { %15695 = vst [vmem:[#allocation9_spill] sm:$0xff] %v12394_v31  ;;  %3032 = vrot.lane.b32.xlu0 %v12394_v31, %s11322_s16  ;;  %v3176_v25 = vmul.f32 %v12342_v0, %v12394_v31  ;;  %v3177_v30 = vmul.f32 %v12350_v63, %v12394_v31  ;;  %v3480_v0 = vadd.f32 %v3479_v60, %v3478_v11  ;;  %v3118_v11 = vsel %vm3117_vm9, %v12356_v3, 0.0 }
 0x365   : > { %v3313_v26 = vrot.slane %v3312_v36, 2  ;;  %v3425_v13 = vrot.slane %v3424_v19, 2  ;;  %v3203_v38 = vrot.slane %v3202_v53, 1  ;;  %v12433_v16 = vadd.f32 %v3119_v15, %v3118_v11 }
 0x366   : > { %v3527_v59 = vsel %vm3190_vm2, %v3176_v25, 0.0  ;;  %v3534_v63 = vsel %vm3190_vm2, %v3177_v30, 0.0  ;;  %v3481_v18 = vrot.slane %v3480_v0, 2  ;;  %v3371_v52 = vrot.slane %v3370_v17, 1 }
 0x367   : > { %v3528_v47 = vrot.slane %v3527_v59, 4  ;;  %v3535_v61 = vrot.slane %v3534_v63, 4  ;;  %v3314_v35 = vadd.f32 %v3313_v26, %v3312_v36  ;;  %v12437_v60 = vadd.f32 %v3252_v23, %v3251_v5 }
 0x368   : > { %3639 = vrot.lane.b32.xlu0 %v12027_v56, %s11323_s17  ;;  %v3475_v25 = vadd.f32 %v3474_v54, %v3473_v10  ;;  %v3482_v58 = vadd.f32 %v3481_v18, %v3480_v0  ;;  %v3426_v30 = vadd.f32 %v3425_v13, %v3424_v19  ;;  %v12442_v49 = vadd.f32 %v3259_v45, %v3258_v9 }
 0x369   : > { %v12435_v6 = vadd.f32 %v3528_v47, %v3527_v59  ;;  %15696 = vst [vmem:[#allocation10_spill] sm:$0xff] %v12437_v60  ;;  %v12440_v2 = vadd.f32 %v3535_v61, %v3534_v63  ;;  %v12444_v1 = vadd.f32 %v3196_v20, %v3195_v4  ;;  %v12446_v22 = vadd.f32 %v3203_v38, %v3202_v53 }
 0x36a   : > { %v12448_v15 = vadd.f32 %v3364_v48, %v3363_v40  ;;  %v12451_v5 = vadd.f32 %v3371_v52, %v3370_v17  ;;  %v12453_v10 = vadd.f32 %v3308_v33, %v3307_v29  ;;  %v3315_v54 = vrot.slane %v3314_v35, 1 }
 0x36b   : > { %15697 = vst [vmem:[#allocation11_spill] sm:$0xff] %v12444_v1  ;;  %v3476_v19 = vrot.slane %v3475_v25, 1  ;;  %v3483_v59 = vrot.slane %v3482_v58, 1  ;;  %v3420_v9 = vrot.slane %v3419_v21, 1  ;;  %v3427_v4 = vrot.slane %v3426_v30, 1 }
 0x36c   : > { %3643 = vrot.lane.b32.xlu0 %v12204_v7, %s11323_s17  ;;  %15698 = vst [vmem:[#allocation12_spill] sm:$0xff] %v12448_v15  ;;  %15699 = vst [vmem:[#allocation13_spill] sm:$0xff] %v12453_v10  ;;  %v12470_v45 = vadd.f32 %v3315_v54, %v3314_v35  ;;  %vm15630_vm5 = vcmask 457728  }
 0x36d   : > { %v12472_v20 = vadd.f32 %v3476_v19, %v3475_v25  ;;  %v12475_v48 = vadd.f32 %v3483_v59, %v3482_v58  ;;  %v12477_v52 = vadd.f32 %v3420_v9, %v3419_v21 }
 0x36f   : > { %15701 = vst [vmem:[#allocation15_spill] sm:$0xff] %v12472_v20  ;;  %15702 = vst [vmem:[#allocation16_spill] sm:$0xff] %v12475_v48 }
 0x370   : > { %3647 = vrot.lane.b32.xlu0 %v12320_v39, %s11323_s17  ;;  %15703 = vst [vmem:[#allocation17_spill] sm:$0xff] %v12477_v52 }
 0x374   : > { %3651 = vrot.lane.b32.xlu0 %v12394_v31, %s11323_s17 }
 0x377   : > { %v3025_v44 = vpop.permute.xlu1 %3024 }
 0x378   : > { %v3142_v8 = vmul.f32 %v3025_v44, %v11977_v57  ;;  %v3135_v36 = vmul.f32 %v3025_v44, %v12027_v56  ;;  %v3157_v42 = vmul.f32 %v3025_v44, %v12211_v24  ;;  %v12460_v40 = vmul.f32 %v3025_v44, %v12204_v7 }
 0x379   : > { %v3164_v26 = vmul.f32 %v3025_v44, %v12320_v39  ;;  %v3171_v17 = vmul.f32 %v3025_v44, %v12272_v37  ;;  %v3178_v29 = vmul.f32 %v3025_v44, %v12394_v31  ;;  %v3185_v47 = vmul.f32 %v3025_v44, %v12332_v14 }
 0x37a   : > { %v3261_v63 = vsel %vm3190_vm2, %v3142_v8, 0.0  ;;  %15700 = vst [vmem:[#allocation14_spill] sm:$0xff] %v12460_v40  ;;  %v3205_v18 = vsel %vm3190_vm2, %v3135_v36, 0.0  ;;  %v3373_v11 = vsel %vm3190_vm2, %v3157_v42, 0.0  ;;  %v12479_v44 = vadd.f32 %v3427_v4, %v3426_v30 }
 0x37b   : > { %v3027_v62 = vpop.permute.xlu1 %3026  ;;  %v3262_v61 = vrot.slane %v3261_v63, 4  ;;  %v3206_v33 = vrot.slane %v3205_v18, 4  ;;  %v12483_v8 = vsel %vm3190_vm2, %v12460_v40, 0.0  ;;  %v3429_v36 = vsel %vm3190_vm2, %v3164_v26, 0.0 }
 0x37c   : > { %v3136_v23 = vmul.f32 %v3027_v62, %v12027_v56  ;;  %v3143_v13 = vmul.f32 %v3027_v62, %v11977_v57  ;;  %15704 = vst [vmem:[#allocation18_spill] sm:$0xff] %v12479_v44  ;;  %v3485_v35 = vsel %vm3190_vm2, %v3171_v17, 0.0  ;;  %v3374_v54 = vrot.slane %v3373_v11, 4 }
 0x37d   : > { %v3541_v25 = vsel %vm3190_vm2, %v3178_v29, 0.0  ;;  %v3597_v42 = vsel %vm3190_vm2, %v3185_v47, 0.0  ;;  %v3263_v21 = vadd.f32 %v3262_v61, %v3261_v63  ;;  %v3150_v30 = vmul.f32 %v3027_v62, %v12204_v7 }
 0x37e   : > { %v3268_v38 = vsel %vm3190_vm2, %v3143_v13, 0.0  ;;  %v3212_v58 = vsel %vm3190_vm2, %v3136_v23, 0.0  ;;  %v3165_v19 = vmul.f32 %v3027_v62, %v12320_v39  ;;  %v3430_v9 = vrot.slane %v3429_v36, 4 }
 0x37f   : > { %v3269_v59 = vrot.slane %v3268_v38, 4  ;;  %v3486_v4 = vrot.slane %v3485_v35, 4  ;;  %v3172_v13 = vmul.f32 %v3027_v62, %v12272_v37  ;;  %v12494_v26 = vmul.f32 %v3027_v62, %v12211_v24 }
 0x380   : > { %v3207_v17 = vadd.f32 %v3206_v33, %v3205_v18  ;;  %v3179_v29 = vmul.f32 %v3027_v62, %v12394_v31  ;;  %v3186_v47 = vmul.f32 %v3027_v62, %v12332_v14  ;;  %v3213_v50 = vrot.slane %v3212_v58, 4 }
 0x381   : > { %15705 = vst [vmem:[#allocation19_spill] sm:$0xff] %v12494_v26  ;;  %v3318_v63 = vrot.slane %v12483_v8, 4  ;;  %v3375_v23 = vadd.f32 %v3374_v54, %v3373_v11  ;;  %v3542_v61 = vrot.slane %v3541_v25, 4  ;;  %v3598_v43 = vrot.slane %v3597_v42, 4 }
 0x382   : > { %v3324_v41 = vsel %vm3190_vm2, %v3150_v30, 0.0  ;;  %v12501_v34 = vsel %vm3190_vm2, %v3165_v19, 0.0  ;;  %v3264_v32 = vrot.slane %v3263_v21, 2  ;;  %v3270_v27 = vadd.f32 %v3269_v59, %v3268_v38 }
 0x383   : > { %v12503_v53 = vadd.f32 %v3430_v9, %v3429_v36  ;;  %v12505_v18 = vadd.f32 %v3486_v4, %v3485_v35  ;;  %v3492_v33 = vsel %vm3190_vm2, %v3172_v13, 0.0  ;;  %v3380_v62 = vsel %vm3190_vm2, %v12494_v26, 0.0 }
 0x384   : > { %v12511_v11 = vsel %vm3190_vm2, %v3179_v29, 0.0  ;;  %v12514_v54 = vsel %vm3190_vm2, %v3186_v47, 0.0  ;;  %v3208_v30 = vrot.slane %v3207_v17, 2  ;;  %v3214_v19 = vadd.f32 %v3213_v50, %v3212_v58 }
 0x385   : > { %v12516_v0 = vadd.f32 %v3542_v61, %v3541_v25  ;;  %v12518_v38 = vadd.f32 %v3598_v43, %v3597_v42  ;;  %v3325_v36 = vrot.slane %v3324_v41, 4  ;;  %v3265_v59 = vadd.f32 %v3264_v32, %v3263_v21 }
 0x386   : > { %v3271_v9 = vrot.slane %v3270_v27, 2  ;;  %v3376_v4 = vrot.slane %v3375_v23, 2  ;;  %v3381_v13 = vrot.slane %v3380_v62, 4  ;;  %v3493_v28 = vrot.slane %v3492_v33, 4 }
 0x387   : > { %v3121_v47 = vsel %vm3117_vm9, %v12460_v40, 0.0  ;;  %v3123_v25 = vsel %vm3117_vm9, %v12494_v26, 0.0  ;;  %v3209_v42 = vadd.f32 %v3208_v30, %v3207_v17  ;;  %v3215_v32 = vrot.slane %v3214_v19, 2 }
 0x388   : > { %v3122_v43 = vadd.f32 %v3121_v47, %v12433_v16  ;;  %v3266_v51 = vrot.slane %v3265_v59, 1  ;;  %v3272_v35 = vadd.f32 %v3271_v9, %v3270_v27  ;;  %v3377_v16 = vadd.f32 %v3376_v4, %v3375_v23 }
 0x389   : > { %v3382_v47 = vadd.f32 %v3381_v13, %v3380_v62  ;;  %v3319_v26 = vadd.f32 %v3318_v63, %v12483_v8  ;;  %v3210_v12 = vrot.slane %v3209_v42, 1  ;;  %v3216_v15 = vadd.f32 %v3215_v32, %v3214_v19 }
 0x38a   : > { %v3326_v27 = vadd.f32 %v3325_v36, %v3324_v41  ;;  %v3494_v13 = vadd.f32 %v3493_v28, %v3492_v33  ;;  %v3378_v1 = vrot.slane %v3377_v16, 1  ;;  %v3488_v28 = vrot.slane %v12505_v18, 2 }
 0x38b   : > { %v3383_v9 = vrot.slane %v3382_v47, 2  ;;  %v3320_v60 = vrot.slane %v3319_v26, 2  ;;  %v12551_v48 = vadd.f32 %v3210_v12, %v3209_v42  ;;  %v3217_v19 = vrot.slane %v3216_v15, 1 }
 0x38c   : > { %v3327_v41 = vrot.slane %v3326_v27, 2  ;;  %v3495_v33 = vrot.slane %v3494_v13, 2 }
 0x38d   : > { %15708 = vst [vmem:[#allocation22_spill] sm:$0xff] %v12551_v48  ;;  %v3384_v36 = vadd.f32 %v3383_v9, %v3382_v47  ;;  %v3321_v12 = vadd.f32 %v3320_v60, %v3319_v26 }
 0x38e   : > { %v3328_v9 = vadd.f32 %v3327_v41, %v3326_v27 }
 0x38f   : > { %v12525_v50 = vpop.permute.xlu1 %3030 }
 0x390   : > { %v3138_v58 = vmul.f32 %v12525_v50, %v12027_v56  ;;  %v3145_v21 = vmul.f32 %v12525_v50, %v11977_v57  ;;  %v3152_v61 = vmul.f32 %v12525_v50, %v12204_v7  ;;  %v3159_v29 = vmul.f32 %v12525_v50, %v12211_v24 }
 0x391   : > { %v12544_v10 = vmul.f32 %v12525_v50, %v12272_v37  ;;  %v3166_v32 = vmul.f32 %v12525_v50, %v12320_v39  ;;  %v12572_v26 = vmul.f32 %v12525_v50, %v12394_v31 }
 0x392   : > { %v3282_v40 = vsel %vm3190_vm2, %v3145_v21, 0.0  ;;  %v3226_v17 = vsel %vm3190_vm2, %v3138_v58, 0.0  ;;  %v3394_v30 = vsel %vm3190_vm2, %v3159_v29, 0.0  ;;  %v3338_v23 = vsel %vm3190_vm2, %v3152_v61, 0.0 }
 0x393   : > { %v3283_v3 = vrot.slane %v3282_v40, 4  ;;  %v3227_v52 = vrot.slane %v3226_v17, 4  ;;  %v3395_v20 = vrot.slane %v3394_v30, 4  ;;  %15706 = vst [vmem:[#allocation20_spill] sm:$0xff] %v12544_v10  ;;  %v3339_v4 = vrot.slane %v3338_v23, 4 }
 0x394   : > { %v12547_v58 = vadd.f32 %v3123_v25, %v3122_v43  ;;  %v12549_v29 = vadd.f32 %v3266_v51, %v3265_v59  ;;  %v3273_v21 = vrot.slane %v3272_v35, 1  ;;  %v12559_v25 = vadd.f32 %v3378_v1, %v3377_v16 }
 0x395   : > { %v3284_v62 = vadd.f32 %v3283_v3, %v3282_v40  ;;  %v3228_v8 = vadd.f32 %v3227_v52, %v3226_v17  ;;  %v3396_v63 = vadd.f32 %v3395_v20, %v3394_v30  ;;  %v3340_v44 = vadd.f32 %v3339_v4, %v3338_v23 }
 0x396   : > { %15707 = vst [vmem:[#allocation21_spill] sm:$0xff] %v12549_v29  ;;  %v3506_v3 = vsel %vm3190_vm2, %v12544_v10, 0.0  ;;  %v3432_v20 = vrot.slane %v12503_v53, 2  ;;  %v12557_v43 = vadd.f32 %v3273_v21, %v3272_v35  ;;  %15709 = vst [vmem:[#allocation23_spill] sm:$0xff] %v12559_v25  ;;  %v12563_v61 = vadd.f32 %v3217_v19, %v3216_v15 }
 0x397   : > { %v3285_v40 = vrot.slane %v3284_v62, 2  ;;  %v3229_v51 = vrot.slane %v3228_v8, 2  ;;  %v3397_v59 = vrot.slane %v3396_v63, 2  ;;  %v3507_v52 = vrot.slane %v3506_v3, 4 }
 0x398   : > { %v3341_v42 = vrot.slane %v3340_v44, 2  ;;  %15710 = vst [vmem:[#allocation24_spill] sm:$0xff] %v12563_v61  ;;  %v15711_v17 = vrot.slane %v12501_v34, 4  ;;  %v3489_v4 = vadd.f32 %v3488_v28, %v12505_v18  ;;  %v3496_v35 = vadd.f32 %v3495_v33, %v3494_v13 }
 0x399   : > { %v3508_v47 = vadd.f32 %v3507_v52, %v3506_v3  ;;  %v3286_v23 = vadd.f32 %v3285_v40, %v3284_v62  ;;  %v3230_v21 = vadd.f32 %v3229_v51, %v3228_v8  ;;  %v3385_v1 = vrot.slane %v3384_v36, 1 }
 0x39a   : > { %v3438_v30 = vadd.f32 %v15711_v17, %v12501_v34  ;;  %v3398_v16 = vadd.f32 %v3397_v59, %v3396_v63  ;;  %v3433_v60 = vadd.f32 %v3432_v20, %v12503_v53  ;;  %v3188_v15 = vmul.f32 %v12525_v50, %v12332_v14 }
 0x39b   : > { %v3322_v19 = vrot.slane %v3321_v12, 1  ;;  %v3342_v3 = vadd.f32 %v3341_v42, %v3340_v44  ;;  %v12578_v34 = vsel %vm3117_vm9, %v12544_v10, 0.0  ;;  %v3509_v18 = vrot.slane %v3508_v47, 2 }
 0x39c   : > { %v3439_v27 = vrot.slane %v3438_v30, 2  ;;  %v3450_v62 = vsel %vm3190_vm2, %v3166_v32, 0.0  ;;  %v3287_v13 = vrot.slane %v3286_v23, 1  ;;  %v3329_v8 = vrot.slane %v3328_v9, 1 }
 0x39d   : > { %v3490_v53 = vrot.slane %v3489_v4, 1  ;;  %v3497_v63 = vrot.slane %v3496_v35, 1  ;;  %v3231_v41 = vrot.slane %v3230_v21, 1  ;;  %v12581_v40 = vadd.f32 %v3385_v1, %v3384_v36 }
 0x39e   : > { %v3399_v28 = vrot.slane %v3398_v16, 1  ;;  %v3434_v33 = vrot.slane %v3433_v60, 1  ;;  %v12583_v50 = vadd.f32 %v3322_v19, %v3321_v12  ;;  %v3343_v44 = vrot.slane %v3342_v3, 1 }
 0x39f   : > { %15712 = vst [vmem:[#allocation25_spill] sm:$0xff] %v12581_v40  ;;  %v3451_v51 = vrot.slane %v3450_v62, 4  ;;  %v15714_v59 = vrot.slane %v12417_v55, 2  ;;  %v3510_v20 = vadd.f32 %v3509_v18, %v3508_v47  ;;  %v3440_v42 = vadd.f32 %v3439_v27, %v3438_v30 }
 0x3a0   : > { %15713 = vst [vmem:[#allocation26_spill] sm:$0xff] %v12583_v50  ;;  %v15715_v32 = vrot.slane %v12420_v46, 2  ;;  %v3600_v10 = vrot.slane %v12518_v38, 2  ;;  %v12592_v36 = vadd.f32 %v3287_v13, %v3286_v23  ;;  %v12594_v1 = vadd.f32 %v3329_v8, %v3328_v9 }
 0x3a1   : > { %v3587_v52 = vadd.f32 %v15714_v59, %v12417_v55  ;;  %v12596_v12 = vadd.f32 %v3490_v53, %v3489_v4  ;;  %v12598_v19 = vadd.f32 %v3497_v63, %v3496_v35  ;;  %v12600_v50 = vadd.f32 %v3231_v41, %v3230_v21 }
 0x3a2   : > { %v3594_v17 = vadd.f32 %v15715_v32, %v12420_v46  ;;  %15716 = vst [vmem:[#allocation27_spill] sm:$0xff] %v12592_v36  ;;  %15717 = vst [vmem:[#allocation28_spill] sm:$0xff] %v12594_v1  ;;  %v12602_v25 = vadd.f32 %v3399_v28, %v3398_v16  ;;  %v12604_v55 = vadd.f32 %v3434_v33, %v3433_v60  ;;  %v15723_v47 = vrot.slane %v12514_v54, 4 }
 0x3a3   : > { %15718 = vst [vmem:[#allocation29_spill] sm:$0xff] %v12596_v12  ;;  %15719 = vst [vmem:[#allocation30_spill] sm:$0xff] %v12598_v19  ;;  %v12609_v30 = vadd.f32 %v3343_v44, %v3342_v3  ;;  %v3452_v23 = vadd.f32 %v3451_v51, %v3450_v62  ;;  %v3588_v18 = vrot.slane %v3587_v52, 1  ;;  %v3618_v9 = vsel %vm3190_vm2, %v3188_v15, 0.0 }
 0x3a4   : > { %15720 = vst [vmem:[#allocation31_spill] sm:$0xff] %v12600_v50  ;;  %15721 = vst [vmem:[#allocation32_spill] sm:$0xff] %v12602_v25  ;;  %v3606_v46 = vadd.f32 %v15723_v47, %v12514_v54  ;;  %v3511_v27 = vrot.slane %v3510_v20, 1  ;;  %v3441_v35 = vrot.slane %v3440_v42, 1  ;;  %v3595_v13 = vrot.slane %v3594_v17, 1 }
 0x3a5   : > { %15722 = vst [vmem:[#allocation33_spill] sm:$0xff] %v12604_v55  ;;  %15724 = vst [vmem:[#allocation34_spill] sm:$0xff] %v12609_v30  ;;  %v3601_v21 = vadd.f32 %v3600_v10, %v12518_v38  ;;  %v3619_v53 = vrot.slane %v3618_v9, 4  ;;  %v3453_v51 = vrot.slane %v3452_v23, 2 }
 0x3a6   : > { %v3607_v15 = vrot.slane %v3606_v46, 2  ;;  %v12635_v36 = vadd.f32 %v3441_v35, %v3440_v42 }
 0x3a7   : > { %v3602_v48 = vrot.slane %v3601_v21, 1  ;;  %v3620_v19 = vadd.f32 %v3619_v53, %v3618_v9  ;;  %v3454_v40 = vadd.f32 %v3453_v51, %v3452_v23  ;;  %v15729_v9 = vrot.slane %v12511_v11, 4 }
 0x3a8   : > { %v3029_v4 = vpop.permute.xlu0 %3028  ;;  %v3608_v29 = vadd.f32 %v3607_v15, %v3606_v46  ;;  %v3544_v53 = vrot.slane %v12516_v0, 2 }
 0x3a9   : > { %v3137_v16 = vmul.f32 %v3029_v4, %v12027_v56  ;;  %v3144_v60 = vmul.f32 %v3029_v4, %v11977_v57  ;;  %v3151_v8 = vmul.f32 %v3029_v4, %v12204_v7  ;;  %v3158_v54 = vmul.f32 %v3029_v4, %v12211_v24 }
 0x3aa   : > { %v3173_v3 = vmul.f32 %v3029_v4, %v12272_v37  ;;  %v12619_v62 = vmul.f32 %v3029_v4, %v12320_v39  ;;  %v3187_v59 = vmul.f32 %v3029_v4, %v12332_v14  ;;  %v3550_v42 = vadd.f32 %v15729_v9, %v12511_v11 }
 0x3ab   : > { %v3275_v63 = vsel %vm3190_vm2, %v3144_v60, 0.0  ;;  %v3219_v41 = vsel %vm3190_vm2, %v3137_v16, 0.0  ;;  %v3387_v10 = vsel %vm3190_vm2, %v3158_v54, 0.0  ;;  %v3331_v38 = vsel %vm3190_vm2, %v3151_v8, 0.0 }
 0x3ac   : > { %15725 = vst [vmem:[#allocation35_spill] sm:$0xff] %v12619_v62  ;;  %v3276_v28 = vrot.slane %v3275_v63, 4  ;;  %v3220_v33 = vrot.slane %v3219_v41, 4  ;;  %v3388_v44 = vrot.slane %v3387_v10, 4  ;;  %v3332_v32 = vrot.slane %v3331_v38, 4 }
 0x3ad   : > { %v3499_v47 = vsel %vm3190_vm2, %v3173_v3, 0.0  ;;  %v3443_v55 = vsel %vm3190_vm2, %v12619_v62, 0.0  ;;  %v12629_v60 = vadd.f32 %v3511_v27, %v3510_v20  ;;  %v12631_v16 = vadd.f32 %v3588_v18, %v3587_v52 }
 0x3ae   : > { %v3500_v12 = vrot.slane %v3499_v47, 4  ;;  %v12633_v54 = vadd.f32 %v3595_v13, %v3594_v17  ;;  %v3444_v8 = vrot.slane %v3443_v55, 4  ;;  %v3277_v30 = vadd.f32 %v3276_v28, %v3275_v63 }
 0x3af   : > { %15726 = vst [vmem:[#allocation36_spill] sm:$0xff] %v12631_v16  ;;  %v3221_v25 = vadd.f32 %v3220_v33, %v3219_v41  ;;  %v3389_v50 = vadd.f32 %v3388_v44, %v3387_v10  ;;  %v3333_v3 = vadd.f32 %v3332_v32, %v3331_v38  ;;  %v3611_v61 = vsel %vm3190_vm2, %v3187_v59, 0.0 }
 0x3b0   : > { %v3501_v1 = vadd.f32 %v3500_v12, %v3499_v47  ;;  %v3445_v20 = vadd.f32 %v3444_v8, %v3443_v55  ;;  %v15727_v52 = vrot.slane %v12435_v6, 2  ;;  %v15728_v18 = vrot.slane %v12440_v2, 2 }
 0x3b1   : > { %v12649_v27 = vadd.f32 %v3602_v48, %v3601_v21  ;;  %v3609_v12 = vrot.slane %v3608_v29, 1  ;;  %v3612_v23 = vrot.slane %v3611_v61, 4  ;;  %v3621_v35 = vrot.slane %v3620_v19, 2 }
 0x3b2   : > { %v3531_v17 = vadd.f32 %v15727_v52, %v12435_v6  ;;  %v12644_v46 = vadd.f32 %v15728_v18, %v12440_v2  ;;  %v3278_v13 = vrot.slane %v3277_v30, 2  ;;  %v3222_v55 = vrot.slane %v3221_v25, 2 }
 0x3b3   : > { %15730 = vst [vmem:[#allocation37_spill] sm:$0xff] %v12649_v27  ;;  %v3390_v15 = vrot.slane %v3389_v50, 2  ;;  %v3180_v6 = vmul.f32 %v3029_v4, %v12394_v31  ;;  %v3334_v63 = vrot.slane %v3333_v3, 2  ;;  %v3502_v41 = vrot.slane %v3501_v1, 2 }
 0x3b4   : > { %v3613_v2 = vadd.f32 %v3612_v23, %v3611_v61  ;;  %v3446_v10 = vrot.slane %v3445_v20, 2  ;;  %v3455_v38 = vrot.slane %v3454_v40, 1  ;;  %v3551_v28 = vrot.slane %v3550_v42, 2 }
 0x3b5   : > { %v3562_v48 = vsel %vm3190_vm2, %v12572_v26, 0.0  ;;  %v3622_v21 = vadd.f32 %v3621_v35, %v3620_v19  ;;  %v3532_v33 = vrot.slane %v3531_v17, 1  ;;  %v3539_v44 = vrot.slane %v12644_v46, 1 }
 0x3b6   : > { %v3614_v11 = vrot.slane %v3613_v2, 2  ;;  %v3279_v51 = vadd.f32 %v3278_v13, %v3277_v30  ;;  %v3223_v59 = vadd.f32 %v3222_v55, %v3221_v25  ;;  %v3391_v32 = vadd.f32 %v3390_v15, %v3389_v50 }
 0x3b7   : > { %v3545_v47 = vadd.f32 %v3544_v53, %v12516_v0  ;;  %v3335_v4 = vadd.f32 %v3334_v63, %v3333_v3  ;;  %v3503_v8 = vadd.f32 %v3502_v41, %v3501_v1  ;;  %v3555_v61 = vsel %vm3190_vm2, %v3180_v6, 0.0 }
 0x3b8   : > { %v3563_v52 = vrot.slane %v3562_v48, 4  ;;  %v3125_v18 = vsel %vm3117_vm9, %v12619_v62, 0.0  ;;  %v3447_v9 = vadd.f32 %v3446_v10, %v3445_v20  ;;  %v3552_v26 = vadd.f32 %v3551_v28, %v3550_v42  ;;  %v15751_v62 = vld [vmem:[#allocation34_spill] sm:$0xff] }
 0x3b9   : > { %v3556_v23 = vrot.slane %v3555_v61, 4  ;;  %v3126_v19 = vadd.f32 %v3125_v18, %v12547_v58  ;;  %v3615_v35 = vadd.f32 %v3614_v11, %v3613_v2  ;;  %v3623_v27 = vrot.slane %v3622_v21, 1 }
 0x3ba   : > { %v3564_v30 = vadd.f32 %v3563_v52, %v3562_v48  ;;  %v3280_v25 = vrot.slane %v3279_v51, 1  ;;  %v3224_v50 = vrot.slane %v3223_v59, 1  ;;  %v12661_v13 = vadd.f32 %v3609_v12, %v3608_v29 }
 0x3bb   : > { %v3557_v0 = vadd.f32 %v3556_v23, %v3555_v61  ;;  %v3392_v1 = vrot.slane %v3391_v32, 1  ;;  %v3336_v3 = vrot.slane %v3335_v4, 1  ;;  %v3504_v55 = vrot.slane %v3503_v8, 1 }
 0x3bc   : > { %15731 = vst [vmem:[#allocation38_spill] sm:$0xff] %v12661_v13  ;;  %v3565_v15 = vrot.slane %v3564_v30, 2  ;;  %v3448_v53 = vrot.slane %v3447_v9, 1  ;;  %v3546_v6 = vrot.slane %v3545_v47, 1  ;;  %v3553_v63 = vrot.slane %v3552_v26, 1 }
 0x3bd   : > { %v3558_v20 = vrot.slane %v3557_v0, 2  ;;  %v12664_v42 = vadd.f32 %v12578_v34, %v3126_v19  ;;  %v12666_v58 = vadd.f32 %v3455_v38, %v3454_v40  ;;  %v3616_v41 = vrot.slane %v3615_v35, 1 }
 0x3be   : > { %v12668_v2 = vadd.f32 %v3623_v27, %v3622_v21  ;;  %v12670_v10 = vadd.f32 %v3280_v25, %v3279_v51  ;;  %v12672_v29 = vadd.f32 %v3224_v50, %v3223_v59  ;;  %v12676_v28 = vadd.f32 %v3565_v15, %v3564_v30 }
 0x3bf   : > { %v12674_v12 = vadd.f32 %v3558_v20, %v3557_v0  ;;  %v12678_v48 = vadd.f32 %v3392_v1, %v3391_v32  ;;  %v12680_v11 = vadd.f32 %v3336_v3, %v3335_v4  ;;  %v12682_v61 = vadd.f32 %v3504_v55, %v3503_v8 }
 0x3c0   : > { %15732 = vst [vmem:[#allocation39_spill] sm:$0xff] %v12668_v2  ;;  %15734 = vst [vmem:[#allocation41_spill] sm:$0xff] %v12676_v28  ;;  %v12684_v34 = vadd.f32 %v3532_v33, %v3531_v17  ;;  %v12686_v38 = vadd.f32 %v3448_v53, %v3447_v9  ;;  %v12689_v27 = vadd.f32 %v3539_v44, %v12644_v46 }
 0x3c1   : > { %15733 = vst [vmem:[#allocation40_spill] sm:$0xff] %v12674_v12  ;;  %v12691_v21 = vadd.f32 %v3546_v6, %v3545_v47  ;;  %v12693_v51 = vadd.f32 %v3553_v63, %v3552_v26  ;;  %v12698_v8 = vadd.f32 %v3616_v41, %v3615_v35 }
 0x3c2   : > { %15735 = vst [vmem:[#allocation42_spill] sm:$0xff] %v12684_v34  ;;  %v3035_v40 = vpop.permute.xlu1 %3034  ;;  %15736 = vst [vmem:[#allocation43_spill] sm:$0xff] %v12689_v27  ;;  %v15758_v34 = vld [vmem:[#allocation11_spill] sm:$0xff] }
 0x3c3   : > { %15737 = vst [vmem:[#allocation44_spill] sm:$0xff] %v12691_v21  ;;  %15738 = vst [vmem:[#allocation45_spill] sm:$0xff] %v12693_v51  ;;  %v3147_v59 = vmul.f32 %v3035_v40, %v11977_v57  ;;  %v3140_v32 = vmul.f32 %v3035_v40, %v12027_v56  ;;  %v3161_v4 = vmul.f32 %v3035_v40, %v12211_v24 }
 0x3c4   : > { %15739 = vst [vmem:[#allocation46_spill] sm:$0xff] %v12698_v8  ;;  %v12701_v17 = vmul.f32 %v3035_v40, %v12332_v14  ;;  %v3154_v33 = vmul.f32 %v3035_v40, %v12204_v7  ;;  %v3175_v18 = vmul.f32 %v3035_v40, %v12272_v37  ;;  %v12710_v9 = vmul.f32 %v3035_v40, %v12320_v39 }
 0x3c5   : > { %v3296_v47 = vsel %vm3190_vm2, %v3147_v59, 0.0  ;;  %v3240_v52 = vsel %vm3190_vm2, %v3140_v32, 0.0  ;;  %v3408_v35 = vsel %vm3190_vm2, %v3161_v4, 0.0  ;;  %v12716_v30 = vmul.f32 %v3035_v40, %v12394_v31  ;;  %v15744_v32 = vld [vmem:[#allocation24_spill] sm:$0xff] }
 0x3c6   : > { %15740 = vst [vmem:[#allocation47_spill] sm:$0xff] %v12701_v17  ;;  %v12712_v26 = vpop.permute.xlu1 %3641  ;;  %v3297_v23 = vrot.slane %v3296_v47, 4  ;;  %v3241_v19 = vrot.slane %v3240_v52, 4  ;;  %v3409_v0 = vrot.slane %v3408_v35, 4  ;;  %v3352_v15 = vsel %vm3190_vm2, %v3154_v33, 0.0 }
 0x3c7   : > { %15741 = vst [vmem:[#allocation48_spill] sm:$0xff] %v12712_v26  ;;  %15742 = vst [vmem:[#allocation49_spill] sm:$0xff] %v12716_v30  ;;  %v3672_v25 = vmul.f32 %v12712_v26, %v12442_v49  ;;  %v3664_v50 = vmul.f32 %v12712_v26, %v12446_v22  ;;  %v3688_v1 = vmul.f32 %v12712_v26, %v12451_v5  ;;  %v12729_v6 = vsel %vm3117_vm9, %v12701_v17, 0.0 }
 0x3c8   : > { %v3298_v3 = vadd.f32 %v3297_v23, %v3296_v47  ;;  %v3242_v55 = vadd.f32 %v3241_v19, %v3240_v52  ;;  %v3680_v53 = vmul.f32 %v12712_v26, %v12470_v45  ;;  %v3410_v63 = vadd.f32 %v3409_v0, %v3408_v35  ;;  %v15745_v47 = vld [vmem:[#allocation25_spill] sm:$0xff] }
 0x3c9   : > { %v12732_v49 = vsel %vm3190_vm2, %v3672_v25, 0.0  ;;  %v12735_v22 = vsel %vm3190_vm2, %v3664_v50, 0.0  ;;  %v12740_v40 = vsel %vm3190_vm2, %v3688_v1, 0.0  ;;  %v3353_v59 = vrot.slane %v3352_v15, 4  ;;  %v15746_v1 = vld [vmem:[#allocation28_spill] sm:$0xff] }
 0x3ca   : > { %v12737_v20 = vpop.permute.xlu1 %3645  ;;  %v3299_v5 = vrot.slane %v3298_v3, 2  ;;  %v3243_v41 = vrot.slane %v3242_v55, 2  ;;  %v3411_v33 = vrot.slane %v3410_v63, 2  ;;  %v12749_v25 = vsel %vm3190_vm2, %v3680_v53, 0.0 }
 0x3cb   : > { %15743 = vst [vmem:[#allocation50_spill] sm:$0xff] %v12737_v20  ;;  %v3674_v45 = vmul.f32 %v12737_v20, %v12557_v43  ;;  %v3666_v4 = vmul.f32 %v12737_v20, %v15744_v32  ;;  %v3690_v52 = vmul.f32 %v12737_v20, %v15745_v47  ;;  %v3354_v35 = vadd.f32 %v3353_v59, %v3352_v15  ;;  %v15748_v15 = vld [vmem:[#allocation27_spill] sm:$0xff] }
 0x3cc   : > { %v3300_v23 = vadd.f32 %v3299_v5, %v3298_v3  ;;  %v3244_v19 = vadd.f32 %v3243_v41, %v3242_v55  ;;  %v3412_v43 = vadd.f32 %v3411_v33, %v3410_v63  ;;  %v3682_v32 = vmul.f32 %v12737_v20, %v15746_v1  ;;  %v15749_v5 = vld [vmem:[#allocation31_spill] sm:$0xff] }
 0x3cd   : > { %v12752_v50 = vsel %vm3190_vm2, %v3674_v45, 0.0  ;;  %v12755_v0 = vsel %vm3190_vm2, %v3666_v4, 0.0  ;;  %v12762_v3 = vsel %vm3190_vm2, %v3690_v52, 0.0  ;;  %v3355_v55 = vrot.slane %v3354_v35, 2  ;;  %v15750_v45 = vld [vmem:[#allocation32_spill] sm:$0xff] }
 0x3ce   : > { %v12759_v44 = vpop.permute.xlu1 %3649  ;;  %v3301_v46 = vrot.slane %v3300_v23, 1  ;;  %v3245_v47 = vrot.slane %v3244_v19, 1  ;;  %v3413_v59 = vrot.slane %v3412_v43, 1  ;;  %v12779_v27 = vsel %vm3190_vm2, %v3682_v32, 0.0 }
 0x3cf   : > { %15747 = vst [vmem:[#allocation24_spill] sm:$0xff] %v12759_v44  ;;  %v3676_v53 = vmul.f32 %v12759_v44, %v15748_v15  ;;  %v3668_v41 = vmul.f32 %v12759_v44, %v15749_v5  ;;  %v3692_v63 = vmul.f32 %v12759_v44, %v15750_v45  ;;  %v3356_v1 = vadd.f32 %v3355_v55, %v3354_v35 }
 0x3d0   : > { %v3302_v4 = vadd.f32 %v3301_v46, %v3300_v23  ;;  %v3246_v33 = vadd.f32 %v3245_v47, %v3244_v19  ;;  %v3684_v51 = vmul.f32 %v12759_v44, %v15751_v62  ;;  %v3414_v15 = vadd.f32 %v3413_v59, %v3412_v43  ;;  %v15752_v19 = vld [vmem:[#allocation16_spill] sm:$0xff] }
 0x3d1   : > { %v12773_v52 = vsel %vm3190_vm2, %v3676_v53, 0.0  ;;  %v12776_v21 = vsel %vm3190_vm2, %v3668_v41, 0.0  ;;  %v12784_v45 = vsel %vm3190_vm2, %v3692_v63, 0.0  ;;  %v3357_v46 = vrot.slane %v3356_v1, 1  ;;  %v15753_v41 = vld [vmem:[#allocation30_spill] sm:$0xff] }
 0x3d2   : > { %v12781_v5 = vpop.permute.xlu1 %3653  ;;  %v3520_v23 = vsel %vm3190_vm2, %v3175_v18, 0.0  ;;  %v3704_v62 = vmul.f32 %v12712_v26, %v15752_v19  ;;  %v12793_v53 = vsel %vm3190_vm2, %v3684_v51, 0.0  ;;  %v3706_v59 = vmul.f32 %v12737_v20, %v15753_v41  ;;  %v15754_v41 = vld [vmem:[#allocation18_spill] sm:$0xff] }
 0x3d3   : > { %v3678_v35 = vmul.f32 %v12781_v5, %v3302_v4  ;;  %v3670_v47 = vmul.f32 %v12781_v5, %v3246_v33  ;;  %v3694_v43 = vmul.f32 %v12781_v5, %v3414_v15  ;;  %v3521_v55 = vrot.slane %v3520_v23, 4 }
 0x3d4   : > { %v3358_v32 = vadd.f32 %v3357_v46, %v3356_v1  ;;  %v3708_v18 = vmul.f32 %v12759_v44, %v12629_v60  ;;  %v12806_v15 = vsel %vm3190_vm2, %v3704_v62, 0.0  ;;  %v12813_v46 = vsel %vm3190_vm2, %v3706_v59, 0.0 }
 0x3d5   : > { %v12800_v63 = vsel %vm3190_vm2, %v3678_v35, 0.0  ;;  %v12803_v4 = vsel %vm3190_vm2, %v3670_v47, 0.0  ;;  %v3522_v33 = vadd.f32 %v3521_v55, %v3520_v23  ;;  %v12809_v1 = vsel %vm3190_vm2, %v3694_v43, 0.0 }
 0x3d6   : > { %v3686_v51 = vmul.f32 %v12781_v5, %v3358_v32  ;;  %v3464_v60 = vsel %vm3190_vm2, %v12710_v9, 0.0  ;;  %v3696_v47 = vmul.f32 %v12712_v26, %v15754_v41  ;;  %v3698_v23 = vmul.f32 %v12737_v20, %v12635_v36  ;;  %v12835_v32 = vpop.permute.xlu0 %3032 }
 0x3d7   : > { %v3523_v19 = vrot.slane %v3522_v33, 2  ;;  %v3465_v35 = vrot.slane %v3464_v60, 4  ;;  %v12825_v43 = vsel %vm3190_vm2, %v3708_v18, 0.0  ;;  %v12829_v55 = vmul.f32 %v12759_v44, %v12666_v58 }
 0x3d8   : > { %v12822_v62 = vsel %vm3190_vm2, %v3686_v51, 0.0  ;;  %v12833_v9 = vsel %vm3190_vm2, %v12701_v17, 0.0  ;;  %v12842_v36 = vsel %vm3190_vm2, %v3696_v47, 0.0  ;;  %v12846_v18 = vmul.f32 %v12712_v26, %v12633_v54 }
 0x3d9   : > { %v12837_v59 = vadd.f32 %v3523_v19, %v3522_v33  ;;  %v12839_v41 = vadd.f32 %v3465_v35, %v3464_v60  ;;  %v12850_v58 = vmul.f32 %v12835_v32, %v12394_v31  ;;  %v3146_v51 = vmul.f32 %v12835_v32, %v11977_v57  ;;  %v15757_v35 = vld [vmem:[#allocation10_spill] sm:$0xff] }
 0x3da   : > { %15755 = vst [vmem:[#allocation25_spill] sm:$0xff] %v12846_v18  ;;  %v3139_v33 = vmul.f32 %v12835_v32, %v12027_v56  ;;  %v3160_v60 = vmul.f32 %v12835_v32, %v12211_v24  ;;  %v3153_v19 = vmul.f32 %v12835_v32, %v12204_v7  ;;  %v12862_v54 = vmul.f32 %v12835_v32, %v12272_v37  ;;  %v12873_v57 = vpop.permute.xlu0 %3639 }
 0x3db   : > { %15756 = vst [vmem:[#allocation28_spill] sm:$0xff] %v12850_v58  ;;  %v12866_v47 = vsel %vm3190_vm2, %v3698_v23, 0.0  ;;  %v3129_v17 = vsel %vm3117_vm9, %v12850_v58, 0.0  ;;  %v3289_v31 = vsel %vm3190_vm2, %v3146_v51, 0.0  ;;  %v3671_v23 = vmul.f32 %v12873_v57, %v15757_v35  ;;  %v15759_v58 = vld [vmem:[#allocation12_spill] sm:$0xff] }
 0x3dc   : > { %v3233_v56 = vsel %vm3190_vm2, %v3139_v33, 0.0  ;;  %v3401_v24 = vsel %vm3190_vm2, %v3160_v60, 0.0  ;;  %v3130_v7 = vadd.f32 %v3129_v17, %v12664_v42  ;;  %v3290_v37 = vrot.slane %v3289_v31, 4 }
 0x3dd   : > { %v3234_v26 = vrot.slane %v3233_v56, 4  ;;  %v3402_v28 = vrot.slane %v3401_v24, 4  ;;  %v3663_v30 = vmul.f32 %v12873_v57, %v15758_v34  ;;  %v3687_v51 = vmul.f32 %v12873_v57, %v15759_v58 }
 0x3de   : > { %v3345_v33 = vsel %vm3190_vm2, %v3153_v19, 0.0  ;;  %v3132_v60 = vadd.f32 %v12729_v6, %v3130_v7  ;;  %v3291_v12 = vadd.f32 %v3290_v37, %v3289_v31  ;;  %v3742_v42 = vsel %vm3190_vm2, %v3671_v23, 0.0  ;;  %v12887_v8 = vpop.permute.xlu0 %3643  ;;  %v15760_v19 = vld [vmem:[#allocation21_spill] sm:$0xff]  ;;  %v15761_v37 = vld [vmem:[#allocation22_spill] sm:$0xff] }
 0x3df   : > { %v3235_v18 = vadd.f32 %v3234_v26, %v3233_v56  ;;  %v3403_v44 = vadd.f32 %v3402_v28, %v3401_v24  ;;  %v3727_v17 = vsel %vm3190_vm2, %v3663_v30, 0.0  ;;  %v3772_v2 = vsel %vm3190_vm2, %v3687_v51, 0.0  ;;  %v15762_v30 = vld [vmem:[#allocation23_spill] sm:$0xff] }
 0x3e0   : > { %v3346_v35 = vrot.slane %v3345_v33, 4  ;;  %v3133_v34 = vmul.f32 0.125, %v3132_v60  ;;  %v3292_v20 = vrot.slane %v3291_v12, 2  ;;  %v3744_v58 = vadd.f32 %v12732_v49, %v3742_v42 }
 0x3e1   : > { %v3236_v13 = vrot.slane %v3235_v18, 2  ;;  %v3673_v7 = vmul.f32 %v12887_v8, %v15760_v19  ;;  %v3665_v56 = vmul.f32 %v12887_v8, %v15761_v37  ;;  %v3729_v24 = vadd.f32 %v12735_v22, %v3727_v17 }
 0x3e2   : > { %v3404_v31 = vrot.slane %v3403_v44, 2  ;;  %3856 = vrot.lane.b32.xlu0 %v3133_v34, %s11322_s16  ;;  %v3293_v28 = vadd.f32 %v3292_v20, %v3291_v12  ;;  %v3689_v6 = vmul.f32 %v12887_v8, %v15762_v30  ;;  %v3774_v23 = vadd.f32 %v12740_v40, %v3772_v2  ;;  %v12901_v19 = vpop.permute.xlu0 %3647 }
 0x3e3   : > { %v3237_v26 = vadd.f32 %v3236_v13, %v3235_v18  ;;  %v3745_v49 = vsel %vm3190_vm2, %v3673_v7, 0.0  ;;  %v3730_v51 = vsel %vm3190_vm2, %v3665_v56, 0.0  ;;  %v3347_v42 = vadd.f32 %v3346_v35, %v3345_v33 }
 0x3e4   : > { %v3405_v60 = vadd.f32 %v3404_v31, %v3403_v44  ;;  %v3294_v37 = vrot.slane %v3293_v28, 1  ;;  %v3746_v22 = vadd.f32 %v3745_v49, %v3744_v58  ;;  %v3731_v16 = vadd.f32 %v3730_v51, %v3729_v24 }
 0x3e5   : > { %v3238_v17 = vrot.slane %v3237_v26, 1  ;;  %v3675_v13 = vmul.f32 %v12901_v19, %v12670_v10  ;;  %v3667_v12 = vmul.f32 %v12901_v19, %v12672_v29  ;;  %v3691_v2 = vmul.f32 %v12901_v19, %v12678_v48 }
 0x3e6   : > { %v3406_v20 = vrot.slane %v3405_v60, 1  ;;  %v3295_v40 = vadd.f32 %v3294_v37, %v3293_v28  ;;  %v3748_v44 = vadd.f32 %v12752_v50, %v3746_v22  ;;  %v3733_v33 = vadd.f32 %v12755_v0, %v3731_v16  ;;  %v12914_v7 = vpop.permute.xlu0 %3651 }
 0x3e7   : > { %v3239_v18 = vadd.f32 %v3238_v17, %v3237_v26  ;;  %v3749_v35 = vsel %vm3190_vm2, %v3675_v13, 0.0  ;;  %v3734_v34 = vsel %vm3190_vm2, %v3667_v12, 0.0  ;;  %v3775_v10 = vsel %vm3190_vm2, %v3689_v6, 0.0  ;;  %v15763_v6 = vld [vmem:[#allocation13_spill] sm:$0xff]  ;;  %v15764_v12 = vld [vmem:[#allocation26_spill] sm:$0xff] }
 0x3e8   : > { %v3407_v58 = vadd.f32 %v3406_v20, %v3405_v60  ;;  %v3750_v29 = vadd.f32 %v3749_v35, %v3748_v44  ;;  %v3735_v56 = vadd.f32 %v3734_v34, %v3733_v33  ;;  %v3776_v24 = vadd.f32 %v3775_v10, %v3774_v23 }
 0x3e9   : > { %v3167_v48 = vmul.f32 %v12835_v32, %v12320_v39  ;;  %v3677_v50 = vmul.f32 %v12914_v7, %v3295_v40  ;;  %v3669_v31 = vmul.f32 %v12914_v7, %v3239_v18  ;;  %v3779_v16 = vsel %vm3190_vm2, %v3691_v2, 0.0 }
 0x3ea   : > { %v3348_v0 = vrot.slane %v3347_v42, 2  ;;  %v3752_v28 = vadd.f32 %v12773_v52, %v3750_v29  ;;  %v3737_v26 = vadd.f32 %v12776_v21, %v3735_v56  ;;  %v3778_v30 = vadd.f32 %v12762_v3, %v3776_v24 }
 0x3eb   : > { %v3679_v49 = vmul.f32 %v12873_v57, %v15763_v6  ;;  %v3753_v23 = vsel %vm3190_vm2, %v3677_v50, 0.0  ;;  %v3738_v51 = vsel %vm3190_vm2, %v3669_v31, 0.0  ;;  %v3693_v60 = vmul.f32 %v12914_v7, %v3407_v58 }
 0x3ec   : > { %v3349_v37 = vadd.f32 %v3348_v0, %v3347_v42  ;;  %v3754_v22 = vadd.f32 %v3753_v23, %v3752_v28  ;;  %v3739_v17 = vadd.f32 %v3738_v51, %v3737_v26  ;;  %v3780_v13 = vadd.f32 %v3779_v16, %v3778_v30  ;;  %v15767_v0 = vld [vmem:[#allocation29_spill] sm:$0xff] }
 0x3ed   : > { %v3681_v52 = vmul.f32 %v12887_v8, %v15764_v12  ;;  %v3683_v21 = vmul.f32 %v12901_v19, %v12680_v11  ;;  %v3757_v3 = vsel %vm3190_vm2, %v3679_v49, 0.0  ;;  %v3513_v2 = vsel %vm3190_vm2, %v12862_v54, 0.0 }
 0x3ee   : > { %v3350_v20 = vrot.slane %v3349_v37, 1  ;;  %v3756_v40 = vadd.f32 %v12800_v63, %v3754_v22  ;;  %v3741_v44 = vadd.f32 %v12803_v4, %v3739_v17  ;;  %v3782_v42 = vadd.f32 %v12784_v45, %v3780_v13  ;;  %v15766_v45 = vld [vmem:[#allocation15_spill] sm:$0xff]  ;;  %v15768_v13 = vld [vmem:[#allocation17_spill] sm:$0xff] }
 0x3ef   : > { %v3759_v18 = vadd.f32 %v12749_v25, %v3757_v3  ;;  %v3783_v33 = vsel %vm3190_vm2, %v3693_v60, 0.0  ;;  %v3760_v34 = vsel %vm3190_vm2, %v3681_v52, 0.0  ;;  %v3514_v58 = vrot.slane %v3513_v2, 4 }
 0x3f0   : > { %v3351_v35 = vadd.f32 %v3350_v20, %v3349_v37  ;;  %v3848_v11 = vmul.f32 0.015625, %v3756_v40  ;;  %v3847_v10 = vmul.f32 0.015625, %v3741_v44  ;;  %v3784_v29 = vadd.f32 %v3783_v33, %v3782_v42 }
 0x3f1   : > { %v3761_v56 = vadd.f32 %v3760_v34, %v3759_v18  ;;  %v3515_v24 = vadd.f32 %v3514_v58, %v3513_v2  ;;  %v15765_v63 = vrot.slane %v12837_v59, 1  ;;  %v3703_v25 = vmul.f32 %v12873_v57, %v15766_v45 }
 0x3f2   : > { %v3685_v54 = vmul.f32 %v12914_v7, %v3351_v35  ;;  %3869 = vrot.lane.b32.xlu0 %v3848_v11, %s11323_s17  ;;  %3867 = vrot.lane.b32.xlu1 %v3847_v10, %s11323_s17  ;;  %v3786_v50 = vadd.f32 %v12809_v1, %v3784_v29  ;;  %v3764_v16 = vsel %vm3190_vm2, %v3683_v21, 0.0  ;;  %v3705_v28 = vmul.f32 %v12887_v8, %v15767_v0  ;;  %v15769_v21 = vld [vmem:[#allocation33_spill] sm:$0xff] }
 0x3f3   : > { %v3526_v4 = vadd.f32 %v15765_v63, %v12837_v59  ;;  %v3763_v31 = vadd.f32 %v12779_v27, %v3761_v56  ;;  %v3516_v30 = vrot.slane %v3515_v24, 2  ;;  %v3707_v59 = vmul.f32 %v12901_v19, %v12682_v61 }
 0x3f4   : > { %v3768_v26 = vsel %vm3190_vm2, %v3685_v54, 0.0  ;;  %v3457_v6 = vsel %vm3190_vm2, %v3167_v48, 0.0  ;;  %v3850_v49 = vmul.f32 0.015625, %v3786_v50  ;;  %v3802_v1 = vsel %vm3190_vm2, %v3703_v25, 0.0 }
 0x3f5   : > { %v3765_v23 = vadd.f32 %v3764_v16, %v3763_v31  ;;  %v3710_v51 = vmul.f32 %v12781_v5, %v3526_v4  ;;  %v3517_v27 = vadd.f32 %v3516_v30, %v3515_v24  ;;  %v3804_v60 = vadd.f32 %v12806_v15, %v3802_v1  ;;  %v15770_v16 = vld [vmem:[#allocation36_spill] sm:$0xff]  ;;  %v15771_v30 = vld [vmem:[#allocation37_spill] sm:$0xff] }
 0x3f6   : > { %v3805_v37 = vsel %vm3190_vm2, %v3705_v28, 0.0  ;;  %v3809_v22 = vsel %vm3190_vm2, %v3707_v59, 0.0  ;;  %3873 = vrot.lane.b32.xlu0 %v3850_v49, %s11323_s17  ;;  %v3458_v61 = vrot.slane %v3457_v6, 4  ;;  %v3467_v48 = vrot.slane %v12839_v41, 2  ;;  %v15773_v49 = vld [vmem:[#allocation50_spill] sm:$0xff] }
 0x3f7   : > { %v3767_v17 = vadd.f32 %v12793_v53, %v3765_v23  ;;  %v3695_v12 = vmul.f32 %v12873_v57, %v15768_v13  ;;  %v3518_v52 = vrot.slane %v3517_v27, 1  ;;  %v3806_v20 = vadd.f32 %v3805_v37, %v3804_v60 }
 0x3f8   : > { %v3697_v3 = vmul.f32 %v12887_v8, %v15769_v21  ;;  %v3699_v15 = vmul.f32 %v12901_v19, %v12686_v38  ;;  %v3459_v40 = vadd.f32 %v3458_v61, %v3457_v6  ;;  %v3468_v44 = vadd.f32 %v3467_v48, %v12839_v41  ;;  %v15772_v6 = vld [vmem:[#allocation38_spill] sm:$0xff]  ;;  %v15775_v61 = vld [vmem:[#allocation39_spill] sm:$0xff]  ;;  %v15777_v21 = vld [vmem:[#allocation25_spill] sm:$0xff] }
 0x3f9   : > { %v3769_v2 = vadd.f32 %v3768_v26, %v3767_v17  ;;  %v3787_v53 = vsel %vm3190_vm2, %v3695_v12, 0.0  ;;  %v3519_v42 = vadd.f32 %v3518_v52, %v3517_v27  ;;  %v3808_v18 = vadd.f32 %v12813_v46, %v3806_v20 }
 0x3fa   : > { %v3815_v33 = vsel %vm3190_vm2, %v3710_v51, 0.0  ;;  %v3789_v35 = vadd.f32 %v12842_v36, %v3787_v53  ;;  %v3460_v58 = vrot.slane %v3459_v40, 2  ;;  %v3469_v11 = vrot.slane %v3468_v44, 1 }
 0x3fb   : > { %v3771_v34 = vadd.f32 %v12822_v62, %v3769_v2  ;;  %v3790_v10 = vsel %vm3190_vm2, %v3697_v3, 0.0  ;;  %v3709_v38 = vmul.f32 %v12914_v7, %v3519_v42  ;;  %v3810_v29 = vadd.f32 %v3809_v22, %v3808_v18  ;;  %v15774_v22 = vld [vmem:[#allocation46_spill] sm:$0xff] }
 0x3fc   : > { %v3791_v56 = vadd.f32 %v3790_v10, %v3789_v35  ;;  %v3794_v41 = vsel %vm3190_vm2, %v3699_v15, 0.0  ;;  %v3461_v24 = vadd.f32 %v3460_v58, %v3459_v40  ;;  %v3470_v63 = vadd.f32 %v3469_v11, %v3468_v44  ;;  %v15778_v11 = vld [vmem:[#allocation40_spill] sm:$0xff] }
 0x3fd   : > { %v3849_v54 = vmul.f32 0.015625, %v3771_v34  ;;  %v3189_v46 = vmul.f32 %v12835_v32, %v12332_v14  ;;  %v3812_v36 = vadd.f32 %v12825_v43, %v3810_v29  ;;  %v3796_v4 = vsel %vm3190_vm2, %v12829_v55, 0.0 }
 0x3fe   : > { %v3793_v62 = vadd.f32 %v12866_v47, %v3791_v56  ;;  %v3633_v45 = vrot.slane %v12833_v9, 4  ;;  %v3813_v25 = vsel %vm3190_vm2, %v3709_v38, 0.0  ;;  %v3462_v50 = vrot.slane %v3461_v24, 1 }
 0x3ff   : > { %3871 = vrot.lane.b32.xlu1 %v3849_v54, %s11323_s17  ;;  %v3625_v31 = vsel %vm3190_vm2, %v3189_v46, 0.0  ;;  %v3719_v0 = vmul.f32 %v12873_v57, %v15770_v16  ;;  %v3814_v32 = vadd.f32 %v3813_v25, %v3812_v36  ;;  %v3702_v55 = vmul.f32 %v12781_v5, %v3470_v63  ;;  %v15780_v54 = vld [vmem:[#allocation28_spill] sm:$0xff]  ;;  %v15781_v36 = vld [vmem:[#allocation49_spill] sm:$0xff] }
 0x400   : > { %v3795_v28 = vadd.f32 %v3794_v41, %v3793_v62  ;;  %v3626_v43 = vrot.slane %v3625_v31, 4  ;;  %v3634_v47 = vadd.f32 %v3633_v45, %v12833_v9  ;;  %v3463_v26 = vadd.f32 %v3462_v50, %v3461_v24  ;;  %v15776_v9 = vld [vmem:[#allocation24_spill] sm:$0xff] }
 0x401   : > { %v3721_v59 = vmul.f32 %v12887_v8, %v15771_v30  ;;  %v3722_v23 = vmul.f32 %v15773_v49, %v15772_v6  ;;  %v3816_v51 = vadd.f32 %v3815_v33, %v3814_v32  ;;  %v3723_v17 = vmul.f32 %v12901_v19, %v15774_v22  ;;  %v15783_v32 = vld [vmem:[#allocation41_spill] sm:$0xff] }
 0x402   : > { %v3797_v1 = vadd.f32 %v3796_v4, %v3795_v28  ;;  %v3627_v27 = vadd.f32 %v3626_v43, %v3625_v31  ;;  %v3635_v60 = vrot.slane %v3634_v47, 2  ;;  %v3701_v37 = vmul.f32 %v12914_v7, %v3463_v26  ;;  %v15782_v4 = vld [vmem:[#allocation42_spill] sm:$0xff]  ;;  %v15785_v26 = vld [vmem:[#allocation43_spill] sm:$0xff] }
 0x403   : > { %v3724_v48 = vmul.f32 %v15776_v9, %v15775_v61  ;;  %v3832_v13 = vsel %vm3190_vm2, %v3719_v0, 0.0  ;;  %v3852_v12 = vmul.f32 0.015625, %v3816_v51  ;;  %v3833_v3 = vsel %vm3190_vm2, %v15777_v21, 0.0  ;;  %v15788_v51 = vld [vmem:[#allocation45_spill] sm:$0xff] }
 0x404   : > { %v3628_v52 = vrot.slane %v3627_v27, 2  ;;  %v3636_v20 = vadd.f32 %v3635_v60, %v3634_v47  ;;  %v3798_v15 = vsel %vm3190_vm2, %v3701_v37, 0.0  ;;  %v3800_v2 = vsel %vm3190_vm2, %v3702_v55, 0.0  ;;  %v15786_v55 = vld [vmem:[#allocation48_spill] sm:$0xff] }
 0x405   : > { %v3834_v40 = vadd.f32 %v3833_v3, %v3832_v13  ;;  %v3835_v44 = vsel %vm3190_vm2, %v3721_v59, 0.0  ;;  %3877 = vrot.lane.b32.xlu0 %v3852_v12, %s11323_s17  ;;  %v3799_v53 = vadd.f32 %v3798_v15, %v3797_v1  ;;  %v3837_v33 = vsel %vm3190_vm2, %v3722_v23, 0.0  ;;  %v3943_v13 = vld [vmem:[%s15579_s5] sm:$0xff] }
 0x406   : > { %v3629_v42 = vadd.f32 %v3628_v52, %v3627_v27  ;;  %v3637_v18 = vrot.slane %v3636_v20, 1  ;;  %v3839_v34 = vsel %vm3190_vm2, %v3723_v17, 0.0  ;;  %v3841_v58 = vsel %vm3190_vm2, %v3724_v48, 0.0 }
 0x407   : > { %v3836_v35 = vadd.f32 %v3835_v44, %v3834_v40  ;;  %v15779_v10 = vrot.slane %v15778_v11, 1  ;;  %v3801_v29 = vadd.f32 %v3800_v2, %v3799_v53  ;;  %v3569_v24 = vsel %vm3190_vm2, %v15780_v54, 0.0 }
 0x408   : > { %v3630_v56 = vrot.slane %v3629_v42, 1  ;;  %v3638_v41 = vadd.f32 %v3637_v18, %v3636_v20  ;;  %v3570_v46 = vrot.slane %v3569_v24, 4  ;;  %v3576_v62 = vsel %vm3190_vm2, %v15781_v36, 0.0  ;;  %v3944_v20 = vld [vmem:[%s15579_s5 + $0x8] sm:$0xff] }
 0x409   : > { %v3561_v38 = vadd.f32 %v15779_v10, %v15778_v11  ;;  %v3838_v63 = vadd.f32 %v3837_v33, %v3836_v35  ;;  %v3711_v45 = vmul.f32 %v12873_v57, %v15782_v4  ;;  %v3851_v25 = vmul.f32 0.015625, %v3801_v29  ;;  %v15787_v57 = vld [vmem:[#allocation44_spill] sm:$0xff]  ;;  %v3946_v29 = vld [vmem:[%s15579_s5 + $0x18] sm:$0xff] }
 0x40a   : > { %v3631_v50 = vadd.f32 %v3630_v56, %v3629_v42  ;;  %v3726_v31 = vmul.f32 %v12781_v5, %v3638_v41  ;;  %v3577_v16 = vrot.slane %v3576_v62, 4  ;;  %v15784_v28 = vrot.slane %v15783_v32, 1 }
 0x40b   : > { %v3840_v0 = vadd.f32 %v3839_v34, %v3838_v63  ;;  %v3571_v47 = vadd.f32 %v3570_v46, %v3569_v24  ;;  %v3712_v30 = vmul.f32 %v15786_v55, %v15785_v26  ;;  %3875 = vrot.lane.b32.xlu1 %v3851_v25, %s11323_s17  ;;  %v3713_v23 = vmul.f32 %v12887_v8, %v15787_v57  ;;  %v15790_v26 = vld [vmem:[#allocation3_spill] sm:$0xff] }
 0x40c   : > { %v3568_v43 = vadd.f32 %v15784_v28, %v15783_v32  ;;  %v3725_v59 = vmul.f32 %v12914_v7, %v3631_v50  ;;  %v3578_v6 = vadd.f32 %v3577_v16, %v3576_v62  ;;  %v3714_v1 = vmul.f32 %v15773_v49, %v15788_v51  ;;  %v13085_v28 = vld [vmem:[%s15579_s5 + $0x30] sm:$0xff]  ;;  %v15792_v51 = vld [vmem:[#allocation5_spill] sm:$0xff] }
 0x40d   : > { %v3842_v27 = vadd.f32 %v3841_v58, %v3840_v0  ;;  %v3845_v60 = vsel %vm3190_vm2, %v3726_v31, 0.0  ;;  %v3572_v37 = vrot.slane %v3571_v47, 2  ;;  %v3817_v61 = vsel %vm3190_vm2, %v3711_v45, 0.0 }
 0x40e   : > { %v3843_v22 = vsel %vm3190_vm2, %v3725_v59, 0.0  ;;  %v3579_v17 = vrot.slane %v3578_v6, 2  ;;  %v3818_v48 = vsel %vm3190_vm2, %v3712_v30, 0.0  ;;  %v3715_v52 = vmul.f32 %v12901_v19, %v3561_v38  ;;  %v15791_v59 = vld [vmem:[#allocation4_spill] sm:$0xff] }
 0x40f   : > { %v3844_v12 = vadd.f32 %v3843_v22, %v3842_v27  ;;  %v3573_v8 = vadd.f32 %v3572_v37, %v3571_v47  ;;  %v3819_v49 = vadd.f32 %v3818_v48, %v3817_v61  ;;  %v3716_v3 = vmul.f32 %v15776_v9, %v3568_v43  ;;  %v3945_v9 = vld [vmem:[%s15579_s5 + $0x10] sm:$0xff]  ;;  %v15789_v43 = vld [vmem:[#allocation2_spill] sm:$0xff] }
 0x410   : > { %v3580_v21 = vadd.f32 %v3579_v17, %v3578_v6  ;;  %v3820_v15 = vsel %vm3190_vm2, %v3713_v23, 0.0  ;;  %v3822_v2 = vsel %vm3190_vm2, %v3714_v1, 0.0  ;;  %v3988_v42 = vand.u32 4294901760, %v3943_v13 }
 0x411   : > { %v3846_v40 = vadd.f32 %v3845_v60, %v3844_v12  ;;  %v3574_v44 = vrot.slane %v3573_v8, 1  ;;  %v3821_v53 = vadd.f32 %v3820_v15, %v3819_v49  ;;  %v3991_v33 = vand.u32 4294901760, %v3944_v20  ;;  %v15793_v15 = vld [vmem:[#allocation6_spill] sm:$0xff] }
 0x412   : > { %v3581_v18 = vrot.slane %v3580_v21, 1  ;;  %v3824_v11 = vsel %vm3190_vm2, %v3715_v52, 0.0  ;;  %v3826_v10 = vsel %vm3190_vm2, %v3716_v3, 0.0  ;;  %v3994_v46 = vand.u32 4294901760, %v3945_v9 }
 0x413   : > { %v3854_v35 = vmul.f32 0.015625, %v3846_v40  ;;  %v3575_v19 = vadd.f32 %v3574_v44, %v3573_v8  ;;  %v3823_v34 = vadd.f32 %v3822_v2, %v3821_v53  ;;  %v13052_v38 = vpack.c.bf16 %v3991_v33, %v3988_v42 }
 0x414   : > { %v3582_v58 = vadd.f32 %v3581_v18, %v3580_v21  ;;  %v3997_v36 = vand.u32 4294901760, %v3946_v29  ;;  %v2990_v47 = vsel %vm2988_vm10, %v15789_v43, 0.0  ;;  %v2989_v55 = vsel %vm2988_vm10, %v15790_v26, 0.0 }
 0x415   : > { %3881 = vrot.lane.b32.xlu0 %v3854_v35, %s11323_s17  ;;  %v3717_v56 = vmul.f32 %v12914_v7, %v3575_v19  ;;  %v3825_v41 = vadd.f32 %v3824_v11, %v3823_v34  ;;  %10637 = vmatprep.subr.bf16.mxu0 %v13052_v38  ;;  %v3947_v7 = vld [vmem:[%s15579_s5 + $0x20] sm:$0xff]  ;;  %v13092_v30 = vand.u32 4294901760, %v13085_v28  ;;  %v2992_v6 = vsel %vm2988_vm10, %v15791_v59, 0.0 }
 0x416   : > { %v3718_v24 = vmul.f32 %v12781_v5, %v3582_v58  ;;  %10639 = vmatpush3.bf16.msra.mxu0 %v13052_v38  ;;  %v13067_v25 = vpack.c.bf16 %v3997_v36, %v3994_v46  ;;  %v3948_v5 = vld [vmem:[%s15579_s5 + $0x28] sm:$0xff]  ;;  %v4000_v16 = vand.u32 4294901760, %v3947_v7  ;;  %v2991_v57 = vadd.f32 %v2990_v47, %v2989_v55 }
 0x417   : > { %v3827_v63 = vadd.f32 %v3826_v10, %v3825_v41  ;;  %v3828_v62 = vsel %vm3190_vm2, %v3717_v56, 0.0  ;;  %v4003_v0 = vand.u32 4294901760, %v3948_v5  ;;  %v2994_v1 = vsel %vm2988_vm10, %v15792_v51, 0.0 }
 0x418   : > { %v3830_v4 = vsel %vm3190_vm2, %v3718_v24, 0.0  ;;  %10641 = vmatprep.subr.bf16.mxu0 %v13067_v25  ;;  %v2993_v23 = vadd.f32 %v2992_v6, %v2991_v57  ;;  %v4141_v60 = vsub.f32 %v3943_v13, %v3988_v42  ;;  %v2996_v37 = vsel %vm2988_vm10, %v12320_v39, 0.0 }
 0x419   : > { %v3829_v45 = vadd.f32 %v3828_v62, %v3827_v63  ;;  %v13078_v32 = vpack.c.bf16 %v4003_v0, %v4000_v16  ;;  %v4148_v22 = vsub.f32 %v3944_v20, %v3991_v33  ;;  %v2907_v12 = vsel %vm2905_vm11, %v15789_v43, 0.0  ;;  %v15794_v33 = vld [vmem:[#allocation9_spill] sm:$0xff] }
 0x41a   : > { %10643 = vmatpush3.bf16.msra.mxu0 %v13067_v25  ;;  %v2995_v27 = vadd.f32 %v2994_v1, %v2993_v23  ;;  %v4142_v17 = vand.u32 4294901760, %v4141_v60  ;;  %v2906_v8 = vsel %vm2905_vm11, %v15790_v26, 0.0  ;;  %v2909_v21 = vsel %vm2905_vm11, %v15791_v59, 0.0 }
 0x41b   : > { %v3831_v50 = vadd.f32 %v3830_v4, %v3829_v45  ;;  %10645 = vmatprep.subr.bf16.mxu0 %v13078_v32  ;;  %v4149_v61 = vand.u32 4294901760, %v4148_v22  ;;  %v4155_v13 = vsub.f32 %v3945_v9, %v3994_v46  ;;  %v4162_v3 = vsub.f32 %v3946_v29, %v3997_v36 }
 0x41c   : > { %v2997_v48 = vadd.f32 %v2996_v37, %v2995_v27  ;;  %v4143_v52 = vsub.f32 %v4141_v60, %v4142_v17  ;;  %v2998_v20 = vsel %vm2988_vm10, %v15793_v15, 0.0  ;;  %v4169_v44 = vsub.f32 %v3947_v7, %v4000_v16  ;;  %v15795_v27 = vld [vmem:[#allocation8_spill] sm:$0xff] }
 0x41d   : > { %v3853_v31 = vmul.f32 0.015625, %v3831_v50  ;;  %v4150_v49 = vsub.f32 %v4148_v22, %v4149_v61  ;;  %v2908_v53 = vadd.f32 %v2907_v12, %v2906_v8  ;;  %v4156_v18 = vand.u32 4294901760, %v4155_v13 }
 0x41e   : > { %10647 = vmatpush3.bf16.msra.mxu0 %v13078_v32  ;;  %v4144_v2 = vand.u32 4294901760, %v4143_v52  ;;  %v2999_v42 = vadd.f32 %v2998_v20, %v2997_v48  ;;  %v3000_v35 = vsel %vm2988_vm10, %v15794_v33, 0.0  ;;  %v4163_v34 = vand.u32 4294901760, %v4162_v3  ;;  %v15796_v52 = vld [vmem:[#allocation7_spill] sm:$0xff] }
 0x41f   : > { %3879 = vrot.lane.b32.xlu1 %v3853_v31, %s11323_s17  ;;  %10024 = vmatprep.subr.mxu0 %v13092_v30  ;;  %v4151_v40 = vand.u32 4294901760, %v4150_v49  ;;  %v4170_v58 = vand.u32 4294901760, %v4169_v44  ;;  %v2931_v11 = vsel %vm2923_vm12, %v15789_v43, 0.0  ;;  %v2910_v10 = vadd.f32 %v2909_v21, %v2908_v53 }
 0x420   : > { %v4157_v9 = vsub.f32 %v4155_v13, %v4156_v18  ;;  %v4176_v29 = vsub.f32 %v3948_v5, %v4003_v0  ;;  %v4164_v56 = vsub.f32 %v4162_v3, %v4163_v34  ;;  %v13117_v24 = vpack.c.bf16 %v4148_v22, %v4141_v60 }
 0x421   : > { %v13112_v19 = vpack.c.bf16 %v4151_v40, %v4144_v2  ;;  %v4171_v41 = vsub.f32 %v4169_v44, %v4170_v58  ;;  %v3001_v63 = vadd.f32 %v3000_v35, %v2999_v42  ;;  %v13119_v62 = vpack.c.bf16 %v4162_v3, %v4155_v13 }
 0x422   : > { %10025 = vmatpush3.msra.mxu0 %v13092_v30  ;;  %v4158_v46 = vand.u32 4294901760, %v4157_v9  ;;  %v4177_v36 = vand.u32 4294901760, %v4176_v29  ;;  %v2911_v4 = vsel %vm2905_vm11, %v15792_v51, 0.0  ;;  %v2932_v45 = vrot.slane %v2931_v11, 4 }
 0x423   : > { %10649 = vmatprep.subr.bf16.mxu0 %v13112_v19  ;;  %v4165_v7 = vand.u32 4294901760, %v4164_v56  ;;  %v2912_v50 = vadd.f32 %v2911_v4, %v2910_v10  ;;  %v4172_v31 = vand.u32 4294901760, %v4171_v41  ;;  %v13123_v5 = vpack.c.bf16 %v4176_v29, %v4169_v44 }
 0x424   : > { %v4178_v16 = vsub.f32 %v4176_v29, %v4177_v36  ;;  %v2913_v0 = vsel %vm2905_vm11, %v12320_v39, 0.0  ;;  %v3002_v47 = vsel %vm2988_vm10, %v12332_v14, 0.0  ;;  %v13131_v6 = vpack.c.bf16 %v4149_v61, %v4142_v17 }
 0x425   : > { %v13129_v55 = vpack.c.bf16 %v4165_v7, %v4158_v46  ;;  %v3003_v57 = vadd.f32 %v3002_v47, %v3001_v63  ;;  %v2933_v1 = vadd.f32 %v2932_v45, %v2931_v11  ;;  %v3060_v60 = vsel %vm15637_vm13, %v15795_v27, 0.0 }
 0x426   : > { %v4179_v23 = vand.u32 4294901760, %v4178_v16  ;;  %v2914_v37 = vadd.f32 %v2913_v0, %v2912_v50  ;;  %v2924_v48 = vsel %vm2923_vm12, %v15790_v26, 0.0  ;;  %v13139_v12 = vpack.c.bf16 %v4163_v34, %v4156_v18  ;;  %v15797_v18 = vld [vmem:[#allocation19_spill] sm:$0xff] }
 0x427   : > { %v3004_v8 = vrot.slane %v3003_v57, 4  ;;  %v3053_v17 = vsel %vm15637_vm13, %v15796_v52, 0.0  ;;  %v2915_v61 = vsel %vm2905_vm11, %v15793_v15, 0.0  ;;  %v3061_v49 = vrot.slane %v3060_v60, 4 }
 0x428   : > { %v13135_v22 = vpack.c.bf16 %v4179_v23, %v4172_v31  ;;  %v2945_v21 = vsel %vm2923_vm12, %v15792_v51, 0.0  ;;  %v2934_v13 = vrot.slane %v2933_v1, 2  ;;  %v2916_v3 = vadd.f32 %v2915_v61, %v2914_v37  ;;  %v15798_v31 = vld [vmem:[#allocation14_spill] sm:$0xff] }
 0x429   : > { %v2925_v20 = vrot.slane %v2924_v48, 4  ;;  %v2917_v2 = vsel %vm2905_vm11, %v15794_v33, 0.0  ;;  %v3054_v40 = vrot.slane %v3053_v17, 4  ;;  %v13149_v44 = vpack.c.bf16 %v4177_v36, %v4170_v58 }
 0x42a   : > { %v3005_v53 = vadd.f32 %v3004_v8, %v3003_v57  ;;  %v2946_v42 = vrot.slane %v2945_v21, 4  ;;  %v3074_v35 = vsel %vm15637_vm13, %v15797_v18, 0.0  ;;  %v2938_v34 = vsel %vm2923_vm12, %v15791_v59, 0.0 }
 0x42b   : > { %v3062_v11 = vadd.f32 %v3061_v49, %v3060_v60  ;;  %v2935_v10 = vadd.f32 %v2934_v13, %v2933_v1  ;;  %v2918_v9 = vadd.f32 %v2917_v2, %v2916_v3  ;;  %v2926_v29 = vadd.f32 %v2925_v20, %v2924_v48 }
 0x42c   : > { %v3055_v56 = vadd.f32 %v3054_v40, %v3053_v17  ;;  %v3075_v41 = vrot.slane %v3074_v35, 4  ;;  %v2939_v63 = vrot.slane %v2938_v34, 4  ;;  %v3006_v46 = vrot.slane %v3005_v53, 2 }
 0x42d   : > { %v2947_v4 = vadd.f32 %v2946_v42, %v2945_v21  ;;  %v2919_v58 = vsel %vm2905_vm11, %v12332_v14, 0.0  ;;  %v3063_v36 = vrot.slane %v3062_v11, 2  ;;  %v2936_v45 = vrot.slane %v2935_v10, 1 }
 0x42e   : > { %v2920_v7 = vadd.f32 %v2919_v58, %v2918_v9  ;;  %v2927_v50 = vrot.slane %v2926_v29, 2  ;;  %v3067_v16 = vsel %vm15637_vm13, %v15798_v31, 0.0  ;;  %v3056_v0 = vrot.slane %v3055_v56, 2 }
 0x42f   : > { %v3076_v47 = vadd.f32 %v3075_v41, %v3074_v35  ;;  %v2940_v57 = vadd.f32 %v2939_v63, %v2938_v34  ;;  %v3007_v23 = vadd.f32 %v3006_v46, %v3005_v53  ;;  %v2948_v1 = vrot.slane %v2947_v4, 2 }
 0x430   : > { %v3064_v27 = vadd.f32 %v3063_v36, %v3062_v11  ;;  %v3068_v60 = vrot.slane %v3067_v16, 4  ;;  %v2937_v37 = vadd.f32 %v2936_v45, %v2935_v10  ;;  %v13159_v48 = vmul.f32 0.125, %v2920_v7  ;;  %v15799_v11 = vld [vmem:[#allocation20_spill] sm:$0xff] }
 0x431   : > { %v2928_v8 = vadd.f32 %v2927_v50, %v2926_v29  ;;  %v2959_v52 = vsel %vm2923_vm12, %v15793_v15, 0.0  ;;  %v3057_v17 = vadd.f32 %v3056_v0, %v3055_v56  ;;  %v3077_v61 = vrot.slane %v3076_v47, 2 }
 0x432   : > { %v2941_v49 = vrot.slane %v2940_v57, 2  ;;  %v3008_v21 = vrot.slane %v3007_v23, 1  ;;  %v2949_v13 = vadd.f32 %v2948_v1, %v2947_v4  ;;  %v3065_v3 = vrot.slane %v3064_v27, 1 }
 0x433   : > { %v3069_v20 = vadd.f32 %v3068_v60, %v3067_v16  ;;  %v2960_v2 = vrot.slane %v2959_v52, 4  ;;  %v2981_v40 = vmul.f32 0.125, %v2937_v37  ;;  %v3893_v53 = vsel %vm15636_vm14, %v15789_v43, %v13159_v48  ;;  %v15800_v16 = vld [vmem:[#allocation47_spill] sm:$0xff] }
 0x434   : > { %v2929_v42 = vrot.slane %v2928_v8, 1  ;;  %v3058_v18 = vrot.slane %v3057_v17, 1  ;;  %v3078_v35 = vadd.f32 %v3077_v61, %v3076_v47  ;;  %v2942_v34 = vadd.f32 %v2941_v49, %v2940_v57 }
 0x435   : > { %v3088_v10 = vsel %vm15637_vm13, %v15799_v11, 0.0  ;;  %v3009_v9 = vadd.f32 %v3008_v21, %v3007_v23  ;;  %v2950_v29 = vrot.slane %v2949_v13, 1  ;;  %v3066_v56 = vadd.f32 %v3065_v3, %v3064_v27  ;;  %v15801_v27 = vld [vmem:[#allocation35_spill] sm:$0xff] }
 0x436   : > { %v3901_v41 = vsel %vm15635_vm0, %v3893_v53, %v2981_v40  ;;  %v3070_v63 = vrot.slane %v3069_v20, 2  ;;  %v2961_v46 = vadd.f32 %v2960_v2, %v2959_v52  ;;  %v2930_v4 = vadd.f32 %v2929_v42, %v2928_v8 }
 0x437   : > { %v3892_v43 = vsel %vm15636_vm14, %v15790_v26, %v13159_v48  ;;  %v3895_v58 = vsel %vm15636_vm14, %v15792_v51, %v13159_v48  ;;  %v3089_v36 = vrot.slane %v3088_v10, 4  ;;  %v3059_v45 = vadd.f32 %v3058_v18, %v3057_v17 }
 0x438   : > { %v3079_v7 = vrot.slane %v3078_v35, 1  ;;  %v2943_v50 = vrot.slane %v2942_v34, 1  ;;  %v2952_v31 = vsel %vm2923_vm12, %v12320_v39, 0.0  ;;  %v13179_v0 = vsel %vm15637_vm13, %v15800_v16, 0.0 }
 0x439   : > { %v13181_v47 = vmul.f32 0.015625, %v3009_v9  ;;  %v2951_v57 = vadd.f32 %v2950_v29, %v2949_v13  ;;  %v3894_v26 = vsel %vm15636_vm14, %v15791_v59, %v13159_v48  ;;  %v3110_v23 = vmul.f32 0.125, %v3066_v56 }
 0x43a   : > { %v3071_v51 = vadd.f32 %v3070_v63, %v3069_v20  ;;  %v2962_v1 = vrot.slane %v2961_v46, 2  ;;  %v3081_v60 = vsel %vm15637_vm13, %v15801_v27, 0.0  ;;  %v3090_v37 = vadd.f32 %v3089_v36, %v3088_v10 }
 0x43b   : > { %v2953_v8 = vrot.slane %v2952_v31, 4  ;;  %v3109_v52 = vmul.f32 0.125, %v3059_v45  ;;  %v2980_v17 = vmul.f32 0.125, %v2930_v4  ;;  %v3080_v61 = vadd.f32 %v3079_v7, %v3078_v35 }
 0x43c   : > { %v2944_v49 = vadd.f32 %v2943_v50, %v2942_v34  ;;  %v3910_v59 = vsel %vm15634_vm15, %v3901_v41, %v13181_v47  ;;  %v2983_v13 = vmul.f32 0.125, %v2951_v57  ;;  %v3082_v3 = vrot.slane %v3081_v60, 4 }
 0x43d   : > { %v3918_v20 = vsel %vm15633_vm1, %v3910_v59, %v3110_v23  ;;  %v3900_v2 = vsel %vm15635_vm0, %v3892_v43, %v2980_v17  ;;  %v3072_v40 = vrot.slane %v3071_v51, 1  ;;  %v2963_v53 = vadd.f32 %v2962_v1, %v2961_v46 }
 0x43e   : > { %v3909_v42 = vsel %vm15634_vm15, %v3900_v2, %v13181_v47  ;;  %v3903_v18 = vsel %vm15635_vm0, %v3895_v58, %v2983_v13  ;;  %v3091_v35 = vrot.slane %v3090_v37, 2  ;;  %v2954_v34 = vadd.f32 %v2953_v8, %v2952_v31 }
 0x43f   : > { %v3917_v11 = vsel %vm15633_vm1, %v3909_v42, %v3109_v52  ;;  %v3112_v10 = vmul.f32 0.125, %v3080_v61  ;;  %v3912_v9 = vsel %vm15634_vm15, %v3903_v18, %v13181_v47  ;;  %v2982_v29 = vmul.f32 0.125, %v2944_v49 }
 0x440   : > { %v3083_v4 = vadd.f32 %v3082_v3, %v3081_v60  ;;  %v2973_v43 = vsel %vm2923_vm12, %v12332_v14, 0.0  ;;  %v3073_v45 = vadd.f32 %v3072_v40, %v3071_v51  ;;  %v2964_v7 = vrot.slane %v2963_v53, 1 }
 0x441   : > { %v3092_v16 = vadd.f32 %v3091_v35, %v3090_v37  ;;  %v2955_v57 = vrot.slane %v2954_v34, 2  ;;  %v3920_v27 = vsel %vm15633_vm1, %v3912_v9, %v3112_v10  ;;  %v2974_v60 = vrot.slane %v2973_v43, 4 }
 0x442   : > { %v3103_v8 = vrot.slane %v13179_v0, 4  ;;  %v3902_v17 = vsel %vm15635_vm0, %v3894_v26, %v2982_v29  ;;  %v3084_v61 = vrot.slane %v3083_v4, 2  ;;  %v3111_v13 = vmul.f32 0.125, %v3073_v45 }
 0x443   : > { %v3093_v2 = vrot.slane %v3092_v16, 1  ;;  %v2956_v40 = vadd.f32 %v2955_v57, %v2954_v34  ;;  %v2975_v18 = vadd.f32 %v2974_v60, %v2973_v43  ;;  %v13244_v9 = vsub.f32 %v13085_v28, %v13092_v30 }
 0x444   : > { %v3085_v10 = vadd.f32 %v3084_v61, %v3083_v4  ;;  %v3104_v29 = vadd.f32 %v3103_v8, %v13179_v0  ;;  %v2966_v28 = vsel %vm2923_vm12, %v15794_v33, 0.0  ;;  %v3095_v57 = vsel %vm15637_vm13, %v15780_v54, 0.0 }
 0x445   : > { %v2976_v45 = vrot.slane %v2975_v18, 2  ;;  %v2967_v8 = vrot.slane %v2966_v28, 4  ;;  %v3897_v54 = vsel %vm15636_vm14, %v15793_v15, %v13159_v48 }
 0x446   : > { %v3105_v60 = vrot.slane %v3104_v29, 2 }
 0x447   : > { %v2968_v15 = vadd.f32 %v2967_v8, %v2966_v28 }
 0x454   : > { %v13188_v21 = vpop.permute.xlu0 %3856 }
 0x455   : > { %v3927_v41 = vsel %vm15632_vm3, %v3918_v20, %v13188_v21  ;;  %v3926_v46 = vsel %vm15632_vm3, %v3917_v11, %v13188_v21  ;;  %v3929_v51 = vsel %vm15632_vm3, %v3920_v27, %v13188_v21  ;;  %v2965_v20 = vadd.f32 %v2964_v7, %v2963_v53 }
 0x456   : > { %v3911_v11 = vsel %vm15634_vm15, %v3902_v17, %v13181_v47  ;;  %v13264_v27 = vand.u32 4294901760, %v13244_v9 }
 0x457   : > { %v3919_v34 = vsel %vm15633_vm1, %v3911_v11, %v3111_v13  ;;  %v2985_v43 = vmul.f32 0.125, %v2965_v20  ;;  %v3096_v20 = vrot.slane %v3095_v57, 4 }
 0x458   : > { %v3928_v0 = vsel %vm15632_vm3, %v3919_v34, %v13188_v21 }
 0x464   : > { %v3870_v56 = vpop.permute.xlu0 %3869  ;;  %v3868_v63 = vpop.permute.xlu1 %3867 }
 0x465   : > { %v13207_v58 = vsel %vm15631_vm4, %v3927_v41, %v3870_v56  ;;  %v13210_v36 = vsel %vm15631_vm4, %v3926_v46, %v3868_v63  ;;  %v3094_v63 = vadd.f32 %v3093_v2, %v3092_v16  ;;  %v2957_v46 = vrot.slane %v2956_v40, 1 }
 0x466   : > { %15802 = vst [vmem:[#allocation27_spill] sm:$0xff] %v13207_v58  ;;  %15803 = vst [vmem:[#allocation31_spill] sm:$0xff] %v13210_v36  ;;  %v3967_v50 = vsel %vm15630_vm5, %v13207_v58, 0  ;;  %v3964_v31 = vsel %vm15630_vm5, %v13210_v36, 0  ;;  %v3905_v2 = vsel %vm15635_vm0, %v3897_v54, %v2985_v43  ;;  %v3097_v43 = vadd.f32 %v3096_v20, %v3095_v57 }
 0x467   : > { %v13216_v23 = vand.u32 4294901760, %v3967_v50  ;;  %v13218_v1 = vand.u32 4294901760, %v3964_v31  ;;  %v2958_v17 = vadd.f32 %v2957_v46, %v2956_v40  ;;  %v4185_v40 = vsub.f32 %v13244_v9, %v13264_v27 }
 0x468   : > { %v3874_v52 = vpop.permute.xlu0 %3873  ;;  %v3914_v34 = vsel %vm15634_vm15, %v3905_v2, %v13181_v47  ;;  %v2969_v57 = vrot.slane %v2968_v15, 2 }
 0x469   : > { %v13226_v49 = vsub.f32 %v3967_v50, %v13216_v23  ;;  %v13229_v37 = vsub.f32 %v3964_v31, %v13218_v1  ;;  %v13232_v59 = vsel %vm15631_vm4, %v3929_v51, %v3874_v52  ;;  %v3086_v31 = vrot.slane %v3085_v10, 1 }
 0x46a   : > { %15804 = vst [vmem:[#allocation32_spill] sm:$0xff] %v13232_v59  ;;  %v3973_v3 = vsel %vm15630_vm5, %v13232_v59, 0  ;;  %v3114_v51 = vmul.f32 0.125, %v3094_v63  ;;  %v2984_v63 = vmul.f32 0.125, %v2958_v17  ;;  %v3098_v17 = vrot.slane %v3097_v43, 2 }
 0x46b   : > { %v4071_v42 = vand.u32 4294901760, %v13226_v49  ;;  %v13237_v26 = vand.u32 4294901760, %v3973_v3  ;;  %v4061_v35 = vand.u32 4294901760, %v13229_v37  ;;  %v3087_v11 = vadd.f32 %v3086_v31, %v3085_v10 }
 0x46d   : > { %v4072_v53 = vsub.f32 %v13226_v49, %v4071_v42  ;;  %v4062_v56 = vsub.f32 %v13229_v37, %v4061_v35  ;;  %v13255_v41 = vsub.f32 %v3973_v3, %v13237_v26  ;;  %v2977_v3 = vadd.f32 %v2976_v45, %v2975_v18 }
 0x46e   : > { %v3922_v18 = vsel %vm15633_vm1, %v3914_v34, %v3114_v51  ;;  %v3113_v28 = vmul.f32 0.125, %v3087_v11 }
 0x46f   : > { %v4073_v4 = vand.u32 4294901760, %v4072_v53  ;;  %v4063_v7 = vand.u32 4294901760, %v4062_v56  ;;  %v4091_v61 = vand.u32 4294901760, %v13255_v41  ;;  %v3106_v56 = vadd.f32 %v3105_v60, %v3104_v29 }
 0x470   : > { %v3931_v46 = vsel %vm15632_vm3, %v3922_v18, %v13188_v21  ;;  %v2970_v18 = vadd.f32 %v2969_v57, %v2968_v15 }
 0x471   : > { %v3872_v50 = vpop.permute.xlu1 %3871  ;;  %10026 = vmatprep.mubr.f32.mxu0 %v4063_v7  ;;  %v3896_v7 = vsel %vm15636_vm14, %v12320_v39, %v13159_v48  ;;  %v3107_v31 = vrot.slane %v3106_v56, 1 }
 0x472   : > { %v13267_v16 = vsel %vm15631_vm4, %v3928_v0, %v3872_v50  ;;  %10027 = vmatmul.mubr.f32.vlgmr.msra.gmra.mrb[8].mxu0 %v4073_v4  ;;  %v2978_v4 = vrot.slane %v2977_v3, 1  ;;  %v4186_v50 = vand.u32 4294901760, %v4185_v40  ;;  %v3904_v8 = vsel %vm15635_vm0, %v3896_v7, %v2984_v63 }
 0x473   : > { %15805 = vst [vmem:[#allocation34_spill] sm:$0xff] %v13267_v16  ;;  %v3970_v52 = vsel %vm15630_vm5, %v13267_v16, 0  ;;  %10651 = vmatpush3.bf16.msra.mxu0 %v13112_v19  ;;  %v4092_v19 = vsub.f32 %v13255_v41, %v4091_v61  ;;  %v3913_v39 = vsel %vm15634_vm15, %v3904_v8, %v13181_v47  ;;  %v3108_v34 = vadd.f32 %v3107_v31, %v3106_v56 }
 0x474   : > { %v13272_v13 = vand.u32 4294901760, %v3970_v52  ;;  %10653 = vmatprep.subr.bf16.mxu0 %v13129_v55  ;;  %v2979_v51 = vadd.f32 %v2978_v4, %v2977_v3  ;;  %v3921_v2 = vsel %vm15633_vm1, %v3913_v39, %v3113_v28  ;;  %v2971_v56 = vrot.slane %v2970_v18, 1 }
 0x475   : > { %v3930_v40 = vsel %vm15632_vm3, %v3921_v2, %v13188_v21  ;;  %v3116_v4 = vmul.f32 0.125, %v3108_v34  ;;  %v3899_v28 = vsel %vm15636_vm14, %v12332_v14, %v13159_v48 }
 0x476   : > { %v13283_v53 = vsub.f32 %v3970_v52, %v13272_v13  ;;  %v4093_v52 = vand.u32 4294901760, %v4092_v19  ;;  %v2987_v3 = vmul.f32 0.125, %v2979_v51  ;;  %v3099_v19 = vadd.f32 %v3098_v17, %v3097_v43 }
 0x477   : > { %v3878_v10 = vpop.permute.xlu0 %3877  ;;  %10655 = vmatpush3.bf16.msra.mxu0 %v13129_v55 }
 0x478   : > { %v4081_v45 = vand.u32 4294901760, %v13283_v53  ;;  %v13296_v29 = vsel %vm15631_vm4, %v3931_v46, %v3878_v10  ;;  %10657 = vmatprep.subr.bf16.mxu0 %v13135_v22  ;;  %v3907_v7 = vsel %vm15635_vm0, %v3899_v28, %v2987_v3 }
 0x479   : > { %15806 = vst [vmem:[#allocation16_spill] sm:$0xff] %v13296_v29  ;;  %v3979_v0 = vsel %vm15630_vm5, %v13296_v29, 0 }
 0x47a   : > { %v4082_v55 = vsub.f32 %v13283_v53, %v4081_v45  ;;  %v13307_v60 = vand.u32 4294901760, %v3979_v0 }
 0x47b   : > { %10659 = vmatpush3.bf16.msra.mxu0 %v13135_v22 }
 0x47c   : > { %v4083_v54 = vand.u32 4294901760, %v4082_v55  ;;  %v13314_v20 = vsub.f32 %v3979_v0, %v13307_v60  ;;  %10050 = vmatprep.subr.mxu0 %v4186_v50  ;;  %v3100_v0 = vrot.slane %v3099_v19, 1  ;;  %v2972_v55 = vadd.f32 %v2971_v56, %v2970_v18 }
 0x47d   : > { %v3876_v11 = vpop.permute.xlu1 %3875  ;;  %v3898_v18 = vsel %vm15636_vm14, %v15794_v33, %v13159_v48 }
 0x47e   : > { %10029 = vmatprep.mubr.f32.mxu0 %v4083_v54  ;;  %v13320_v63 = vsel %vm15631_vm4, %v3930_v40, %v3876_v11  ;;  %v4111_v10 = vand.u32 4294901760, %v13314_v20  ;;  %v3101_v51 = vadd.f32 %v3100_v0, %v3099_v19  ;;  %v2986_v11 = vmul.f32 0.125, %v2972_v55 }
 0x47f   : > { %15807 = vst [vmem:[#allocation30_spill] sm:$0xff] %v13320_v63  ;;  %10030 = vmatmul.mubr.f32.gmra.mrb[10].mxu0 %v4093_v52  ;;  %v3976_v22 = vsel %vm15630_vm5, %v13320_v63, 0 }
 0x480   : > { %10051 = vmatpush3.msra.mxu0 %v4186_v50  ;;  %v13325_v46 = vand.u32 4294901760, %v3976_v22  ;;  %v4112_v43 = vsub.f32 %v13314_v20, %v4111_v10  ;;  %v3916_v50 = vsel %vm15634_vm15, %v3907_v7, %v13181_v47  ;;  %v3115_v34 = vmul.f32 0.125, %v3101_v51 }
 0x481   : > { %10661 = vmatprep.subr.bf16.mxu0 %v13117_v24  ;;  %v3924_v57 = vsel %vm15633_vm1, %v3916_v50, %v3116_v4 }
 0x482   : > { %v13329_v15 = vsub.f32 %v3976_v22, %v13325_v46  ;;  %v3933_v52 = vsel %vm15632_vm3, %v3924_v57, %v13188_v21  ;;  %v4113_v17 = vand.u32 4294901760, %v4112_v43  ;;  %v3906_v22 = vsel %vm15635_vm0, %v3898_v18, %v2986_v11 }
 0x483   : > { %v3915_v19 = vsel %vm15634_vm15, %v3906_v22, %v13181_v47 }
 0x484   : > { %v4101_v31 = vand.u32 4294901760, %v13329_v15  ;;  %v3923_v4 = vsel %vm15633_vm1, %v3915_v19, %v3115_v34 }
 0x485   : > { %v3932_v28 = vsel %vm15632_vm3, %v3923_v4, %v13188_v21 }
 0x486   : > { %v4102_v14 = vsub.f32 %v13329_v15, %v4101_v31 }
 0x487   : > { %v3882_v8 = vpop.permute.xlu0 %3881 }
 0x488   : > { %v13348_v39 = vsel %vm15631_vm4, %v3933_v52, %v3882_v8  ;;  %v4103_v2 = vand.u32 4294901760, %v4102_v14  ;;  %v9300_v14 = vld [vmem:[%s15580_s6] ss:$0 sm:$0xff] }
 0x489   : > { %15808 = vst [vmem:[#allocation18_spill] sm:$0xff] %v13348_v39  ;;  %v3985_v54 = vsel %vm15630_vm5, %v13348_v39, 0 }
 0x48a   : > { %v13352_v40 = vand.u32 4294901760, %v3985_v54  ;;  %10032 = vmatprep.mubr.f32.mxu0 %v4103_v2 }
 0x48b   : > { %10033 = vmatmul.mubr.f32.gmra.mrb[12].mxu0 %v4113_v17 }
 0x48c   : > { %v4130_v3 = vsub.f32 %v3985_v54, %v13352_v40 }
 0x48e   : > { %v4131_v33 = vand.u32 4294901760, %v4130_v3 }
 0x490   : > { %v4132_v50 = vsub.f32 %v4130_v3, %v4131_v33 }
 0x491   : > { %v3880_v56 = vpop.permute.xlu1 %3879 }
 0x492   : > { %v13365_v7 = vsel %vm15631_vm4, %v3932_v28, %v3880_v56  ;;  %v4133_v55 = vand.u32 4294901760, %v4132_v50 }
 0x493   : > { %15809 = vst [vmem:[#allocation10_spill] sm:$0xff] %v13365_v7  ;;  %v3982_v0 = vsel %vm15630_vm5, %v13365_v7, 0 }
 0x494   : > { %v13369_v48 = vand.u32 4294901760, %v3982_v0 }
 0x496   : > { %v4120_v43 = vsub.f32 %v3982_v0, %v13369_v48 }
 0x498   : > { %v4121_v57 = vand.u32 4294901760, %v4120_v43 }
 0x49a   : > { %v4122_v47 = vsub.f32 %v4120_v43, %v4121_v57 }
 0x49c   : > { %v4123_v8 = vand.u32 4294901760, %v4122_v47 }
 0x49e   : > { %10035 = vmatprep.mubr.f32.mxu0 %v4123_v8 }
 0x49f   : > { %10036 = vmatmul.mubr.f32.gmra.mrb[14].mxu0 %v4133_v55 }
 0x4a0   : > { %10052 = vmatprep.mubr.f32.mxu0 %v13218_v1 }
 0x4a3   : > { %10053 = vmatmul.mubr.f32.vlgmr.msra.gmra.mrb[8].mxu0 %v13216_v23 }
 0x4a4   : > { %10663 = vmatpush3.bf16.msra.mxu0 %v13117_v24  ;;  %10055 = vmatprep.mubr.f32.mxu0 %v13272_v13 }
 0x4a5   : > { %10665 = vmatprep.subr.bf16.mxu0 %v13119_v62 }
 0x4a7   : > { %10056 = vmatmul.mubr.f32.gmra.mrb[10].mxu0 %v13237_v26 }
 0x4a8   : > { %10667 = vmatpush3.bf16.msra.mxu0 %v13119_v62  ;;  %10058 = vmatprep.mubr.f32.mxu0 %v13325_v46  ;;  %v3953_v62 = vld [vmem:[%s15581_s7 + $0x10] sm:$0xff] }
 0x4a9   : > { %10669 = vmatprep.subr.bf16.mxu0 %v13123_v5 }
 0x4ab   : > { %10059 = vmatmul.mubr.f32.gmra.mrb[12].mxu0 %v13307_v60 }
 0x4ac   : > { %10671 = vmatpush3.bf16.msra.mxu0 %v13123_v5  ;;  %10061 = vmatprep.mubr.f32.mxu0 %v13369_v48  ;;  %v3954_v5 = vld [vmem:[%s15581_s7 + $0x18] sm:$0xff] }
 0x4ad   : > { %10076 = vmatprep.subr.mxu0 %v13244_v9 }
 0x4af   : > { %10062 = vmatmul.mubr.f32.gmra.mrb[14].mxu0 %v13352_v40 }
 0x4b0   : > { %10077 = vmatpush3.msra.mxu0 %v13244_v9  ;;  %10078 = vmatprep.mubr.f32.mxu0 %v13229_v37 }
 0x4b1   : > { %10673 = vmatprep.subr.bf16.mxu0 %v13052_v38 }
 0x4b3   : > { %10079 = vmatmul.mubr.f32.vlgmr.msra.gmra.mrb[8].mxu0 %v13226_v49 }
 0x4b4   : > { %10675 = vmatpush3.bf16.msra.mxu0 %v13052_v38  ;;  %10081 = vmatprep.mubr.f32.mxu0 %v13283_v53 }
 0x4b5   : > { %10677 = vmatprep.subr.bf16.mxu0 %v13067_v25 }
 0x4b7   : > { %10082 = vmatmul.mubr.f32.gmra.mrb[10].mxu0 %v13255_v41 }
 0x4b8   : > { %10679 = vmatpush3.bf16.msra.mxu0 %v13067_v25  ;;  %10084 = vmatprep.mubr.f32.mxu0 %v13329_v15 }
 0x4b9   : > { %10681 = vmatprep.subr.bf16.mxu0 %v13078_v32 }
 0x4bb   : > { %10085 = vmatmul.mubr.f32.gmra.mrb[12].mxu0 %v13314_v20 }
 0x4bc   : > { %10683 = vmatpush3.bf16.msra.mxu0 %v13078_v32  ;;  %10087 = vmatprep.mubr.f32.mxu0 %v4120_v43 }
 0x4bd   : > { %10102 = vmatprep.subr.mxu0 %v13092_v30 }
 0x4bf   : > { %10088 = vmatmul.mubr.f32.gmra.mrb[14].mxu0 %v4130_v3 }
 0x4c0   : > { %10103 = vmatpush3.msra.mxu0 %v13092_v30  ;;  %10104 = vmatprep.mubr.f32.mxu0 %v4061_v35 }
 0x4c1   : > { %10685 = vmatprep.subr.bf16.mxu0 %v13131_v6 }
 0x4c3   : > { %10105 = vmatmul.mubr.f32.vlgmr.msra.gmra.mrb[8].mxu0 %v4071_v42 }
 0x4c4   : > { %10687 = vmatpush3.bf16.msra.mxu0 %v13131_v6  ;;  %10107 = vmatprep.mubr.f32.mxu0 %v4081_v45  ;;  %v4857_v6 = vand.u32 4294901760, %v3953_v62 }
 0x4c5   : > { %10689 = vmatprep.subr.bf16.mxu0 %v13139_v12 }
 0x4c7   : > { %10108 = vmatmul.mubr.f32.gmra.mrb[10].mxu0 %v4091_v61 }
 0x4c8   : > { %10691 = vmatpush3.bf16.msra.mxu0 %v13139_v12  ;;  %10110 = vmatprep.mubr.f32.mxu0 %v4101_v31  ;;  %v4860_v12 = vand.u32 4294901760, %v3954_v5 }
 0x4c9   : > { %10693 = vmatprep.subr.bf16.mxu0 %v13149_v44 }
 0x4ca   : > { %v5022_v35 = vsub.f32 %v3954_v5, %v4860_v12 }
 0x4cb   : > { %10111 = vmatmul.mubr.f32.gmra.mrb[12].mxu0 %v4111_v10 }
 0x4cc   : > { %10695 = vmatpush3.bf16.msra.mxu0 %v13149_v44  ;;  %10113 = vmatprep.mubr.f32.mxu0 %v4121_v57  ;;  %v13461_v44 = vpack.c.bf16 %v4860_v12, %v4857_v6  ;;  %v5023_v61 = vand.u32 4294901760, %v5022_v35 }
 0x4cd   : > { %10128 = vmatprep.subr.mxu0 %v13264_v27 }
 0x4ce   : > { %v5024_v45 = vsub.f32 %v5022_v35, %v5023_v61 }
 0x4cf   : > { %10114 = vmatmul.mubr.f32.gmra.mrb[14].mxu0 %v4131_v33 }
 0x4d0   : > { %10129 = vmatpush3.msra.mxu0 %v13264_v27  ;;  %10130 = vmatprep.mubr.f32.mxu0 %v13218_v1  ;;  %v5025_v20 = vand.u32 4294901760, %v5024_v45 }
 0x4d1   : > { %10697 = vmatprep.subr.bf16.mxu0 %v13052_v38 }
 0x4d3   : > { %10131 = vmatmul.mubr.f32.vlgmr.msra.gmra.mrb[8].mxu0 %v13216_v23 }
 0x4d4   : > { %10699 = vmatpush3.bf16.msra.mxu0 %v13052_v38  ;;  %10133 = vmatprep.mubr.f32.mxu0 %v13272_v13  ;;  %v3951_v38 = vld [vmem:[%s15581_s7] sm:$0xff] }
 0x4d5   : > { %10701 = vmatprep.subr.bf16.mxu0 %v13067_v25 }
 0x4d7   : > { %10134 = vmatmul.mubr.f32.gmra.mrb[10].mxu0 %v13237_v26 }
 0x4d8   : > { %10703 = vmatpush3.bf16.msra.mxu0 %v13067_v25  ;;  %10136 = vmatprep.mubr.f32.mxu0 %v13325_v46  ;;  %v3952_v25 = vld [vmem:[%s15581_s7 + $0x8] sm:$0xff] }
 0x4d9   : > { %10705 = vmatprep.subr.bf16.mxu0 %v13078_v32 }
 0x4db   : > { %10137 = vmatmul.mubr.f32.gmra.mrb[12].mxu0 %v13307_v60 }
 0x4dc   : > { %10707 = vmatpush3.bf16.msra.mxu0 %v13078_v32  ;;  %10139 = vmatprep.mubr.f32.mxu0 %v13369_v48  ;;  %v4851_v32 = vand.u32 4294901760, %v3951_v38 }
 0x4dd   : > { %10154 = vmatprep.subr.mxu0 %v13092_v30 }
 0x4de   : > { %v5001_v21 = vsub.f32 %v3951_v38, %v4851_v32 }
 0x4df   : > { %10140 = vmatmul.mubr.f32.gmra.mrb[14].mxu0 %v13352_v40 }
 0x4e0   : > { %10155 = vmatpush3.msra.mxu0 %v13092_v30  ;;  %10156 = vmatprep.mubr.f32.mxu0 %v13218_v1  ;;  %v4854_v30 = vand.u32 4294901760, %v3952_v25  ;;  %v5002_v1 = vand.u32 4294901760, %v5001_v21 }
 0x4e2   : > { %v13451_v24 = vpack.c.bf16 %v4854_v30, %v4851_v32  ;;  %v5003_v37 = vsub.f32 %v5001_v21, %v5002_v1 }
 0x4e3   : > { %10157 = vmatmul.mubr.f32.vlgmr.msra.gmra.mrb[8].mxu0 %v13216_v23  ;;  %v5008_v23 = vsub.f32 %v3952_v25, %v4854_v30 }
 0x4e4   : > { %10159 = vmatprep.mubr.f32.mxu0 %v13272_v13  ;;  %10709 = vmatprep.subr.bf16.mxu1 %v13451_v24  ;;  %v5004_v9 = vand.u32 4294901760, %v5003_v37 }
 0x4e5   : > { %10711 = vmatpush3.bf16.msra.mxu1 %v13451_v24  ;;  %v5009_v49 = vand.u32 4294901760, %v5008_v23  ;;  %v13468_v10 = vpack.c.bf16 %v5008_v23, %v5001_v21 }
 0x4e6   : > { %10713 = vmatprep.subr.bf16.mxu1 %v13461_v44 }
 0x4e7   : > { %10160 = vmatmul.mubr.f32.gmra.mrb[10].mxu0 %v13237_v26  ;;  %v5010_v42 = vsub.f32 %v5008_v23, %v5009_v49  ;;  %v5015_v26 = vsub.f32 %v3953_v62, %v4857_v6  ;;  %v13474_v31 = vpack.c.bf16 %v5009_v49, %v5002_v1 }
 0x4e8   : > { %10162 = vmatprep.mubr.f32.mxu0 %v13325_v46 }
 0x4e9   : > { %10715 = vmatpush3.bf16.msra.mxu1 %v13461_v44  ;;  %v5011_v41 = vand.u32 4294901760, %v5010_v42  ;;  %v5016_v27 = vand.u32 4294901760, %v5015_v26  ;;  %v13472_v15 = vpack.c.bf16 %v5022_v35, %v5015_v26 }
 0x4eb   : > { %10163 = vmatmul.mubr.f32.gmra.mrb[12].mxu0 %v13307_v60  ;;  %v13465_v13 = vpack.c.bf16 %v5011_v41, %v5004_v9  ;;  %v5017_v53 = vsub.f32 %v5015_v26, %v5016_v27  ;;  %v13476_v52 = vpack.c.bf16 %v5023_v61, %v5016_v27 }
 0x4ec   : > { %10165 = vmatprep.mubr.f32.mxu0 %v13369_v48 }
 0x4ed   : > { %10717 = vmatprep.subr.bf16.mxu1 %v13465_v13  ;;  %v5018_v60 = vand.u32 4294901760, %v5017_v53 }
 0x4ef   : > { %10166 = vmatmul.mubr.f32.gmra.mrb[14].mxu0 %v13352_v40  ;;  %v13470_v46 = vpack.c.bf16 %v5025_v20, %v5018_v60 }
 0x5b6   : > { %v10158_v51 = vpop.f32.mrb[8].mxu0 }
 0x5b7   : > { %v10892_v17 = vadd.f32 %v10158_v51, %v9300_v14  ;;  %v4766_v54 = vpop.f32.mrb[9].mxu0 }
 0x5b8   : > { %v10893_v2 = vadd.f32 %v9300_v14, %v4766_v54 }
 0x5b9   : > { %v4813_v11 = vmax.f32 %v10892_v17, 0.0 }
 0x5ba   : > { %v4812_v40 = vmax.f32 %v10893_v2, 0.0  ;;  %v10161_v34 = vpop.f32.mrb[10].mxu0 }
 0x5bb   : > { %v4830_v18 = vsel %vm15633_vm1, %v4813_v11, 0  ;;  %v10894_v22 = vadd.f32 %v10161_v34, %v9300_v14  ;;  %v4778_v3 = vpop.f32.mrb[11].mxu0 }
 0x5bc   : > { %v13482_v19 = vand.u32 4294901760, %v4830_v18  ;;  %v4827_v4 = vsel %vm15633_vm1, %v4812_v40, 0  ;;  %v10895_v56 = vadd.f32 %v9300_v14, %v4778_v3 }
 0x5bd   : > { %v13485_v28 = vand.u32 4294901760, %v4827_v4  ;;  %v4815_v0 = vmax.f32 %v10894_v22, 0.0 }
 0x5be   : > { %v13488_v33 = vsub.f32 %v4830_v18, %v13482_v19  ;;  %v4814_v48 = vmax.f32 %v10895_v56, 0.0  ;;  %v10164_v43 = vpop.f32.mrb[12].mxu0 }
 0x5bf   : > { %v13491_v50 = vsub.f32 %v4827_v4, %v13485_v28  ;;  %v4836_v57 = vsel %vm15633_vm1, %v4815_v0, 0  ;;  %v10896_v47 = vadd.f32 %v10164_v43, %v9300_v14  ;;  %v4790_v55 = vpop.f32.mrb[13].mxu0 }
 0x5c0   : > { %v4931_v8 = vand.u32 4294901760, %v13488_v33  ;;  %v13495_v38 = vand.u32 4294901760, %v4836_v57  ;;  %v4833_v25 = vsel %vm15633_vm1, %v4814_v48, 0  ;;  %v10897_v32 = vadd.f32 %v9300_v14, %v4790_v55 }
 0x5c1   : > { %v13498_v30 = vand.u32 4294901760, %v4833_v25  ;;  %v4817_v62 = vmax.f32 %v10896_v47, 0.0  ;;  %v4921_v5 = vand.u32 4294901760, %v13491_v50 }
 0x5c2   : > { %v4932_v6 = vsub.f32 %v13488_v33, %v4931_v8  ;;  %v13505_v12 = vsub.f32 %v4836_v57, %v13495_v38  ;;  %v4816_v21 = vmax.f32 %v10897_v32, 0.0  ;;  %v10167_v23 = vpop.f32.mrb[14].mxu0 }
 0x5c3   : > { %v13508_v1 = vsub.f32 %v4833_v25, %v13498_v30  ;;  %v4842_v49 = vsel %vm15633_vm1, %v4817_v62, 0  ;;  %v10898_v37 = vadd.f32 %v10167_v23, %v9300_v14  ;;  %v4802_v42 = vpop.f32.mrb[15].mxu0  ;;  %v4922_v26 = vsub.f32 %v13491_v50, %v4921_v5 }
 0x5c4   : > { %v13514_v35 = vand.u32 4294901760, %v4842_v49  ;;  %v4839_v9 = vsel %vm15633_vm1, %v4816_v21, 0  ;;  %v10899_v41 = vadd.f32 %v9300_v14, %v4802_v42  ;;  %v4933_v60 = vand.u32 4294901760, %v4932_v6 }
 0x5c5   : > { %v13517_v27 = vand.u32 4294901760, %v4839_v9  ;;  %v4819_v61 = vmax.f32 %v10898_v37, 0.0  ;;  %v4923_v53 = vand.u32 4294901760, %v4922_v26  ;;  %v4941_v45 = vand.u32 4294901760, %v13508_v1 }
 0x5c6   : > { %v13521_v20 = vsub.f32 %v4842_v49, %v13514_v35  ;;  %v4818_v51 = vmax.f32 %v10899_v41, 0.0  ;;  %v4951_v17 = vand.u32 4294901760, %v13505_v12 }
 0x5c7   : > { %v13525_v54 = vsub.f32 %v4839_v9, %v13517_v27  ;;  %v4848_v2 = vsel %vm15633_vm1, %v4819_v61, 0  ;;  %10176 = vmatprep.mubr.f32.mxu1 %v4923_v53  ;;  %v4942_v14 = vsub.f32 %v13508_v1, %v4941_v45 }
 0x5c8   : > { %v13531_v11 = vand.u32 4294901760, %v4848_v2  ;;  %v4845_v40 = vsel %vm15633_vm1, %v4818_v51, 0  ;;  %10177 = vmatmul.mubr.f32.vlgmr.msra.gmra.mrb[8].mxu1 %v4933_v60  ;;  %v4952_v34 = vsub.f32 %v13505_v12, %v4951_v17  ;;  %v4971_v18 = vand.u32 4294901760, %v13521_v20 }
 0x5c9   : > { %v13538_v22 = vand.u32 4294901760, %v4845_v40  ;;  %10719 = vmatpush3.bf16.msra.mxu1 %v13465_v13  ;;  %v4943_v3 = vand.u32 4294901760, %v4942_v14  ;;  %v4961_v4 = vand.u32 4294901760, %v13525_v54 }
 0x5ca   : > { %v4990_v56 = vsub.f32 %v4848_v2, %v13531_v11  ;;  %v4953_v0 = vand.u32 4294901760, %v4952_v34  ;;  %10721 = vmatprep.subr.bf16.mxu1 %v13470_v46  ;;  %v4972_v48 = vsub.f32 %v13521_v20, %v4971_v18 }
 0x5cb   : > { %v4980_v43 = vsub.f32 %v4845_v40, %v13538_v22  ;;  %10179 = vmatprep.mubr.f32.mxu1 %v4943_v3  ;;  %v4962_v57 = vsub.f32 %v13525_v54, %v4961_v4 }
 0x5cc   : > { %10180 = vmatmul.mubr.f32.gmra.mrb[10].mxu1 %v4953_v0  ;;  %v4991_v47 = vand.u32 4294901760, %v4990_v56  ;;  %v4973_v25 = vand.u32 4294901760, %v4972_v48  ;;  %v15813_v0 = vmov 2102212464  }
 0x5cd   : > { %v4963_v55 = vand.u32 4294901760, %v4962_v57  ;;  %10723 = vmatpush3.bf16.msra.mxu1 %v13470_v46  ;;  %v4981_v13 = vand.u32 4294901760, %v4980_v43 }
 0x5ce   : > { %v4992_v32 = vsub.f32 %v4990_v56, %v4991_v47  ;;  %10725 = vmatprep.subr.bf16.mxu1 %v13468_v10 }
 0x5cf   : > { %10182 = vmatprep.mubr.f32.mxu1 %v4963_v55  ;;  %v4982_v62 = vsub.f32 %v4980_v43, %v4981_v13 }
 0x5d0   : > { %10183 = vmatmul.mubr.f32.gmra.mrb[12].mxu1 %v4973_v25  ;;  %v4993_v21 = vand.u32 4294901760, %v4992_v32 }
 0x5d1   : > { %v4983_v6 = vand.u32 4294901760, %v4982_v62 }
 0x5d3   : > { %10185 = vmatprep.mubr.f32.mxu1 %v4983_v6  ;;  %v15815_v6 = vmov 1326507024  }
 0x5d4   : > { %10186 = vmatmul.mubr.f32.gmra.mrb[14].mxu1 %v4993_v21 }
 0x5d5   : > { %10196 = vmatprep.mubr.f32.mxu1 %v13485_v28 }
 0x5d8   : > { %10197 = vmatmul.mubr.f32.vlgmr.msra.gmra.mrb[8].mxu1 %v13482_v19 }
 0x5d9   : > { %10727 = vmatpush3.bf16.msra.mxu1 %v13468_v10  ;;  %10199 = vmatprep.mubr.f32.mxu1 %v13498_v30 }
 0x5da   : > { %10729 = vmatprep.subr.bf16.mxu1 %v13472_v15 }
 0x5dc   : > { %10200 = vmatmul.mubr.f32.gmra.mrb[10].mxu1 %v13495_v38 }
 0x5dd   : > { %10202 = vmatprep.mubr.f32.mxu1 %v13517_v27  ;;  %10731 = vmatpush3.bf16.msra.mxu1 %v13472_v15 }
 0x5de   : > { %10733 = vmatprep.subr.bf16.mxu1 %v13451_v24 }
 0x5e0   : > { %10203 = vmatmul.mubr.f32.gmra.mrb[12].mxu1 %v13514_v35 }
 0x5e1   : > { %10205 = vmatprep.mubr.f32.mxu1 %v13538_v22 }
 0x5e4   : > { %10206 = vmatmul.mubr.f32.gmra.mrb[14].mxu1 %v13531_v11 }
 0x5e5   : > { %10216 = vmatprep.mubr.f32.mxu1 %v13491_v50 }
 0x5e8   : > { %10217 = vmatmul.mubr.f32.vlgmr.msra.gmra.mrb[8].mxu1 %v13488_v33 }
 0x5e9   : > { %10735 = vmatpush3.bf16.msra.mxu1 %v13451_v24  ;;  %10219 = vmatprep.mubr.f32.mxu1 %v13508_v1 }
 0x5ea   : > { %10737 = vmatprep.subr.bf16.mxu1 %v13461_v44 }
 0x5ec   : > { %10220 = vmatmul.mubr.f32.gmra.mrb[10].mxu1 %v13505_v12 }
 0x5ed   : > { %10222 = vmatprep.mubr.f32.mxu1 %v13525_v54  ;;  %10739 = vmatpush3.bf16.msra.mxu1 %v13461_v44 }
 0x5ee   : > { %10741 = vmatprep.subr.bf16.mxu1 %v13474_v31 }
 0x5f0   : > { %10223 = vmatmul.mubr.f32.gmra.mrb[12].mxu1 %v13521_v20 }
 0x5f1   : > { %10225 = vmatprep.mubr.f32.mxu1 %v4980_v43  ;;  %v15814_v43 = vmov 920167782  }
 0x5f4   : > { %10226 = vmatmul.mubr.f32.gmra.mrb[14].mxu1 %v4990_v56 }
 0x5f5   : > { %10236 = vmatprep.mubr.f32.mxu1 %v4921_v5 }
 0x5f8   : > { %10237 = vmatmul.mubr.f32.vlgmr.msra.gmra.mrb[8].mxu1 %v4931_v8 }
 0x5f9   : > { %10743 = vmatpush3.bf16.msra.mxu1 %v13474_v31  ;;  %10239 = vmatprep.mubr.f32.mxu1 %v4941_v45 }
 0x5fa   : > { %10745 = vmatprep.subr.bf16.mxu1 %v13476_v52 }
 0x5fc   : > { %10240 = vmatmul.mubr.f32.gmra.mrb[10].mxu1 %v4951_v17 }
 0x5fd   : > { %10242 = vmatprep.mubr.f32.mxu1 %v4961_v4  ;;  %10747 = vmatpush3.bf16.msra.mxu1 %v13476_v52  ;;  %v15812_v4 = vmov 2131351028  }
 0x5fe   : > { %10749 = vmatprep.subr.bf16.mxu1 %v13451_v24 }
 0x600   : > { %10243 = vmatmul.mubr.f32.gmra.mrb[12].mxu1 %v4971_v18 }
 0x601   : > { %10245 = vmatprep.mubr.f32.mxu1 %v4981_v13 }
 0x604   : > { %10246 = vmatmul.mubr.f32.gmra.mrb[14].mxu1 %v4991_v47 }
 0x605   : > { %10256 = vmatprep.mubr.f32.mxu1 %v13485_v28 }
 0x608   : > { %10257 = vmatmul.mubr.f32.vlgmr.msra.gmra.mrb[8].mxu1 %v13482_v19 }
 0x609   : > { %10751 = vmatpush3.bf16.msra.mxu1 %v13451_v24  ;;  %10259 = vmatprep.mubr.f32.mxu1 %v13498_v30  ;;  %v13605_v24 = vld [vmem:[%s15582_s8] ss:$0 sm:$0xff] }
 0x60a   : > { %10753 = vmatprep.subr.bf16.mxu1 %v13461_v44 }
 0x60c   : > { %10260 = vmatmul.mubr.f32.gmra.mrb[10].mxu1 %v13495_v38 }
 0x60d   : > { %10262 = vmatprep.mubr.f32.mxu1 %v13517_v27  ;;  %10755 = vmatpush3.bf16.msra.mxu1 %v13461_v44 }
 0x610   : > { %10263 = vmatmul.mubr.f32.gmra.mrb[12].mxu1 %v13514_v35 }
 0x611   : > { %10265 = vmatprep.mubr.f32.mxu1 %v13538_v22 }
 0x614   : > { %10266 = vmatmul.mubr.f32.gmra.mrb[14].mxu1 %v13531_v11 }
 0x615   : > { %10276 = vmatprep.mubr.f32.mxu1 %v13485_v28 }
 0x618   : > { %10277 = vmatmul.mubr.f32.vlgmr.msra.gmra.mrb[8].mxu1 %v13482_v19 }
 0x619   : > { %10279 = vmatprep.mubr.f32.mxu1 %v13498_v30 }
 0x61c   : > { %10280 = vmatmul.mubr.f32.gmra.mrb[10].mxu1 %v13495_v38 }
 0x61d   : > { %10282 = vmatprep.mubr.f32.mxu1 %v13517_v27 }
 0x620   : > { %10283 = vmatmul.mubr.f32.gmra.mrb[12].mxu1 %v13514_v35 }
 0x621   : > { %10285 = vmatprep.mubr.f32.mxu1 %v13538_v22  ;;  %v15811_v22 = vmov 2475754826  }
 0x624   : > { %10286 = vmatmul.mubr.f32.gmra.mrb[14].mxu1 %v13531_v11  ;;  %v15810_v11 = vmov 683565275  }
 0x6eb   : > { %v10278_v44 = vpop.f32.mrb[8].mxu1 }
 0x6ec   : > { %v13608_v10 = vadd.f32 %v10278_v44, %v13605_v24  ;;  %v5590_v46 = vpop.f32.mrb[9].mxu1 }
 0x6ed   : > { %v13611_v15 = vadd.f32 %v13605_v24, %v5590_v46 }
 0x6ee   : > { %v5740_v31 = vand.u32 2147483647, %v13608_v10  ;;  %v5743_v52 = vand.u32 2139095040, %v13608_v10 }
 0x6ef   : > { %v5636_v19 = vand.u32 2147483647, %v13611_v15  ;;  %v5639_v28 = vand.u32 2139095040, %v13611_v15  ;;  %v10281_v33 = vpop.f32.mrb[10].mxu1 }
 0x6f0   : > { %v5744_v50 = vshrl.u32 %v5743_v52, 23  ;;  %v5747_v8 = vand.u32 8388607, %v5740_v31  ;;  %v13620_v38 = vadd.f32 %v10281_v33, %v13605_v24  ;;  %v5602_v30 = vpop.f32.mrb[11].mxu1 }
 0x6f1   : > { %v5640_v5 = vshrl.u32 %v5639_v28, 23  ;;  %v5643_v12 = vand.u32 8388607, %v5636_v19  ;;  %v13627_v20 = vadd.f32 %v13605_v24, %v5602_v30  ;;  %vm13746_vm15 = vcmp.le.f32.partialorder %v5636_v19, 0.7853982 }
 0x6f2   : > { %v9306_v23 = vadd.s32 4294967169, %v5744_v50  ;;  %v5951_v49 = vand.u32 2139095040, %v13620_v38  ;;  %v5748_v37 = vor.u32 8388608, %v5747_v8  ;;  %v5948_v9 = vand.u32 2147483647, %v13620_v38 }
 0x6f3   : > { %v9302_v1 = vadd.s32 4294967169, %v5640_v5  ;;  %v5644_v26 = vor.u32 8388608, %v5643_v12  ;;  %v13646_v47 = vpop.f32.mrb[12].mxu1 }
 0x6f4   : > { %v5750_v42 = vadd.s32 1, %v9306_v23  ;;  %v5952_v41 = vshrl.u32 %v5951_v49, 23  ;;  %v13629_v51 = vshll.u32 %v5748_v37, 8  ;;  %v13637_v2 = vand.u32 8388607, %v5948_v9 }
 0x6f5   : > { %v5646_v35 = vadd.s32 1, %v9302_v1  ;;  %v13633_v54 = vshll.u32 %v5644_v26, 8 }
 0x6f6   : > { %vm5751_vm6 = vcmp.gt.s32.totalorder %v5750_v42, 0  ;;  %v9314_v61 = vadd.s32 4294967169, %v5952_v41 }
 0x6f7   : > { %v5752_v27 = vsel %vm5751_vm6, %v5750_v42, 0  ;;  %vm5647_vm7 = vcmp.gt.s32.totalorder %v5646_v35, 0 }
 0x6f8   : > { %v5753_v53 = vshrl.u32 %v5752_v27, 5  ;;  %v5754_v45 = vand.u32 31, %v5752_v27  ;;  %v5648_v60 = vsel %vm5647_vm7, %v5646_v35, 0  ;;  %v13640_v18 = vadd.s32 1, %v9314_v61 }
 0x6f9   : > { %v13631_v17 = vshrl.u32 %v5648_v60, 5  ;;  %v5650_v34 = vand.u32 31, %v5648_v60 }
 0x6fa   : > { %v5755_v14 = vsub.s32 32, %v5754_v45  ;;  %v5757_v40 = vshll.u32 %v15810_v11, %v5754_v45  ;;  %v5760_v3 = vshll.u32 %v15811_v22, %v5754_v45  ;;  %v5763_v56 = vshll.u32 %v15812_v4, %v5754_v45 }
 0x6fb   : > { %v5766_v48 = vshll.u32 %v15813_v0, %v5754_v45  ;;  %v5769_v57 = vshll.u32 %v15814_v43, %v5754_v45  ;;  %vm5772_vm8 = vcmp.lt.s32.totalorder %v5753_v53, 1  ;;  %vm5773_vm6 = vcmp.lt.s32.totalorder %v5753_v53, 2 }
 0x6fc   : > { %v5758_v55 = vshrl.u32 %v15811_v22, %v5755_v14  ;;  %v5761_v13 = vshrl.u32 %v15812_v4, %v5755_v14  ;;  %v5764_v25 = vshrl.u32 %v15813_v0, %v5755_v14  ;;  %v5756_v32 = vshrl.u32 %v15810_v11, %v5755_v14 }
 0x6fd   : > { %v5767_v62 = vshrl.u32 %v15814_v43, %v5755_v14  ;;  %v5770_v21 = vshrl.u32 %v15815_v6, %v5755_v14  ;;  %v5651_v28 = vsub.s32 32, %v5650_v34  ;;  %vm5774_vm7 = vcmp.lt.s32.totalorder %v5753_v53, 3 }
 0x6fe   : > { %v5759_v44 = vor.u32 %v5758_v55, %v5757_v40  ;;  %v5762_v46 = vor.u32 %v5761_v13, %v5760_v3  ;;  %v5765_v52 = vor.u32 %v5764_v25, %v5763_v56  ;;  %vm5775_vm5 = vcmp.lt.s32.totalorder %v5753_v53, 4 }
 0x6ff   : > { %v5768_v33 = vor.u32 %v5767_v62, %v5766_v48  ;;  %v5771_v50 = vor.u32 %v5770_v21, %v5769_v57  ;;  %v5653_v37 = vshll.u32 %v15810_v11, %v5650_v34  ;;  %v5654_v35 = vshrl.u32 %v15811_v22, %v5651_v28 }
 0x700   : > { %v5776_v8 = vsel %vm5772_vm8, %v5756_v32, %v5759_v44  ;;  %v5777_v30 = vsel %vm5775_vm5, %v5765_v52, 2102212464  ;;  %v5780_v5 = vsel %vm5772_vm8, %v5759_v44, %v5762_v46  ;;  %v5784_v12 = vsel %vm5772_vm8, %v5762_v46, %v5765_v52 }
 0x701   : > { %v5778_v23 = vsel %vm5774_vm7, %v5762_v46, %v5777_v30  ;;  %v5781_v1 = vsel %vm5775_vm5, %v5768_v33, 920167782  ;;  %v5785_v49 = vsel %vm5775_vm5, %v5771_v50, 1326507024  ;;  %v5656_v41 = vshll.u32 %v15811_v22, %v5650_v34 }
 0x702   : > { %v5782_v42 = vsel %vm5774_vm7, %v5765_v52, %v5781_v1  ;;  %v5786_v26 = vsel %vm5774_vm7, %v5768_v33, %v5785_v49  ;;  %v5779_v27 = vsel %vm5773_vm6, %v5776_v8, %v5778_v23  ;;  %v5657_v60 = vshrl.u32 %v15812_v4, %v5651_v28 }
 0x703   : > { %v5783_v61 = vsel %vm5773_vm6, %v5780_v5, %v5782_v42  ;;  %v5787_v45 = vsel %vm5773_vm6, %v5784_v12, %v5786_v26  ;;  %v5655_v48 = vor.u32 %v5654_v35, %v5653_v37  ;;  %v5659_v55 = vshll.u32 %v15812_v4, %v5650_v34 }
 0x704   : > { %v13665_v14 = vmul.u32.u64.low %v13629_v51, %v5787_v45  ;;  %v13666_v40 = vmul.u32.u64.high %v13629_v51, %v5787_v45, %v13665_v14  ;;  %v13669_v3 = vmul.u32.u64.low %v13629_v51, %v5783_v61  ;;  %v13670_v56 = vmul.u32.u64.high %v13629_v51, %v5783_v61, %v13669_v3 }
 0x705   : > { %v5658_v57 = vor.u32 %v5657_v60, %v5656_v41  ;;  %v5660_v13 = vshrl.u32 %v15813_v0, %v5651_v28  ;;  %v5652_v25 = vshrl.u32 %v15810_v11, %v5651_v28  ;;  %v5662_v53 = vshll.u32 %v15813_v0, %v5650_v34 }
 0x706   : > { %v5663_v32 = vshrl.u32 %v15814_v43, %v5651_v28  ;;  %v5666_v62 = vshrl.u32 %v15815_v6, %v5651_v28  ;;  %v5795_v21 = vmul.u32 %v13629_v51, %v5779_v27  ;;  %v5665_v46 = vshll.u32 %v15814_v43, %v5650_v34 }
 0x707   : > { %v5661_v44 = vor.u32 %v5660_v13, %v5659_v55  ;;  %vm5668_vm5 = vcmp.lt.s32.totalorder %v13631_v17, 1  ;;  %vm5797_vm8 = vc.u32 %v13666_v40, %v13669_v3  ;;  %v5798_v52 = vadd.s32 1, %v13670_v56 }
 0x708   : > { %v5664_v33 = vor.u32 %v5663_v32, %v5662_v53  ;;  %vm5669_vm6 = vcmp.lt.s32.totalorder %v13631_v17, 2  ;;  %v5667_v50 = vor.u32 %v5666_v62, %v5665_v46  ;;  %vm5670_vm7 = vcmp.lt.s32.totalorder %v13631_v17, 3  ;;  %v13710_v62 = vpop.f32.mrb[13].mxu1 }
 0x709   : > { %vm5671_vm4 = vcmp.lt.s32.totalorder %v13631_v17, 4  ;;  %v5676_v28 = vsel %vm5668_vm5, %v5655_v48, %v5658_v57  ;;  %v5799_v51 = vsel %vm5797_vm8, %v5798_v52, %v13670_v56  ;;  %v5680_v34 = vsel %vm5668_vm5, %v5658_v57, %v5661_v44 }
 0x70a   : > { %v5673_v8 = vsel %vm5671_vm4, %v5661_v44, 2102212464  ;;  %v5677_v30 = vsel %vm5671_vm4, %v5664_v33, 920167782  ;;  %v5800_v5 = vadd.s32 %v5799_v51, %v5795_v21  ;;  %v5672_v12 = vsel %vm5668_vm5, %v5652_v25, %v5655_v48 }
 0x70b   : > { %v5678_v23 = vsel %vm5670_vm7, %v5661_v44, %v5677_v30  ;;  %v5681_v1 = vsel %vm5671_vm4, %v5667_v50, 1326507024  ;;  %v5674_v49 = vsel %vm5670_vm7, %v5658_v57, %v5673_v8  ;;  %vm5959_vm3 = vcmp.gt.s32.totalorder %v13640_v18, 0 }
 0x70c   : > { %v5679_v37 = vsel %vm5669_vm6, %v5676_v28, %v5678_v23  ;;  %v5682_v42 = vsel %vm5670_vm7, %v5664_v33, %v5681_v1  ;;  %v5801_v26 = vadd.s32 536870912, %v5800_v5  ;;  %v5960_v60 = vsel %vm5959_vm3, %v13640_v18, 0 }
 0x70d   : > { %v5683_v35 = vsel %vm5669_vm6, %v5680_v34, %v5682_v42  ;;  %v13693_v41 = vmul.u32.u64.low %v13633_v54, %v5679_v37  ;;  %v13694_v27 = vmul.u32.u64.high %v13633_v54, %v5679_v37, %v13693_v41  ;;  %v5675_v56 = vsel %vm5669_vm6, %v5672_v12, %v5674_v49 }
 0x70e   : > { %v13698_v61 = vmul.u32.u64.low %v13633_v54, %v5683_v35  ;;  %v13699_v45 = vmul.u32.u64.high %v13633_v54, %v5683_v35, %v13698_v61  ;;  %v5802_v14 = vshrl.u32 %v5801_v26, 30  ;;  %v5962_v48 = vand.u32 31, %v5960_v60 }
 0x70f   : > { %v5847_v57 = vand.u32 2139095040, %v13627_v20  ;;  %v5694_v13 = vadd.s32 1, %v13694_v27  ;;  %v5956_v25 = vor.u32 8388608, %v13637_v2  ;;  %v5691_v53 = vmul.u32 %v13633_v54, %v5675_v56 }
 0x710   : > { %v5803_v55 = vshll.u32 %v5802_v14, 30  ;;  %vm5693_vm4 = vc.u32 %v13699_v45, %v13693_v41  ;;  %v5963_v32 = vsub.s32 32, %v5962_v48  ;;  %vm5742_vm3 = vcmp.lt.s32.totalorder %v13608_v10, 0 }
 0x711   : > { %v5695_v17 = vsel %vm5693_vm4, %v5694_v13, %v13694_v27  ;;  %v5848_v44 = vshrl.u32 %v5847_v57, 23  ;;  %v5796_v46 = vadd.s32 %v13669_v3, %v13666_v40  ;;  %v13718_v52 = vshll.u32 %v5956_v25, 8 }
 0x712   : > { %v13712_v18 = vsub.s32 %v5800_v5, %v5803_v55  ;;  %v5696_v21 = vadd.s32 %v5695_v17, %v5691_v53  ;;  %v5844_v54 = vand.u32 2147483647, %v13627_v20  ;;  %v5826_v33 = vsub.s32 4, %v5802_v14 }
 0x713   : > { %v5966_v28 = vshrl.u32 %v15811_v22, %v5963_v32  ;;  %v5969_v51 = vshrl.u32 %v15812_v4, %v5963_v32  ;;  %v5961_v30 = vshrl.u32 %v5960_v60, 5  ;;  %v5972_v34 = vshrl.u32 %v15813_v0, %v5963_v32 }
 0x714   : > { %v5806_v2 = vsub.s32 0, %v13712_v18  ;;  %v5697_v50 = vadd.s32 536870912, %v5696_v21  ;;  %v5975_v5 = vshrl.u32 %v15814_v43, %v5963_v32  ;;  %v5965_v3 = vshll.u32 %v15810_v11, %v5962_v48 }
 0x715   : > { %v5968_v12 = vshll.u32 %v15811_v22, %v5962_v48  ;;  %v9310_v23 = vadd.s32 4294967169, %v5848_v44  ;;  %vm13730_vm5 = vcmp.le.f32.partialorder %v5740_v31, 0.7853982  ;;  %v5971_v37 = vshll.u32 %v15812_v4, %v5962_v48 }
 0x716   : > { %v9307_v8 = vmin.u32 %v5806_v2, %v13712_v18  ;;  %v5698_v40 = vshrl.u32 %v5697_v50, 30  ;;  %v5974_v42 = vshll.u32 %v15813_v0, %v5962_v48  ;;  %v5978_v26 = vshrl.u32 %v15815_v6, %v5963_v32 }
 0x717   : > { %v5827_v35 = vsel %vm5742_vm3, %v5826_v33, %v5802_v14  ;;  %vm5638_vm8 = vcmp.lt.s32.totalorder %v13611_v15, 0  ;;  %v5967_v61 = vor.u32 %v5966_v28, %v5965_v3  ;;  %v5970_v60 = vor.u32 %v5969_v51, %v5968_v12 }
 0x718   : > { %v5808_v49 = vclz %v9307_v8  ;;  %v5699_v27 = vshll.u32 %v5698_v40, 30  ;;  %v5973_v31 = vor.u32 %v5972_v34, %v5971_v37  ;;  %v5976_v57 = vor.u32 %v5975_v5, %v5974_v42  ;;  %v13756_v34 = vpop.f32.mrb[14].mxu1 }
 0x719   : > { %v5977_v55 = vshll.u32 %v15814_v43, %v5962_v48  ;;  %v5722_v25 = vsub.s32 4, %v5698_v40  ;;  %v5964_v53 = vshrl.u32 %v15810_v11, %v5963_v32  ;;  %vm5980_vm6 = vcmp.lt.s32.totalorder %v5961_v30, 1  ;;  %v13759_v37 = vpop.f32.mrb[15].mxu1 }
 0x71a   : > { %v9308_v56 = vadd.s32 4294967294, %v5808_v49  ;;  %v13741_v13 = vsub.s32 %v5696_v21, %v5699_v27  ;;  %vm5981_vm4 = vcmp.lt.s32.totalorder %v5961_v30, 2  ;;  %vm5982_vm1 = vcmp.lt.s32.totalorder %v5961_v30, 3 }
 0x71b   : > { %v5979_v17 = vor.u32 %v5978_v26, %v5977_v55  ;;  %vm5983_vm0 = vcmp.lt.s32.totalorder %v5961_v30, 4  ;;  %v5988_v48 = vsel %vm5980_vm6, %v5967_v61, %v5970_v60  ;;  %v5992_v19 = vsel %vm5980_vm6, %v5970_v60, %v5973_v31 }
 0x71c   : > { %vm9309_vm7 = vcmp.lt.s32.totalorder %v9308_v56, 0  ;;  %v5702_v2 = vsub.s32 0, %v13741_v13  ;;  %v5985_v32 = vsel %vm5983_vm0, %v5973_v31, 2102212464  ;;  %v5989_v50 = vsel %vm5983_vm0, %v5976_v57, 920167782 }
 0x71d   : > { %v5811_v14 = vsel %vm9309_vm7, 0, %v9308_v56  ;;  %v5990_v8 = vsel %vm5982_vm1, %v5973_v31, %v5989_v50  ;;  %v5993_v49 = vsel %vm5983_vm0, %v5979_v17, 1326507024  ;;  %v5829_v42 = vsel %vm13730_vm5, 0, %v5827_v35 }
 0x71e   : > { %v5812_v21 = vsub.s32 32, %v5811_v14  ;;  %v5816_v33 = vsub.s32 4294967266, %v5811_v14  ;;  %v5813_v28 = vshll.u32 %v13712_v18, %v5811_v14  ;;  %v9303_v51 = vmin.u32 %v5702_v2, %v13741_v13 }
 0x71f   : > { %v5991_v12 = vsel %vm5981_vm4, %v5988_v48, %v5990_v8  ;;  %v5984_v18 = vsel %vm5980_vm6, %v5964_v53, %v5967_v61  ;;  %v5986_v27 = vsel %vm5982_vm1, %v5970_v60, %v5985_v32  ;;  %v5723_v31 = vsel %vm5638_vm8, %v5722_v25, %v5698_v40 }
 0x720   : > { %v5814_v5 = vshrl.u32 %v5796_v46, %v5812_v21  ;;  %v5817_v3 = vadd.s32 127, %v5816_v33  ;;  %v5704_v26 = vclz %v9303_v51  ;;  %v5994_v46 = vsel %vm5982_vm1, %v5976_v57, %v5993_v49 }
 0x721   : > { %v5995_v17 = vsel %vm5981_vm4, %v5992_v19, %v5994_v46  ;;  %v13770_v2 = vmul.u32.u64.low %v13718_v52, %v5991_v12  ;;  %v13771_v48 = vmul.u32.u64.high %v13718_v52, %v5991_v12, %v13770_v2  ;;  %v5987_v61 = vsel %vm5981_vm4, %v5984_v18, %v5986_v27 }
 0x722   : > { %v5815_v56 = vor.u32 %v5814_v5, %v5813_v28  ;;  %v5818_v55 = vshll.u32 %v5817_v3, 23  ;;  %v9304_v14 = vadd.s32 4294967294, %v5704_v26  ;;  %v5833_v21 = vadd.s32 3, %v5829_v42 }
 0x723   : > { %v13776_v60 = vmul.u32.u64.low %v13718_v52, %v5995_v17  ;;  %v13777_v53 = vmul.u32.u64.high %v13718_v52, %v5995_v17, %v13776_v60  ;;  %v5692_v40 = vadd.s32 %v13693_v41, %v13699_v45  ;;  %v5854_v57 = vadd.s32 1, %v9310_v23 }
 0x724   : > { %v5819_v35 = vor.u32 4788187, %v5818_v55  ;;  %vm9305_vm0 = vcmp.lt.s32.totalorder %v9304_v14, 0  ;;  %v5822_v33 = vcvt.s32.f32 %v5815_v56  ;;  %v5725_v50 = vsel %vm13746_vm15, 0, %v5723_v31 }
 0x725   : > { %v5707_v32 = vsel %vm9305_vm0, 0, %v9304_v14  ;;  %v6003_v30 = vmul.u32 %v13718_v52, %v5987_v61  ;;  %v6006_v8 = vadd.s32 1, %v13771_v48  ;;  %vm6005_vm1 = vc.u32 %v13777_v53, %v13770_v2 }
 0x726   : > { %v5820_v25 = vand.u32 2147483647, %v5819_v35  ;;  %v5708_v28 = vsub.s32 32, %v5707_v32  ;;  %v5712_v51 = vsub.s32 4294967266, %v5707_v32  ;;  %v5709_v5 = vshll.u32 %v13741_v13, %v5707_v32 }
 0x727   : > { %vm5855_vm6 = vcmp.gt.s32.totalorder %v5854_v57, 0  ;;  %v6007_v23 = vsel %vm6005_vm1, %v6006_v8, %v13771_v48  ;;  %v5729_v49 = vadd.s32 3, %v5725_v50  ;;  %v5851_v27 = vand.u32 8388607, %v5844_v54 }
 0x728   : > { %v5823_v19 = vmul.f32 %v5822_v33, %v5820_v25  ;;  %v5710_v41 = vshrl.u32 %v5692_v40, %v5708_v28  ;;  %v5713_v45 = vadd.s32 127, %v5712_v51  ;;  %v5856_v3 = vsel %vm5855_vm6, %v5854_v57, 0 }
 0x729   : > { %v6008_v42 = vadd.s32 %v6007_v23, %v6003_v30  ;;  %v5858_v26 = vand.u32 31, %v5856_v3  ;;  %v13795_v31 = vadd.f32 %v13646_v47, %v13605_v24  ;;  %v13800_v17 = vand.u32 3, %v5833_v21 }
 0x72a   : > { %v5824_v12 = vxor.u32 2147483648, %v5823_v19  ;;  %v5711_v18 = vor.u32 %v5710_v41, %v5709_v5  ;;  %v5714_v52 = vshll.u32 %v5713_v45, 23  ;;  %v13802_v48 = vand.u32 3, %v5729_v49 }
 0x72b   : > { %v6009_v56 = vadd.s32 536870912, %v6008_v42  ;;  %v5859_v55 = vsub.s32 32, %v5858_v26  ;;  %v5852_v40 = vor.u32 8388608, %v5851_v27  ;;  %v6159_v1 = vand.u32 2139095040, %v13795_v31 }
 0x72c   : > { %v5825_v13 = vsel %vm5742_vm3, %v5824_v12, %v5823_v19  ;;  %v5715_v14 = vor.u32 4788187, %v5714_v52  ;;  %v5718_v60 = vcvt.s32.f32 %v5711_v18  ;;  %vm5950_vm3 = vcmp.lt.s32.totalorder %v13620_v38, 0 }
 0x72d   : > { %v5828_v46 = vsel %vm13730_vm5, %v13608_v10, %v5825_v13  ;;  %v6010_v35 = vshrl.u32 %v6009_v56, 30  ;;  %v5862_v47 = vshrl.u32 %v15811_v22, %v5859_v55  ;;  %v5865_v25 = vshrl.u32 %v15812_v4, %v5859_v55 }
 0x72e   : > { %11276 = vcosq.f32 %v5828_v46  ;;  %v5716_v61 = vand.u32 2147483647, %v5715_v14  ;;  %v5868_v21 = vshrl.u32 %v15813_v0, %v5859_v55  ;;  %v5870_v32 = vshll.u32 %v15813_v0, %v5858_v26 }
 0x72f   : > { %11278 = vsinq.f32 %v5828_v46  ;;  %v6011_v57 = vshll.u32 %v6010_v35, 30  ;;  %v5871_v50 = vshrl.u32 %v15814_v43, %v5859_v55  ;;  %vm5839_vm5 = vcmp.eq.s32.totalorder %v13800_v17, 2 }
 0x730   : > { %v5719_v33 = vmul.f32 %v5718_v60, %v5716_v61  ;;  %v13814_v51 = vshrl.u32 %v5856_v3, 5  ;;  %v5861_v30 = vshll.u32 %v15810_v11, %v5858_v26  ;;  %v5864_v8 = vshll.u32 %v15811_v22, %v5858_v26 }
 0x731   : > { %v13812_v28 = vsub.s32 %v6008_v42, %v6011_v57  ;;  %vm5836_vm7 = vcmp.eq.s32.totalorder %v13800_v17, 0  ;;  %v5867_v5 = vshll.u32 %v15812_v4, %v5858_v26  ;;  %v5872_v41 = vor.u32 %v5871_v50, %v5870_v32 }
 0x732   : > { %v5720_v19 = vxor.u32 2147483648, %v5719_v33  ;;  %v5874_v45 = vshrl.u32 %v15815_v6, %v5859_v55  ;;  %vm5835_vm4 = vcmp.lt.s32.totalorder %v13800_v17, 2  ;;  %v6004_v23 = vadd.s32 %v13770_v2, %v13777_v53 }
 0x733   : > { %v6014_v3 = vsub.s32 0, %v13812_v28  ;;  %v5863_v12 = vor.u32 %v5862_v47, %v5861_v30  ;;  %v5866_v49 = vor.u32 %v5865_v25, %v5864_v8  ;;  %vm5832_vm0 = vweird.f32 %v13608_v10 }
 0x734   : > { %v5721_v42 = vsel %vm5638_vm8, %v5720_v19, %v5719_v33  ;;  %v6034_v18 = vsub.s32 4, %v6010_v35  ;;  %v5869_v52 = vor.u32 %v5868_v21, %v5867_v5  ;;  %v5873_v27 = vshll.u32 %v15814_v43, %v5858_v26 }
 0x735   : > { %v5724_v13 = vsel %vm13746_vm15, %v13611_v15, %v5721_v42  ;;  %v9315_v56 = vmin.u32 %v6014_v3, %v13812_v28  ;;  %vm5879_vm1 = vcmp.lt.s32.totalorder %v13814_v51, 4  ;;  %v13834_v2 = vshll.u32 %v5852_v40, 8 }
 0x736   : > { %11280 = vcosq.f32 %v5724_v13  ;;  %v5875_v53 = vor.u32 %v5874_v45, %v5873_v27  ;;  %vm5876_vm6 = vcmp.lt.s32.totalorder %v13814_v51, 1  ;;  %v5885_v46 = vsel %vm5879_vm1, %v5872_v41, 920167782 }
 0x737   : > { %11282 = vsinq.f32 %v5724_v13  ;;  %vm13841_vm8 = vcmp.le.f32.partialorder %v5948_v9, 0.7853982  ;;  %v6016_v26 = vclz %v9315_v56  ;;  %vm5878_vm15 = vcmp.lt.s32.totalorder %v13814_v51, 3 }
 0x738   : > { %v11277_v14 = vpop.eup %11276  ;;  %v5884_v61 = vsel %vm5876_vm6, %v5863_v12, %v5866_v49  ;;  %v6035_v57 = vsel %vm5950_vm3, %v6034_v18, %v6010_v35  ;;  %v5860_v47 = vshrl.u32 %v15810_v11, %v5859_v55  ;;  %v5886_v25 = vsel %vm5878_vm15, %v5869_v52, %v5885_v46 }
 0x739   : > { %v11279_v60 = vpop.eup %11278  ;;  %v5840_v40 = vxor.u32 2147483648, %v11277_v14  ;;  %v9316_v33 = vadd.s32 4294967294, %v6016_v26  ;;  %vm5877_vm14 = vcmp.lt.s32.totalorder %v13814_v51, 2  ;;  %v5881_v21 = vsel %vm5879_vm1, %v5869_v52, 2102212464 }
 0x73a   : > { %v5837_v9 = vxor.u32 2147483648, %v11279_v60  ;;  %v5887_v50 = vsel %vm5877_vm14, %v5884_v61, %v5886_v25  ;;  %v5888_v35 = vsel %vm5876_vm6, %v5866_v49, %v5869_v52  ;;  %v5889_v55 = vsel %vm5879_vm1, %v5875_v53, 1326507024 }
 0x73b   : > { %v5841_v32 = vsel %vm5839_vm5, %v5840_v40, %v11279_v60  ;;  %vm9317_vm13 = vcmp.lt.s32.totalorder %v9316_v33, 0  ;;  %v5890_v8 = vsel %vm5878_vm15, %v5872_v41, %v5889_v55  ;;  %v6160_v19 = vshrl.u32 %v6159_v1, 23 }
 0x73c   : > { %v5838_v30 = vsel %vm5836_vm7, %v11277_v14, %v5837_v9  ;;  %vm5731_vm5 = vcmp.lt.s32.totalorder %v13802_v48, 2  ;;  %v6019_v45 = vsel %vm9317_vm13, 0, %v9316_v33  ;;  %v5880_v3 = vsel %vm5876_vm6, %v5860_v47, %v5863_v12 }
 0x73d   : > { %v5842_v5 = vsel %vm5835_vm4, %v5838_v30, %v5841_v32  ;;  %v5891_v42 = vsel %vm5877_vm14, %v5888_v35, %v5890_v8  ;;  %vm5728_vm7 = vweird.f32 %v13611_v15  ;;  %v6020_v41 = vsub.s32 32, %v6019_v45 }
 0x73e   : > { %v13877_v18 = vsel %vm5832_vm0, nan, %v5842_v5  ;;  %v6024_v1 = vsub.s32 4294967266, %v6019_v45  ;;  %v5882_v17 = vsel %vm5878_vm15, %v5866_v49, %v5881_v21  ;;  %v6021_v10 = vshll.u32 %v13812_v28, %v6019_v45 }
 0x73f   : > { %15822 = vst [vmem:[#allocation11_spill] sm:$0xff] %v13877_v18  ;;  %v13883_v52 = vmul.u32.u64.low %v13834_v2, %v5891_v42  ;;  %v13884_v27 = vmul.u32.u64.high %v13834_v2, %v5891_v42, %v13883_v52  ;;  %v13887_v12 = vmul.u32.u64.low %v13834_v2, %v5887_v50  ;;  %v13888_v13 = vmul.u32.u64.high %v13834_v2, %v5887_v50, %v13887_v12  ;;  %6580 = vrot.lane.b32.xlu0 %v13877_v18, %s11322_s16 }
 0x740   : > { %v6022_v56 = vshrl.u32 %v6004_v23, %v6020_v41  ;;  %v6025_v53 = vadd.s32 127, %v6024_v1  ;;  %v9322_v46 = vadd.s32 4294967169, %v6160_v19  ;;  %v11281_v14 = vpop.eup %11280  ;;  %vm5732_vm13 = vcmp.eq.s32.totalorder %v13802_v48, 0 }
 0x741   : > { %vm5735_vm4 = vcmp.eq.s32.totalorder %v13802_v48, 2  ;;  %v6037_v49 = vsel %vm13841_vm8, 0, %v6035_v57  ;;  %v5883_v26 = vsel %vm5877_vm14, %v5880_v3, %v5882_v17  ;;  %v11283_v61 = vpop.eup %11282  ;;  %v5736_v60 = vxor.u32 2147483648, %v11281_v14 }
 0x742   : > { %v6023_v40 = vor.u32 %v6022_v56, %v6021_v10  ;;  %v6026_v47 = vshll.u32 %v6025_v53, 23  ;;  %v6166_v25 = vadd.s32 1, %v9322_v46  ;;  %v5733_v28 = vxor.u32 2147483648, %v11283_v61 }
 0x743   : > { %vm5901_vm0 = vc.u32 %v13884_v27, %v13887_v12  ;;  %v5902_v23 = vadd.s32 1, %v13888_v13  ;;  %v6156_v9 = vand.u32 2147483647, %v13795_v31  ;;  %v5737_v33 = vsel %vm5735_vm4, %v5736_v60, %v11283_v61 }
 0x744   : > { %v6027_v21 = vor.u32 4788187, %v6026_v47  ;;  %v5899_v57 = vmul.u32 %v13834_v2, %v5883_v26  ;;  %vm6167_vm1 = vcmp.gt.s32.totalorder %v6166_v25, 0  ;;  %v5734_v51 = vsel %vm5732_vm13, %v11281_v14, %v5733_v28 }
 0x745   : > { %v6041_v32 = vadd.s32 3, %v6037_v49  ;;  %v5903_v50 = vsel %vm5901_vm0, %v5902_v23, %v13888_v13  ;;  %v6168_v35 = vsel %vm6167_vm1, %v6166_v25, 0  ;;  %v5738_v55 = vsel %vm5731_vm5, %v5734_v51, %v5737_v33 }
 0x746   : > { %v6028_v30 = vand.u32 2147483647, %v6027_v21  ;;  %v6030_v8 = vcvt.s32.f32 %v6023_v40  ;;  %v5904_v19 = vadd.s32 %v5903_v50, %v5899_v57  ;;  %v13912_v5 = vsel %vm5728_vm7, nan, %v5738_v55 }
 0x747   : > { %15823 = vst [vmem:[#allocation12_spill] sm:$0xff] %v13912_v5  ;;  %v6170_v45 = vand.u32 31, %v6168_v35  ;;  %6578 = vrot.lane.b32.xlu1 %v13912_v5, %s11322_s16  ;;  %v13916_v42 = vand.u32 3, %v6041_v32  ;;  %v6163_v41 = vand.u32 8388607, %v6156_v9  ;;  %v6169_v48 = vshrl.u32 %v6168_v35, 5 }
 0x748   : > { %v6031_v2 = vmul.f32 %v6030_v8, %v6028_v30  ;;  %v5905_v3 = vadd.s32 536870912, %v5904_v19  ;;  %v13942_v51 = vadd.f32 %v13605_v24, %v13710_v62  ;;  %vm5846_vm14 = vcmp.lt.s32.totalorder %v13627_v20, 0 }
 0x749   : > { %v6171_v1 = vsub.s32 32, %v6170_v45  ;;  %v6173_v15 = vshll.u32 %v15810_v11, %v6170_v45  ;;  %v6176_v13 = vshll.u32 %v15811_v22, %v6170_v45  ;;  %v6179_v53 = vshll.u32 %v15812_v4, %v6170_v45 }
 0x74a   : > { %v6032_v17 = vxor.u32 2147483648, %v6031_v2  ;;  %v13920_v52 = vshrl.u32 %v5905_v3, 30  ;;  %v6182_v26 = vshll.u32 %v15813_v0, %v6170_v45  ;;  %v6164_v23 = vor.u32 8388608, %v6163_v41 }
 0x74b   : > { %v6174_v10 = vshrl.u32 %v15811_v22, %v6171_v1  ;;  %v6177_v56 = vshrl.u32 %v15812_v4, %v6171_v1  ;;  %v6180_v46 = vshrl.u32 %v15813_v0, %v6171_v1  ;;  %v6183_v61 = vshrl.u32 %v15814_v43, %v6171_v1 }
 0x74c   : > { %v6033_v14 = vsel %vm5950_vm3, %v6032_v17, %v6031_v2  ;;  %v5907_v49 = vshll.u32 %v13920_v52, 30  ;;  %v6185_v21 = vshll.u32 %v15814_v43, %v6170_v45  ;;  %v6186_v57 = vshrl.u32 %v15815_v6, %v6171_v1 }
 0x74d   : > { %v6036_v60 = vsel %vm13841_vm8, %v13620_v38, %v6033_v14  ;;  %v6175_v40 = vor.u32 %v6174_v10, %v6173_v15  ;;  %v6178_v47 = vor.u32 %v6177_v56, %v6176_v13  ;;  %v6181_v25 = vor.u32 %v6180_v46, %v6179_v53 }
 0x74e   : > { %11284 = vcosq.f32 %v6036_v60  ;;  %v13936_v28 = vsub.s32 %v5904_v19, %v5907_v49  ;;  %v6184_v33 = vor.u32 %v6183_v61, %v6182_v26  ;;  %vm6188_vm3 = vcmp.lt.s32.totalorder %v6169_v48, 1 }
 0x74f   : > { %11286 = vsinq.f32 %v6036_v60  ;;  %vm6190_vm6 = vcmp.lt.s32.totalorder %v6169_v48, 3  ;;  %vm6191_vm8 = vcmp.lt.s32.totalorder %v6169_v48, 4  ;;  %v6187_v32 = vor.u32 %v6186_v57, %v6185_v21 }
 0x750   : > { %v5910_v44 = vsub.s32 0, %v13936_v28  ;;  %v6193_v50 = vsel %vm6191_vm8, %v6181_v25, 2102212464  ;;  %v6196_v35 = vsel %vm6188_vm3, %v6175_v40, %v6178_v47  ;;  %v6197_v55 = vsel %vm6191_vm8, %v6184_v33, 920167782 }
 0x751   : > { %v6172_v8 = vshrl.u32 %v15810_v11, %v6171_v1  ;;  %vm6189_vm15 = vcmp.lt.s32.totalorder %v6169_v48, 2  ;;  %v6198_v62 = vsel %vm6190_vm6, %v6181_v25, %v6197_v55  ;;  %v6200_v45 = vsel %vm6188_vm3, %v6178_v47, %v6181_v25 }
 0x752   : > { %v9311_v30 = vmin.u32 %v5910_v44, %v13936_v28  ;;  %v6199_v19 = vsel %vm6189_vm15, %v6196_v35, %v6198_v62  ;;  %v6201_v2 = vsel %vm6191_vm8, %v6187_v32, 1326507024  ;;  %v6204_v3 = vshll.u32 %v6164_v23, 8 }
 0x753   : > { %vm6043_vm5 = vcmp.lt.s32.totalorder %v13916_v42, 2  ;;  %vm13955_vm7 = vcmp.le.f32.partialorder %v5844_v54, 0.7853982  ;;  %v6192_v1 = vsel %vm6188_vm3, %v6172_v8, %v6175_v40  ;;  %v6194_v15 = vsel %vm6190_vm6, %v6178_v47, %v6193_v50 }
 0x754   : > { %v5912_v17 = vclz %v9311_v30  ;;  %vm6040_vm13 = vweird.f32 %v13620_v38  ;;  %v5930_v13 = vsub.s32 4, %v13920_v52  ;;  %v6202_v10 = vsel %vm6190_vm6, %v6184_v33, %v6201_v2 }
 0x755   : > { %v13964_v56 = vmul.u32.u64.low %v6204_v3, %v6199_v19  ;;  %v13965_v53 = vmul.u32.u64.high %v6204_v3, %v6199_v19, %v13964_v56  ;;  %vm6044_vm4 = vcmp.eq.s32.totalorder %v13916_v42, 0  ;;  %v6203_v46 = vsel %vm6189_vm15, %v6200_v45, %v6202_v10 }
 0x756   : > { %v9312_v54 = vadd.s32 4294967294, %v5912_v17  ;;  %v6055_v14 = vand.u32 2139095040, %v13942_v51  ;;  %vm6047_vm0 = vcmp.eq.s32.totalorder %v13916_v42, 2  ;;  %v6195_v49 = vsel %vm6189_vm15, %v6192_v1, %v6194_v15 }
 0x757   : > { %v13972_v26 = vmul.u32.u64.low %v6204_v3, %v6203_v46  ;;  %v13973_v61 = vmul.u32.u64.high %v6204_v3, %v6203_v46, %v13972_v26  ;;  %v5900_v40 = vadd.s32 %v13887_v12, %v13884_v27  ;;  %v6052_v47 = vand.u32 2147483647, %v13942_v51 }
 0x758   : > { %v11285_v60 = vpop.eup %11284  ;;  %vm9313_vm1 = vcmp.lt.s32.totalorder %v9312_v54, 0  ;;  %v6056_v25 = vshrl.u32 %v6055_v14, 23  ;;  %v5931_v57 = vsel %vm5846_vm14, %v5930_v13, %v13920_v52  ;;  %v6214_v48 = vadd.s32 1, %v13965_v53 }
 0x759   : > { %v11287_v23 = vpop.eup %11286  ;;  %v6048_v33 = vxor.u32 2147483648, %v11285_v60  ;;  %v5915_v21 = vsel %vm9313_vm1, 0, %v9312_v54  ;;  %v6211_v35 = vmul.u32 %v6204_v3, %v6195_v49  ;;  %vm6213_vm3 = vc.u32 %v13973_v61, %v13964_v56 }
 0x75a   : > { %v6045_v44 = vxor.u32 2147483648, %v11287_v23  ;;  %v5916_v32 = vsub.s32 32, %v5915_v21  ;;  %v5920_v50 = vsub.s32 4294967266, %v5915_v21  ;;  %v5917_v12 = vshll.u32 %v13936_v28, %v5915_v21 }
 0x75b   : > { %v6049_v27 = vsel %vm6047_vm0, %v6048_v33, %v11287_v23  ;;  %v9318_v55 = vadd.s32 4294967169, %v6056_v25  ;;  %v6215_v52 = vsel %vm6213_vm3, %v6214_v48, %v13965_v53  ;;  %v5933_v45 = vsel %vm13955_vm7, 0, %v5931_v57 }
 0x75c   : > { %v6046_v30 = vsel %vm6044_vm4, %v11285_v60, %v6045_v44  ;;  %v5918_v8 = vshrl.u32 %v5900_v40, %v5916_v32  ;;  %v5921_v62 = vadd.s32 127, %v5920_v50  ;;  %v6216_v2 = vadd.s32 %v6215_v52, %v6211_v35 }
 0x75d   : > { %v6050_v19 = vsel %vm6043_vm5, %v6046_v30, %v6049_v27  ;;  %v6062_v3 = vadd.s32 1, %v9318_v55  ;;  %v5937_v10 = vadd.s32 3, %v5933_v45  ;;  %v6059_v42 = vand.u32 8388607, %v6052_v47 }
 0x75e   : > { %v13995_v28 = vsel %vm6040_vm13, nan, %v6050_v19  ;;  %v5919_v17 = vor.u32 %v5918_v8, %v5917_v12  ;;  %v5922_v1 = vshll.u32 %v5921_v62, 23  ;;  %v6217_v15 = vadd.s32 536870912, %v6216_v2 }
 0x75f   : > { %15826 = vst [vmem:[#allocation21_spill] sm:$0xff] %v13995_v28  ;;  %vm6063_vm6 = vcmp.gt.s32.totalorder %v6062_v3, 0  ;;  %6584 = vrot.lane.b32.xlu0 %v13995_v28, %s11322_s16  ;;  %v14003_v38 = vadd.f32 %v13756_v34, %v13605_v24  ;;  %vm6158_vm8 = vcmp.lt.s32.totalorder %v13795_v31, 0  ;;  %v14008_v40 = vadd.f32 %v13605_v24, %v13759_v37 }
 0x760   : > { %v5923_v13 = vor.u32 4788187, %v5922_v1  ;;  %v6064_v53 = vsel %vm6063_vm6, %v6062_v3, 0  ;;  %v6218_v54 = vshrl.u32 %v6217_v15, 30  ;;  %v5926_v49 = vcvt.s32.f32 %v5919_v17 }
 0x761   : > { %v6066_v46 = vand.u32 31, %v6064_v53  ;;  %v14010_v23 = vand.u32 3, %v5937_v10  ;;  %v6212_v33 = vadd.s32 %v13964_v56, %v13973_v61  ;;  %v6060_v21 = vor.u32 8388608, %v6059_v42 }
 0x762   : > { %v5924_v14 = vand.u32 2147483647, %v5923_v13  ;;  %v6219_v26 = vshll.u32 %v6218_v54, 30  ;;  %v14015_v34 = vshrl.u32 %v6064_v53, 5  ;;  %v6367_v44 = vand.u32 2139095040, %v14003_v38 }
 0x763   : > { %v6067_v60 = vsub.s32 32, %v6066_v46  ;;  %v6069_v50 = vshll.u32 %v15810_v11, %v6066_v46  ;;  %v6072_v56 = vshll.u32 %v15811_v22, %v6066_v46  ;;  %v6075_v61 = vshll.u32 %v15812_v4, %v6066_v46 }
 0x764   : > { %v5927_v25 = vmul.f32 %v5926_v49, %v5924_v14  ;;  %v14013_v57 = vsub.s32 %v6216_v2, %v6219_v26  ;;  %v6242_v55 = vsub.s32 4, %v6218_v54  ;;  %v6078_v8 = vshll.u32 %v15813_v0, %v6066_v46 }
 0x765   : > { %v6070_v48 = vshrl.u32 %v15811_v22, %v6067_v60  ;;  %v6073_v24 = vshrl.u32 %v15812_v4, %v6067_v60  ;;  %v6076_v37 = vshrl.u32 %v15813_v0, %v6067_v60  ;;  %v6079_v27 = vshrl.u32 %v15814_v43, %v6067_v60 }
 0x766   : > { %v5928_v32 = vxor.u32 2147483648, %v5927_v25  ;;  %v6222_v35 = vsub.s32 0, %v14013_v57  ;;  %v6081_v3 = vshll.u32 %v15814_v43, %v6066_v46  ;;  %v6082_v17 = vshrl.u32 %v15815_v6, %v6067_v60 }
 0x767   : > { %v6071_v30 = vor.u32 %v6070_v48, %v6069_v50  ;;  %v6074_v19 = vor.u32 %v6073_v24, %v6072_v56  ;;  %v6077_v45 = vor.u32 %v6076_v37, %v6075_v61  ;;  %v6080_v2 = vor.u32 %v6079_v27, %v6078_v8 }
 0x768   : > { %v5929_v12 = vsel %vm5846_vm14, %v5928_v32, %v5927_v25  ;;  %v9323_v52 = vmin.u32 %v6222_v35, %v14013_v57  ;;  %v6100_v15 = vshll.u32 %v6060_v21, 8  ;;  %v6368_v13 = vshrl.u32 %v6367_v44, 23 }
 0x769   : > { %v5932_v62 = vsel %vm13955_vm7, %v13627_v20, %v5929_v12  ;;  %v6243_v10 = vsel %vm6158_vm8, %v6242_v55, %v6218_v54  ;;  %v6068_v41 = vshrl.u32 %v15810_v11, %v6067_v60  ;;  %v6083_v42 = vor.u32 %v6082_v17, %v6081_v3 }
 0x76a   : > { %11288 = vcosq.f32 %v5932_v62  ;;  %v6224_v1 = vclz %v9323_v52  ;;  %vm6084_vm14 = vcmp.lt.s32.totalorder %v14015_v34, 1  ;;  %vm14041_vm15 = vcmp.le.f32.partialorder %v6156_v9, 0.7853982 }
 0x76b   : > { %11290 = vsinq.f32 %v5932_v62  ;;  %vm6086_vm5 = vcmp.lt.s32.totalorder %v14015_v34, 3  ;;  %vm6087_vm7 = vcmp.lt.s32.totalorder %v14015_v34, 4  ;;  %v6092_v14 = vsel %vm6084_vm14, %v6071_v30, %v6074_v19 }
 0x76c   : > { %v9324_v46 = vadd.s32 4294967294, %v6224_v1  ;;  %v6089_v49 = vsel %vm6087_vm7, %v6077_v45, 2102212464  ;;  %v6093_v26 = vsel %vm6087_vm7, %v6080_v2, 920167782  ;;  %v6096_v54 = vsel %vm6084_vm14, %v6074_v19, %v6077_v45 }
 0x76d   : > { %v6097_v25 = vsel %vm6087_vm7, %v6083_v42, 1326507024  ;;  %vm6085_vm4 = vcmp.lt.s32.totalorder %v14015_v34, 2  ;;  %v6094_v60 = vsel %vm6086_vm5, %v6077_v45, %v6093_v26  ;;  %v6088_v48 = vsel %vm6084_vm14, %v6068_v41, %v6071_v30 }
 0x76e   : > { %vm9325_vm13 = vcmp.lt.s32.totalorder %v9324_v46, 0  ;;  %v6098_v9 = vsel %vm6086_vm5, %v6080_v2, %v6097_v25  ;;  %v6095_v44 = vsel %vm6085_vm4, %v6092_v14, %v6094_v60  ;;  %vm5936_vm0 = vweird.f32 %v13627_v20 }
 0x76f   : > { %v6227_v21 = vsel %vm9325_vm13, 0, %v9324_v46  ;;  %v6099_v32 = vsel %vm6085_vm4, %v6096_v54, %v6098_v9  ;;  %v6090_v37 = vsel %vm6086_vm5, %v6074_v19, %v6089_v49  ;;  %v9330_v35 = vadd.s32 4294967169, %v6368_v13 }
 0x770   : > { %v6228_v50 = vsub.s32 32, %v6227_v21  ;;  %v6232_v24 = vsub.s32 4294967266, %v6227_v21  ;;  %v14059_v56 = vmul.u32.u64.low %v6100_v15, %v6099_v32  ;;  %v14060_v61 = vmul.u32.u64.high %v6100_v15, %v6099_v32, %v14059_v56 }
 0x771   : > { %v14062_v27 = vmul.u32.u64.low %v6100_v15, %v6095_v44  ;;  %v14063_v12 = vmul.u32.u64.high %v6100_v15, %v6095_v44, %v14062_v27  ;;  %v6229_v55 = vshll.u32 %v14013_v57, %v6227_v21  ;;  %v6374_v62 = vadd.s32 1, %v9330_v35 }
 0x772   : > { %v6230_v30 = vshrl.u32 %v6212_v33, %v6228_v50  ;;  %v6233_v8 = vadd.s32 127, %v6232_v24  ;;  %vm5940_vm1 = vcmp.eq.s32.totalorder %v14010_v23, 0  ;;  %vm5943_vm3 = vcmp.eq.s32.totalorder %v14010_v23, 2 }
 0x773   : > { %v6091_v19 = vsel %vm6085_vm4, %v6088_v48, %v6090_v37  ;;  %v6364_v45 = vand.u32 2147483647, %v14003_v38  ;;  %vm6375_vm6 = vcmp.gt.s32.totalorder %v6374_v62, 0  ;;  %v6245_v33 = vsel %vm14041_vm15, 0, %v6243_v10 }
 0x774   : > { %v11289_v52 = vpop.eup %11288  ;;  %v6231_v17 = vor.u32 %v6230_v30, %v6229_v55  ;;  %v6234_v1 = vshll.u32 %v6233_v8, 23  ;;  %vm6109_vm14 = vc.u32 %v14060_v61, %v14062_v27  ;;  %v6110_v57 = vadd.s32 1, %v14063_v12 }
 0x775   : > { %v11291_v2 = vpop.eup %11290  ;;  %v5944_v3 = vxor.u32 2147483648, %v11289_v52  ;;  %v6107_v34 = vmul.u32 %v6100_v15, %v6091_v19  ;;  %v6376_v46 = vsel %vm6375_vm6, %v6374_v62, 0  ;;  %vm5939_vm5 = vcmp.lt.s32.totalorder %v14010_v23, 2 }
 0x776   : > { %v5941_v13 = vxor.u32 2147483648, %v11291_v2  ;;  %v6235_v42 = vor.u32 4788187, %v6234_v1  ;;  %v6111_v49 = vsel %vm6109_vm14, %v6110_v57, %v14063_v12  ;;  %v6378_v26 = vand.u32 31, %v6376_v46 }
 0x777   : > { %v5945_v41 = vsel %vm5943_vm3, %v5944_v3, %v11291_v2  ;;  %v6238_v10 = vcvt.s32.f32 %v6231_v17  ;;  %v6112_v60 = vadd.s32 %v6111_v49, %v6107_v34  ;;  %v6249_v21 = vadd.s32 3, %v6245_v33 }
 0x778   : > { %v5942_v14 = vsel %vm5940_vm1, %v11289_v52, %v5941_v13  ;;  %v6236_v25 = vand.u32 2147483647, %v6235_v42  ;;  %v6371_v15 = vand.u32 8388607, %v6364_v45  ;;  %v6379_v48 = vsub.s32 32, %v6378_v26 }
 0x779   : > { %v5946_v54 = vsel %vm5939_vm5, %v5942_v14, %v5945_v41  ;;  %v6113_v32 = vadd.s32 536870912, %v6112_v60  ;;  %v14087_v23 = vshrl.u32 %v6376_v46, 5  ;;  %v6263_v50 = vand.u32 2139095040, %v14008_v40 }
 0x77a   : > { %v14083_v9 = vsel %vm5936_vm0, nan, %v5946_v54  ;;  %v6239_v44 = vmul.f32 %v6238_v10, %v6236_v25  ;;  %v6381_v24 = vshll.u32 %v15810_v11, %v6378_v26  ;;  %v6382_v20 = vshrl.u32 %v15811_v22, %v6379_v48 }
 0x77b   : > { %15829 = vst [vmem:[#allocation22_spill] sm:$0xff] %v14083_v9  ;;  %6582 = vrot.lane.b32.xlu1 %v14083_v9, %s11322_s16  ;;  %v6384_v37 = vshll.u32 %v15811_v22, %v6378_v26  ;;  %v6385_v35 = vshrl.u32 %v15812_v4, %v6379_v48  ;;  %v14096_v12 = vshrl.u32 %v6113_v32, 30  ;;  %v6388_v55 = vshrl.u32 %v15813_v0, %v6379_v48 }
 0x77c   : > { %v6240_v56 = vxor.u32 2147483648, %v6239_v44  ;;  %v6391_v30 = vshrl.u32 %v15814_v43, %v6379_v48  ;;  %v6387_v8 = vshll.u32 %v15812_v4, %v6378_v26  ;;  %v6390_v62 = vshll.u32 %v15813_v0, %v6378_v26 }
 0x77d   : > { %v6393_v52 = vshll.u32 %v15814_v43, %v6378_v26  ;;  %v6394_v19 = vshrl.u32 %v15815_v6, %v6379_v48  ;;  %v6115_v3 = vshll.u32 %v14096_v12, 30  ;;  %v6383_v17 = vor.u32 %v6382_v20, %v6381_v24 }
 0x77e   : > { %v6241_v2 = vsel %vm6158_vm8, %v6240_v56, %v6239_v44  ;;  %v6386_v1 = vor.u32 %v6385_v35, %v6384_v37  ;;  %v6392_v33 = vor.u32 %v6391_v30, %v6390_v62  ;;  %v6372_v42 = vor.u32 8388608, %v6371_v15 }
 0x77f   : > { %v6244_v13 = vsel %vm14041_vm15, %v13795_v31, %v6241_v2  ;;  %v6395_v57 = vor.u32 %v6394_v19, %v6393_v52  ;;  %v14110_v41 = vsub.s32 %v6112_v60, %v6115_v3  ;;  %v6389_v34 = vor.u32 %v6388_v55, %v6387_v8 }
 0x780   : > { %11292 = vcosq.f32 %v6244_v13  ;;  %v6250_v46 = vand.u32 3, %v6249_v21  ;;  %vm6396_vm7 = vcmp.lt.s32.totalorder %v14087_v23, 1  ;;  %v6264_v14 = vshrl.u32 %v6263_v50, 23 }
 0x781   : > { %11294 = vsinq.f32 %v6244_v13  ;;  %v6118_v49 = vsub.s32 0, %v14110_v41  ;;  %v6380_v26 = vshrl.u32 %v15810_v11, %v6379_v48  ;;  %vm6399_vm8 = vcmp.lt.s32.totalorder %v14087_v23, 4 }
 0x782   : > { %v6404_v53 = vsel %vm6396_vm7, %v6383_v17, %v6386_v1  ;;  %vm6397_vm15 = vcmp.lt.s32.totalorder %v14087_v23, 2  ;;  %vm6398_vm13 = vcmp.lt.s32.totalorder %v14087_v23, 3  ;;  %v6405_v54 = vsel %vm6399_vm8, %v6392_v33, 920167782 }
 0x783   : > { %v6409_v25 = vsel %vm6399_vm8, %v6395_v57, 1326507024  ;;  %v9319_v10 = vmin.u32 %v6118_v49, %v14110_v41  ;;  %v6401_v60 = vsel %vm6399_vm8, %v6389_v34, 2102212464  ;;  %v6406_v21 = vsel %vm6398_vm13, %v6389_v34, %v6405_v54 }
 0x784   : > { %v6408_v15 = vsel %vm6396_vm7, %v6386_v1, %v6389_v34  ;;  %v6407_v48 = vsel %vm6397_vm15, %v6404_v53, %v6406_v21  ;;  %v6410_v44 = vsel %vm6398_vm13, %v6392_v33, %v6409_v25  ;;  %v6412_v32 = vshll.u32 %v6372_v42, 8 }
 0x785   : > { %v9326_v50 = vadd.s32 4294967169, %v6264_v14  ;;  %v6120_v24 = vclz %v9319_v10  ;;  %v6400_v20 = vsel %vm6396_vm7, %v6380_v26, %v6383_v17  ;;  %v6402_v37 = vsel %vm6398_vm13, %v6386_v1, %v6401_v60 }
 0x786   : > { %v6411_v35 = vsel %vm6397_vm15, %v6408_v15, %v6410_v44  ;;  %v14129_v56 = vmul.u32.u64.low %v6412_v32, %v6407_v48  ;;  %v14130_v55 = vmul.u32.u64.high %v6412_v32, %v6407_v48, %v14129_v56  ;;  %vm6251_vm4 = vcmp.lt.s32.totalorder %v6250_v46, 2 }
 0x787   : > { %v9320_v30 = vadd.s32 4294967294, %v6120_v24  ;;  %v14133_v8 = vmul.u32.u64.low %v6412_v32, %v6411_v35  ;;  %v14134_v62 = vmul.u32.u64.high %v6412_v32, %v6411_v35, %v14133_v8  ;;  %v6270_v52 = vadd.s32 1, %v9326_v50 }
 0x788   : > { %vm6252_vm0 = vcmp.eq.s32.totalorder %v6250_v46, 0  ;;  %vm6255_vm1 = vcmp.eq.s32.totalorder %v6250_v46, 2  ;;  %v6260_v19 = vand.u32 2147483647, %v14008_v40  ;;  %v6108_v3 = vadd.s32 %v14062_v27, %v14060_v61 }
 0x789   : > { %vm9321_vm3 = vcmp.lt.s32.totalorder %v9320_v30, 0  ;;  %v6403_v17 = vsel %vm6397_vm15, %v6400_v20, %v6402_v37  ;;  %vm6271_vm6 = vcmp.gt.s32.totalorder %v6270_v52, 0  ;;  %v6138_v57 = vsub.s32 4, %v14096_v12 }
 0x78a   : > { %v11293_v2 = vpop.eup %11292  ;;  %v6123_v33 = vsel %vm9321_vm3, 0, %v9320_v30  ;;  %v6422_v42 = vadd.s32 1, %v14130_v55  ;;  %v6272_v26 = vsel %vm6271_vm6, %v6270_v52, 0  ;;  %v6419_v27 = vmul.u32 %v6412_v32, %v6403_v17 }
 0x78b   : > { %v11295_v1 = vpop.eup %11294  ;;  %v6256_v13 = vxor.u32 2147483648, %v11293_v2  ;;  %v6124_v14 = vsub.s32 32, %v6123_v33  ;;  %v6128_v49 = vsub.s32 4294967266, %v6123_v33  ;;  %v6125_v61 = vshll.u32 %v14110_v41, %v6123_v33 }
 0x78c   : > { %v6253_v34 = vxor.u32 2147483648, %v11295_v1  ;;  %vm6421_vm14 = vc.u32 %v14134_v62, %v14129_v56  ;;  %vm6248_vm5 = vweird.f32 %v13795_v31  ;;  %v6274_v15 = vand.u32 31, %v6272_v26 }
 0x78d   : > { %v6257_v53 = vsel %vm6255_vm1, %v6256_v13, %v11295_v1  ;;  %v6126_v54 = vshrl.u32 %v6108_v3, %v6124_v14  ;;  %v6129_v25 = vadd.s32 127, %v6128_v49  ;;  %v6423_v10 = vsel %vm6421_vm14, %v6422_v42, %v14130_v55 }
 0x78e   : > { %v6254_v23 = vsel %vm6252_vm0, %v11293_v2, %v6253_v34  ;;  %v6424_v21 = vadd.s32 %v6423_v10, %v6419_v27  ;;  %vm14155_vm7 = vcmp.le.f32.partialorder %v6052_v47, 0.7853982  ;;  %vm6054_vm8 = vcmp.lt.s32.totalorder %v13942_v51, 0 }
 0x78f   : > { %v6258_v60 = vsel %vm6251_vm4, %v6254_v23, %v6257_v53  ;;  %v6127_v44 = vor.u32 %v6126_v54, %v6125_v61  ;;  %v6130_v41 = vshll.u32 %v6129_v25, 23  ;;  %v6275_v24 = vsub.s32 32, %v6274_v15 }
 0x790   : > { %v14151_v48 = vsel %vm6248_vm5, nan, %v6258_v60  ;;  %v6425_v50 = vadd.s32 536870912, %v6424_v21  ;;  %v6139_v46 = vsel %vm6054_vm8, %v6138_v57, %v14096_v12  ;;  %v6267_v20 = vand.u32 8388607, %v6260_v19 }
 0x791   : > { %15830 = vst [vmem:[#allocation23_spill] sm:$0xff] %v14151_v48  ;;  %6588 = vrot.lane.b32.xlu0 %v14151_v48, %s11322_s16  ;;  %v6131_v31 = vor.u32 4788187, %v6130_v41  ;;  %v6273_v37 = vshrl.u32 %v6272_v26, 5  ;;  %v6134_v47 = vcvt.s32.f32 %v6127_v44  ;;  %v6278_v55 = vshrl.u32 %v15811_v22, %v6275_v24 }
 0x792   : > { %v14167_v35 = vshrl.u32 %v6425_v50, 30  ;;  %v6281_v30 = vshrl.u32 %v15812_v4, %v6275_v24  ;;  %v6284_v52 = vshrl.u32 %v15813_v0, %v6275_v24  ;;  %v6286_v2 = vshll.u32 %v15813_v0, %v6274_v15 }
 0x793   : > { %v6132_v8 = vand.u32 2147483647, %v6131_v31  ;;  %v6287_v3 = vshrl.u32 %v15814_v43, %v6275_v24  ;;  %v6277_v17 = vshll.u32 %v15810_v11, %v6274_v15  ;;  %v6280_v1 = vshll.u32 %v15811_v22, %v6274_v15 }
 0x794   : > { %v6427_v12 = vshll.u32 %v14167_v35, 30  ;;  %v6283_v13 = vshll.u32 %v15812_v4, %v6274_v15  ;;  %v6289_v42 = vshll.u32 %v15814_v43, %v6274_v15  ;;  %v6290_v34 = vshrl.u32 %v15815_v6, %v6275_v24 }
 0x795   : > { %v6135_v33 = vmul.f32 %v6134_v47, %v6132_v8  ;;  %v6288_v57 = vor.u32 %v6287_v3, %v6286_v2  ;;  %v6279_v49 = vor.u32 %v6278_v55, %v6277_v17  ;;  %v6282_v26 = vor.u32 %v6281_v30, %v6280_v1 }
 0x796   : > { %v6428_v14 = vsub.s32 %v6424_v21, %v6427_v12  ;;  %v6285_v0 = vor.u32 %v6284_v52, %v6283_v13  ;;  %v6141_v61 = vsel %vm14155_vm7, 0, %v6139_v46  ;;  %v6291_v27 = vor.u32 %v6290_v34, %v6289_v42 }
 0x797   : > { %v6136_v53 = vxor.u32 2147483648, %v6135_v33  ;;  %v6268_v54 = vor.u32 8388608, %v6267_v20  ;;  %vm6292_vm15 = vcmp.lt.s32.totalorder %v6273_v37, 1  ;;  %vm6295_vm13 = vcmp.lt.s32.totalorder %v6273_v37, 4 }
 0x798   : > { %v6430_v23 = vsub.s32 0, %v6428_v14  ;;  %v6276_v4 = vshrl.u32 %v15810_v11, %v6275_v24  ;;  %vm6294_vm4 = vcmp.lt.s32.totalorder %v6273_v37, 3  ;;  %v6301_v43 = vsel %vm6295_vm13, %v6288_v57, 920167782 }
 0x799   : > { %v6137_v22 = vsel %vm6054_vm8, %v6136_v53, %v6135_v33  ;;  %v6297_v10 = vsel %vm6295_vm13, %v6285_v0, 2102212464  ;;  %v6300_v60 = vsel %vm6292_vm15, %v6279_v49, %v6282_v26  ;;  %v6302_v21 = vsel %vm6294_vm4, %v6285_v0, %v6301_v43 }
 0x79a   : > { %v6140_v6 = vsel %vm14155_vm7, %v13942_v51, %v6137_v22  ;;  %v9331_v25 = vmin.u32 %v6430_v23, %v6428_v14  ;;  %v6304_v15 = vsel %vm6292_vm15, %v6282_v26, %v6285_v0  ;;  %v6305_v44 = vsel %vm6295_vm13, %v6291_v27, 1326507024 }
 0x79b   : > { %11296 = vcosq.f32 %v6140_v6  ;;  %vm6293_vm0 = vcmp.lt.s32.totalorder %v6273_v37, 2  ;;  %v6308_v11 = vshll.u32 %v6268_v54, 8  ;;  %v6296_v50 = vsel %vm6292_vm15, %v6276_v4, %v6279_v49 }
 0x79c   : > { %11298 = vsinq.f32 %v6140_v6  ;;  %v6432_v41 = vclz %v9331_v25  ;;  %v6298_v24 = vsel %vm6294_vm4, %v6282_v26, %v6297_v10  ;;  %v6303_v32 = vsel %vm6293_vm0, %v6300_v60, %v6302_v21 }
 0x79d   : > { %v6306_v31 = vsel %vm6294_vm4, %v6288_v57, %v6305_v44  ;;  %v14194_v47 = vmul.u32.u64.low %v6308_v11, %v6303_v32  ;;  %v14195_v55 = vmul.u32.u64.high %v6308_v11, %v6303_v32, %v14194_v47  ;;  %v6145_v30 = vadd.s32 3, %v6141_v61 }
 0x79e   : > { %v9332_v46 = vadd.s32 4294967294, %v6432_v41  ;;  %v6307_v20 = vsel %vm6293_vm0, %v6304_v15, %v6306_v31  ;;  %v6299_v2 = vsel %vm6293_vm0, %v6296_v50, %v6298_v24  ;;  %v6420_v12 = vadd.s32 %v14129_v56, %v14134_v62 }
 0x79f   : > { %v14197_v8 = vmul.u32.u64.low %v6308_v11, %v6307_v20  ;;  %v14198_v52 = vmul.u32.u64.high %v6308_v11, %v6307_v20, %v14197_v8  ;;  %v6318_v37 = vadd.s32 1, %v14195_v55  ;;  %v6146_v13 = vand.u32 3, %v6145_v30 }
 0x7a0   : > { %vm9333_vm1 = vcmp.lt.s32.totalorder %v9332_v46, 0  ;;  %v6315_v33 = vmul.u32 %v6308_v11, %v6299_v2  ;;  %vm6144_vm7 = vweird.f32 %v13942_v51  ;;  %v6450_v15 = vsub.s32 4, %v14167_v35 }
 0x7a1   : > { %v6435_v3 = vsel %vm9333_vm1, 0, %v9332_v46  ;;  %vm6317_vm3 = vc.u32 %v14198_v52, %v14194_v47  ;;  %vm6151_vm6 = vcmp.eq.s32.totalorder %v6146_v13, 2  ;;  %vm6148_vm14 = vcmp.eq.s32.totalorder %v6146_v13, 0 }
 0x7a2   : > { %v6436_v17 = vsub.s32 32, %v6435_v3  ;;  %v6440_v1 = vsub.s32 4294967266, %v6435_v3  ;;  %v6437_v57 = vshll.u32 %v6428_v14, %v6435_v3  ;;  %v6319_v49 = vsel %vm6317_vm3, %v6318_v37, %v14195_v55 }
 0x7a3   : > { %v6320_v0 = vadd.s32 %v6319_v49, %v6315_v33  ;;  %vm6147_vm5 = vcmp.lt.s32.totalorder %v6146_v13, 2  ;;  %vm6366_vm8 = vcmp.lt.s32.totalorder %v14003_v38, 0  ;;  %vm6365_vm15 = vcmp.le.f32.partialorder %v6364_v45, 0.7853982 }
 0x7a4   : > { %v6438_v42 = vshrl.u32 %v6420_v12, %v6436_v17  ;;  %v6441_v34 = vadd.s32 127, %v6440_v1  ;;  %v6451_v50 = vsel %vm6366_vm8, %v6450_v15, %v14167_v35  ;;  %v6316_v8 = vadd.s32 %v14194_v47, %v14198_v52 }
 0x7a5   : > { %v11297_v26 = vpop.eup %11296  ;;  %v6321_v62 = vadd.s32 536870912, %v6320_v0  ;;  %v6453_v31 = vsel %vm6365_vm15, 0, %v6451_v50  ;;  %vm6456_vm3 = vweird.f32 %v14003_v38 }
 0x7a6   : > { %v11299_v53 = vpop.eup %11298  ;;  %v6152_v61 = vxor.u32 2147483648, %v11297_v26  ;;  %v6439_v27 = vor.u32 %v6438_v42, %v6437_v57  ;;  %v6442_v23 = vshll.u32 %v6441_v34, 23  ;;  %v6457_v55 = vadd.s32 3, %v6453_v31 }
 0x7a7   : > { %v6149_v56 = vxor.u32 2147483648, %v11299_v53  ;;  %v6322_v43 = vshrl.u32 %v6321_v62, 30 }
 0x7a8   : > { %v6153_v54 = vsel %vm6151_vm6, %v6152_v61, %v11299_v53  ;;  %v6443_v22 = vor.u32 4788187, %v6442_v23  ;;  %v6446_v25 = vcvt.s32.f32 %v6439_v27  ;;  %v6458_v12 = vand.u32 3, %v6457_v55 }
 0x7a9   : > { %v6150_v4 = vsel %vm6148_vm14, %v11297_v26, %v6149_v56  ;;  %v6323_v60 = vshll.u32 %v6322_v43, 30  ;;  %v6346_v61 = vsub.s32 4, %v6322_v43  ;;  %vm6262_vm6 = vcmp.lt.s32.totalorder %v14008_v40, 0 }
 0x7aa   : > { %v6154_v14 = vsel %vm6147_vm5, %v6150_v4, %v6153_v54  ;;  %v6444_v6 = vand.u32 2147483647, %v6443_v22  ;;  %vm6463_vm4 = vcmp.eq.s32.totalorder %v6458_v12, 2  ;;  %vm6460_vm0 = vcmp.eq.s32.totalorder %v6458_v12, 0 }
 0x7ab   : > { %v14206_v10 = vsel %vm6144_vm7, nan, %v6154_v14  ;;  %v6324_v44 = vsub.s32 %v6320_v0, %v6323_v60  ;;  %vm6459_vm1 = vcmp.lt.s32.totalorder %v6458_v12, 2  ;;  %v6347_v56 = vsel %vm6262_vm6, %v6346_v61, %v6322_v43 }
 0x7ac   : > { %15833 = vst [vmem:[#allocation13_spill] sm:$0xff] %v14206_v10  ;;  %v6447_v21 = vmul.f32 %v6446_v25, %v6444_v6  ;;  %6586 = vrot.lane.b32.xlu1 %v14206_v10, %s11322_s16  ;;  %vm6261_vm14 = vcmp.le.f32.partialorder %v6260_v19, 0.7853982  ;;  %vm6352_vm5 = vweird.f32 %v14008_v40 }
 0x7ad   : > { %v6326_v11 = vsub.s32 0, %v6324_v44  ;;  %v6349_v54 = vsel %vm6261_vm14, 0, %v6347_v56 }
 0x7ae   : > { %v6448_v41 = vxor.u32 2147483648, %v6447_v21  ;;  %v6353_v4 = vadd.s32 3, %v6349_v54 }
 0x7af   : > { %v9327_v32 = vmin.u32 %v6326_v11, %v6324_v44 }
 0x7b0   : > { %v6449_v51 = vsel %vm6366_vm8, %v6448_v41, %v6447_v21  ;;  %v6354_v25 = vand.u32 3, %v6353_v4 }
 0x7b1   : > { %v6452_v24 = vsel %vm6365_vm15, %v14003_v38, %v6449_v51  ;;  %v6328_v46 = vclz %v9327_v32  ;;  %v14230_v22 = vpop.permute.xlu0 %6580 }
 0x7b2   : > { %11300 = vcosq.f32 %v6452_v24  ;;  %v6690_v43 = vmul.f32 %v14230_v22, %v13912_v5  ;;  %v6705_v19 = vmul.f32 %v14230_v22, %v14083_v9  ;;  %v6712_v14 = vmul.f32 %v14230_v22, %v13995_v28 }
 0x7b3   : > { %11302 = vsinq.f32 %v6452_v24  ;;  %v9328_v20 = vadd.s32 4294967294, %v6328_v46  ;;  %v6719_v6 = vmul.f32 %v14230_v22, %v14206_v10  ;;  %v14244_v60 = vmul.f32 %v14230_v22, %v13877_v18 }
 0x7b4   : > { %v6726_v21 = vmul.f32 %v14230_v22, %v14151_v48  ;;  %v6753_v15 = vsel %vm3190_vm2, %v6690_v43, 0.0  ;;  %v6921_v11 = vsel %vm3190_vm2, %v6712_v14, 0.0  ;;  %vm6355_vm7 = vcmp.lt.s32.totalorder %v6354_v25, 2 }
 0x7b5   : > { %vm9329_vm13 = vcmp.lt.s32.totalorder %v9328_v20, 0  ;;  %15834 = vst [vmem:[#allocation26_spill] sm:$0xff] %v14244_v60  ;;  %v6977_v51 = vsel %vm3190_vm2, %v6719_v6, 0.0  ;;  %vm6356_vm8 = vcmp.eq.s32.totalorder %v6354_v25, 0  ;;  %vm6359_vm15 = vcmp.eq.s32.totalorder %v6354_v25, 2 }
 0x7b6   : > { %v6331_v30 = vsel %vm9329_vm13, 0, %v9328_v20  ;;  %v6754_v46 = vrot.slane %v6753_v15, 4  ;;  %v6809_v20 = vsel %vm3190_vm2, %v14244_v60, 0.0 }
 0x7b7   : > { %v6332_v2 = vsub.s32 32, %v6331_v30  ;;  %v6336_v3 = vsub.s32 4294967266, %v6331_v30  ;;  %v6333_v45 = vshll.u32 %v6324_v44, %v6331_v30  ;;  %v6865_v44 = vsel %vm3190_vm2, %v6705_v19, 0.0 }
 0x7b8   : > { %v6866_v55 = vrot.slane %v6865_v44, 4 }
 0x7b9   : > { %v6334_v17 = vshrl.u32 %v6316_v8, %v6332_v2  ;;  %v6337_v1 = vadd.s32 127, %v6336_v3  ;;  %v14255_v32 = vpop.permute.xlu1 %6578  ;;  %v6922_v8 = vrot.slane %v6921_v11, 4  ;;  %v6978_v2 = vrot.slane %v6977_v51, 4 }
 0x7ba   : > { %v7033_v3 = vsel %vm3190_vm2, %v6726_v21, 0.0 }
 0x7bb   : > { %v6335_v33 = vor.u32 %v6334_v17, %v6333_v45  ;;  %v6338_v57 = vshll.u32 %v6337_v1, 23  ;;  %v6697_v45 = vmul.f32 %v14255_v32, %v13877_v18  ;;  %v6704_v17 = vmul.f32 %v14255_v32, %v14083_v9 }
 0x7bc   : > { %v11301_v35 = vpop.eup %11300  ;;  %v6711_v1 = vmul.f32 %v14255_v32, %v13995_v28  ;;  %v14299_v54 = vadd.f32 %v6978_v2, %v6977_v51 }
 0x7bd   : > { %v11303_v37 = vpop.eup %11302  ;;  %v6464_v13 = vxor.u32 2147483648, %v11301_v35  ;;  %v6339_v49 = vor.u32 4788187, %v6338_v57  ;;  %v6342_v0 = vcvt.s32.f32 %v6335_v33  ;;  %v6725_v33 = vmul.f32 %v14255_v32, %v14151_v48 }
 0x7be   : > { %v6461_v42 = vxor.u32 2147483648, %v11303_v37  ;;  %v6914_v61 = vsel %vm3190_vm2, %v6711_v1, 0.0 }
 0x7bf   : > { %v6465_v34 = vsel %vm6463_vm4, %v6464_v13, %v11303_v37  ;;  %v6340_v52 = vand.u32 2147483647, %v6339_v49  ;;  %v6718_v13 = vmul.f32 %v14255_v32, %v14206_v10  ;;  %v6915_v25 = vrot.slane %v6914_v61, 4 }
 0x7c0   : > { %v6462_v26 = vsel %vm6460_vm0, %v11301_v35, %v6461_v42  ;;  %v7034_v42 = vrot.slane %v7033_v3, 4 }
 0x7c1   : > { %v6466_v47 = vsel %vm6459_vm1, %v6462_v26, %v6465_v34  ;;  %v6343_v27 = vmul.f32 %v6342_v0, %v6340_v52  ;;  %v14279_v34 = vmul.f32 %v14255_v32, %v13912_v5  ;;  %v14285_v26 = vadd.f32 %v6754_v46, %v6753_v15 }
 0x7c2   : > { %v14218_v53 = vsel %vm6456_vm3, nan, %v6466_v47  ;;  %v6810_v47 = vrot.slane %v6809_v20, 4  ;;  %v14287_v52 = vadd.f32 %v6866_v55, %v6865_v44  ;;  %v6858_v0 = vsel %vm3190_vm2, %v6704_v17, 0.0 }
 0x7c3   : > { %6592 = vrot.lane.b32.xlu0 %v14218_v53, %s11322_s16  ;;  %v6344_v23 = vxor.u32 2147483648, %v6343_v27  ;;  %v6740_v37 = vmul.f32 %v14230_v22, %v14218_v53  ;;  %15836 = vst [vmem:[#allocation29_spill] sm:$0xff] %v14279_v34  ;;  %v6739_v49 = vmul.f32 %v14255_v32, %v14218_v53  ;;  %v14301_v4 = vadd.f32 %v7034_v42, %v7033_v3 }
 0x7c4   : > { %v6746_v43 = vsel %vm3190_vm2, %v14279_v34, 0.0  ;;  %v6859_v6 = vrot.slane %v6858_v0, 4  ;;  %v6811_v15 = vadd.f32 %v6810_v47, %v6809_v20  ;;  %v6756_v51 = vrot.slane %v14285_v26, 2 }
 0x7c5   : > { %v6345_v62 = vsel %vm6262_vm6, %v6344_v23, %v6343_v27  ;;  %v14294_v23 = vadd.f32 %v6922_v8, %v6921_v11  ;;  %v7145_v56 = vsel %vm3190_vm2, %v6740_v37, 0.0  ;;  %v7138_v19 = vsel %vm3190_vm2, %v6739_v49, 0.0 }
 0x7c6   : > { %v6348_v38 = vsel %vm6261_vm14, %v14008_v40, %v6345_v62  ;;  %v6802_v40 = vsel %vm3190_vm2, %v6697_v45, 0.0  ;;  %v6970_v62 = vsel %vm3190_vm2, %v6718_v13, 0.0  ;;  %v7146_v44 = vrot.slane %v7145_v56, 4 }
 0x7c7   : > { %7196 = vrot.lane.b32.xlu0 %v13877_v18, %s11323_s17  ;;  %11304 = vcosq.f32 %v6348_v38  ;;  %v6803_v14 = vrot.slane %v6802_v40, 4  ;;  %v14319_v2 = vadd.f32 %v6859_v6, %v6858_v0  ;;  %v14321_v3 = vadd.f32 %v6915_v25, %v6914_v61 }
 0x7c8   : > { %11306 = vsinq.f32 %v6348_v38  ;;  %v7026_v38 = vsel %vm3190_vm2, %v6725_v33, 0.0  ;;  %v14324_v45 = vadd.f32 %v7146_v44, %v7145_v56  ;;  %vm15952_vm6 = vcmask 130048  }
 0x7c9   : > { %v7027_v11 = vrot.slane %v7026_v38, 4  ;;  %v6804_v20 = vadd.f32 %v6803_v14, %v6802_v40  ;;  %vm15953_vm14 = vmmov %vm15952_vm6 }
 0x7cb   : > { %7200 = vrot.lane.b32.xlu0 %v13995_v28, %s11323_s17  ;;  %v14328_v1 = vadd.f32 %v7027_v11, %v7026_v38  ;;  %v6805_v61 = vrot.slane %v6804_v20, 2 }
 0x7cf   : > { %7204 = vrot.lane.b32.xlu0 %v14151_v48, %s11323_s17 }
 0x7d1   : > { %v11305_v41 = vpop.eup %11304  ;;  %v14292_v27 = vpop.permute.xlu0 %6584 }
 0x7d2   : > { %v11307_v50 = vpop.eup %11306  ;;  %v6360_v24 = vxor.u32 2147483648, %v11305_v41  ;;  %v6699_v21 = vmul.f32 %v14292_v27, %v13877_v18  ;;  %v6692_v8 = vmul.f32 %v14292_v27, %v13912_v5  ;;  %v6721_v33 = vmul.f32 %v14292_v27, %v14206_v10 }
 0x7d3   : > { %7208 = vrot.lane.b32.xlu0 %v14218_v53, %s11323_s17  ;;  %v6357_v31 = vxor.u32 2147483648, %v11307_v50  ;;  %v6728_v42 = vmul.f32 %v14292_v27, %v14151_v48  ;;  %v6742_v38 = vmul.f32 %v14292_v27, %v14218_v53 }
 0x7d4   : > { %v6361_v30 = vsel %vm6359_vm15, %v6360_v24, %v11307_v50  ;;  %v6747_v24 = vrot.slane %v6746_v43, 4  ;;  %v6767_v40 = vsel %vm3190_vm2, %v6692_v8, 0.0  ;;  %v14356_v6 = vsel %vm3190_vm2, %v6721_v33, 0.0 }
 0x7d5   : > { %v6358_v12 = vsel %vm6356_vm8, %v11305_v41, %v6357_v31  ;;  %v6971_v41 = vrot.slane %v6970_v62, 4  ;;  %v7139_v31 = vrot.slane %v7138_v19, 4  ;;  %v6768_v14 = vrot.slane %v6767_v40, 4 }
 0x7d6   : > { %v6362_v35 = vsel %vm6355_vm7, %v6358_v12, %v6361_v30  ;;  %v6823_v12 = vsel %vm3190_vm2, %v6699_v21, 0.0  ;;  %v6748_v37 = vadd.f32 %v6747_v24, %v6746_v43  ;;  %v14359_v25 = vsel %vm3190_vm2, %v6728_v42, 0.0  ;;  %vm15955_vm7 = vmmov %vm15952_vm6 }
 0x7d7   : > { %v14275_v57 = vsel %vm6352_vm5, nan, %v6362_v35  ;;  %v14326_v17 = vadd.f32 %v6971_v41, %v6970_v62  ;;  %v6706_v35 = vmul.f32 %v14292_v27, %v14083_v9  ;;  %v14332_v13 = vadd.f32 %v7139_v31, %v7138_v19 }
 0x7d8   : > { %15835 = vst [vmem:[#allocation15_spill] sm:$0xff] %v14275_v57  ;;  %6590 = vrot.lane.b32.xlu1 %v14275_v57, %s11322_s16  ;;  %v6733_v49 = vmul.f32 %v14230_v22, %v14275_v57  ;;  %v6732_v47 = vmul.f32 %v14255_v32, %v14275_v57  ;;  %v6824_v0 = vrot.slane %v6823_v12, 4  ;;  %v6917_v62 = vrot.slane %v14321_v3, 2 }
 0x7d9   : > { %v14353_v19 = vsel %vm3190_vm2, %v6706_v35, 0.0  ;;  %v6812_v21 = vrot.slane %v6811_v15, 2  ;;  %v6735_v31 = vmul.f32 %v14292_v27, %v14275_v57  ;;  %v14370_v35 = vsel %vm3190_vm2, %v6742_v38, 0.0 }
 0x7da   : > { %v7089_v44 = vsel %vm3190_vm2, %v6733_v49, 0.0  ;;  %v7082_v41 = vsel %vm3190_vm2, %v6732_v47, 0.0  ;;  %v6825_v24 = vadd.f32 %v6824_v0, %v6823_v12  ;;  %v6880_v8 = vrot.slane %v14353_v19, 4 }
 0x7db   : > { %v14374_v33 = vmul.f32 %v14292_v27, %v13995_v28  ;;  %v6806_v47 = vadd.f32 %v6805_v61, %v6804_v20  ;;  %v6749_v0 = vrot.slane %v6748_v37, 2  ;;  %v7090_v43 = vrot.slane %v7089_v44, 4 }
 0x7dc   : > { %7194 = vrot.lane.b32.xlu1 %v13912_v5, %s11323_s17  ;;  %v7083_v11 = vrot.slane %v7082_v41, 4  ;;  %v6813_v55 = vadd.f32 %v6812_v21, %v6811_v15  ;;  %v6769_v22 = vadd.f32 %v6768_v14, %v6767_v40  ;;  %v6674_v38 = vsel %vm3117_vm9, %v14279_v34, 0.0 }
 0x7dd   : > { %15837 = vst [vmem:[#allocation17_spill] sm:$0xff] %v14374_v33  ;;  %v6675_v27 = vsel %vm3117_vm9, %v14244_v60, 0.0  ;;  %v6826_v32 = vrot.slane %v6825_v24, 2  ;;  %v14386_v42 = vsel %vm3190_vm2, %v6735_v31, 0.0  ;;  %v14394_v15 = vsel %vm3117_vm9, %v14374_v33, 0.0 }
 0x7de   : > { %v6807_v40 = vrot.slane %v6806_v47, 1  ;;  %v6750_v14 = vadd.f32 %v6749_v0, %v6748_v37  ;;  %v6757_v21 = vadd.f32 %v6756_v51, %v14285_v26  ;;  %v6935_v31 = vsel %vm3190_vm2, %v14374_v33, 0.0 }
 0x7df   : > { %v14401_v30 = vadd.f32 %v7090_v43, %v7089_v44  ;;  %v14403_v49 = vadd.f32 %v7083_v11, %v7082_v41  ;;  %v6814_v50 = vrot.slane %v6813_v55, 1  ;;  %v6770_v56 = vrot.slane %v6769_v22, 2 }
 0x7e0   : > { %7198 = vrot.lane.b32.xlu1 %v14083_v9, %s11323_s17  ;;  %v14407_v7 = vadd.f32 %v6675_v27, %v6674_v38  ;;  %v6827_v39 = vadd.f32 %v6826_v32, %v6825_v24  ;;  %v6918_v37 = vadd.f32 %v6917_v62, %v14321_v3  ;;  %v15838_v51 = vrot.slane %v14294_v23, 2 }
 0x7e1   : > { %v6936_v44 = vrot.slane %v6935_v31, 4  ;;  %v14416_v11 = vadd.f32 %v6807_v40, %v6806_v47  ;;  %v6751_v63 = vrot.slane %v6750_v14, 1  ;;  %v6758_v29 = vrot.slane %v6757_v21, 1 }
 0x7e2   : > { %v6925_v43 = vadd.f32 %v15838_v51, %v14294_v23  ;;  %v14420_v3 = vadd.f32 %v6814_v50, %v6813_v55  ;;  %v6771_v62 = vadd.f32 %v6770_v56, %v6769_v22  ;;  %v6919_v51 = vrot.slane %v6918_v37, 1 }
 0x7e3   : > { %15839 = vst [vmem:[#allocation33_spill] sm:$0xff] %v14416_v11  ;;  %v6937_v40 = vadd.f32 %v6936_v44, %v6935_v31  ;;  %v14429_v38 = vadd.f32 %v6751_v63, %v6750_v14  ;;  %v14431_v50 = vadd.f32 %v6758_v29, %v6757_v21  ;;  %v15842_v55 = vrot.slane %v14319_v2, 2 }
 0x7e4   : > { %7202 = vrot.lane.b32.xlu1 %v14206_v10, %s11323_s17  ;;  %v6926_v47 = vrot.slane %v6925_v43, 1  ;;  %v6772_v22 = vrot.slane %v6771_v62, 1  ;;  %v15843_v32 = vrot.slane %v14287_v52, 2  ;;  %v6881_v31 = vadd.f32 %v6880_v8, %v14353_v19 }
 0x7e5   : > { %15841 = vst [vmem:[#allocation37_spill] sm:$0xff] %v14429_v38  ;;  %v6862_v56 = vadd.f32 %v15842_v55, %v14319_v2  ;;  %v14445_v21 = vadd.f32 %v6919_v51, %v6918_v37  ;;  %v6938_v55 = vrot.slane %v6937_v40, 2  ;;  %v15845_v51 = vrot.slane %v14328_v1, 2 }
 0x7e6   : > { %v6869_v16 = vadd.f32 %v15843_v32, %v14287_v52  ;;  %v14447_v2 = vadd.f32 %v6926_v47, %v6925_v43  ;;  %v6882_v32 = vrot.slane %v6881_v31, 2  ;;  %v15846_v47 = vrot.slane %v14301_v4, 2 }
 0x7e7   : > { %15844 = vst [vmem:[#allocation38_spill] sm:$0xff] %v14445_v21  ;;  %v6863_v8 = vrot.slane %v6862_v56, 1  ;;  %vm15954_vm5 = vcmask 195584  }
 0x7e8   : > { %7206 = vrot.lane.b32.xlu1 %v14275_v57, %s11323_s17  ;;  %v7037_v58 = vadd.f32 %v15846_v47, %v14301_v4  ;;  %v6883_v47 = vadd.f32 %v6882_v32, %v6881_v31 }
 0x7ea   : > { %v6884_v32 = vrot.slane %v6883_v47, 1 }
 0x7ed   : > { %v14378_v12 = vpop.permute.xlu1 %6582 }
 0x7ee   : > { %v6691_v20 = vmul.f32 %v14378_v12, %v13912_v5  ;;  %v6698_v61 = vmul.f32 %v14378_v12, %v13877_v18  ;;  %v6713_v46 = vmul.f32 %v14378_v12, %v13995_v28  ;;  %v6727_v23 = vmul.f32 %v14378_v12, %v14151_v48 }
 0x7ef   : > { %v14427_v41 = vmul.f32 %v14378_v12, %v14083_v9  ;;  %v6720_v44 = vmul.f32 %v14378_v12, %v14206_v10  ;;  %v6734_v36 = vmul.f32 %v14378_v12, %v14275_v57  ;;  %v6741_v52 = vmul.f32 %v14378_v12, %v14218_v53 }
 0x7f0   : > { %v6760_v0 = vsel %vm3190_vm2, %v6691_v20, 0.0  ;;  %v6816_v26 = vsel %vm3190_vm2, %v6698_v61, 0.0  ;;  %v6928_v20 = vsel %vm3190_vm2, %v6713_v46, 0.0  ;;  %v6828_v61 = vrot.slane %v6827_v39, 1 }
 0x7f1   : > { %v6761_v24 = vrot.slane %v6760_v0, 4  ;;  %v6817_v27 = vrot.slane %v6816_v26, 4  ;;  %15840 = vst [vmem:[#allocation36_spill] sm:$0xff] %v14427_v41  ;;  %v6929_v46 = vrot.slane %v6928_v20, 4  ;;  %v7040_v29 = vsel %vm3190_vm2, %v6727_v23, 0.0 }
 0x7f2   : > { %v14442_v14 = vadd.f32 %v6828_v61, %v6827_v39  ;;  %v6872_v19 = vsel %vm3190_vm2, %v14427_v41, 0.0  ;;  %v14455_v39 = vadd.f32 %v6772_v22, %v6771_v62  ;;  %v6984_v37 = vsel %vm3190_vm2, %v6720_v44, 0.0 }
 0x7f3   : > { %v6762_v59 = vadd.f32 %v6761_v24, %v6760_v0  ;;  %v6818_v63 = vadd.f32 %v6817_v27, %v6816_v26  ;;  %v6930_v0 = vadd.f32 %v6929_v46, %v6928_v20  ;;  %v6870_v26 = vrot.slane %v6869_v16, 1 }
 0x7f4   : > { %v7041_v43 = vrot.slane %v7040_v29, 4  ;;  %v6873_v61 = vrot.slane %v6872_v19, 4  ;;  %v6939_v23 = vadd.f32 %v6938_v55, %v6937_v40  ;;  %v7030_v12 = vadd.f32 %v15845_v51, %v14328_v1 }
 0x7f5   : > { %v6819_v24 = vrot.slane %v6818_v63, 2  ;;  %v6763_v27 = vrot.slane %v6762_v59, 2  ;;  %v7096_v62 = vsel %vm3190_vm2, %v6734_v36, 0.0  ;;  %v7152_v20 = vsel %vm3190_vm2, %v6741_v52, 0.0 }
 0x7f6   : > { %v14466_v46 = vadd.f32 %v6863_v8, %v6862_v56  ;;  %v15848_v22 = vrot.slane %v14359_v25, 4  ;;  %v6985_v33 = vrot.slane %v6984_v37, 4  ;;  %v6677_v40 = vsel %vm3117_vm9, %v14427_v41, 0.0 }
 0x7f7   : > { %v6931_v55 = vrot.slane %v6930_v0, 2  ;;  %v14473_v1 = vadd.f32 %v6870_v26, %v6869_v16  ;;  %v7042_v51 = vadd.f32 %v7041_v43, %v7040_v29  ;;  %v6820_v34 = vadd.f32 %v6819_v24, %v6818_v63 }
 0x7f8   : > { %15847 = vst [vmem:[#allocation50_spill] sm:$0xff] %v14466_v46  ;;  %v7049_v44 = vadd.f32 %v15848_v22, %v14359_v25  ;;  %v6764_v4 = vadd.f32 %v6763_v27, %v6762_v59  ;;  %v7097_v36 = vrot.slane %v7096_v62, 4  ;;  %v7153_v60 = vrot.slane %v7152_v20, 4 }
 0x7f9   : > { %v6874_v52 = vadd.f32 %v6873_v61, %v6872_v19  ;;  %v7031_v56 = vrot.slane %v7030_v12, 1  ;;  %v6678_v46 = vadd.f32 %v6677_v40, %v14407_v7  ;;  %v7038_v25 = vrot.slane %v7037_v58, 1 }
 0x7fa   : > { %v7050_v22 = vrot.slane %v7049_v44, 2  ;;  %v15849_v41 = vrot.slane %v14326_v17, 2  ;;  %v6986_v16 = vadd.f32 %v6985_v33, %v6984_v37  ;;  %v6932_v26 = vadd.f32 %v6931_v55, %v6930_v0 }
 0x7fb   : > { %v6940_v29 = vrot.slane %v6939_v23, 1  ;;  %v15850_v59 = vrot.slane %v14299_v54, 2  ;;  %v6821_v63 = vrot.slane %v6820_v34, 1  ;;  %v6765_v19 = vrot.slane %v6764_v4, 1 }
 0x7fc   : > { %v6974_v21 = vadd.f32 %v15849_v41, %v14326_v17  ;;  %v7043_v43 = vrot.slane %v7042_v51, 2  ;;  %v14484_v24 = vadd.f32 %v7097_v36, %v7096_v62  ;;  %v7154_v7 = vadd.f32 %v7153_v60, %v7152_v20 }
 0x7fd   : > { %v6981_v31 = vadd.f32 %v15850_v59, %v14299_v54  ;;  %v6875_v61 = vrot.slane %v6874_v52, 2  ;;  %v14493_v41 = vadd.f32 %v14394_v15, %v6678_v46  ;;  %v7051_v54 = vadd.f32 %v7050_v22, %v7049_v44 }
 0x7fe   : > { %v6933_v0 = vrot.slane %v6932_v26, 1  ;;  %v14495_v37 = vadd.f32 %v6940_v29, %v6939_v23  ;;  %v14497_v62 = vadd.f32 %v7031_v56, %v7030_v12  ;;  %v14499_v60 = vadd.f32 %v7038_v25, %v7037_v58 }
 0x7ff   : > { %v14501_v20 = vadd.f32 %v6821_v63, %v6820_v34  ;;  %v14503_v40 = vadd.f32 %v6765_v19, %v6764_v4  ;;  %v14505_v55 = vadd.f32 %v6884_v32, %v6883_v47  ;;  %v7044_v36 = vadd.f32 %v7043_v43, %v7042_v51 }
 0x800   : > { %15851 = vst [vmem:[#allocation46_spill] sm:$0xff] %v14497_v62  ;;  %15852 = vst [vmem:[#allocation39_spill] sm:$0xff] %v14499_v60  ;;  %v6876_v46 = vadd.f32 %v6875_v61, %v6874_v52  ;;  %v6975_v44 = vrot.slane %v6974_v21, 1  ;;  %v7052_v58 = vrot.slane %v7051_v54, 1  ;;  %v6987_v56 = vrot.slane %v6986_v16, 2 }
 0x801   : > { %15853 = vst [vmem:[#allocation24_spill] sm:$0xff] %v14501_v20  ;;  %15854 = vst [vmem:[#allocation25_spill] sm:$0xff] %v14503_v40  ;;  %v14512_v34 = vadd.f32 %v6933_v0, %v6932_v26  ;;  %v6982_v4 = vrot.slane %v6981_v31, 1  ;;  %v15856_v47 = vrot.slane %v14356_v6, 4  ;;  %v15857_v25 = vrot.slane %v14370_v35, 4 }
 0x802   : > { %v7045_v63 = vrot.slane %v7044_v36, 1  ;;  %v15859_v19 = vrot.slane %v14332_v13, 2  ;;  %v6877_v61 = vrot.slane %v6876_v46, 1  ;;  %v15863_v40 = vrot.slane %v14324_v45, 2 }
 0x803   : > { %v14475_v8 = vpop.permute.xlu0 %6588  ;;  %15855 = vst [vmem:[#allocation40_spill] sm:$0xff] %v14512_v34  ;;  %v6993_v51 = vadd.f32 %v15856_v47, %v14356_v6  ;;  %v7161_v22 = vadd.f32 %v15857_v25, %v14370_v35  ;;  %v14532_v35 = vadd.f32 %v6975_v44, %v6974_v21  ;;  %v14534_v0 = vadd.f32 %v6982_v4, %v6981_v31 }
 0x804   : > { %v6701_v27 = vmul.f32 %v14475_v8, %v13877_v18  ;;  %v6694_v17 = vmul.f32 %v14475_v8, %v13912_v5  ;;  %v6715_v33 = vmul.f32 %v14475_v8, %v13995_v28  ;;  %v6708_v59 = vmul.f32 %v14475_v8, %v14083_v9 }
 0x805   : > { %v14522_v52 = vmul.f32 %v14475_v8, %v14151_v48  ;;  %v7142_v26 = vadd.f32 %v15859_v19, %v14332_v13  ;;  %v6722_v32 = vmul.f32 %v14475_v8, %v14206_v10  ;;  %15861 = vst [vmem:[#allocation42_spill] sm:$0xff] %v14532_v35  ;;  %15862 = vst [vmem:[#allocation41_spill] sm:$0xff] %v14534_v0  ;;  %v6994_v47 = vrot.slane %v6993_v51, 2 }
 0x806   : > { %v6837_v15 = vsel %vm3190_vm2, %v6701_v27, 0.0  ;;  %v6781_v23 = vsel %vm3190_vm2, %v6694_v17, 0.0  ;;  %v6949_v12 = vsel %vm3190_vm2, %v6715_v33, 0.0  ;;  %v6893_v6 = vsel %vm3190_vm2, %v6708_v59, 0.0 }
 0x807   : > { %15858 = vst [vmem:[#allocation28_spill] sm:$0xff] %v14522_v52  ;;  %v6838_v29 = vrot.slane %v6837_v15, 4  ;;  %v6782_v43 = vrot.slane %v6781_v23, 4  ;;  %v6950_v27 = vrot.slane %v6949_v12, 4  ;;  %v14530_v17 = vadd.f32 %v7052_v58, %v7051_v54 }
 0x808   : > { %v6988_v33 = vadd.f32 %v6987_v56, %v6986_v16  ;;  %v7155_v25 = vrot.slane %v7154_v7, 2  ;;  %v7162_v62 = vrot.slane %v7161_v22, 2  ;;  %v6894_v13 = vrot.slane %v6893_v6, 4 }
 0x809   : > { %15860 = vst [vmem:[#allocation49_spill] sm:$0xff] %v14530_v17  ;;  %v6839_v34 = vadd.f32 %v6838_v29, %v6837_v15  ;;  %v7061_v19 = vsel %vm3190_vm2, %v14522_v52, 0.0  ;;  %v7149_v59 = vadd.f32 %v15863_v40, %v14324_v45  ;;  %v6783_v20 = vadd.f32 %v6782_v43, %v6781_v23 }
 0x80a   : > { %v6951_v54 = vadd.f32 %v6950_v27, %v6949_v12  ;;  %v7005_v21 = vsel %vm3190_vm2, %v6722_v32, 0.0  ;;  %v7143_v44 = vrot.slane %v7142_v26, 1  ;;  %v6744_v16 = vmul.f32 %v14475_v8, %v14218_v53 }
 0x80b   : > { %v14544_v31 = vadd.f32 %v6877_v61, %v6876_v46  ;;  %v14546_v58 = vadd.f32 %v7045_v63, %v7044_v36  ;;  %v6989_v15 = vrot.slane %v6988_v33, 1  ;;  %v7062_v56 = vrot.slane %v7061_v19, 4 }
 0x80c   : > { %v6995_v4 = vadd.f32 %v6994_v47, %v6993_v51  ;;  %v7156_v29 = vadd.f32 %v7155_v25, %v7154_v7  ;;  %v7163_v35 = vadd.f32 %v7162_v62, %v7161_v22  ;;  %v6840_v38 = vrot.slane %v6839_v34, 2 }
 0x80d   : > { %15864 = vst [vmem:[#allocation43_spill] sm:$0xff] %v14544_v31  ;;  %15865 = vst [vmem:[#allocation48_spill] sm:$0xff] %v14546_v58  ;;  %v6895_v11 = vadd.f32 %v6894_v13, %v6893_v6  ;;  %v7006_v45 = vrot.slane %v7005_v21, 4  ;;  %v15866_v40 = vrot.slane %v14403_v49, 2  ;;  %v6784_v12 = vrot.slane %v6783_v20, 2 }
 0x80e   : > { %v6952_v32 = vrot.slane %v6951_v54, 2  ;;  %v14551_v43 = vadd.f32 %v7143_v44, %v7142_v26  ;;  %v7150_v46 = vrot.slane %v7149_v59, 1  ;;  %v6737_v36 = vmul.f32 %v14475_v8, %v14275_v57 }
 0x80f   : > { %v7086_v23 = vadd.f32 %v15866_v40, %v14403_v49  ;;  %v14555_v63 = vadd.f32 %v6989_v15, %v6988_v33  ;;  %v7173_v7 = vsel %vm3190_vm2, %v6744_v16, 0.0  ;;  %v15869_v62 = vrot.slane %v14401_v30, 2 }
 0x810   : > { %15867 = vst [vmem:[#allocation44_spill] sm:$0xff] %v14551_v43  ;;  %v7063_v22 = vadd.f32 %v7062_v56, %v7061_v19  ;;  %v6996_v27 = vrot.slane %v6995_v4, 1  ;;  %v7157_v49 = vrot.slane %v7156_v29, 1  ;;  %v7164_v6 = vrot.slane %v7163_v35, 1 }
 0x811   : > { %15868 = vst [vmem:[#allocation45_spill] sm:$0xff] %v14555_v63  ;;  %v14561_v51 = vadd.f32 %v15869_v62, %v14401_v30  ;;  %v14563_v61 = vadd.f32 %v6840_v38, %v6839_v34  ;;  %v6896_v26 = vrot.slane %v6895_v11, 2  ;;  %v7007_v47 = vadd.f32 %v7006_v45, %v7005_v21 }
 0x812   : > { %v7087_v25 = vrot.slane %v7086_v23, 1  ;;  %v14565_v13 = vadd.f32 %v6784_v12, %v6783_v20  ;;  %v14567_v8 = vadd.f32 %v6952_v32, %v6951_v54  ;;  %v14569_v33 = vadd.f32 %v7150_v46, %v7149_v59 }
 0x813   : > { %v7174_v44 = vrot.slane %v7173_v7, 4  ;;  %v14573_v30 = vsel %vm3117_vm9, %v14522_v52, 0.0  ;;  %v7117_v38 = vsel %vm3190_vm2, %v6737_v36, 0.0  ;;  %v7064_v34 = vrot.slane %v7063_v22, 2 }
 0x814   : > { %15870 = vst [vmem:[#allocation2_spill] sm:$0xff] %v14569_v33  ;;  %v14578_v21 = vadd.f32 %v6996_v27, %v6995_v4  ;;  %v14580_v20 = vadd.f32 %v7157_v49, %v7156_v29  ;;  %v14582_v54 = vadd.f32 %v7164_v6, %v7163_v35  ;;  %v6842_v59 = vrot.slane %v14563_v61, 1 }
 0x815   : > { %v14585_v15 = vadd.f32 %v6896_v26, %v6895_v11  ;;  %v7008_v56 = vrot.slane %v7007_v47, 2  ;;  %v14587_v45 = vadd.f32 %v7087_v25, %v7086_v23  ;;  %v6786_v12 = vrot.slane %v14565_v13, 1 }
 0x816   : > { %15871 = vst [vmem:[#allocation3_spill] sm:$0xff] %v14578_v21  ;;  %15872 = vst [vmem:[#allocation4_spill] sm:$0xff] %v14580_v20  ;;  %v7175_v46 = vadd.f32 %v7174_v44, %v7173_v7  ;;  %v7118_v36 = vrot.slane %v7117_v38, 4  ;;  %v15876_v49 = vrot.slane %v14386_v42, 4 }
 0x817   : > { %15873 = vst [vmem:[#allocation5_spill] sm:$0xff] %v14582_v54  ;;  %15874 = vst [vmem:[#allocation6_spill] sm:$0xff] %v14587_v45  ;;  %v6898_v31 = vrot.slane %v14585_v15, 1 }
 0x818   : > { %v7105_v7 = vadd.f32 %v15876_v49, %v14386_v42  ;;  %v7119_v52 = vadd.f32 %v7118_v36, %v7117_v38  ;;  %v7009_v36 = vadd.f32 %v7008_v56, %v7007_v47 }
 0x81e   : > { %v6587_v40 = vpop.permute.xlu1 %6586 }
 0x81f   : > { %v6693_v4 = vmul.f32 %v6587_v40, %v13912_v5  ;;  %v6700_v29 = vmul.f32 %v6587_v40, %v13877_v18  ;;  %v6707_v35 = vmul.f32 %v6587_v40, %v14083_v9  ;;  %v6714_v62 = vmul.f32 %v6587_v40, %v13995_v28 }
 0x820   : > { %v6729_v11 = vmul.f32 %v6587_v40, %v14151_v48  ;;  %v6743_v23 = vmul.f32 %v6587_v40, %v14218_v53  ;;  %v14598_v27 = vmul.f32 %v6587_v40, %v14206_v10  ;;  %v6736_v45 = vmul.f32 %v6587_v40, %v14275_v57 }
 0x821   : > { %v6830_v6 = vsel %vm3190_vm2, %v6700_v29, 0.0  ;;  %v6774_v26 = vsel %vm3190_vm2, %v6693_v4, 0.0  ;;  %v6942_v25 = vsel %vm3190_vm2, %v6714_v62, 0.0  ;;  %v6886_v44 = vsel %vm3190_vm2, %v6707_v35, 0.0 }
 0x822   : > { %15875 = vst [vmem:[#allocation9_spill] sm:$0xff] %v14598_v27  ;;  %v6831_v32 = vrot.slane %v6830_v6, 4  ;;  %v6775_v16 = vrot.slane %v6774_v26, 4  ;;  %v6943_v19 = vrot.slane %v6942_v25, 4  ;;  %v6887_v54 = vrot.slane %v6886_v44, 4 }
 0x823   : > { %v7054_v20 = vsel %vm3190_vm2, %v6729_v11, 0.0  ;;  %v6998_v42 = vsel %vm3190_vm2, %v14598_v27, 0.0  ;;  %v7065_v62 = vadd.f32 %v7064_v34, %v7063_v22  ;;  %v7166_v35 = vsel %vm3190_vm2, %v6743_v23, 0.0 }
 0x824   : > { %v6832_v49 = vadd.f32 %v6831_v32, %v6830_v6  ;;  %v6776_v29 = vadd.f32 %v6775_v16, %v6774_v26  ;;  %v6944_v43 = vadd.f32 %v6943_v19, %v6942_v25  ;;  %v7055_v4 = vrot.slane %v7054_v20, 4 }
 0x825   : > { %v6888_v63 = vadd.f32 %v6887_v54, %v6886_v44  ;;  %v6999_v58 = vrot.slane %v6998_v42, 4  ;;  %v7176_v40 = vrot.slane %v7175_v46, 2  ;;  %v7167_v21 = vrot.slane %v7166_v35, 4 }
 0x826   : > { %v7056_v38 = vadd.f32 %v7055_v4, %v7054_v20  ;;  %v7106_v11 = vrot.slane %v7105_v7, 2  ;;  %v7110_v0 = vsel %vm3190_vm2, %v6736_v45, 0.0  ;;  %v6833_v17 = vrot.slane %v6832_v49, 2 }
 0x827   : > { %v7000_v33 = vadd.f32 %v6999_v58, %v6998_v42  ;;  %v6777_v32 = vrot.slane %v6776_v29, 2  ;;  %v6945_v16 = vrot.slane %v6944_v43, 2  ;;  %v7120_v19 = vrot.slane %v7119_v52, 2 }
 0x828   : > { %v6889_v6 = vrot.slane %v6888_v63, 2  ;;  %v7057_v54 = vrot.slane %v7056_v38, 2  ;;  %v7168_v22 = vadd.f32 %v7167_v21, %v7166_v35  ;;  %v7111_v34 = vrot.slane %v7110_v0, 4 }
 0x829   : > { %v14615_v23 = vadd.f32 %v6842_v59, %v14563_v61  ;;  %v14618_v20 = vadd.f32 %v6786_v12, %v14565_v13  ;;  %v7001_v47 = vrot.slane %v7000_v33, 2  ;;  %v15877_v58 = vrot.slane %v14561_v51, 1 }
 0x82a   : > { %v7169_v45 = vrot.slane %v7168_v22, 2  ;;  %v7177_v26 = vadd.f32 %v7176_v40, %v7175_v46  ;;  %v15879_v25 = vrot.slane %v14484_v24, 2  ;;  %v7112_v21 = vadd.f32 %v7111_v34, %v7110_v0 }
 0x82b   : > { %v14623_v56 = vadd.f32 %v15877_v58, %v14561_v51  ;;  %v6681_v61 = vsel %vm3117_vm9, %v14598_v27, 0.0  ;;  %v6834_v59 = vadd.f32 %v6833_v17, %v6832_v49  ;;  %v7107_v42 = vadd.f32 %v7106_v11, %v7105_v7 }
 0x82c   : > { %v7100_v44 = vadd.f32 %v15879_v25, %v14484_v24  ;;  %v7121_v13 = vadd.f32 %v7120_v19, %v7119_v52  ;;  %v6778_v12 = vadd.f32 %v6777_v32, %v6776_v29  ;;  %v6946_v4 = vadd.f32 %v6945_v16, %v6944_v43 }
 0x82d   : > { %15878 = vst [vmem:[#allocation8_spill] sm:$0xff] %v14623_v56  ;;  %v6890_v35 = vadd.f32 %v6889_v6, %v6888_v63  ;;  %v7058_v60 = vadd.f32 %v7057_v54, %v7056_v38  ;;  %v15880_v51 = vrot.slane %v14567_v8, 1  ;;  %v7066_v46 = vrot.slane %v7065_v62, 1 }
 0x82e   : > { %v7002_v40 = vadd.f32 %v7001_v47, %v7000_v33  ;;  %v7010_v56 = vrot.slane %v7009_v36, 1  ;;  %v7170_v24 = vadd.f32 %v7169_v45, %v7168_v22  ;;  %v7178_v0 = vrot.slane %v7177_v26, 1 }
 0x82f   : > { %v14633_v58 = vadd.f32 %v15880_v51, %v14567_v8  ;;  %v7101_v34 = vrot.slane %v7100_v44, 1  ;;  %v7113_v25 = vrot.slane %v7112_v21, 2  ;;  %v6682_v17 = vadd.f32 %v6681_v61, %v14493_v41 }
 0x830   : > { %v6835_v7 = vrot.slane %v6834_v59, 1  ;;  %v7108_v52 = vrot.slane %v7107_v42, 1  ;;  %v7122_v49 = vrot.slane %v7121_v13, 1  ;;  %v6779_v43 = vrot.slane %v6778_v12, 1 }
 0x831   : > { %v6947_v63 = vrot.slane %v6946_v4, 1  ;;  %v6891_v29 = vrot.slane %v6890_v35, 1  ;;  %v7059_v38 = vrot.slane %v7058_v60, 1  ;;  %v14637_v11 = vadd.f32 %v6898_v31, %v14585_v15 }
 0x832   : > { %v14639_v8 = vadd.f32 %v7066_v46, %v7065_v62  ;;  %v7003_v33 = vrot.slane %v7002_v40, 1  ;;  %v14641_v32 = vadd.f32 %v7010_v56, %v7009_v36  ;;  %v7171_v16 = vrot.slane %v7170_v24, 1 }
 0x833   : > { %v14643_v19 = vadd.f32 %v7178_v0, %v7177_v26  ;;  %v14645_v6 = vadd.f32 %v7101_v34, %v7100_v44  ;;  %v14647_v41 = vadd.f32 %v7113_v25, %v7112_v21  ;;  %v14650_v54 = vadd.f32 %v14573_v30, %v6682_v17 }
 0x834   : > { %v14652_v22 = vadd.f32 %v6835_v7, %v6834_v59  ;;  %v14654_v47 = vadd.f32 %v7108_v52, %v7107_v42  ;;  %v14656_v31 = vadd.f32 %v7122_v49, %v7121_v13  ;;  %v14658_v62 = vadd.f32 %v6779_v43, %v6778_v12 }
 0x835   : > { %15881 = vst [vmem:[#allocation7_spill] sm:$0xff] %v14643_v19  ;;  %15882 = vst [vmem:[#allocation19_spill] sm:$0xff] %v14645_v6  ;;  %v6593_v15 = vpop.permute.xlu0 %6592  ;;  %v14660_v36 = vadd.f32 %v6947_v63, %v6946_v4  ;;  %v14662_v56 = vadd.f32 %v6891_v29, %v6890_v35  ;;  %v14664_v45 = vadd.f32 %v7059_v38, %v7058_v60 }
 0x836   : > { %15883 = vst [vmem:[#allocation14_spill] sm:$0xff] %v14647_v41  ;;  %15884 = vst [vmem:[#allocation20_spill] sm:$0xff] %v14654_v47  ;;  %v6703_v26 = vmul.f32 %v6593_v15, %v13877_v18  ;;  %v6696_v30 = vmul.f32 %v6593_v15, %v13912_v5  ;;  %v6717_v44 = vmul.f32 %v6593_v15, %v13995_v28  ;;  %v15900_v47 = vld [vmem:[#allocation37_spill] sm:$0xff] }
 0x837   : > { %15885 = vst [vmem:[#allocation47_spill] sm:$0xff] %v14656_v31  ;;  %v14669_v21 = vadd.f32 %v7003_v33, %v7002_v40  ;;  %v14672_v61 = vmul.f32 %v6593_v15, %v14218_v53  ;;  %v6710_v59 = vmul.f32 %v6593_v15, %v14083_v9  ;;  %v14675_v42 = vadd.f32 %v7171_v16, %v7170_v24  ;;  %v15899_v31 = vld [vmem:[#allocation33_spill] sm:$0xff] }
 0x838   : > { %v6851_v60 = vsel %vm3190_vm2, %v6703_v26, 0.0  ;;  %v6795_v12 = vsel %vm3190_vm2, %v6696_v30, 0.0  ;;  %v6731_v4 = vmul.f32 %v6593_v15, %v14151_v48  ;;  %v14682_v35 = vmul.f32 %v6593_v15, %v14206_v10 }
 0x839   : > { %15886 = vst [vmem:[#allocation35_spill] sm:$0xff] %v14672_v61  ;;  %15887 = vst [vmem:[#allocation51_spill] sm:$0xff] %v14675_v42  ;;  %v14684_v51 = vpop.permute.xlu0 %7196  ;;  %v6852_v46 = vrot.slane %v6851_v60, 4  ;;  %v6796_v40 = vrot.slane %v6795_v12, 4  ;;  %v6963_v0 = vsel %vm3190_vm2, %v6717_v44, 0.0  ;;  %v14688_v24 = vmul.f32 %v6593_v15, %v14275_v57 }
 0x83a   : > { %15888 = vst [vmem:[#allocation52_spill] sm:$0xff] %v14684_v51  ;;  %v7227_v34 = vmul.f32 %v14684_v51, %v14420_v3  ;;  %v7219_v25 = vmul.f32 %v14684_v51, %v14431_v50  ;;  %v6964_v17 = vrot.slane %v6963_v0, 4  ;;  %v7243_v7 = vmul.f32 %v14684_v51, %v14447_v2 }
 0x83b   : > { %15889 = vst [vmem:[#allocation53_spill] sm:$0xff] %v14688_v24  ;;  %v6853_v52 = vadd.f32 %v6852_v46, %v6851_v60  ;;  %v6797_v49 = vadd.f32 %v6796_v40, %v6795_v12  ;;  %v6907_v43 = vsel %vm3190_vm2, %v6710_v59, 0.0  ;;  %v7235_v63 = vmul.f32 %v14684_v51, %v14473_v1 }
 0x83c   : > { %v14701_v29 = vsel %vm3117_vm9, %v14672_v61, 0.0  ;;  %v14704_v3 = vsel %vm3190_vm2, %v7227_v34, 0.0  ;;  %v14707_v50 = vsel %vm3190_vm2, %v7219_v25, 0.0  ;;  %v6965_v38 = vadd.f32 %v6964_v17, %v6963_v0 }
 0x83d   : > { %v14709_v33 = vpop.permute.xlu0 %7200  ;;  %v6854_v2 = vrot.slane %v6853_v52, 2  ;;  %v6798_v16 = vrot.slane %v6797_v49, 2  ;;  %v14712_v15 = vsel %vm3190_vm2, %v7243_v7, 0.0  ;;  %v6908_v26 = vrot.slane %v6907_v43, 4 }
 0x83e   : > { %15890 = vst [vmem:[#allocation54_spill] sm:$0xff] %v14709_v33  ;;  %v7229_v1 = vmul.f32 %v14709_v33, %v14442_v14  ;;  %v7221_v30 = vmul.f32 %v14709_v33, %v14455_v39  ;;  %v6966_v44 = vrot.slane %v6965_v38, 2  ;;  %v7245_v59 = vmul.f32 %v14709_v33, %v14495_v37 }
 0x83f   : > { %v6855_v60 = vadd.f32 %v6854_v2, %v6853_v52  ;;  %v6799_v12 = vadd.f32 %v6798_v16, %v6797_v49  ;;  %v6909_v46 = vadd.f32 %v6908_v26, %v6907_v43  ;;  %v14721_v40 = vsel %vm3190_vm2, %v7235_v63, 0.0 }
 0x840   : > { %v14724_v0 = vsel %vm3190_vm2, %v7229_v1, 0.0  ;;  %v14727_v34 = vsel %vm3190_vm2, %v7221_v30, 0.0  ;;  %v6967_v14 = vadd.f32 %v6966_v44, %v6965_v38  ;;  %v7237_v39 = vmul.f32 %v14709_v33, %v14505_v55 }
 0x841   : > { %v14731_v25 = vpop.permute.xlu0 %7204  ;;  %v6856_v17 = vrot.slane %v6855_v60, 1  ;;  %v6800_v37 = vrot.slane %v6799_v12, 1  ;;  %v14734_v7 = vsel %vm3190_vm2, %v7245_v59, 0.0  ;;  %v6910_v52 = vrot.slane %v6909_v46, 2 }
 0x842   : > { %15891 = vst [vmem:[#allocation55_spill] sm:$0xff] %v14731_v25  ;;  %v7231_v49 = vmul.f32 %v14731_v25, %v14615_v23  ;;  %v7223_v43 = vmul.f32 %v14731_v25, %v14618_v20  ;;  %v6968_v63 = vrot.slane %v6967_v14, 1  ;;  %v7247_v38 = vmul.f32 %v14731_v25, %v14633_v58 }
 0x843   : > { %v6857_v2 = vadd.f32 %v6856_v17, %v6855_v60  ;;  %v6801_v55 = vadd.f32 %v6800_v37, %v6799_v12  ;;  %v6911_v16 = vadd.f32 %v6910_v52, %v6909_v46  ;;  %v7239_v26 = vmul.f32 %v14731_v25, %v14637_v11  ;;  %v15892_v12 = vld [vmem:[#allocation39_spill] sm:$0xff] }
 0x844   : > { %v14745_v1 = vsel %vm3190_vm2, %v7231_v49, 0.0  ;;  %v14748_v30 = vsel %vm3190_vm2, %v7223_v43, 0.0  ;;  %v6969_v23 = vadd.f32 %v6968_v63, %v6967_v14  ;;  %v14751_v44 = vsel %vm3190_vm2, %v7237_v39, 0.0  ;;  %v15893_v49 = vld [vmem:[#allocation49_spill] sm:$0xff] }
 0x845   : > { %v14753_v20 = vpop.permute.xlu0 %7208  ;;  %v14756_v58 = vsel %vm3190_vm2, %v7247_v38, 0.0  ;;  %v6912_v59 = vrot.slane %v6911_v16, 1  ;;  %v7075_v60 = vsel %vm3190_vm2, %v6731_v4, 0.0  ;;  %v7259_v11 = vmul.f32 %v14684_v51, %v15892_v12 }
 0x846   : > { %v7233_v46 = vmul.f32 %v14753_v20, %v6857_v2  ;;  %v7225_v17 = vmul.f32 %v14753_v20, %v6801_v55  ;;  %v7249_v14 = vmul.f32 %v14753_v20, %v6969_v23  ;;  %v7076_v37 = vrot.slane %v7075_v60, 4 }
 0x847   : > { %v6913_v39 = vadd.f32 %v6912_v59, %v6911_v16  ;;  %v14765_v52 = vsel %vm3190_vm2, %v7239_v26, 0.0  ;;  %v7261_v43 = vmul.f32 %v14709_v33, %v15893_v49  ;;  %v7263_v4 = vmul.f32 %v14731_v25, %v14639_v8 }
 0x848   : > { %v14772_v63 = vsel %vm3190_vm2, %v7233_v46, 0.0  ;;  %v14775_v38 = vsel %vm3190_vm2, %v7225_v17, 0.0  ;;  %v7077_v2 = vadd.f32 %v7076_v37, %v7075_v60  ;;  %v14778_v55 = vsel %vm3190_vm2, %v7259_v11, 0.0  ;;  %v15894_v60 = vld [vmem:[#allocation41_spill] sm:$0xff] }
 0x849   : > { %v14781_v16 = vsel %vm3190_vm2, %v7249_v14, 0.0  ;;  %v7241_v26 = vmul.f32 %v14753_v20, %v6913_v39  ;;  %v14785_v23 = vsel %vm3190_vm2, %v7261_v43, 0.0  ;;  %v7019_v8 = vsel %vm3190_vm2, %v14682_v35, 0.0  ;;  %v15895_v14 = vld [vmem:[#allocation3_spill] sm:$0xff] }
 0x84a   : > { %v7078_v59 = vrot.slane %v7077_v2, 2  ;;  %v14790_v12 = vsel %vm3190_vm2, %v7263_v4, 0.0  ;;  %v7020_v46 = vrot.slane %v7019_v8, 4  ;;  %v7251_v11 = vmul.f32 %v14684_v51, %v15894_v60  ;;  %v14809_v49 = vpop.permute.xlu1 %6590  ;;  %v15896_v60 = vld [vmem:[#allocation2_spill] sm:$0xff] }
 0x84b   : > { %v14795_v17 = vsel %vm3190_vm2, %v7241_v26, 0.0  ;;  %v14799_v37 = vmul.f32 %v14709_v33, %v15895_v14  ;;  %v14803_v39 = vmul.f32 %v14731_v25, %v14641_v32  ;;  %v14807_v35 = vsel %vm3190_vm2, %v14672_v61, 0.0 }
 0x84c   : > { %v14811_v43 = vadd.f32 %v7078_v59, %v7077_v2  ;;  %v14813_v4 = vadd.f32 %v7020_v46, %v7019_v8  ;;  %v14816_v26 = vsel %vm3190_vm2, %v7251_v11, 0.0  ;;  %v14820_v14 = vmul.f32 %v14684_v51, %v15896_v60  ;;  %v15901_v51 = vld [vmem:[#allocation38_spill] sm:$0xff] }
 0x84d   : > { %v14824_v32 = vmul.f32 %v14809_v49, %v14275_v57  ;;  %v6702_v13 = vmul.f32 %v14809_v49, %v13877_v18  ;;  %v6695_v2 = vmul.f32 %v14809_v49, %v13912_v5  ;;  %v6716_v8 = vmul.f32 %v14809_v49, %v13995_v28 }
 0x84e   : > { %15897 = vst [vmem:[#allocation39_spill] sm:$0xff] %v14820_v14  ;;  %v6709_v59 = vmul.f32 %v14809_v49, %v14083_v9  ;;  %v14836_v46 = vmul.f32 %v14809_v49, %v14151_v48  ;;  %v14841_v60 = vmul.f32 %v14809_v49, %v14206_v10  ;;  %v14848_v9 = vpop.permute.xlu1 %7194 }
 0x84f   : > { %15898 = vst [vmem:[#allocation49_spill] sm:$0xff] %v14824_v32  ;;  %v6685_v61 = vsel %vm3117_vm9, %v14824_v32, 0.0  ;;  %v6844_v27 = vsel %vm3190_vm2, %v6702_v13, 0.0  ;;  %v6788_v57 = vsel %vm3190_vm2, %v6695_v2, 0.0  ;;  %v6956_v28 = vsel %vm3190_vm2, %v6716_v8, 0.0 }
 0x850   : > { %v6686_v48 = vadd.f32 %v6685_v61, %v14650_v54  ;;  %v6845_v5 = vrot.slane %v6844_v27, 4  ;;  %v6789_v18 = vrot.slane %v6788_v57, 4  ;;  %v6957_v11 = vrot.slane %v6956_v28, 4 }
 0x851   : > { %v7226_v10 = vmul.f32 %v14848_v9, %v15899_v31  ;;  %v7218_v6 = vmul.f32 %v14848_v9, %v15900_v47  ;;  %v7242_v13 = vmul.f32 %v14848_v9, %v15901_v51  ;;  %v6900_v2 = vsel %vm3190_vm2, %v6709_v59, 0.0  ;;  %v15902_v59 = vld [vmem:[#allocation24_spill] sm:$0xff] }
 0x852   : > { %v6688_v8 = vadd.f32 %v14701_v29, %v6686_v48  ;;  %v6846_v41 = vadd.f32 %v6845_v5, %v6844_v27  ;;  %v6790_v24 = vadd.f32 %v6789_v18, %v6788_v57  ;;  %v6958_v32 = vadd.f32 %v6957_v11, %v6956_v28  ;;  %v14862_v19 = vpop.permute.xlu1 %7198  ;;  %v15903_v5 = vld [vmem:[#allocation25_spill] sm:$0xff] }
 0x853   : > { %v7297_v54 = vsel %vm3190_vm2, %v7226_v10, 0.0  ;;  %v7282_v61 = vsel %vm3190_vm2, %v7218_v6, 0.0  ;;  %v7327_v25 = vsel %vm3190_vm2, %v7242_v13, 0.0  ;;  %v6901_v31 = vrot.slane %v6900_v2, 4  ;;  %v15904_v6 = vld [vmem:[#allocation40_spill] sm:$0xff] }
 0x854   : > { %v6689_v47 = vmul.f32 0.125, %v6688_v8  ;;  %v6847_v14 = vrot.slane %v6846_v41, 2  ;;  %v7299_v51 = vadd.f32 %v14704_v3, %v7297_v54  ;;  %v6791_v42 = vrot.slane %v6790_v24, 2 }
 0x855   : > { %v7228_v48 = vmul.f32 %v14862_v19, %v15902_v59  ;;  %v7220_v18 = vmul.f32 %v14862_v19, %v15903_v5  ;;  %v7284_v28 = vadd.f32 %v14707_v50, %v7282_v61  ;;  %v6959_v10 = vrot.slane %v6958_v32, 2 }
 0x856   : > { %7411 = vrot.lane.b32.xlu1 %v6689_v47, %s11322_s16  ;;  %v6848_v57 = vadd.f32 %v6847_v14, %v6846_v41  ;;  %v6792_v27 = vadd.f32 %v6791_v42, %v6790_v24  ;;  %v7244_v29 = vmul.f32 %v14862_v19, %v15904_v6  ;;  %v7329_v11 = vadd.f32 %v14712_v15, %v7327_v25  ;;  %v14876_v59 = vpop.permute.xlu1 %7202 }
 0x857   : > { %v7300_v3 = vsel %vm3190_vm2, %v7228_v48, 0.0  ;;  %v7285_v13 = vsel %vm3190_vm2, %v7220_v18, 0.0  ;;  %v6960_v8 = vadd.f32 %v6959_v10, %v6958_v32  ;;  %v6902_v54 = vadd.f32 %v6901_v31, %v6900_v2 }
 0x858   : > { %v6849_v5 = vrot.slane %v6848_v57, 1  ;;  %v7301_v50 = vadd.f32 %v7300_v3, %v7299_v51  ;;  %v6793_v61 = vrot.slane %v6792_v27, 1  ;;  %v7286_v33 = vadd.f32 %v7285_v13, %v7284_v28 }
 0x859   : > { %v7230_v41 = vmul.f32 %v14876_v59, %v14652_v22  ;;  %v7222_v42 = vmul.f32 %v14876_v59, %v14658_v62  ;;  %v6961_v24 = vrot.slane %v6960_v8, 1  ;;  %v7246_v15 = vmul.f32 %v14876_v59, %v14660_v36 }
 0x85a   : > { %v6850_v25 = vadd.f32 %v6849_v5, %v6848_v57  ;;  %v7303_v14 = vadd.f32 %v14724_v0, %v7301_v50  ;;  %v6794_v32 = vadd.f32 %v6793_v61, %v6792_v27  ;;  %v7288_v2 = vadd.f32 %v14727_v34, %v7286_v33  ;;  %v14889_v48 = vpop.permute.xlu1 %7206 }
 0x85b   : > { %v7304_v31 = vsel %vm3190_vm2, %v7230_v41, 0.0  ;;  %v7289_v47 = vsel %vm3190_vm2, %v7222_v42, 0.0  ;;  %v6962_v51 = vadd.f32 %v6961_v24, %v6960_v8  ;;  %v7330_v22 = vsel %vm3190_vm2, %v7244_v29, 0.0  ;;  %v15905_v29 = vld [vmem:[#allocation50_spill] sm:$0xff]  ;;  %v15906_v42 = vld [vmem:[#allocation43_spill] sm:$0xff] }
 0x85c   : > { %v7305_v62 = vadd.f32 %v7304_v31, %v7303_v14  ;;  %v7290_v18 = vadd.f32 %v7289_v47, %v7288_v2  ;;  %v7331_v28 = vadd.f32 %v7330_v22, %v7329_v11  ;;  %v7334_v36 = vsel %vm3190_vm2, %v7246_v15, 0.0 }
 0x85d   : > { %v7232_v10 = vmul.f32 %v14889_v48, %v6850_v25  ;;  %v7224_v0 = vmul.f32 %v14889_v48, %v6794_v32  ;;  %v7248_v33 = vmul.f32 %v14889_v48, %v6962_v51  ;;  %v6903_v34 = vrot.slane %v6902_v54, 2 }
 0x85e   : > { %v7307_v57 = vadd.f32 %v14745_v1, %v7305_v62  ;;  %v7292_v27 = vadd.f32 %v14748_v30, %v7290_v18  ;;  %v7333_v6 = vadd.f32 %v14734_v7, %v7331_v28  ;;  %v7234_v3 = vmul.f32 %v14848_v9, %v15905_v29 }
 0x85f   : > { %v7308_v11 = vsel %vm3190_vm2, %v7232_v10, 0.0  ;;  %v7293_v13 = vsel %vm3190_vm2, %v7224_v0, 0.0  ;;  %v7338_v8 = vsel %vm3190_vm2, %v7248_v33, 0.0  ;;  %v6904_v5 = vadd.f32 %v6903_v34, %v6902_v54  ;;  %v15909_v0 = vld [vmem:[#allocation48_spill] sm:$0xff] }
 0x860   : > { %v7309_v50 = vadd.f32 %v7308_v11, %v7307_v57  ;;  %v7294_v61 = vadd.f32 %v7293_v13, %v7292_v27  ;;  %v7335_v41 = vadd.f32 %v7334_v36, %v7333_v6  ;;  %v7236_v1 = vmul.f32 %v14862_v19, %v15906_v42 }
 0x861   : > { %v6905_v24 = vrot.slane %v6904_v5, 1  ;;  %v7238_v7 = vmul.f32 %v14876_v59, %v14662_v56  ;;  %v7312_v30 = vsel %vm3190_vm2, %v7234_v3, 0.0  ;;  %v7068_v15 = vsel %vm3190_vm2, %v14836_v46, 0.0 }
 0x862   : > { %v7311_v25 = vadd.f32 %v14772_v63, %v7309_v50  ;;  %v7296_v14 = vadd.f32 %v14775_v38, %v7294_v61  ;;  %v7337_v54 = vadd.f32 %v14756_v58, %v7335_v41  ;;  %v7314_v32 = vadd.f32 %v14721_v40, %v7312_v30  ;;  %v15908_v58 = vld [vmem:[#allocation46_spill] sm:$0xff] }
 0x863   : > { %v6906_v2 = vadd.f32 %v6905_v24, %v6904_v5  ;;  %v7315_v31 = vsel %vm3190_vm2, %v7236_v1, 0.0  ;;  %v7319_v47 = vsel %vm3190_vm2, %v7238_v7, 0.0  ;;  %v7069_v51 = vrot.slane %v7068_v15, 4  ;;  %v15910_v50 = vld [vmem:[#allocation42_spill] sm:$0xff]  ;;  %v15911_v1 = vld [vmem:[#allocation45_spill] sm:$0xff] }
 0x864   : > { %v7403_v56 = vmul.f32 0.015625, %v7311_v25  ;;  %v7402_v22 = vmul.f32 0.015625, %v7296_v14  ;;  %v7339_v62 = vadd.f32 %v7338_v8, %v7337_v54  ;;  %v7316_v18 = vadd.f32 %v7315_v31, %v7314_v32 }
 0x865   : > { %v7240_v46 = vmul.f32 %v14889_v48, %v6906_v2  ;;  %v7070_v28 = vadd.f32 %v7069_v51, %v7068_v15  ;;  %v15907_v63 = vrot.slane %v14811_v43, 1  ;;  %v7258_v40 = vmul.f32 %v14848_v9, %v15908_v58 }
 0x866   : > { %7424 = vrot.lane.b32.xlu1 %v7403_v56, %s11323_s17  ;;  %7422 = vrot.lane.b32.xlu0 %v7402_v22, %s11323_s17  ;;  %v7341_v36 = vadd.f32 %v14781_v16, %v7339_v62  ;;  %v7318_v10 = vadd.f32 %v14751_v44, %v7316_v18  ;;  %v7260_v33 = vmul.f32 %v14862_v19, %v15909_v0  ;;  %v7347_v34 = vsel %vm3190_vm2, %v14799_v37, 0.0 }
 0x867   : > { %v7081_v38 = vadd.f32 %v15907_v63, %v14811_v43  ;;  %v7323_v57 = vsel %vm3190_vm2, %v7240_v46, 0.0  ;;  %v7071_v43 = vrot.slane %v7070_v28, 2  ;;  %v7262_v27 = vmul.f32 %v14876_v59, %v14664_v45 }
 0x868   : > { %v7012_v6 = vsel %vm3190_vm2, %v14841_v60, 0.0  ;;  %v7405_v29 = vmul.f32 0.015625, %v7341_v36  ;;  %v7320_v3 = vadd.f32 %v7319_v47, %v7318_v10  ;;  %v7357_v16 = vsel %vm3190_vm2, %v7258_v40, 0.0  ;;  %v15912_v36 = vld [vmem:[#allocation44_spill] sm:$0xff] }
 0x869   : > { %v7360_v44 = vsel %vm3190_vm2, %v7260_v33, 0.0  ;;  %v7072_v11 = vadd.f32 %v7071_v43, %v7070_v28  ;;  %v7265_v13 = vmul.f32 %v14753_v20, %v7081_v38  ;;  %v7359_v37 = vadd.f32 %v14778_v55, %v7357_v16  ;;  %v15913_v43 = vld [vmem:[#allocation4_spill] sm:$0xff] }
 0x86a   : > { %v7364_v8 = vsel %vm3190_vm2, %v7262_v27, 0.0  ;;  %7428 = vrot.lane.b32.xlu1 %v7405_v29, %s11323_s17  ;;  %v7322_v45 = vadd.f32 %v14765_v52, %v7320_v3  ;;  %v7013_v5 = vrot.slane %v7012_v6, 4  ;;  %v7022_v60 = vrot.slane %v14813_v4, 2  ;;  %v15915_v29 = vld [vmem:[#allocation54_spill] sm:$0xff] }
 0x86b   : > { %v7250_v61 = vmul.f32 %v14848_v9, %v15910_v50  ;;  %v7073_v41 = vrot.slane %v7072_v11, 1  ;;  %v7361_v42 = vadd.f32 %v7360_v44, %v7359_v37  ;;  %v7252_v24 = vmul.f32 %v14862_v19, %v15911_v1  ;;  %v15918_v1 = vld [vmem:[#allocation7_spill] sm:$0xff] }
 0x86c   : > { %v7254_v55 = vmul.f32 %v14876_v59, %v14669_v21  ;;  %v7324_v7 = vadd.f32 %v7323_v57, %v7322_v45  ;;  %v7014_v30 = vadd.f32 %v7013_v5, %v7012_v6  ;;  %v7023_v15 = vadd.f32 %v7022_v60, %v14813_v4  ;;  %v15914_v6 = vld [vmem:[#allocation5_spill] sm:$0xff]  ;;  %v15916_v45 = vld [vmem:[#allocation51_spill] sm:$0xff] }
 0x86d   : > { %v7342_v52 = vsel %vm3190_vm2, %v7250_v61, 0.0  ;;  %v7074_v25 = vadd.f32 %v7073_v41, %v7072_v11  ;;  %v7363_v14 = vadd.f32 %v14785_v23, %v7361_v42  ;;  %v7345_v32 = vsel %vm3190_vm2, %v7252_v24, 0.0  ;;  %v15917_v61 = vld [vmem:[#allocation39_spill] sm:$0xff] }
 0x86e   : > { %v7344_v54 = vadd.f32 %v14816_v26, %v7342_v52  ;;  %v7326_v2 = vadd.f32 %v14795_v17, %v7324_v7  ;;  %v7370_v31 = vsel %vm3190_vm2, %v7265_v13, 0.0  ;;  %v7015_v47 = vrot.slane %v7014_v30, 2  ;;  %v15919_v24 = vld [vmem:[#allocation55_spill] sm:$0xff] }
 0x86f   : > { %v7024_v51 = vrot.slane %v7023_v15, 1  ;;  %v7264_v21 = vmul.f32 %v14889_v48, %v7074_v25  ;;  %v7365_v56 = vadd.f32 %v7364_v8, %v7363_v14  ;;  %v7349_v4 = vsel %vm3190_vm2, %v7254_v55, 0.0 }
 0x870   : > { %v7346_v22 = vadd.f32 %v7345_v32, %v7344_v54  ;;  %v7404_v62 = vmul.f32 0.015625, %v7326_v2  ;;  %v7016_v18 = vadd.f32 %v7015_v47, %v7014_v30  ;;  %v6745_v23 = vmul.f32 %v14809_v49, %v14218_v53  ;;  %v15920_v2 = vld [vmem:[#allocation49_spill] sm:$0xff] }
 0x871   : > { %v7025_v46 = vadd.f32 %v7024_v51, %v7023_v15  ;;  %v7367_v26 = vadd.f32 %v14790_v12, %v7365_v56  ;;  %v7368_v17 = vsel %vm3190_vm2, %v7264_v21, 0.0  ;;  %v7188_v63 = vrot.slane %v14807_v35, 4  ;;  %v15921_v47 = vld [vmem:[#allocation53_spill] sm:$0xff] }
 0x872   : > { %v7348_v28 = vadd.f32 %v7347_v34, %v7346_v22  ;;  %7426 = vrot.lane.b32.xlu0 %v7404_v62, %s11323_s17  ;;  %v7017_v38 = vrot.slane %v7016_v18, 1  ;;  %v7180_v40 = vsel %vm3190_vm2, %v6745_v23, 0.0  ;;  %v7274_v10 = vmul.f32 %v14848_v9, %v15912_v36  ;;  %v15926_v36 = vld [vmem:[#allocation52_spill] sm:$0xff] }
 0x873   : > { %v7257_v58 = vmul.f32 %v14753_v20, %v7025_v46  ;;  %v7369_v0 = vadd.f32 %v7368_v17, %v7367_v26  ;;  %v7181_v49 = vrot.slane %v7180_v40, 4  ;;  %v7189_v12 = vadd.f32 %v7188_v63, %v14807_v35  ;;  %v15924_v17 = vld [vmem:[#allocation6_spill] sm:$0xff] }
 0x874   : > { %v7350_v33 = vadd.f32 %v7349_v4, %v7348_v28  ;;  %v7018_v57 = vadd.f32 %v7017_v38, %v7016_v18  ;;  %v7351_v34 = vsel %vm3190_vm2, %v14803_v39, 0.0  ;;  %v7276_v27 = vmul.f32 %v14862_v19, %v15913_v43  ;;  %v15922_v18 = vld [vmem:[#allocation14_spill] sm:$0xff] }
 0x875   : > { %v7277_v3 = vmul.f32 %v15915_v29, %v15914_v6  ;;  %v7371_v16 = vadd.f32 %v7370_v31, %v7369_v0  ;;  %v7182_v11 = vadd.f32 %v7181_v49, %v7180_v40  ;;  %v7190_v13 = vrot.slane %v7189_v12, 2  ;;  %v15925_v40 = vld [vmem:[#allocation8_spill] sm:$0xff] }
 0x876   : > { %v7352_v44 = vadd.f32 %v7351_v34, %v7350_v33  ;;  %v7256_v37 = vmul.f32 %v14889_v48, %v7018_v57  ;;  %v7355_v8 = vsel %vm3190_vm2, %v7257_v58, 0.0  ;;  %v7278_v35 = vmul.f32 %v14876_v59, %v15916_v45 }
 0x877   : > { %v7387_v5 = vsel %vm3190_vm2, %v7274_v10, 0.0  ;;  %v7407_v39 = vmul.f32 0.015625, %v7371_v16  ;;  %v7183_v60 = vrot.slane %v7182_v11, 2  ;;  %v7191_v50 = vadd.f32 %v7190_v13, %v7189_v12  ;;  %v15927_v12 = vld [vmem:[#allocation19_spill] sm:$0xff] }
 0x878   : > { %v7388_v41 = vsel %vm3190_vm2, %v15917_v61, 0.0  ;;  %v7353_v42 = vsel %vm3190_vm2, %v7256_v37, 0.0  ;;  %v7279_v55 = vmul.f32 %v15919_v24, %v15918_v1  ;;  %v7390_v30 = vsel %vm3190_vm2, %v7276_v27, 0.0  ;;  %v15928_v27 = vld [vmem:[#allocation20_spill] sm:$0xff] }
 0x879   : > { %v7389_v7 = vadd.f32 %v7388_v41, %v7387_v5  ;;  %7432 = vrot.lane.b32.xlu1 %v7407_v39, %s11323_s17  ;;  %v7354_v15 = vadd.f32 %v7353_v42, %v7352_v44  ;;  %v7184_v52 = vadd.f32 %v7183_v60, %v7182_v11  ;;  %v7192_v25 = vrot.slane %v7191_v50, 1  ;;  %v7504_v60 = vld [vmem:[%s15583_s9 + $0x10] sm:$0xff]  ;;  %v15929_v41 = vld [vmem:[#allocation47_spill] sm:$0xff] }
 0x87a   : > { %v7392_v14 = vsel %vm3190_vm2, %v7277_v3, 0.0  ;;  %v7394_v32 = vsel %vm3190_vm2, %v7278_v35, 0.0  ;;  %v7124_v31 = vsel %vm3190_vm2, %v15920_v2, 0.0  ;;  %v7131_v51 = vsel %vm3190_vm2, %v15921_v47, 0.0 }
 0x87b   : > { %v7391_v54 = vadd.f32 %v7390_v30, %v7389_v7  ;;  %v7356_v21 = vadd.f32 %v7355_v8, %v7354_v15  ;;  %v7185_v56 = vrot.slane %v7184_v52, 1  ;;  %v7193_v22 = vadd.f32 %v7192_v25, %v7191_v50  ;;  %v7505_v50 = vld [vmem:[%s15583_s9 + $0x18] sm:$0xff]  ;;  %v7506_v25 = vld [vmem:[%s15583_s9 + $0x20] sm:$0xff] }
 0x87c   : > { %v7125_v4 = vrot.slane %v7124_v31, 4  ;;  %v15923_v46 = vrot.slane %v15922_v18, 1  ;;  %v7132_v26 = vrot.slane %v7131_v51, 4  ;;  %v7266_v28 = vmul.f32 %v14848_v9, %v15924_v17 }
 0x87d   : > { %v7393_v62 = vadd.f32 %v7392_v14, %v7391_v54  ;;  %v7406_v63 = vmul.f32 0.015625, %v7356_v21  ;;  %v7186_v38 = vadd.f32 %v7185_v56, %v7184_v52  ;;  %v7267_v10 = vmul.f32 %v15926_v36, %v15925_v40 }
 0x87e   : > { %v7116_v23 = vadd.f32 %v15923_v46, %v15922_v18  ;;  %v7126_v58 = vadd.f32 %v7125_v4, %v7124_v31  ;;  %v7281_v0 = vmul.f32 %v14753_v20, %v7193_v22  ;;  %v7133_v49 = vadd.f32 %v7132_v26, %v7131_v51 }
 0x87f   : > { %v7395_v33 = vadd.f32 %v7394_v32, %v7393_v62  ;;  %v7268_v57 = vmul.f32 %v14862_v19, %v15927_v12  ;;  %7430 = vrot.lane.b32.xlu0 %v7406_v63, %s11323_s17  ;;  %v7280_v34 = vmul.f32 %v14889_v48, %v7186_v38  ;;  %v7396_v43 = vsel %vm3190_vm2, %v7279_v55, 0.0  ;;  %v7502_v19 = vld [vmem:[%s15583_s9] sm:$0xff]  ;;  %v15053_v63 = vld [vmem:[%s15583_s9 + $0x30] sm:$0xff] }
 0x880   : > { %v7127_v9 = vrot.slane %v7126_v58, 2  ;;  %v7269_v6 = vmul.f32 %v15915_v29, %v15928_v27  ;;  %v7134_v16 = vrot.slane %v7133_v49, 2  ;;  %v7270_v44 = vmul.f32 %v14876_v59, %v7116_v23  ;;  %v7503_v29 = vld [vmem:[%s15583_s9 + $0x8] sm:$0xff] }
 0x881   : > { %v7397_v3 = vadd.f32 %v7396_v43, %v7395_v33  ;;  %v7372_v11 = vsel %vm3190_vm2, %v7266_v28, 0.0  ;;  %v7398_v13 = vsel %vm3190_vm2, %v7280_v34, 0.0  ;;  %v7373_v8 = vsel %vm3190_vm2, %v7267_v10, 0.0 }
 0x882   : > { %v7128_v37 = vadd.f32 %v7127_v9, %v7126_v58  ;;  %v7375_v45 = vsel %vm3190_vm2, %v7268_v57, 0.0  ;;  %v7400_v59 = vsel %vm3190_vm2, %v7281_v0, 0.0  ;;  %v7135_v5 = vadd.f32 %v7134_v16, %v7133_v49  ;;  %v15930_v9 = vld [vmem:[#allocation11_spill] sm:$0xff] }
 0x883   : > { %v7399_v35 = vadd.f32 %v7398_v13, %v7397_v3  ;;  %v7374_v39 = vadd.f32 %v7373_v8, %v7372_v11  ;;  %v7271_v42 = vmul.f32 %v15919_v24, %v15929_v41  ;;  %v7377_v1 = vsel %vm3190_vm2, %v7269_v6, 0.0  ;;  %v7507_v24 = vld [vmem:[%s15583_s9 + $0x28] sm:$0xff]  ;;  %v15931_v6 = vld [vmem:[#allocation12_spill] sm:$0xff] }
 0x884   : > { %v7129_v61 = vrot.slane %v7128_v37, 1  ;;  %v7546_v55 = vand.u32 4294901760, %v7502_v19  ;;  %v7136_v30 = vrot.slane %v7135_v5, 1  ;;  %v7549_v52 = vand.u32 4294901760, %v7503_v29 }
 0x885   : > { %v7401_v7 = vadd.f32 %v7400_v59, %v7399_v35  ;;  %v7376_v15 = vadd.f32 %v7375_v45, %v7374_v39  ;;  %v7379_v54 = vsel %vm3190_vm2, %v7270_v44, 0.0  ;;  %v7552_v32 = vand.u32 4294901760, %v7504_v60 }
 0x886   : > { %v7130_v14 = vadd.f32 %v7129_v61, %v7128_v37  ;;  %v7555_v31 = vand.u32 4294901760, %v7505_v50  ;;  %v7137_v51 = vadd.f32 %v7136_v30, %v7135_v5  ;;  %v15036_v56 = vpack.c.bf16 %v7549_v52, %v7546_v55  ;;  %v15932_v37 = vld [vmem:[#allocation22_spill] sm:$0xff] }
 0x887   : > { %v7409_v47 = vmul.f32 0.015625, %v7401_v7  ;;  %v7378_v21 = vadd.f32 %v7377_v1, %v7376_v15  ;;  %v7558_v62 = vand.u32 4294901760, %v7506_v25  ;;  %v7561_v46 = vand.u32 4294901760, %v7507_v24 }
 0x888   : > { %v7272_v22 = vmul.f32 %v14889_v48, %v7130_v14  ;;  %v15039_v4 = vpack.c.bf16 %v7555_v31, %v7552_v32  ;;  %10757 = vmatprep.subr.bf16.mxu0 %v15036_v56  ;;  %v7273_v23 = vmul.f32 %v14753_v20, %v7137_v51  ;;  %v7381_v26 = vsel %vm3190_vm2, %v7271_v42, 0.0 }
 0x889   : > { %7436 = vrot.lane.b32.xlu1 %v7409_v47, %s11323_s17  ;;  %v7380_v18 = vadd.f32 %v7379_v54, %v7378_v21  ;;  %10759 = vmatpush3.bf16.msra.mxu0 %v15036_v56  ;;  %v15048_v48 = vpack.c.bf16 %v7561_v46, %v7558_v62  ;;  %v15059_v40 = vand.u32 4294901760, %v15053_v63  ;;  %v7699_v10 = vsub.f32 %v7502_v19, %v7546_v55  ;;  %v15935_v21 = vld [vmem:[#allocation23_spill] sm:$0xff] }
 0x88a   : > { %v7383_v17 = vsel %vm3190_vm2, %v7272_v22, 0.0  ;;  %10761 = vmatprep.subr.bf16.mxu0 %v15039_v4  ;;  %v7385_v58 = vsel %vm3190_vm2, %v7273_v23, 0.0  ;;  %v7706_v0 = vsub.f32 %v7503_v29, %v7549_v52  ;;  %v7713_v43 = vsub.f32 %v7504_v60, %v7552_v32  ;;  %v15933_v52 = vld [vmem:[#allocation21_spill] sm:$0xff] }
 0x88b   : > { %v7382_v28 = vadd.f32 %v7381_v26, %v7380_v18  ;;  %v7700_v33 = vand.u32 4294901760, %v7699_v10  ;;  %v6549_v27 = vsel %vm2988_vm10, %v15930_v9, 0.0  ;;  %v6548_v3 = vsel %vm2988_vm10, %v15931_v6, 0.0  ;;  %v15936_v18 = vld [vmem:[#allocation15_spill] sm:$0xff] }
 0x88c   : > { %v7707_v49 = vand.u32 4294901760, %v7706_v0  ;;  %v7720_v44 = vsub.f32 %v7505_v50, %v7555_v31  ;;  %v7714_v11 = vand.u32 4294901760, %v7713_v43  ;;  %v7727_v13 = vsub.f32 %v7506_v25, %v7558_v62  ;;  %v15934_v31 = vld [vmem:[#allocation13_spill] sm:$0xff] }
 0x88d   : > { %v7384_v38 = vadd.f32 %v7383_v17, %v7382_v28  ;;  %10763 = vmatpush3.bf16.msra.mxu0 %v15039_v4  ;;  %v7701_v12 = vsub.f32 %v7699_v10, %v7700_v33  ;;  %v6551_v19 = vsel %vm2988_vm10, %v15932_v37, 0.0  ;;  %v6550_v29 = vadd.f32 %v6549_v27, %v6548_v3  ;;  %v15937_v3 = vld [vmem:[#allocation26_spill] sm:$0xff] }
 0x88e   : > { %10765 = vmatprep.subr.bf16.mxu0 %v15048_v48  ;;  %v7708_v57 = vsub.f32 %v7706_v0, %v7707_v49  ;;  %v7721_v45 = vand.u32 4294901760, %v7720_v44  ;;  %v7715_v35 = vsub.f32 %v7713_v43, %v7714_v11  ;;  %v7728_v59 = vand.u32 4294901760, %v7727_v13 }
 0x88f   : > { %v7386_v20 = vadd.f32 %v7385_v58, %v7384_v38  ;;  %v7702_v34 = vand.u32 4294901760, %v7701_v12  ;;  %v7734_v5 = vsub.f32 %v7507_v24, %v7561_v46  ;;  %v15074_v60 = vpack.c.bf16 %v7706_v0, %v7699_v10 }
 0x890   : > { %v7709_v16 = vand.u32 4294901760, %v7708_v57  ;;  %v7722_v39 = vsub.f32 %v7720_v44, %v7721_v45  ;;  %v6552_v61 = vadd.f32 %v6551_v19, %v6550_v29  ;;  %v7716_v41 = vand.u32 4294901760, %v7715_v35 }
 0x891   : > { %v7408_v36 = vmul.f32 0.015625, %v7386_v20  ;;  %10767 = vmatpush3.bf16.msra.mxu0 %v15048_v48  ;;  %v7729_v50 = vsub.f32 %v7727_v13, %v7728_v59  ;;  %v7735_v42 = vand.u32 4294901760, %v7734_v5  ;;  %v15076_v55 = vpack.c.bf16 %v7720_v44, %v7713_v43 }
 0x892   : > { %10300 = vmatprep.subr.mxu0 %v15059_v40  ;;  %v15071_v8 = vpack.c.bf16 %v7709_v16, %v7702_v34  ;;  %v7723_v1 = vand.u32 4294901760, %v7722_v39  ;;  %v15078_v7 = vpack.c.bf16 %v7734_v5, %v7727_v13  ;;  %v6553_v25 = vsel %vm2988_vm10, %v15933_v52, 0.0  ;;  %v15939_v13 = vld [vmem:[#allocation29_spill] sm:$0xff] }
 0x893   : > { %7434 = vrot.lane.b32.xlu0 %v7408_v36, %s11323_s17  ;;  %v7730_v30 = vand.u32 4294901760, %v7729_v50  ;;  %v7736_v15 = vsub.f32 %v7734_v5, %v7735_v42  ;;  %v6554_v54 = vadd.f32 %v6553_v25, %v6552_v61  ;;  %v6555_v24 = vsel %vm2988_vm10, %v15934_v31, 0.0  ;;  %s440_s17 = scalar_lea.vmem %s15587_s13, %s9338_s14 }
 0x894   : > { %v15082_v14 = vpack.c.bf16 %v7723_v1, %v7716_v41  ;;  %v6557_v22 = vsel %vm2988_vm10, %v15935_v21, 0.0  ;;  %v6559_v46 = vsel %vm2988_vm10, %v15936_v18, 0.0  ;;  %v6469_v23 = vsel %vm2905_vm11, %v15930_v9, 0.0 }
 0x895   : > { %10301 = vmatpush3.msra.mxu0 %v15059_v40  ;;  %v7737_v32 = vand.u32 4294901760, %v7736_v15  ;;  %v6556_v51 = vadd.f32 %v6555_v24, %v6554_v54  ;;  %v6468_v26 = vsel %vm2905_vm11, %v15931_v6, 0.0  ;;  %v6471_v17 = vsel %vm2905_vm11, %v15932_v37, 0.0  ;;  %v15941_v15 = vld [vmem:[#allocation17_spill] sm:$0xff] }
 0x896   : > { %10769 = vmatprep.subr.bf16.mxu0 %v15071_v8  ;;  %v6470_v38 = vadd.f32 %v6469_v23, %v6468_v26  ;;  %v6491_v58 = vsel %vm2923_vm12, %v15930_v9, 0.0  ;;  %v6561_v20 = vsel %vm2988_vm10, %v14218_v53, 0.0  ;;  %v6484_v0 = vsel %vm2923_vm12, %v15931_v6, 0.0 }
 0x897   : > { %v15086_v47 = vpack.c.bf16 %v7737_v32, %v7730_v30  ;;  %v6558_v62 = vadd.f32 %v6557_v22, %v6556_v51  ;;  %v15104_v12 = vpack.c.bf16 %v7707_v49, %v7700_v33  ;;  %v6473_v57 = vsel %vm2905_vm11, %v15933_v52, 0.0 }
 0x898   : > { %v6472_v36 = vadd.f32 %v6471_v17, %v6470_v38  ;;  %v6492_v34 = vrot.slane %v6491_v58, 4  ;;  %v6505_v43 = vsel %vm2923_vm12, %v15933_v52, 0.0  ;;  %v6498_v27 = vsel %vm2923_vm12, %v15932_v37, 0.0 }
 0x899   : > { %v6560_v28 = vadd.f32 %v6559_v46, %v6558_v62  ;;  %vm15938_vm2 = vcmask 326912   ;;  %v6485_v29 = vrot.slane %v6484_v0, 4  ;;  %v6475_v33 = vsel %vm2905_vm11, %v15934_v31, 0.0 }
 0x89a   : > { %v6617_v16 = vsel %vm15938_vm2, %v15937_v3, 0.0  ;;  %v6474_v44 = vadd.f32 %v6473_v57, %v6472_v36  ;;  %vm15940_vm9 = vmmov %vm15938_vm2  ;;  %v15118_v35 = vpack.c.bf16 %v7721_v45, %v7714_v11  ;;  %v6506_v5 = vrot.slane %v6505_v43, 4 }
 0x89b   : > { %v6562_v10 = vadd.f32 %v6561_v20, %v6560_v28  ;;  %v6610_v19 = vsel %vm15940_vm9, %v15939_v13, 0.0  ;;  %v6499_v39 = vrot.slane %v6498_v27, 4  ;;  %v6618_v61 = vrot.slane %v6617_v16, 4  ;;  %vm15942_vm10 = vmmov %vm15938_vm2 }
 0x89c   : > { %v6611_v41 = vrot.slane %v6610_v19, 4  ;;  %v6493_v50 = vadd.f32 %v6492_v34, %v6491_v58  ;;  %v6476_v1 = vadd.f32 %v6475_v33, %v6474_v44  ;;  %v6486_v30 = vadd.f32 %v6485_v29, %v6484_v0  ;;  %vm15944_vm13 = vmmov %vm15938_vm2 }
 0x89d   : > { %v6563_v49 = vrot.slane %v6562_v10, 4  ;;  %v6631_v25 = vsel %vm15942_vm10, %v15941_v15, 0.0  ;;  %v15122_v32 = vpack.c.bf16 %v7735_v42, %v7728_v59  ;;  %v6507_v24 = vadd.f32 %v6506_v5, %v6505_v43  ;;  %vm15946_vm4 = vmmov %vm15938_vm2 }
 0x89e   : > { %v6500_v51 = vadd.f32 %v6499_v39, %v6498_v27  ;;  %v6477_v22 = vsel %vm2905_vm11, %v15935_v21, 0.0  ;;  %v6619_v11 = vadd.f32 %v6618_v61, %v6617_v16  ;;  %v6612_v45 = vadd.f32 %v6611_v41, %v6610_v19  ;;  %vm15950_vm1 = vmmov %vm15938_vm2 }
 0x89f   : > { %v6564_v54 = vadd.f32 %v6563_v49, %v6562_v10  ;;  %v6632_v62 = vrot.slane %v6631_v25, 4  ;;  %v6494_v46 = vrot.slane %v6493_v50, 2  ;;  %v6478_v23 = vadd.f32 %v6477_v22, %v6476_v1  ;;  %v15943_v10 = vld [vmem:[#allocation36_spill] sm:$0xff]  ;;  %vm15958_vm15 = vmmov %vm15950_vm1 }
 0x8a0   : > { %v6487_v26 = vrot.slane %v6486_v30, 2  ;;  %v6479_v17 = vsel %vm2905_vm11, %v15936_v18, 0.0  ;;  %v6519_v38 = vsel %vm2923_vm12, %v15935_v21, 0.0  ;;  %v6508_v59 = vrot.slane %v6507_v24, 2  ;;  %vm15959_vm2 = vmmov %vm15954_vm5 }
 0x8a1   : > { %v6565_v28 = vrot.slane %v6564_v54, 2  ;;  %v6501_v42 = vrot.slane %v6500_v51, 2  ;;  %v6620_v58 = vrot.slane %v6619_v11, 2  ;;  %v6613_v20 = vrot.slane %v6612_v45, 2 }
 0x8a2   : > { %v6633_v36 = vadd.f32 %v6632_v62, %v6631_v25  ;;  %v6624_v0 = vsel %vm15944_vm13, %v15943_v10, 0.0  ;;  %v6495_v57 = vadd.f32 %v6494_v46, %v6493_v50  ;;  %v6480_v34 = vadd.f32 %v6479_v17, %v6478_v23  ;;  %vm15962_vm13 = vmmov %vm15959_vm2 }
 0x8a3   : > { %v6488_v43 = vadd.f32 %v6487_v26, %v6486_v30  ;;  %v6520_v27 = vrot.slane %v6519_v38, 4  ;;  %v6566_v3 = vadd.f32 %v6565_v28, %v6564_v54  ;;  %v6509_v16 = vadd.f32 %v6508_v59, %v6507_v24  ;;  %v15945_v30 = vld [vmem:[#allocation28_spill] sm:$0xff] }
 0x8a4   : > { %v6502_v44 = vadd.f32 %v6501_v42, %v6500_v51  ;;  %v6625_v13 = vrot.slane %v6624_v0, 4  ;;  %v6481_v19 = vsel %vm2905_vm11, %v14218_v53, 0.0  ;;  %v6621_v29 = vadd.f32 %v6620_v58, %v6619_v11 }
 0x8a5   : > { %v6614_v33 = vadd.f32 %v6613_v20, %v6612_v45  ;;  %v6634_v49 = vrot.slane %v6633_v36, 2  ;;  %v6496_v5 = vrot.slane %v6495_v57, 1  ;;  %v6482_v39 = vadd.f32 %v6481_v19, %v6480_v34 }
 0x8a6   : > { %v6489_v61 = vrot.slane %v6488_v43, 1  ;;  %v6521_v41 = vadd.f32 %v6520_v27, %v6519_v38  ;;  %v6567_v1 = vrot.slane %v6566_v3, 1  ;;  %v6510_v15 = vrot.slane %v6509_v16, 1 }
 0x8a7   : > { %v6503_v50 = vrot.slane %v6502_v44, 1  ;;  %v6626_v25 = vadd.f32 %v6625_v13, %v6624_v0  ;;  %v6645_v54 = vsel %vm15946_vm4, %v15945_v30, 0.0  ;;  %v6622_v24 = vrot.slane %v6621_v29, 1  ;;  %v15957_v30 = vld [vmem:[#allocation35_spill] sm:$0xff] }
 0x8a8   : > { %v6615_v51 = vrot.slane %v6614_v33, 1  ;;  %v6635_v22 = vadd.f32 %v6634_v49, %v6633_v36  ;;  %v6497_v62 = vadd.f32 %v6496_v5, %v6495_v57  ;;  %v15136_v46 = vmul.f32 0.125, %v6482_v39 }
 0x8a9   : > { %v6490_v11 = vadd.f32 %v6489_v61, %v6488_v43  ;;  %v6522_v45 = vrot.slane %v6521_v41, 2  ;;  %v6568_v23 = vadd.f32 %v6567_v1, %v6566_v3  ;;  %v6646_v26 = vrot.slane %v6645_v54, 4  ;;  %v15949_v3 = vld [vmem:[#allocation9_spill] sm:$0xff] }
 0x8aa   : > { %v6511_v17 = vadd.f32 %v6510_v15, %v6509_v16  ;;  %v6504_v28 = vadd.f32 %v6503_v50, %v6502_v44  ;;  %v6627_v38 = vrot.slane %v6626_v25, 2  ;;  %v6623_v59 = vadd.f32 %v6622_v24, %v6621_v29 }
 0x8ab   : > { %v6616_v42 = vadd.f32 %v6615_v51, %v6614_v33  ;;  %v6636_v58 = vrot.slane %v6635_v22, 1  ;;  %v6512_v20 = vsel %vm2923_vm12, %v15934_v31, 0.0  ;;  %v6541_v10 = vmul.f32 0.125, %v6497_v62 }
 0x8ac   : > { %vm15947_vm11 = vcmask 64512   ;;  %v6540_v0 = vmul.f32 0.125, %v6490_v11  ;;  %v6523_v57 = vadd.f32 %v6522_v45, %v6521_v41  ;;  %v15143_v34 = vmul.f32 0.015625, %v6568_v23 }
 0x8ad   : > { %v7447_v36 = vsel %vm15947_vm11, %v15930_v9, %v15136_v46  ;;  %vm15948_vm0 = vmmov %vm15947_vm11  ;;  %v6647_v27 = vadd.f32 %v6646_v26, %v6645_v54  ;;  %v6638_v16 = vsel %vm15950_vm1, %v15949_v3, 0.0  ;;  %v6543_v44 = vmul.f32 0.125, %v6511_v17 }
 0x8ae   : > { %v7446_v43 = vsel %vm15948_vm0, %v15931_v6, %v15136_v46  ;;  %vm15951_vm3 = vmmov %vm15948_vm0  ;;  %v6628_v19 = vadd.f32 %v6627_v38, %v6626_v25  ;;  %v6513_v29 = vrot.slane %v6512_v20, 4  ;;  %v6667_v9 = vmul.f32 0.125, %v6623_v59 }
 0x8af   : > { %v7449_v13 = vsel %vm15951_vm3, %v15933_v52, %v15136_v46  ;;  %v6666_v33 = vmul.f32 0.125, %v6616_v42  ;;  %v6637_v49 = vadd.f32 %v6636_v58, %v6635_v22  ;;  %v6542_v5 = vmul.f32 0.125, %v6504_v28  ;;  %vm15956_vm8 = vmmov %vm15948_vm0 }
 0x8b0   : > { %v7455_v61 = vsel %vm15952_vm6, %v7447_v36, %v6541_v10  ;;  %v7454_v6 = vsel %vm15953_vm14, %v7446_v43, %v6540_v0  ;;  %v6524_v41 = vrot.slane %v6523_v57, 1  ;;  %v6639_v1 = vrot.slane %v6638_v16, 4  ;;  %v15967_v36 = vld [vmem:[#allocation27_spill] sm:$0xff] }
 0x8b1   : > { %v7463_v15 = vsel %vm15954_vm5, %v7455_v61, %v15143_v34  ;;  %v7457_v50 = vsel %vm15955_vm7, %v7449_v13, %v6543_v44  ;;  %v7448_v52 = vsel %vm15956_vm8, %v15932_v37, %v15136_v46  ;;  %v6648_v25 = vrot.slane %v6647_v27, 2  ;;  %v15968_v43 = vld [vmem:[#allocation31_spill] sm:$0xff] }
 0x8b2   : > { %v6659_v54 = vsel %vm15958_vm15, %v15957_v30, 0.0  ;;  %v7462_v24 = vsel %vm15959_vm2, %v7454_v6, %v15143_v34  ;;  %v6629_v51 = vrot.slane %v6628_v19, 1  ;;  %v6514_v22 = vadd.f32 %v6513_v29, %v6512_v20  ;;  %v15974_v30 = vld [vmem:[#allocation32_spill] sm:$0xff] }
 0x8b3   : > { %vm15960_vm9 = vcmask 261120   ;;  %v6669_v45 = vmul.f32 0.125, %v6637_v49  ;;  %v7465_v23 = vsel %vm15962_vm13, %v7457_v50, %v15143_v34  ;;  %vm15963_vm4 = vcmask 326656  }
 0x8b4   : > { %v7471_v62 = vsel %vm15960_vm9, %v7463_v15, %v6667_v9  ;;  %vm15961_vm10 = vmmov %vm15960_vm9  ;;  %v6640_v38 = vadd.f32 %v6639_v1, %v6638_v16  ;;  %v6533_v59 = vsel %vm2923_vm12, %v14218_v53, 0.0  ;;  %v6660_v42 = vrot.slane %v6659_v54, 4 }
 0x8b5   : > { %v7470_v11 = vsel %vm15961_vm10, %v7462_v24, %v6666_v33  ;;  %vm15964_vm11 = vmmov %vm15963_vm4  ;;  %vm15965_vm0 = vcmask 392192   ;;  %v6649_v10 = vadd.f32 %v6648_v25, %v6647_v27  ;;  %v6630_v44 = vadd.f32 %v6629_v51, %v6628_v19 }
 0x8b6   : > { %vm15966_vm1 = vmmov %vm15965_vm0  ;;  %v6515_v13 = vrot.slane %v6514_v22, 2  ;;  %v7456_v9 = vsel %vm15952_vm6, %v7448_v52, %v6542_v5  ;;  %v6525_v16 = vadd.f32 %v6524_v41, %v6523_v57  ;;  %v6534_v33 = vrot.slane %v6533_v59, 4 }
 0x8b7   : > { %vm15969_vm3 = vmmov %vm15960_vm9  ;;  %vm15970_vm14 = vcmask 457728   ;;  %v6641_v1 = vrot.slane %v6640_v38, 2  ;;  %v6650_v25 = vrot.slane %v6649_v10, 1  ;;  %v6668_v57 = vmul.f32 0.125, %v6630_v44 }
 0x8b8   : > { %v7473_v29 = vsel %vm15969_vm3, %v7465_v23, %v6669_v45  ;;  %vm15971_vm5 = vmmov %vm15970_vm14  ;;  %v6516_v41 = vadd.f32 %v6515_v13, %v6514_v22  ;;  %v6661_v52 = vadd.f32 %v6660_v42, %v6659_v54  ;;  %v7464_v23 = vsel %vm15959_vm2, %v7456_v9, %v15143_v34 }
 0x8b9   : > { %vm15972_vm7 = vmmov %vm15963_vm4 }
 0x8ba   : > { %vm15973_vm8 = vmmov %vm15965_vm0 }
 0x8bb   : > { %vm15975_vm15 = vmmov %vm15971_vm5 }
 0x8bc   : > { %vm15976_vm9 = vmmov %vm15969_vm3 }
 0x8bd   : > { %v7472_v42 = vsel %vm15976_vm9, %v7464_v23, %v6668_v57  ;;  %vm15978_vm10 = vmmov %vm15963_vm4 }
 0x8be   : > { %vm15979_vm13 = vmmov %vm15965_vm0 }
 0x8c8   : > { %v15153_v39 = vpop.permute.xlu1 %7411 }
 0x8c9   : > { %v7479_v37 = vsel %vm15963_vm4, %v7471_v62, %v15153_v39  ;;  %v7478_v28 = vsel %vm15964_vm11, %v7470_v11, %v15153_v39  ;;  %v7481_v27 = vsel %vm15972_vm7, %v7473_v29, %v15153_v39  ;;  %v6545_v62 = vmul.f32 0.125, %v6525_v16  ;;  %vm15982_vm11 = vmmov %vm15971_vm5 }
 0x8ca   : > { %v6535_v11 = vadd.f32 %v6534_v33, %v6533_v59  ;;  %v6662_v59 = vrot.slane %v6661_v52, 2  ;;  %vm15981_vm4 = vcmask 64512  }
 0x8cc   : > { %v6663_v23 = vadd.f32 %v6662_v59, %v6661_v52 }
 0x8d8   : > { %v7425_v26 = vpop.permute.xlu1 %7424  ;;  %v7423_v17 = vpop.permute.xlu0 %7422 }
 0x8d9   : > { %v7487_v58 = vsel %vm15965_vm0, %v7479_v37, %v7425_v26  ;;  %v7486_v20 = vsel %vm15966_vm1, %v7478_v28, %v7423_v17  ;;  %v6642_v26 = vadd.f32 %v6641_v1, %v6640_v38  ;;  %v6526_v37 = vsel %vm2923_vm12, %v15936_v18, 0.0  ;;  %vm15983_vm0 = vmmov %vm15952_vm6 }
 0x8da   : > { %v7495_v0 = vadd.f32 %v7487_v58, %v15967_v36  ;;  %v7494_v3 = vadd.f32 %v7486_v20, %v15968_v43  ;;  %v6651_v17 = vadd.f32 %v6650_v25, %v6649_v10  ;;  %v6517_v58 = vrot.slane %v6516_v41, 1  ;;  %vm15984_vm1 = vmmov %vm15959_vm2 }
 0x8db   : > { %v15211_v20 = vsub.f32 %v15053_v63, %v15059_v40  ;;  %v6536_v36 = vrot.slane %v6535_v11, 2  ;;  %vm15977_vm12 = vcmask 326912   ;;  %v7480_v63 = vsel %vm15978_vm10, %v7472_v42, %v15153_v39  ;;  %vm15985_vm6 = vmmov %vm15972_vm7 }
 0x8dc   : > { %v7525_v49 = vsel %vm15970_vm14, %v7495_v0, 0  ;;  %v7522_v61 = vsel %vm15971_vm5, %v7494_v3, 0  ;;  %v7429_v6 = vpop.permute.xlu1 %7428  ;;  %v6652_v0 = vsel %vm15977_vm12, %v15920_v2, 0.0  ;;  %v6643_v44 = vrot.slane %v6642_v26, 1  ;;  %vm15986_vm14 = vmmov %vm15973_vm8 }
 0x8dd   : > { %v15187_v15 = vand.u32 4294901760, %v7525_v49  ;;  %v15189_v50 = vand.u32 4294901760, %v7522_v61  ;;  %v7489_v19 = vsel %vm15973_vm8, %v7481_v27, %v7429_v6  ;;  %v6527_v13 = vrot.slane %v6526_v37, 4  ;;  %vm15987_vm5 = vmmov %vm15981_vm4 }
 0x8de   : > { %v7497_v5 = vadd.f32 %v7489_v19, %v15974_v30  ;;  %v6671_v16 = vmul.f32 0.125, %v6651_v17  ;;  %v6653_v6 = vrot.slane %v6652_v0, 4  ;;  %v15229_v27 = vand.u32 4294901760, %v15211_v20  ;;  %vm15989_vm7 = vmmov %vm15983_vm0 }
 0x8df   : > { %v15194_v24 = vsub.f32 %v7525_v49, %v15187_v15  ;;  %v15197_v51 = vsub.f32 %v7522_v61, %v15189_v50  ;;  %v15980_v49 = vld [vmem:[#allocation34_spill] sm:$0xff]  ;;  %v6518_v61 = vadd.f32 %v6517_v58, %v6516_v41  ;;  %v7451_v1 = vsel %vm15981_vm4, %v15935_v21, %v15136_v46  ;;  %vm15990_vm8 = vmmov %vm15982_vm11 }
 0x8e0   : > { %v7531_v45 = vsel %vm15975_vm15, %v7497_v5, 0  ;;  %v6537_v19 = vadd.f32 %v6536_v36, %v6535_v11  ;;  %v7459_v30 = vsel %vm15983_vm0, %v7451_v1, %v6545_v62  ;;  %v6644_v5 = vadd.f32 %v6643_v44, %v6642_v26  ;;  %vm15991_vm15 = vmmov %vm15984_vm1 }
 0x8e1   : > { %v7629_v22 = vand.u32 4294901760, %v15194_v24  ;;  %v15205_v54 = vand.u32 4294901760, %v7531_v45  ;;  %v7619_v28 = vand.u32 4294901760, %v15197_v51  ;;  %v7467_v41 = vsel %vm15984_vm1, %v7459_v30, %v15143_v34  ;;  %vm15992_vm2 = vmmov %vm15969_vm3 }
 0x8e2   : > { %v6528_v17 = vadd.f32 %v6527_v13, %v6526_v37  ;;  %v7475_v21 = vsel %vm15969_vm3, %v7467_v41, %v6671_v16  ;;  %v6544_v11 = vmul.f32 0.125, %v6518_v61  ;;  %v6654_v42 = vadd.f32 %v6653_v6, %v6652_v0  ;;  %v15988_v0 = vld [vmem:[#allocation16_spill] sm:$0xff]  ;;  %vm15993_vm9 = vmmov %vm15985_vm6 }
 0x8e3   : > { %v7630_v38 = vsub.f32 %v15194_v24, %v7629_v22  ;;  %v7620_v10 = vsub.f32 %v15197_v51, %v7619_v28  ;;  %v15222_v43 = vsub.f32 %v7531_v45, %v15205_v54  ;;  %v7743_v62 = vsub.f32 %v15211_v20, %v15229_v27  ;;  %vm15994_vm12 = vmmov %vm15979_vm13 }
 0x8e4   : > { %v7427_v3 = vpop.permute.xlu0 %7426  ;;  %v6538_v52 = vrot.slane %v6537_v19, 1  ;;  %v7450_v59 = vsel %vm15987_vm5, %v15934_v31, %v15136_v46  ;;  %vm15996_vm10 = vmmov %vm15990_vm8 }
 0x8e5   : > { %v7631_v29 = vand.u32 4294901760, %v7630_v38  ;;  %v7488_v9 = vsel %vm15979_vm13, %v7480_v63, %v7427_v3  ;;  %v7621_v33 = vand.u32 4294901760, %v7620_v10  ;;  %v7649_v57 = vand.u32 4294901760, %v15222_v43  ;;  %vm15997_vm13 = vmmov %vm15981_vm4 }
 0x8e6   : > { %v7496_v2 = vadd.f32 %v7488_v9, %v15980_v49  ;;  %v7483_v38 = vsel %vm15985_vm6, %v7475_v21, %v15153_v39  ;;  %v6664_v3 = vrot.slane %v6663_v23, 1  ;;  %v6529_v63 = vrot.slane %v6528_v17, 2  ;;  %v15995_v21 = vld [vmem:[#allocation30_spill] sm:$0xff]  ;;  %vm15998_vm4 = vmmov %vm15983_vm0 }
 0x8e7   : > { %10302 = vmatprep.mubr.f32.mxu0 %v7621_v33  ;;  %v7650_v36 = vsub.f32 %v15222_v43, %v7649_v57  ;;  %v7458_v13 = vsel %vm15989_vm7, %v7450_v59, %v6544_v11  ;;  %v7744_v9 = vand.u32 4294901760, %v7743_v62  ;;  %v6539_v33 = vadd.f32 %v6538_v52, %v6537_v19  ;;  %vm16000_vm0 = vmmov %vm15992_vm2 }
 0x8e8   : > { %v7528_v25 = vsel %vm15982_vm11, %v7496_v2, 0  ;;  %10303 = vmatmul.mubr.f32.vlgmr.msra.gmra.mrb[16].mxu0 %v7631_v29  ;;  %v6655_v29 = vrot.slane %v6654_v42, 2  ;;  %v7466_v16 = vsel %vm15991_vm15, %v7458_v13, %v15143_v34  ;;  %v6530_v30 = vadd.f32 %v6529_v63, %v6528_v17  ;;  %vm15999_vm11 = vmmov %vm15984_vm1 }
 0x8e9   : > { %v15237_v45 = vand.u32 4294901760, %v7528_v25  ;;  %10771 = vmatpush3.bf16.msra.mxu0 %v15071_v8  ;;  %v6670_v8 = vmul.f32 0.125, %v6644_v5  ;;  %v7651_v61 = vand.u32 4294901760, %v7650_v36  ;;  %v6547_v62 = vmul.f32 0.125, %v6539_v33  ;;  %vm16001_vm1 = vmmov %vm15985_vm6 }
 0x8ea   : > { %10773 = vmatprep.subr.bf16.mxu0 %v15082_v14  ;;  %vm16002_vm3 = vmmov %vm15994_vm12 }
 0x8eb   : > { %v15247_v26 = vsub.f32 %v7528_v25, %v15237_v45  ;;  %v7433_v58 = vpop.permute.xlu1 %7432  ;;  %v6665_v25 = vadd.f32 %v6664_v3, %v6663_v23  ;;  %v6531_v23 = vrot.slane %v6530_v30, 1  ;;  %vm16004_vm6 = vmmov %vm15990_vm8 }
 0x8ec   : > { %v7491_v37 = vsel %vm15986_vm14, %v7483_v38, %v7433_v58  ;;  %v6656_v58 = vadd.f32 %v6655_v29, %v6654_v42  ;;  %vm16005_vm14 = vmmov %vm15987_vm5 }
 0x8ed   : > { %v7499_v10 = vadd.f32 %v7491_v37, %v15988_v0  ;;  %v7639_v44 = vand.u32 4294901760, %v15247_v26  ;;  %10775 = vmatpush3.bf16.msra.mxu0 %v15082_v14  ;;  %v7474_v14 = vsel %vm15992_vm2, %v7466_v16, %v6670_v8  ;;  %v6673_v52 = vmul.f32 0.125, %v6665_v25  ;;  %vm16006_vm5 = vmmov %vm15998_vm4 }
 0x8ee   : > { %10777 = vmatprep.subr.bf16.mxu0 %v15086_v47  ;;  %v7482_v1 = vsel %vm15993_vm9, %v7474_v14, %v15153_v39  ;;  %v7453_v37 = vsel %vm15997_vm13, %v14218_v53, %v15136_v46  ;;  %v6657_v42 = vrot.slane %v6656_v58, 1  ;;  %vm16007_vm7 = vmmov %vm15999_vm11 }
 0x8ef   : > { %v7537_v31 = vsel %vm15990_vm8, %v7499_v10, 0  ;;  %v7640_v49 = vsub.f32 %v15247_v26, %v7639_v44  ;;  %v7461_v8 = vsel %vm15998_vm4, %v7453_v37, %v6547_v62  ;;  %v6532_v10 = vadd.f32 %v6531_v23, %v6530_v30  ;;  %vm16008_vm8 = vmmov %vm16000_vm0 }
 0x8f0   : > { %v15269_v2 = vand.u32 4294901760, %v7537_v31  ;;  %v7469_v36 = vsel %vm15999_vm11, %v7461_v8, %v15143_v34  ;;  %v7452_v30 = vsel %vm16005_vm14, %v15936_v18, %v15136_v46  ;;  %vm16009_vm15 = vmmov %vm16001_vm1 }
 0x8f1   : > { %v7431_v6 = vpop.permute.xlu0 %7430  ;;  %v7641_v5 = vand.u32 4294901760, %v7640_v49  ;;  %10779 = vmatpush3.bf16.msra.mxu0 %v15086_v47  ;;  %v7477_v0 = vsel %vm16000_vm0, %v7469_v36, %v6673_v52  ;;  %v6546_v49 = vmul.f32 0.125, %v6532_v10  ;;  %vm16010_vm2 = vmmov %vm16002_vm3  ;;  %v16011_v52 = vld [vmem:[#allocation10_spill] sm:$0xff] }
 0x8f2   : > { %v15276_v19 = vsub.f32 %v7537_v31, %v15269_v2  ;;  %v7490_v41 = vsel %vm15994_vm12, %v7482_v1, %v7431_v6  ;;  %10326 = vmatprep.subr.mxu0 %v7744_v9  ;;  %v7485_v53 = vsel %vm16001_vm1, %v7477_v0, %v15153_v39  ;;  %v16003_v31 = vld [vmem:[#allocation18_spill] sm:$0xff]  ;;  %vm16012_vm9 = vmmov %vm16004_vm6 }
 0x8f3   : > { %v7498_v11 = vadd.f32 %v7490_v41, %v15995_v21  ;;  %10305 = vmatprep.mubr.f32.mxu0 %v7641_v5  ;;  %v7460_v5 = vsel %vm16006_vm5, %v7452_v30, %v6546_v49  ;;  %vm16013_vm12 = vmmov %vm16000_vm0 }
 0x8f4   : > { %10306 = vmatmul.mubr.f32.gmra.mrb[18].mxu0 %v7651_v61  ;;  %v7669_v17 = vand.u32 4294901760, %v15276_v19  ;;  %v7468_v41 = vsel %vm16007_vm7, %v7460_v5, %v15143_v34  ;;  %vm16015_vm13 = vmmov %vm16000_vm0 }
 0x8f5   : > { %v7534_v38 = vsel %vm15996_vm10, %v7498_v11, 0  ;;  %10327 = vmatpush3.msra.mxu0 %v7744_v9  ;;  %v6658_v9 = vadd.f32 %v6657_v42, %v6656_v58  ;;  %vm16014_vm10 = vmmov %vm16000_vm0 }
 0x8f6   : > { %v15282_v47 = vand.u32 4294901760, %v7534_v38  ;;  %10781 = vmatprep.subr.bf16.mxu0 %v15074_v60  ;;  %v7670_v3 = vsub.f32 %v15276_v19, %v7669_v17  ;;  %vm16016_vm4 = vmmov %vm16000_vm0 }
 0x8f7   : > { %v6672_v1 = vmul.f32 0.125, %v6658_v9  ;;  %vm16017_vm11 = vmmov %vm16000_vm0 }
 0x8f8   : > { %v15290_v59 = vsub.f32 %v7534_v38, %v15282_v47  ;;  %v7671_v14 = vand.u32 4294901760, %v7670_v3  ;;  %vm16018_vm1 = vmmov %vm16000_vm0 }
 0x8f9   : > { %v7476_v21 = vsel %vm16008_vm8, %v7468_v41, %v6672_v1  ;;  %vm16021_vm14 = vmmov %vm16006_vm5 }
 0x8fa   : > { %v7659_v13 = vand.u32 4294901760, %v15290_v59  ;;  %v7484_v58 = vsel %vm16009_vm15, %v7476_v21, %v15153_v39  ;;  %vm16022_vm7 = vmmov %vm16006_vm5 }
 0x8fb   : > { %v7437_v63 = vpop.permute.xlu1 %7436  ;;  %vm16023_vm8 = vmmov %vm16006_vm5 }
 0x8fc   : > { %v7493_v29 = vsel %vm16002_vm3, %v7485_v53, %v7437_v63  ;;  %v7660_v33 = vsub.f32 %v15290_v59, %v7659_v13  ;;  %v9334_v53 = vld [vmem:[%s15584_s10] ss:$0 sm:$0xff]  ;;  %vm16019_vm3 = vmmov %vm16000_vm0 }
 0x8fd   : > { %v7501_v16 = vadd.f32 %v7493_v29, %v16003_v31  ;;  %vm16024_vm15 = vmmov %vm16006_vm5 }
 0x8fe   : > { %v7661_v6 = vand.u32 4294901760, %v7660_v33 }
 0x8ff   : > { %v7543_v61 = vsel %vm16004_vm6, %v7501_v16, 0  ;;  %vm16020_vm6 = vmmov %vm16006_vm5 }
 0x900   : > { %v15307_v25 = vand.u32 4294901760, %v7543_v61  ;;  %10308 = vmatprep.mubr.f32.mxu0 %v7661_v6 }
 0x901   : > { %10309 = vmatmul.mubr.f32.gmra.mrb[20].mxu0 %v7671_v14 }
 0x902   : > { %v7688_v11 = vsub.f32 %v7543_v61, %v15307_v25 }
 0x904   : > { %v7689_v46 = vand.u32 4294901760, %v7688_v11 }
 0x905   : > { %v7435_v62 = vpop.permute.xlu0 %7434 }
 0x906   : > { %v7492_v38 = vsel %vm16010_vm2, %v7484_v58, %v7435_v62  ;;  %v7690_v34 = vsub.f32 %v7688_v11, %v7689_v46  ;;  %vm16025_vm2 = vmmov %vm16006_vm5 }
 0x907   : > { %v7500_v23 = vadd.f32 %v7492_v38, %v16011_v52 }
 0x908   : > { %v7691_v0 = vand.u32 4294901760, %v7690_v34 }
 0x909   : > { %v7540_v18 = vsel %vm16012_vm9, %v7500_v23, 0  ;;  %vm16026_vm9 = vmmov %vm16025_vm2 }
 0x90a   : > { %v15322_v37 = vand.u32 4294901760, %v7540_v18 }
 0x90c   : > { %v7678_v8 = vsub.f32 %v7540_v18, %v15322_v37 }
 0x90e   : > { %v7679_v42 = vand.u32 4294901760, %v7678_v8 }
 0x910   : > { %v7680_v36 = vsub.f32 %v7678_v8, %v7679_v42 }
 0x912   : > { %v7681_v10 = vand.u32 4294901760, %v7680_v36 }
 0x914   : > { %10311 = vmatprep.mubr.f32.mxu0 %v7681_v10 }
 0x915   : > { %10312 = vmatmul.mubr.f32.gmra.mrb[22].mxu0 %v7691_v0 }
 0x916   : > { %10328 = vmatprep.mubr.f32.mxu0 %v15189_v50 }
 0x919   : > { %10329 = vmatmul.mubr.f32.vlgmr.msra.gmra.mrb[16].mxu0 %v15187_v15 }
 0x91a   : > { %10783 = vmatpush3.bf16.msra.mxu0 %v15074_v60  ;;  %10331 = vmatprep.mubr.f32.mxu0 %v15237_v45 }
 0x91b   : > { %10785 = vmatprep.subr.bf16.mxu0 %v15076_v55 }
 0x91d   : > { %10332 = vmatmul.mubr.f32.gmra.mrb[18].mxu0 %v15205_v54 }
 0x91e   : > { %10787 = vmatpush3.bf16.msra.mxu0 %v15076_v55  ;;  %10334 = vmatprep.mubr.f32.mxu0 %v15282_v47  ;;  %v7512_v55 = vld [vmem:[%s15585_s11 + $0x10] sm:$0xff] }
 0x91f   : > { %10789 = vmatprep.subr.bf16.mxu0 %v15078_v7 }
 0x921   : > { %10335 = vmatmul.mubr.f32.gmra.mrb[20].mxu0 %v15269_v2 }
 0x922   : > { %10791 = vmatpush3.bf16.msra.mxu0 %v15078_v7  ;;  %10337 = vmatprep.mubr.f32.mxu0 %v15322_v37  ;;  %v7513_v7 = vld [vmem:[%s15585_s11 + $0x18] sm:$0xff] }
 0x923   : > { %10352 = vmatprep.subr.mxu0 %v15211_v20 }
 0x925   : > { %10338 = vmatmul.mubr.f32.gmra.mrb[22].mxu0 %v15307_v25 }
 0x926   : > { %10353 = vmatpush3.msra.mxu0 %v15211_v20  ;;  %10354 = vmatprep.mubr.f32.mxu0 %v15197_v51 }
 0x927   : > { %10793 = vmatprep.subr.bf16.mxu0 %v15036_v56 }
 0x929   : > { %10355 = vmatmul.mubr.f32.vlgmr.msra.gmra.mrb[16].mxu0 %v15194_v24 }
 0x92a   : > { %10795 = vmatpush3.bf16.msra.mxu0 %v15036_v56  ;;  %10357 = vmatprep.mubr.f32.mxu0 %v15247_v26 }
 0x92b   : > { %10797 = vmatprep.subr.bf16.mxu0 %v15039_v4 }
 0x92d   : > { %10358 = vmatmul.mubr.f32.gmra.mrb[18].mxu0 %v15222_v43 }
 0x92e   : > { %10799 = vmatpush3.bf16.msra.mxu0 %v15039_v4  ;;  %10360 = vmatprep.mubr.f32.mxu0 %v15290_v59 }
 0x92f   : > { %10801 = vmatprep.subr.bf16.mxu0 %v15048_v48 }
 0x931   : > { %10361 = vmatmul.mubr.f32.gmra.mrb[20].mxu0 %v15276_v19 }
 0x932   : > { %10803 = vmatpush3.bf16.msra.mxu0 %v15048_v48  ;;  %10363 = vmatprep.mubr.f32.mxu0 %v7678_v8 }
 0x933   : > { %10378 = vmatprep.subr.mxu0 %v15059_v40 }
 0x935   : > { %10364 = vmatmul.mubr.f32.gmra.mrb[22].mxu0 %v7688_v11 }
 0x936   : > { %10379 = vmatpush3.msra.mxu0 %v15059_v40  ;;  %10380 = vmatprep.mubr.f32.mxu0 %v7619_v28 }
 0x937   : > { %10805 = vmatprep.subr.bf16.mxu0 %v15104_v12 }
 0x939   : > { %10381 = vmatmul.mubr.f32.vlgmr.msra.gmra.mrb[16].mxu0 %v7629_v22 }
 0x93a   : > { %10807 = vmatpush3.bf16.msra.mxu0 %v15104_v12  ;;  %10383 = vmatprep.mubr.f32.mxu0 %v7639_v44  ;;  %v8415_v12 = vand.u32 4294901760, %v7512_v55 }
 0x93b   : > { %10809 = vmatprep.subr.bf16.mxu0 %v15118_v35 }
 0x93d   : > { %10384 = vmatmul.mubr.f32.gmra.mrb[18].mxu0 %v7649_v57 }
 0x93e   : > { %10811 = vmatpush3.bf16.msra.mxu0 %v15118_v35  ;;  %10386 = vmatprep.mubr.f32.mxu0 %v7659_v13  ;;  %v8418_v35 = vand.u32 4294901760, %v7513_v7 }
 0x93f   : > { %10813 = vmatprep.subr.bf16.mxu0 %v15122_v32 }
 0x940   : > { %v8580_v28 = vsub.f32 %v7513_v7, %v8418_v35 }
 0x941   : > { %10387 = vmatmul.mubr.f32.gmra.mrb[20].mxu0 %v7669_v17 }
 0x942   : > { %10815 = vmatpush3.bf16.msra.mxu0 %v15122_v32  ;;  %10389 = vmatprep.mubr.f32.mxu0 %v7679_v42  ;;  %v15414_v32 = vpack.c.bf16 %v8418_v35, %v8415_v12  ;;  %v8581_v57 = vand.u32 4294901760, %v8580_v28 }
 0x943   : > { %10404 = vmatprep.subr.mxu0 %v15229_v27 }
 0x944   : > { %v8582_v44 = vsub.f32 %v8580_v28, %v8581_v57 }
 0x945   : > { %10390 = vmatmul.mubr.f32.gmra.mrb[22].mxu0 %v7689_v46 }
 0x946   : > { %10405 = vmatpush3.msra.mxu0 %v15229_v27  ;;  %10406 = vmatprep.mubr.f32.mxu0 %v15189_v50  ;;  %v8583_v19 = vand.u32 4294901760, %v8582_v44 }
 0x947   : > { %10817 = vmatprep.subr.bf16.mxu0 %v15036_v56 }
 0x949   : > { %10407 = vmatmul.mubr.f32.vlgmr.msra.gmra.mrb[16].mxu0 %v15187_v15 }
 0x94a   : > { %10819 = vmatpush3.bf16.msra.mxu0 %v15036_v56  ;;  %10409 = vmatprep.mubr.f32.mxu0 %v15237_v45  ;;  %v7510_v56 = vld [vmem:[%s15585_s11] sm:$0xff] }
 0x94b   : > { %10821 = vmatprep.subr.bf16.mxu0 %v15039_v4 }
 0x94d   : > { %10410 = vmatmul.mubr.f32.gmra.mrb[18].mxu0 %v15205_v54 }
 0x94e   : > { %10823 = vmatpush3.bf16.msra.mxu0 %v15039_v4  ;;  %10412 = vmatprep.mubr.f32.mxu0 %v15282_v47  ;;  %v7511_v4 = vld [vmem:[%s15585_s11 + $0x8] sm:$0xff] }
 0x94f   : > { %10825 = vmatprep.subr.bf16.mxu0 %v15048_v48 }
 0x951   : > { %10413 = vmatmul.mubr.f32.gmra.mrb[20].mxu0 %v15269_v2 }
 0x952   : > { %10827 = vmatpush3.bf16.msra.mxu0 %v15048_v48  ;;  %10415 = vmatprep.mubr.f32.mxu0 %v15322_v37  ;;  %v8409_v48 = vand.u32 4294901760, %v7510_v56 }
 0x953   : > { %10430 = vmatprep.subr.mxu0 %v15059_v40 }
 0x954   : > { %v8559_v39 = vsub.f32 %v7510_v56, %v8409_v48 }
 0x955   : > { %10416 = vmatmul.mubr.f32.gmra.mrb[22].mxu0 %v15307_v25 }
 0x956   : > { %10431 = vmatpush3.msra.mxu0 %v15059_v40  ;;  %10432 = vmatprep.mubr.f32.mxu0 %v15189_v50  ;;  %v8412_v40 = vand.u32 4294901760, %v7511_v4  ;;  %v8560_v50 = vand.u32 4294901760, %v8559_v39 }
 0x958   : > { %v15404_v60 = vpack.c.bf16 %v8412_v40, %v8409_v48  ;;  %v8561_v51 = vsub.f32 %v8559_v39, %v8560_v50 }
 0x959   : > { %10433 = vmatmul.mubr.f32.vlgmr.msra.gmra.mrb[16].mxu0 %v15187_v15  ;;  %v8566_v15 = vsub.f32 %v7511_v4, %v8412_v40 }
 0x95a   : > { %10435 = vmatprep.mubr.f32.mxu0 %v15237_v45  ;;  %10829 = vmatprep.subr.bf16.mxu1 %v15404_v60  ;;  %v8562_v20 = vand.u32 4294901760, %v8561_v51 }
 0x95b   : > { %10831 = vmatpush3.bf16.msra.mxu1 %v15404_v60  ;;  %v8567_v24 = vand.u32 4294901760, %v8566_v15  ;;  %v15421_v17 = vpack.c.bf16 %v8566_v15, %v8559_v39 }
 0x95c   : > { %10833 = vmatprep.subr.bf16.mxu1 %v15414_v32 }
 0x95d   : > { %10436 = vmatmul.mubr.f32.gmra.mrb[18].mxu0 %v15205_v54  ;;  %v8568_v22 = vsub.f32 %v8566_v15, %v8567_v24  ;;  %v8573_v54 = vsub.f32 %v7512_v55, %v8415_v12  ;;  %v15427_v3 = vpack.c.bf16 %v8567_v24, %v8560_v50 }
 0x95e   : > { %10438 = vmatprep.mubr.f32.mxu0 %v15282_v47 }
 0x95f   : > { %10835 = vmatpush3.bf16.msra.mxu1 %v15414_v32  ;;  %v8569_v43 = vand.u32 4294901760, %v8568_v22  ;;  %v8574_v27 = vand.u32 4294901760, %v8573_v54  ;;  %v15425_v59 = vpack.c.bf16 %v8580_v28, %v8573_v54 }
 0x961   : > { %10439 = vmatmul.mubr.f32.gmra.mrb[20].mxu0 %v15269_v2  ;;  %v15418_v45 = vpack.c.bf16 %v8569_v43, %v8562_v20  ;;  %v8575_v26 = vsub.f32 %v8573_v54, %v8574_v27  ;;  %v15429_v63 = vpack.c.bf16 %v8581_v57, %v8574_v27 }
 0x962   : > { %10441 = vmatprep.mubr.f32.mxu0 %v15322_v37 }
 0x963   : > { %10837 = vmatprep.subr.bf16.mxu1 %v15418_v45  ;;  %v8576_v2 = vand.u32 4294901760, %v8575_v26 }
 0x965   : > { %10442 = vmatmul.mubr.f32.gmra.mrb[22].mxu0 %v15307_v25  ;;  %v15423_v47 = vpack.c.bf16 %v8583_v19, %v8576_v2 }
 0xa2c   : > { %v10434_v13 = vpop.f32.mrb[16].mxu0 }
 0xa2d   : > { %v10908_v29 = vadd.f32 %v10434_v13, %v9334_v53  ;;  %v8324_v9 = vpop.f32.mrb[17].mxu0 }
 0xa2e   : > { %v10909_v31 = vadd.f32 %v9334_v53, %v8324_v9 }
 0xa2f   : > { %v8371_v16 = vmax.f32 %v10908_v29, 0.0 }
 0xa30   : > { %v8370_v33 = vmax.f32 %v10909_v31, 0.0  ;;  %v10437_v49 = vpop.f32.mrb[18].mxu0 }
 0xa31   : > { %v8388_v14 = vsel %vm16013_vm12, %v8371_v16, 0  ;;  %v10910_v61 = vadd.f32 %v10437_v49, %v9334_v53  ;;  %v8336_v6 = vpop.f32.mrb[19].mxu0 }
 0xa32   : > { %v15435_v1 = vand.u32 4294901760, %v8388_v14  ;;  %v8385_v25 = vsel %vm16014_vm10, %v8370_v33, 0  ;;  %v10911_v30 = vadd.f32 %v9334_v53, %v8336_v6 }
 0xa33   : > { %v15438_v5 = vand.u32 4294901760, %v8385_v25  ;;  %v8373_v41 = vmax.f32 %v10910_v61, 0.0 }
 0xa34   : > { %v15441_v21 = vsub.f32 %v8388_v14, %v15435_v1  ;;  %v8372_v11 = vmax.f32 %v10911_v30, 0.0  ;;  %v10440_v62 = vpop.f32.mrb[20].mxu0 }
 0xa35   : > { %v15444_v58 = vsub.f32 %v8385_v25, %v15438_v5  ;;  %v8394_v38 = vsel %vm16015_vm13, %v8373_v41, 0  ;;  %v10912_v52 = vadd.f32 %v10440_v62, %v9334_v53  ;;  %v8348_v23 = vpop.f32.mrb[21].mxu0 }
 0xa36   : > { %v8489_v18 = vand.u32 4294901760, %v15441_v21  ;;  %v15448_v46 = vand.u32 4294901760, %v8394_v38  ;;  %v8391_v37 = vsel %vm16016_vm4, %v8372_v11, 0  ;;  %v10913_v8 = vadd.f32 %v9334_v53, %v8348_v23 }
 0xa37   : > { %v15451_v34 = vand.u32 4294901760, %v8391_v37  ;;  %v8375_v42 = vmax.f32 %v10912_v52, 0.0  ;;  %v8479_v36 = vand.u32 4294901760, %v15444_v58 }
 0xa38   : > { %v8490_v0 = vsub.f32 %v15441_v21, %v8489_v18  ;;  %v15458_v10 = vsub.f32 %v8394_v38, %v15448_v46  ;;  %v8374_v56 = vmax.f32 %v10913_v8, 0.0  ;;  %v10443_v4 = vpop.f32.mrb[22].mxu0 }
 0xa39   : > { %v15461_v48 = vsub.f32 %v8391_v37, %v15451_v34  ;;  %v8400_v40 = vsel %vm16017_vm11, %v8375_v42, 0  ;;  %v10914_v55 = vadd.f32 %v10443_v4, %v9334_v53  ;;  %v8360_v7 = vpop.f32.mrb[23].mxu0  ;;  %v8480_v12 = vsub.f32 %v15444_v58, %v8479_v36 }
 0xa3a   : > { %v15467_v35 = vand.u32 4294901760, %v8400_v40  ;;  %v8397_v39 = vsel %vm16000_vm0, %v8374_v56, 0  ;;  %v10915_v15 = vadd.f32 %v9334_v53, %v8360_v7  ;;  %v8491_v54 = vand.u32 4294901760, %v8490_v0 }
 0xa3b   : > { %v15470_v50 = vand.u32 4294901760, %v8397_v39  ;;  %v8377_v24 = vmax.f32 %v10914_v55, 0.0  ;;  %v8481_v51 = vand.u32 4294901760, %v8480_v12  ;;  %v8499_v22 = vand.u32 4294901760, %v15461_v48 }
 0xa3c   : > { %v15474_v28 = vsub.f32 %v8400_v40, %v15467_v35  ;;  %v8376_v20 = vmax.f32 %v10915_v15, 0.0  ;;  %v8509_v43 = vand.u32 4294901760, %v15458_v10 }
 0xa3d   : > { %v15478_v27 = vsub.f32 %v8397_v39, %v15470_v50  ;;  %v8406_v57 = vsel %vm16018_vm1, %v8377_v24, 0  ;;  %10452 = vmatprep.mubr.f32.mxu1 %v8481_v51  ;;  %v8500_v26 = vsub.f32 %v15461_v48, %v8499_v22 }
 0xa3e   : > { %v15484_v44 = vand.u32 4294901760, %v8406_v57  ;;  %v8403_v2 = vsel %vm16019_vm3, %v8376_v20, 0  ;;  %10453 = vmatmul.mubr.f32.vlgmr.msra.gmra.mrb[16].mxu1 %v8491_v54  ;;  %v8510_v19 = vsub.f32 %v15458_v10, %v8509_v43  ;;  %v8529_v53 = vand.u32 4294901760, %v15474_v28 }
 0xa3f   : > { %v15491_v13 = vand.u32 4294901760, %v8403_v2  ;;  %10839 = vmatpush3.bf16.msra.mxu1 %v15418_v45  ;;  %v8501_v29 = vand.u32 4294901760, %v8500_v26  ;;  %v8519_v9 = vand.u32 4294901760, %v15478_v27 }
 0xa40   : > { %v8548_v31 = vsub.f32 %v8406_v57, %v15484_v44  ;;  %v8511_v16 = vand.u32 4294901760, %v8510_v19  ;;  %10841 = vmatprep.subr.bf16.mxu1 %v15423_v47  ;;  %v8530_v33 = vsub.f32 %v15474_v28, %v8529_v53 }
 0xa41   : > { %v8538_v49 = vsub.f32 %v8403_v2, %v15491_v13  ;;  %10455 = vmatprep.mubr.f32.mxu1 %v8501_v29  ;;  %v8520_v14 = vsub.f32 %v15478_v27, %v8519_v9 }
 0xa42   : > { %10456 = vmatmul.mubr.f32.gmra.mrb[18].mxu1 %v8511_v16  ;;  %v8549_v61 = vand.u32 4294901760, %v8548_v31  ;;  %v8531_v25 = vand.u32 4294901760, %v8530_v33 }
 0xa43   : > { %v8521_v6 = vand.u32 4294901760, %v8520_v14  ;;  %10843 = vmatpush3.bf16.msra.mxu1 %v15423_v47  ;;  %v8539_v45 = vand.u32 4294901760, %v8538_v49 }
 0xa44   : > { %v8550_v30 = vsub.f32 %v8548_v31, %v8549_v61  ;;  %10845 = vmatprep.subr.bf16.mxu1 %v15421_v17 }
 0xa45   : > { %10458 = vmatprep.mubr.f32.mxu1 %v8521_v6  ;;  %v8540_v41 = vsub.f32 %v8538_v49, %v8539_v45 }
 0xa46   : > { %10459 = vmatmul.mubr.f32.gmra.mrb[20].mxu1 %v8531_v25  ;;  %v8551_v62 = vand.u32 4294901760, %v8550_v30 }
 0xa47   : > { %v8541_v11 = vand.u32 4294901760, %v8540_v41 }
 0xa49   : > { %10461 = vmatprep.mubr.f32.mxu1 %v8541_v11 }
 0xa4a   : > { %10462 = vmatmul.mubr.f32.gmra.mrb[22].mxu1 %v8551_v62 }
 0xa4b   : > { %10472 = vmatprep.mubr.f32.mxu1 %v15438_v5 }
 0xa4e   : > { %10473 = vmatmul.mubr.f32.vlgmr.msra.gmra.mrb[16].mxu1 %v15435_v1 }
 0xa4f   : > { %10847 = vmatpush3.bf16.msra.mxu1 %v15421_v17  ;;  %10475 = vmatprep.mubr.f32.mxu1 %v15451_v34 }
 0xa50   : > { %10849 = vmatprep.subr.bf16.mxu1 %v15425_v59 }
 0xa52   : > { %10476 = vmatmul.mubr.f32.gmra.mrb[18].mxu1 %v15448_v46 }
 0xa53   : > { %10478 = vmatprep.mubr.f32.mxu1 %v15470_v50  ;;  %10851 = vmatpush3.bf16.msra.mxu1 %v15425_v59 }
 0xa54   : > { %10853 = vmatprep.subr.bf16.mxu1 %v15404_v60 }
 0xa56   : > { %10479 = vmatmul.mubr.f32.gmra.mrb[20].mxu1 %v15467_v35 }
 0xa57   : > { %10481 = vmatprep.mubr.f32.mxu1 %v15491_v13 }
 0xa5a   : > { %10482 = vmatmul.mubr.f32.gmra.mrb[22].mxu1 %v15484_v44 }
 0xa5b   : > { %10492 = vmatprep.mubr.f32.mxu1 %v15444_v58 }
 0xa5e   : > { %10493 = vmatmul.mubr.f32.vlgmr.msra.gmra.mrb[16].mxu1 %v15441_v21 }
 0xa5f   : > { %10855 = vmatpush3.bf16.msra.mxu1 %v15404_v60  ;;  %10495 = vmatprep.mubr.f32.mxu1 %v15461_v48 }
 0xa60   : > { %10857 = vmatprep.subr.bf16.mxu1 %v15414_v32 }
 0xa62   : > { %10496 = vmatmul.mubr.f32.gmra.mrb[18].mxu1 %v15458_v10 }
 0xa63   : > { %10498 = vmatprep.mubr.f32.mxu1 %v15478_v27  ;;  %10859 = vmatpush3.bf16.msra.mxu1 %v15414_v32 }
 0xa64   : > { %10861 = vmatprep.subr.bf16.mxu1 %v15427_v3 }
 0xa66   : > { %10499 = vmatmul.mubr.f32.gmra.mrb[20].mxu1 %v15474_v28 }
 0xa67   : > { %10501 = vmatprep.mubr.f32.mxu1 %v8538_v49 }
 0xa6a   : > { %10502 = vmatmul.mubr.f32.gmra.mrb[22].mxu1 %v8548_v31 }
 0xa6b   : > { %10512 = vmatprep.mubr.f32.mxu1 %v8479_v36 }
 0xa6e   : > { %10513 = vmatmul.mubr.f32.vlgmr.msra.gmra.mrb[16].mxu1 %v8489_v18 }
 0xa6f   : > { %10863 = vmatpush3.bf16.msra.mxu1 %v15427_v3  ;;  %10515 = vmatprep.mubr.f32.mxu1 %v8499_v22 }
 0xa70   : > { %10865 = vmatprep.subr.bf16.mxu1 %v15429_v63 }
 0xa72   : > { %10516 = vmatmul.mubr.f32.gmra.mrb[18].mxu1 %v8509_v43 }
 0xa73   : > { %10518 = vmatprep.mubr.f32.mxu1 %v8519_v9  ;;  %10867 = vmatpush3.bf16.msra.mxu1 %v15429_v63 }
 0xa74   : > { %10869 = vmatprep.subr.bf16.mxu1 %v15404_v60 }
 0xa76   : > { %10519 = vmatmul.mubr.f32.gmra.mrb[20].mxu1 %v8529_v53 }
 0xa77   : > { %10521 = vmatprep.mubr.f32.mxu1 %v8539_v45 }
 0xa7a   : > { %10522 = vmatmul.mubr.f32.gmra.mrb[22].mxu1 %v8549_v61 }
 0xa7b   : > { %10532 = vmatprep.mubr.f32.mxu1 %v15438_v5 }
 0xa7e   : > { %10533 = vmatmul.mubr.f32.vlgmr.msra.gmra.mrb[16].mxu1 %v15435_v1 }
 0xa7f   : > { %10871 = vmatpush3.bf16.msra.mxu1 %v15404_v60  ;;  %10535 = vmatprep.mubr.f32.mxu1 %v15451_v34  ;;  %v9335_v60 = vld [vmem:[%s15586_s12] ss:$0 sm:$0xff] }
 0xa80   : > { %10873 = vmatprep.subr.bf16.mxu1 %v15414_v32 }
 0xa82   : > { %10536 = vmatmul.mubr.f32.gmra.mrb[18].mxu1 %v15448_v46 }
 0xa83   : > { %10538 = vmatprep.mubr.f32.mxu1 %v15470_v50  ;;  %10875 = vmatpush3.bf16.msra.mxu1 %v15414_v32 }
 0xa86   : > { %10539 = vmatmul.mubr.f32.gmra.mrb[20].mxu1 %v15467_v35 }
 0xa87   : > { %10541 = vmatprep.mubr.f32.mxu1 %v15491_v13 }
 0xa8a   : > { %10542 = vmatmul.mubr.f32.gmra.mrb[22].mxu1 %v15484_v44 }
 0xa8b   : > { %10552 = vmatprep.mubr.f32.mxu1 %v15438_v5 }
 0xa8e   : > { %10553 = vmatmul.mubr.f32.vlgmr.msra.gmra.mrb[16].mxu1 %v15435_v1 }
 0xa8f   : > { %10555 = vmatprep.mubr.f32.mxu1 %v15451_v34 }
 0xa92   : > { %10556 = vmatmul.mubr.f32.gmra.mrb[18].mxu1 %v15448_v46 }
 0xa93   : > { %10558 = vmatprep.mubr.f32.mxu1 %v15470_v50 }
 0xa96   : > { %10559 = vmatmul.mubr.f32.gmra.mrb[20].mxu1 %v15467_v35 }
 0xa97   : > { %10561 = vmatprep.mubr.f32.mxu1 %v15491_v13 }
 0xa9a   : > { %10562 = vmatmul.mubr.f32.gmra.mrb[22].mxu1 %v15484_v44 }
 0xb61   : > { %v10554_v32 = vpop.f32.mrb[16].mxu1 }
 0xb62   : > { %v10916_v17 = vadd.f32 %v10554_v32, %v9335_v60  ;;  %v9148_v47 = vpop.f32.mrb[17].mxu1 }
 0xb63   : > { %v10917_v59 = vadd.f32 %v9335_v60, %v9148_v47 }
 0xb64   : > { %9195 = vst.msk [vmem:[%s440_s17 + $0x8] sm:$0xff] %vm16020_vm6, %v10916_v17 }
 0xb65   : > { %9194 = vst.msk [vmem:[%s440_s17] sm:$0xff] %vm16021_vm14, %v10917_v59  ;;  %v10557_v3 = vpop.f32.mrb[18].mxu1 }
 0xb66   : > { %v10918_v63 = vadd.f32 %v10557_v3, %v9335_v60  ;;  %v9160_v1 = vpop.f32.mrb[19].mxu1 }
 0xb67   : > { %v10919_v5 = vadd.f32 %v9335_v60, %v9160_v1 }
 0xb68   : > { %9197 = vst.msk [vmem:[%s440_s17 + $0x18] sm:$0xff] %vm16006_vm5, %v10918_v63 }
 0xb69   : > { %9196 = vst.msk [vmem:[%s440_s17 + $0x10] sm:$0xff] %vm16022_vm7, %v10919_v5  ;;  %v10560_v21 = vpop.f32.mrb[20].mxu1 }
 0xb6a   : > { %v10920_v58 = vadd.f32 %v10560_v21, %v9335_v60  ;;  %v9172_v38 = vpop.f32.mrb[21].mxu1 }
 0xb6b   : > { %v10921_v52 = vadd.f32 %v9335_v60, %v9172_v38 }
 0xb6c   : > { %9199 = vst.msk [vmem:[%s440_s17 + $0x28] sm:$0xff] %vm16023_vm8, %v10920_v58 }
 0xb6d   : > { %9198 = vst.msk [vmem:[%s440_s17 + $0x20] sm:$0xff] %vm16024_vm15, %v10921_v52  ;;  %v10563_v23 = vpop.f32.mrb[22].mxu1 }
 0xb6e   : > { %v10922_v18 = vadd.f32 %v10563_v23, %v9335_v60  ;;  %v9184_v46 = vpop.f32.mrb[23].mxu1 }
 0xb6f   : > { %v10923_v37 = vadd.f32 %v9335_v60, %v9184_v46 }
 0xb70   : > { %9201 = vst.msk [vmem:[%s440_s17 + $0x38] sm:$0xff] %vm16025_vm2, %v10922_v18 }
 0xb71   : > { %9200 = vst.msk [vmem:[%s440_s17 + $0x30] sm:$0xff] %vm16026_vm9, %v10923_v37 }
 0xb72 PF: > { %s23_s25 = sadd.s32 1, %s11314_s25  }
 0xb73   : > { %p20_p4 = scmp.ge.s32.totalorder %s23_s25, 4  }
 0xb75   :  { %22 = sbr.rel (!%p20_p4) target bundleno = 1 (0x1), region = 102 }

</bundles_post_ra>
